<compile_context>
chip_gen: v7x
topology: tpu7x:2x2x1
jax: 0.10.0
libtpu: 0.0.40
codegen_flags: <defaults>
</compile_context>

<pallas_src>
import functools

import jax
import jax.numpy as jnp
from jax.experimental import pallas as pl
from jax.experimental.pallas import tpu as pltpu


def _round_up(x, m):
    return ((x + m - 1) // m) * m


# ----------------------------------------------------------------------------
# Fused Pallas kernel:
#   im2col-matmul (block-diag adapters) + BN + ReLU  ->  VMEM bridge (bf16)
#   im2col-matmul (fusion)              + BN + ReLU  ->  output
# ----------------------------------------------------------------------------
def _decoder_fused_kernel(xcol_ref, wa_ref, ga_ref, ba_ref,
                          wf_ref, gf_ref, bf_ref,
                          o_ref, bridge_ref, col2_ref,
                          *, N, H, W, CP, eps):
    # xcol_ref : (N*H*W, 9*Cin)      bf16, stage-1 im2col slab (built in wrapper)
    # wa_ref   : (9*Cin, CP)         bf16, block-diag adapter weights, tap-major rows
    # ga/ba    : (1, CP)             f32, BN gamma/beta for the adapter stage
    # wf_ref   : (9*CP, CP)          bf16, fusion weights, tap-major rows
    # gf/bf    : (1, CP)             f32, BN gamma/beta for the fusion stage
    # o_ref    : (N*H*W, CP)         f32, lane-dense output slab
    # bridge_ref: (N, H+2, Wp, CP)   bf16 VMEM scratch (1-px halo, Wp = 8-aligned)
    # col2_ref : (N*H*W, 9*CP)       bf16 VMEM scratch, stage-2 im2col slab
    NP = N * H * W
    inv_np = 1.0 / NP

    # ---- Stage 1: adapter convs as ONE big-K MXU matmul (f32 accumulate) ----
    acc = jnp.dot(xcol_ref[...], wa_ref[...], preferred_element_type=jnp.float32)

    # Fused BatchNorm2d (training mode, biased variance) + ReLU epilogue.
    # Conv bias omitted: it is cancelled exactly by the batch-mean subtraction.
    mean1 = jnp.sum(acc, axis=0, keepdims=True) * inv_np
    msq1 = jnp.sum(acc * acc, axis=0, keepdims=True) * inv_np
    var1 = jnp.maximum(msq1 - mean1 * mean1, 0.0)          # f32 sums; means are small
    scale1 = ga_ref[...] * jax.lax.rsqrt(var1 + eps)
    shift1 = ba_ref[...] - mean1 * scale1
    y = jnp.maximum(acc * scale1 + shift1, 0.0).astype(jnp.bfloat16)   # cast once

    # ---- Bridge (channel concat) in VMEM: zero only the 1-px halo ----------
    Wp = bridge_ref.shape[2]
    zrow = jnp.zeros((N, 1, Wp, CP), jnp.bfloat16)
    bridge_ref[:, 0:1, :, :] = zrow
    bridge_ref[:, H + 1:H + 2, :, :] = zrow
    zcol = jnp.zeros((N, H + 2, 1, CP), jnp.bfloat16)
    bridge_ref[:, :, 0:1, :] = zcol
    bridge_ref[:, :, W + 1:W + 2, :] = zcol
    bridge_ref[:, 1:H + 1, 1:W + 1, :] = y.reshape(N, H, W, CP)

    # ---- Stage 2: build im2col slab (lane-aligned 128-wide block writes) ----
    for ky in range(3):
        for kx in range(3):
            t = ky * 3 + kx
            col2_ref[:, t * CP:(t + 1) * CP] = (
                bridge_ref[:, ky:ky + H, kx:kx + W, :].reshape(NP, CP))

    acc2 = jnp.dot(col2_ref[...], wf_ref[...], preferred_element_type=jnp.float32)

    mean2 = jnp.sum(acc2, axis=0, keepdims=True) * inv_np
    msq2 = jnp.sum(acc2 * acc2, axis=0, keepdims=True) * inv_np
    var2 = jnp.maximum(msq2 - mean2 * mean2, 0.0)
    scale2 = gf_ref[...] * jax.lax.rsqrt(var2 + eps)
    shift2 = bf_ref[...] - mean2 * scale2
    o_ref[...] = jnp.maximum(acc2 * scale2 + shift2, 0.0)   # lane-dense store (CP % 128 == 0)


# ----------------------------------------------------------------------------
# Glue ops (resizing that feeds the fused kernel) -- plain JAX/XLA
# ----------------------------------------------------------------------------
def max_pool2d_nhwc(x, k):
    # F.max_pool2d(kernel_size=k, stride=k); H and W divisible by k.
    N, H, W, C = x.shape
    return x.reshape(N, H // k, k, W // k, k, C).max(axis=(2, 4))


def _bilinear_matrix(in_size, out_size):
    # align_corners=True: src = i * (in-1)/(out-1); guarded degenerate cases.
    if in_size == 1:
        return jnp.ones((out_size, 1), jnp.float32)
    if out_size == 1:
        return jnp.zeros((1, in_size), jnp.float32).at[0, 0].set(1.0)
    i = jnp.arange(out_size, dtype=jnp.float32)
    src = i * (in_size - 1) / (out_size - 1)
    lo = jnp.clip(jnp.floor(src).astype(jnp.int32), 0, in_size - 2)
    frac = src - lo.astype(jnp.float32)
    M = jnp.zeros((out_size, in_size), jnp.float32)
    M = M.at[jnp.arange(out_size), lo].add(1.0 - frac)
    M = M.at[jnp.arange(out_size), lo + 1].add(frac)
    return M


def bilinear_resize_nhwc(x, scale):
    # F.interpolate(scale_factor=scale, mode='bilinear', align_corners=True)
    N, H, W, C = x.shape
    Ho, Wo = int(H * scale), int(W * scale)
    Mh = _bilinear_matrix(H, Ho)
    Mw = _bilinear_matrix(W, Wo)
    y = jnp.einsum('oh,nhwc->nowc', Mh, x)
    y = jnp.einsum('pw,nowc->nopc', Mw, y)
    return y


# ----------------------------------------------------------------------------
# Parameter construction (deterministic, synthetic) with lane padding / packing
# ----------------------------------------------------------------------------
def make_decoder_params(key, skip_channels, bridge_channels):
    nb = len(skip_channels)
    cin_total = sum(skip_channels)
    cb_cat = bridge_channels * nb
    CP = _round_up(max(cb_cat, bridge_channels, 1), 128)     # lane-dense channel pad

    keys = jax.random.split(key, 3 * nb + 3)

    # Adapter weights packed as one block-diagonal (3,3,cin_total,CP) tensor.
    wa = jnp.zeros((3, 3, cin_total, CP), jnp.float32)
    ga = jnp.ones((1, CP), jnp.float32)
    ba = jnp.zeros((1, CP), jnp.float32)
    cin_off = 0
    for i, cin in enumerate(skip_channels):
        kw, kg, kb = keys[3 * i], keys[3 * i + 1], keys[3 * i + 2]
        w = jax.random.normal(kw, (3, 3, cin, bridge_channels), jnp.float32) / jnp.sqrt(9.0 * cin)
        g = 1.0 + 0.1 * jax.random.normal(kg, (1, bridge_channels), jnp.float32)
        b = 0.1 * jax.random.normal(kb, (1, bridge_channels), jnp.float32)
        co = i * bridge_channels
        wa = wa.at[:, :, cin_off:cin_off + cin, co:co + bridge_channels].set(w)
        ga = ga.at[:, co:co + bridge_channels].set(g)
        ba = ba.at[:, co:co + bridge_channels].set(b)
        cin_off += cin

    # Fusion conv, zero-padded to (3,3,CP,CP).
    kwf, kgf, kbf = keys[3 * nb], keys[3 * nb + 1], keys[3 * nb + 2]
    w_f = jax.random.normal(kwf, (3, 3, cb_cat, bridge_channels), jnp.float32) / jnp.sqrt(9.0 * cb_cat)
    g_f = 1.0 + 0.1 * jax.random.normal(kgf, (1, bridge_channels), jnp.float32)
    b_f = 0.1 * jax.random.normal(kbf, (1, bridge_channels), jnp.float32)
    wf = jnp.zeros((3, 3, CP, CP), jnp.float32)
    wf = wf.at[:, :, :cb_cat, :bridge_channels].set(w_f)
    gf = jnp.ones((1, CP), jnp.float32).at[:, :bridge_channels].set(g_f)
    bf = jnp.zeros((1, CP), jnp.float32).at[:, :bridge_channels].set(b_f)

    # Reshape to im2col (tap-major, channel-minor) matmul weights, bf16 for MXU.
    # NOTE: conv biases are intentionally omitted everywhere -- training-mode
    # BatchNorm subtracts the per-channel batch mean, cancelling them exactly.
    wa2 = wa.reshape(9 * cin_total, CP).astype(jnp.bfloat16)
    wf2 = wf.reshape(9 * CP, CP).astype(jnp.bfloat16)
    return dict(wa=wa2, ga=ga, ba=ba, wf=wf2, gf=gf, bf=bf,
                cp=CP, cin_total=cin_total, bridge_channels=bridge_channels)


# ----------------------------------------------------------------------------
# Decoder forward (inputs / output in NCHW like the PyTorch module)
# ----------------------------------------------------------------------------
def decoder_forward(params, encoder_features_nchw, scale_factors):
    # Glue: per-branch resize (data-dependent scale factors) in plain JAX, NHWC.
    resized = []
    for feat, scale in zip(encoder_features_nchw, scale_factors):
        x = jnp.transpose(feat, (0, 2, 3, 1))            # NCHW -> NHWC
        if scale < 0:
            x = max_pool2d_nhwc(x, abs(scale))
        elif scale > 0:
            x = bilinear_resize_nhwc(x, scale)
        resized.append(x)
    x_cat = jnp.concatenate(resized, axis=-1)            # (N, H, W, sum(Cin))

    N, H, W, Cin = x_cat.shape
    CP = params['cp']
    Cb = params['bridge_channels']

    # Stage-1 im2col slab built once here (cheap, data-prep), cast once to bf16.
    x_pad = jnp.pad(x_cat, ((0, 0), (1, 1), (1, 1), (0, 0)))
    cols = [x_pad[:, ky:ky + H, kx:kx + W, :] for ky in range(3) for kx in range(3)]
    xcol = jnp.concatenate(cols, axis=-1).reshape(N * H * W, 9 * Cin).astype(jnp.bfloat16)

    Wp = _round_up(W + 2, 8)                              # 8-aligned sublane dim for the bridge

    kernel = functools.partial(_decoder_fused_kernel,
                               N=N, H=H, W=W, CP=CP, eps=1e-5)
    out2d = pl.pallas_call(
        kernel,
        out_shape=jax.ShapeDtypeStruct((N * H * W, CP), jnp.float32),
        in_specs=[pl.BlockSpec(memory_space=pltpu.MemorySpace.VMEM)] * 7,
        out_specs=pl.BlockSpec(memory_space=pltpu.MemorySpace.VMEM),
        scratch_shapes=[
            pltpu.VMEM((N, H + 2, Wp, CP), jnp.bfloat16),       # halo-padded bridge
            pltpu.VMEM((N * H * W, 9 * CP), jnp.bfloat16),      # stage-2 im2col slab
        ],
    )(xcol, params['wa'], params['ga'], params['ba'],
      params['wf'], params['gf'], params['bf'])

    out = out2d.reshape(N, H, W, CP)[..., :Cb]           # drop lane padding (free in XLA)
    return jnp.transpose(out, (0, 3, 1, 2))              # NHWC -> NCHW


# ----------------------------------------------------------------------------
if __name__ == "__main__":
    key = jax.random.PRNGKey(0)
    k_feat, k_param = jax.random.split(key)

    skip_channels = [8, 16, 8]
    bridge_channels = 32
    scale_factors = [-2, 0, 2]      # maxpool x2, identity, bilinear upsample x2
    N = 2

    # Encoder features in NCHW, sized so every branch resolves to 16x16.
    kf = jax.random.split(k_feat, 3)
    encoder_features = [
        jax.random.normal(kf[0], (N, skip_channels[0], 32, 32), jnp.float32),
        jax.random.normal(kf[1], (N, skip_channels[1], 16, 16), jnp.float32),
        jax.random.normal(kf[2], (N, skip_channels[2], 8, 8), jnp.float32),
    ]

    params = make_decoder_params(k_param, skip_channels, bridge_channels)

    out = decoder_forward(params, encoder_features, scale_factors)
    out = jax.block_until_ready(out)
    assert out.shape == (N, bridge_channels, 16, 16)
    assert bool(jnp.all(jnp.isfinite(out)))
    print("KERNEL_OK")
</pallas_src>

<mosaic_0001>
module attributes {stable_mosaic.version = 11 : i64} {
  func.func @_decoder_fused_kernel(%arg0: memref<512x288xbf16, #tpu.memory_space<vmem>>, %arg1: memref<288x128xbf16, #tpu.memory_space<vmem>>, %arg2: memref<1x128xf32, #tpu.memory_space<vmem>>, %arg3: memref<1x128xf32, #tpu.memory_space<vmem>>, %arg4: memref<1152x128xbf16, #tpu.memory_space<vmem>>, %arg5: memref<1x128xf32, #tpu.memory_space<vmem>>, %arg6: memref<1x128xf32, #tpu.memory_space<vmem>>, %arg7: memref<512x128xf32, #tpu.memory_space<vmem>>, %arg8: memref<2x18x24x128xbf16, #tpu.memory_space<vmem>>, %arg9: memref<512x1152xbf16, #tpu.memory_space<vmem>>) attributes {dimension_semantics = [], scalar_prefetch = 0 : i64, scratch_operands = 2 : i64, tpu.core_type = #tpu.core_type<tc>} {
    %c0 = arith.constant 0 : index
    %c0_0 = arith.constant 0 : index
    %0 = vector.load %arg0[%c0, %c0_0] : memref<512x288xbf16, #tpu.memory_space<vmem>>, vector<512x288xbf16>
    %c0_1 = arith.constant 0 : index
    %c0_2 = arith.constant 0 : index
    %1 = vector.load %arg1[%c0_1, %c0_2] : memref<288x128xbf16, #tpu.memory_space<vmem>>, vector<288x128xbf16>
    %cst = arith.constant dense<0.000000e+00> : vector<512x128xf32>
    %2 = tpu.matmul %0, %1, %cst {dimension_numbers = #tpu.dot_dimension_numbers<[1], [0], [0], [1], [0, 0, 1, 1], [], []>} : vector<512x288xbf16>, vector<288x128xbf16>, vector<512x128xf32> -> vector<512x128xf32>
    %cst_3 = arith.constant dense<0.000000e+00> : vector<128xf32>
    %3 = vector.multi_reduction <add>, %2, %cst_3 [0] : vector<512x128xf32> to vector<128xf32>
    %4 = vector.shape_cast %3 : vector<128xf32> to vector<1x128xf32>
    %cst_4 = arith.constant 0.001953125 : f32
    %5 = vector.broadcast %cst_4 : f32 to vector<1x128xf32>
    %6 = arith.mulf %4, %5 : vector<1x128xf32>
    %7 = arith.mulf %2, %2 : vector<512x128xf32>
    %cst_5 = arith.constant dense<0.000000e+00> : vector<128xf32>
    %8 = vector.multi_reduction <add>, %7, %cst_5 [0] : vector<512x128xf32> to vector<128xf32>
    %9 = vector.shape_cast %8 : vector<128xf32> to vector<1x128xf32>
    %cst_6 = arith.constant 0.001953125 : f32
    %10 = vector.broadcast %cst_6 : f32 to vector<1x128xf32>
    %11 = arith.mulf %9, %10 : vector<1x128xf32>
    %12 = arith.mulf %6, %6 : vector<1x128xf32>
    %13 = arith.subf %11, %12 : vector<1x128xf32>
    %cst_7 = arith.constant 0.000000e+00 : f32
    %14 = vector.broadcast %cst_7 : f32 to vector<1x128xf32>
    %15 = arith.maximumf %13, %14 : vector<1x128xf32>
    %c0_8 = arith.constant 0 : index
    %c0_9 = arith.constant 0 : index
    %16 = vector.load %arg2[%c0_8, %c0_9] : memref<1x128xf32, #tpu.memory_space<vmem>>, vector<1x128xf32>
    %cst_10 = arith.constant 9.99999974E-6 : f32
    %17 = vector.broadcast %cst_10 : f32 to vector<1x128xf32>
    %18 = arith.addf %15, %17 : vector<1x128xf32>
    %19 = math.rsqrt %18 : vector<1x128xf32>
    %20 = arith.mulf %16, %19 : vector<1x128xf32>
    %c0_11 = arith.constant 0 : index
    %c0_12 = arith.constant 0 : index
    %21 = vector.load %arg3[%c0_11, %c0_12] : memref<1x128xf32, #tpu.memory_space<vmem>>, vector<1x128xf32>
    %22 = arith.mulf %6, %20 : vector<1x128xf32>
    %23 = arith.subf %21, %22 : vector<1x128xf32>
    %24 = vector.broadcast %20 : vector<1x128xf32> to vector<512x128xf32>
    %25 = arith.mulf %2, %24 : vector<512x128xf32>
    %26 = vector.broadcast %23 : vector<1x128xf32> to vector<512x128xf32>
    %27 = arith.addf %25, %26 : vector<512x128xf32>
    %cst_13 = arith.constant 0.000000e+00 : f32
    %28 = vector.broadcast %cst_13 : f32 to vector<512x128xf32>
    %29 = arith.maximumf %27, %28 : vector<512x128xf32>
    %30 = arith.truncf %29 : vector<512x128xf32> to vector<512x128xbf16>
    %cst_14 = arith.constant 0.000000e+00 : bf16
    %31 = vector.broadcast %cst_14 : bf16 to vector<2x1x24x128xbf16>
    %c0_15 = arith.constant 0 : index
    %c0_16 = arith.constant 0 : index
    %c0_17 = arith.constant 0 : index
    %c0_18 = arith.constant 0 : index
    %32 = vector.load %arg8[%c0_15, %c0_16, %c0_17, %c0_18] : memref<2x18x24x128xbf16, #tpu.memory_space<vmem>>, vector<2x1x24x128xbf16>
    tpu.vector_store %arg8[%c0_15, %c0_16, %c0_17, %c0_18], %31 {strides = array<i32>} : memref<2x18x24x128xbf16, #tpu.memory_space<vmem>>, vector<2x1x24x128xbf16>,
    %c0_19 = arith.constant 0 : index
    %c17 = arith.constant 17 : index
    %c0_20 = arith.constant 0 : index
    %c0_21 = arith.constant 0 : index
    %33 = vector.load %arg8[%c0_19, %c17, %c0_20, %c0_21] : memref<2x18x24x128xbf16, #tpu.memory_space<vmem>>, vector<2x1x24x128xbf16>
    tpu.vector_store %arg8[%c0_19, %c17, %c0_20, %c0_21], %31 {strides = array<i32>} : memref<2x18x24x128xbf16, #tpu.memory_space<vmem>>, vector<2x1x24x128xbf16>,
    %cst_22 = arith.constant 0.000000e+00 : bf16
    %34 = vector.broadcast %cst_22 : bf16 to vector<2x18x1x128xbf16>
    %c0_23 = arith.constant 0 : index
    %c0_24 = arith.constant 0 : index
    %c0_25 = arith.constant 0 : index
    %c0_26 = arith.constant 0 : index
    %35 = vector.load %arg8[%c0_23, %c0_24, %c0_25, %c0_26] : memref<2x18x24x128xbf16, #tpu.memory_space<vmem>>, vector<2x18x1x128xbf16>
    tpu.vector_store %arg8[%c0_23, %c0_24, %c0_25, %c0_26], %34 {strides = array<i32>} : memref<2x18x24x128xbf16, #tpu.memory_space<vmem>>, vector<2x18x1x128xbf16>,
    %c0_27 = arith.constant 0 : index
    %c0_28 = arith.constant 0 : index
    %c17_29 = arith.constant 17 : index
    %c0_30 = arith.constant 0 : index
    %36 = vector.load %arg8[%c0_27, %c0_28, %c17_29, %c0_30] : memref<2x18x24x128xbf16, #tpu.memory_space<vmem>>, vector<2x18x1x128xbf16>
    tpu.vector_store %arg8[%c0_27, %c0_28, %c17_29, %c0_30], %34 {strides = array<i32>} : memref<2x18x24x128xbf16, #tpu.memory_space<vmem>>, vector<2x18x1x128xbf16>,
    %37 = vector.shape_cast %30 : vector<512x128xbf16> to vector<2x16x16x128xbf16>
    %c0_31 = arith.constant 0 : index
    %c1 = arith.constant 1 : index
    %c1_32 = arith.constant 1 : index
    %c0_33 = arith.constant 0 : index
    %38 = vector.load %arg8[%c0_31, %c1, %c1_32, %c0_33] : memref<2x18x24x128xbf16, #tpu.memory_space<vmem>>, vector<2x16x16x128xbf16>
    tpu.vector_store %arg8[%c0_31, %c1, %c1_32, %c0_33], %37 {strides = array<i32>} : memref<2x18x24x128xbf16, #tpu.memory_space<vmem>>, vector<2x16x16x128xbf16>,
    %c0_34 = arith.constant 0 : index
    %c0_35 = arith.constant 0 : index
    %c0_36 = arith.constant 0 : index
    %c0_37 = arith.constant 0 : index
    %39 = vector.load %arg8[%c0_34, %c0_35, %c0_36, %c0_37] : memref<2x18x24x128xbf16, #tpu.memory_space<vmem>>, vector<2x16x16x128xbf16>
    %40 = vector.shape_cast %39 : vector<2x16x16x128xbf16> to vector<512x128xbf16>
    %c0_38 = arith.constant 0 : index
    %c0_39 = arith.constant 0 : index
    %41 = vector.load %arg9[%c0_38, %c0_39] : memref<512x1152xbf16, #tpu.memory_space<vmem>>, vector<512x128xbf16>
    tpu.vector_store %arg9[%c0_38, %c0_39], %40 {strides = array<i32>} : memref<512x1152xbf16, #tpu.memory_space<vmem>>, vector<512x128xbf16>,
    %c0_40 = arith.constant 0 : index
    %c0_41 = arith.constant 0 : index
    %c1_42 = arith.constant 1 : index
    %c0_43 = arith.constant 0 : index
    %42 = vector.load %arg8[%c0_40, %c0_41, %c1_42, %c0_43] : memref<2x18x24x128xbf16, #tpu.memory_space<vmem>>, vector<2x16x16x128xbf16>
    %43 = vector.shape_cast %42 : vector<2x16x16x128xbf16> to vector<512x128xbf16>
    %c0_44 = arith.constant 0 : index
    %c128 = arith.constant 128 : index
    %44 = vector.load %arg9[%c0_44, %c128] : memref<512x1152xbf16, #tpu.memory_space<vmem>>, vector<512x128xbf16>
    tpu.vector_store %arg9[%c0_44, %c128], %43 {strides = array<i32>} : memref<512x1152xbf16, #tpu.memory_space<vmem>>, vector<512x128xbf16>,
    %c0_45 = arith.constant 0 : index
    %c0_46 = arith.constant 0 : index
    %c2 = arith.constant 2 : index
    %c0_47 = arith.constant 0 : index
    %45 = vector.load %arg8[%c0_45, %c0_46, %c2, %c0_47] : memref<2x18x24x128xbf16, #tpu.memory_space<vmem>>, vector<2x16x16x128xbf16>
    %46 = vector.shape_cast %45 : vector<2x16x16x128xbf16> to vector<512x128xbf16>
    %c0_48 = arith.constant 0 : index
    %c256 = arith.constant 256 : index
    %47 = vector.load %arg9[%c0_48, %c256] : memref<512x1152xbf16, #tpu.memory_space<vmem>>, vector<512x128xbf16>
    tpu.vector_store %arg9[%c0_48, %c256], %46 {strides = array<i32>} : memref<512x1152xbf16, #tpu.memory_space<vmem>>, vector<512x128xbf16>,
    %c0_49 = arith.constant 0 : index
    %c1_50 = arith.constant 1 : index
    %c0_51 = arith.constant 0 : index
    %c0_52 = arith.constant 0 : index
    %48 = vector.load %arg8[%c0_49, %c1_50, %c0_51, %c0_52] : memref<2x18x24x128xbf16, #tpu.memory_space<vmem>>, vector<2x16x16x128xbf16>
    %49 = vector.shape_cast %48 : vector<2x16x16x128xbf16> to vector<512x128xbf16>
    %c0_53 = arith.constant 0 : index
    %c384 = arith.constant 384 : index
    %50 = vector.load %arg9[%c0_53, %c384] : memref<512x1152xbf16, #tpu.memory_space<vmem>>, vector<512x128xbf16>
    tpu.vector_store %arg9[%c0_53, %c384], %49 {strides = array<i32>} : memref<512x1152xbf16, #tpu.memory_space<vmem>>, vector<512x128xbf16>,
    %c0_54 = arith.constant 0 : index
    %c1_55 = arith.constant 1 : index
    %c1_56 = arith.constant 1 : index
    %c0_57 = arith.constant 0 : index
    %51 = vector.load %arg8[%c0_54, %c1_55, %c1_56, %c0_57] : memref<2x18x24x128xbf16, #tpu.memory_space<vmem>>, vector<2x16x16x128xbf16>
    %52 = vector.shape_cast %51 : vector<2x16x16x128xbf16> to vector<512x128xbf16>
    %c0_58 = arith.constant 0 : index
    %c512 = arith.constant 512 : index
    %53 = vector.load %arg9[%c0_58, %c512] : memref<512x1152xbf16, #tpu.memory_space<vmem>>, vector<512x128xbf16>
    tpu.vector_store %arg9[%c0_58, %c512], %52 {strides = array<i32>} : memref<512x1152xbf16, #tpu.memory_space<vmem>>, vector<512x128xbf16>,
    %c0_59 = arith.constant 0 : index
    %c1_60 = arith.constant 1 : index
    %c2_61 = arith.constant 2 : index
    %c0_62 = arith.constant 0 : index
    %54 = vector.load %arg8[%c0_59, %c1_60, %c2_61, %c0_62] : memref<2x18x24x128xbf16, #tpu.memory_space<vmem>>, vector<2x16x16x128xbf16>
    %55 = vector.shape_cast %54 : vector<2x16x16x128xbf16> to vector<512x128xbf16>
    %c0_63 = arith.constant 0 : index
    %c640 = arith.constant 640 : index
    %56 = vector.load %arg9[%c0_63, %c640] : memref<512x1152xbf16, #tpu.memory_space<vmem>>, vector<512x128xbf16>
    tpu.vector_store %arg9[%c0_63, %c640], %55 {strides = array<i32>} : memref<512x1152xbf16, #tpu.memory_space<vmem>>, vector<512x128xbf16>,
    %c0_64 = arith.constant 0 : index
    %c2_65 = arith.constant 2 : index
    %c0_66 = arith.constant 0 : index
    %c0_67 = arith.constant 0 : index
    %57 = vector.load %arg8[%c0_64, %c2_65, %c0_66, %c0_67] : memref<2x18x24x128xbf16, #tpu.memory_space<vmem>>, vector<2x16x16x128xbf16>
    %58 = vector.shape_cast %57 : vector<2x16x16x128xbf16> to vector<512x128xbf16>
    %c0_68 = arith.constant 0 : index
    %c768 = arith.constant 768 : index
    %59 = vector.load %arg9[%c0_68, %c768] : memref<512x1152xbf16, #tpu.memory_space<vmem>>, vector<512x128xbf16>
    tpu.vector_store %arg9[%c0_68, %c768], %58 {strides = array<i32>} : memref<512x1152xbf16, #tpu.memory_space<vmem>>, vector<512x128xbf16>,
    %c0_69 = arith.constant 0 : index
    %c2_70 = arith.constant 2 : index
    %c1_71 = arith.constant 1 : index
    %c0_72 = arith.constant 0 : index
    %60 = vector.load %arg8[%c0_69, %c2_70, %c1_71, %c0_72] : memref<2x18x24x128xbf16, #tpu.memory_space<vmem>>, vector<2x16x16x128xbf16>
    %61 = vector.shape_cast %60 : vector<2x16x16x128xbf16> to vector<512x128xbf16>
    %c0_73 = arith.constant 0 : index
    %c896 = arith.constant 896 : index
    %62 = vector.load %arg9[%c0_73, %c896] : memref<512x1152xbf16, #tpu.memory_space<vmem>>, vector<512x128xbf16>
    tpu.vector_store %arg9[%c0_73, %c896], %61 {strides = array<i32>} : memref<512x1152xbf16, #tpu.memory_space<vmem>>, vector<512x128xbf16>,
    %c0_74 = arith.constant 0 : index
    %c2_75 = arith.constant 2 : index
    %c2_76 = arith.constant 2 : index
    %c0_77 = arith.constant 0 : index
    %63 = vector.load %arg8[%c0_74, %c2_75, %c2_76, %c0_77] : memref<2x18x24x128xbf16, #tpu.memory_space<vmem>>, vector<2x16x16x128xbf16>
    %64 = vector.shape_cast %63 : vector<2x16x16x128xbf16> to vector<512x128xbf16>
    %c0_78 = arith.constant 0 : index
    %c1024 = arith.constant 1024 : index
    %65 = vector.load %arg9[%c0_78, %c1024] : memref<512x1152xbf16, #tpu.memory_space<vmem>>, vector<512x128xbf16>
    tpu.vector_store %arg9[%c0_78, %c1024], %64 {strides = array<i32>} : memref<512x1152xbf16, #tpu.memory_space<vmem>>, vector<512x128xbf16>,
    %c0_79 = arith.constant 0 : index
    %c0_80 = arith.constant 0 : index
    %66 = vector.load %arg9[%c0_79, %c0_80] : memref<512x1152xbf16, #tpu.memory_space<vmem>>, vector<512x1152xbf16>
    %c0_81 = arith.constant 0 : index
    %c0_82 = arith.constant 0 : index
    %67 = vector.load %arg4[%c0_81, %c0_82] : memref<1152x128xbf16, #tpu.memory_space<vmem>>, vector<1152x128xbf16>
    %cst_83 = arith.constant dense<0.000000e+00> : vector<512x128xf32>
    %68 = tpu.matmul %66, %67, %cst_83 {dimension_numbers = #tpu.dot_dimension_numbers<[1], [0], [0], [1], [0, 0, 1, 1], [], []>} : vector<512x1152xbf16>, vector<1152x128xbf16>, vector<512x128xf32> -> vector<512x128xf32>
    %cst_84 = arith.constant dense<0.000000e+00> : vector<128xf32>
    %69 = vector.multi_reduction <add>, %68, %cst_84 [0] : vector<512x128xf32> to vector<128xf32>
    %70 = vector.shape_cast %69 : vector<128xf32> to vector<1x128xf32>
    %cst_85 = arith.constant 0.001953125 : f32
    %71 = vector.broadcast %cst_85 : f32 to vector<1x128xf32>
    %72 = arith.mulf %70, %71 : vector<1x128xf32>
    %73 = arith.mulf %68, %68 : vector<512x128xf32>
    %cst_86 = arith.constant dense<0.000000e+00> : vector<128xf32>
    %74 = vector.multi_reduction <add>, %73, %cst_86 [0] : vector<512x128xf32> to vector<128xf32>
    %75 = vector.shape_cast %74 : vector<128xf32> to vector<1x128xf32>
    %cst_87 = arith.constant 0.001953125 : f32
    %76 = vector.broadcast %cst_87 : f32 to vector<1x128xf32>
    %77 = arith.mulf %75, %76 : vector<1x128xf32>
    %78 = arith.mulf %72, %72 : vector<1x128xf32>
    %79 = arith.subf %77, %78 : vector<1x128xf32>
    %cst_88 = arith.constant 0.000000e+00 : f32
    %80 = vector.broadcast %cst_88 : f32 to vector<1x128xf32>
    %81 = arith.maximumf %79, %80 : vector<1x128xf32>
    %c0_89 = arith.constant 0 : index
    %c0_90 = arith.constant 0 : index
    %82 = vector.load %arg5[%c0_89, %c0_90] : memref<1x128xf32, #tpu.memory_space<vmem>>, vector<1x128xf32>
    %cst_91 = arith.constant 9.99999974E-6 : f32
    %83 = vector.broadcast %cst_91 : f32 to vector<1x128xf32>
    %84 = arith.addf %81, %83 : vector<1x128xf32>
    %85 = math.rsqrt %84 : vector<1x128xf32>
    %86 = arith.mulf %82, %85 : vector<1x128xf32>
    %c0_92 = arith.constant 0 : index
    %c0_93 = arith.constant 0 : index
    %87 = vector.load %arg6[%c0_92, %c0_93] : memref<1x128xf32, #tpu.memory_space<vmem>>, vector<1x128xf32>
    %88 = arith.mulf %72, %86 : vector<1x128xf32>
    %89 = arith.subf %87, %88 : vector<1x128xf32>
    %90 = vector.broadcast %86 : vector<1x128xf32> to vector<512x128xf32>
    %91 = arith.mulf %68, %90 : vector<512x128xf32>
    %92 = vector.broadcast %89 : vector<1x128xf32> to vector<512x128xf32>
    %93 = arith.addf %91, %92 : vector<512x128xf32>
    %cst_94 = arith.constant 0.000000e+00 : f32
    %94 = vector.broadcast %cst_94 : f32 to vector<512x128xf32>
    %95 = arith.maximumf %93, %94 : vector<512x128xf32>
    %c0_95 = arith.constant 0 : index
    %c0_96 = arith.constant 0 : index
    %96 = vector.load %arg7[%c0_95, %c0_96] : memref<512x128xf32, #tpu.memory_space<vmem>>, vector<512x128xf32>
    tpu.vector_store %arg7[%c0_95, %c0_96], %95 {strides = array<i32>} : memref<512x128xf32, #tpu.memory_space<vmem>>, vector<512x128xf32>,
    return
  }
}

</mosaic_0001>

<bundles_post_ra>
// kernel: tpu_custom_call.1
= control target key start
LH: loop header
LB: loop body
LE: loop exit
PB: predicated region body
PF: predicated region fallthrough
CT: control target
= control target key end

     0   :  { %v19586_v1 = vmov 0   ;;  %vm780_vm0 = vcmask 261120   ;;  %s19578_s0 = inlined_call_operand.vmem [shape: bf16[512,288], index: 0, kind: input, shape index: {}]   ;;  %s19579_s1 = inlined_call_operand.vmem [shape: bf16[288,128], index: 1, kind: input, shape index: {}]   ;;  %s19580_s2 = inlined_call_operand.vmem [shape: f32[1,128], index: 2, kind: input, shape index: {}]   ;;  %s19581_s3 = inlined_call_operand.vmem [shape: f32[1,128], index: 3, kind: input, shape index: {}]   ;;  %s19582_s4 = inlined_call_operand.vmem [shape: bf16[1152,128], index: 4, kind: input, shape index: {}]   ;;  %s19583_s5 = inlined_call_operand.vmem [shape: f32[1,128], index: 5, kind: input, shape index: {}]   ;;  %s19584_s6 = inlined_call_operand.vmem [shape: f32[1,128], index: 6, kind: input, shape index: {}]   ;;  %s19585_s7 = inlined_call_operand.hbm [shape: f32[512,128], index: 7, kind: output, shape index: {}]  }
   0x1   :  { %v12954_v0 = vld [vmem:[%s19579_s1] sm:$0xff]   ;;  %877 = vmatprep.subr.bf16.mxu0 %v19586_v1  ;;  %1905 = vst [vmem:[#allocation2] sm:$0xf] %v19586_v1  ;;  %1906 = vst [vmem:[#allocation2 + $0x4] sm:$0xf] %v19586_v1  ;;  %v12955_v2 = vld [vmem:[%s19579_s1 + $0x8] sm:$0xff]  }
   0x2   :  { %1907 = vst [vmem:[#allocation2 + $0x8] sm:$0xf] %v19586_v1  ;;  %1908 = vst [vmem:[#allocation2 + $0xd8] sm:$0xf] %v19586_v1  ;;  %878 = vmatpush1.bf16.msra.mxu0 %v12954_v0  ;;  %v12956_v3 = vld [vmem:[%s19579_s1 + $0x10] sm:$0xff]   ;;  %v12957_v4 = vld [vmem:[%s19579_s1 + $0x18] sm:$0xff]  }
   0x3   :  { %1909 = vst [vmem:[#allocation2 + $0xdc] sm:$0xf] %v19586_v1  ;;  %1910 = vst [vmem:[#allocation2 + $0xe0] sm:$0xf] %v19586_v1  ;;  %879 = vmatprep.subr.bf16.mxu0 %v19586_v1  ;;  %v12958_v5 = vld [vmem:[%s19579_s1 + $0x20] sm:$0xff]   ;;  %v12970_v7 = vld [vmem:[%s19579_s1 + $0x88] sm:$0xff]  }
   0x4   :  { %1912 = vst [vmem:[#allocation2 + $0xcc] sm:$0xf] %v19586_v1  ;;  %1913 = vst [vmem:[#allocation2 + $0xd0] sm:$0xf] %v19586_v1  ;;  %v12968_v6 = vld [vmem:[%s19579_s1 + $0x80] sm:$0xff]   ;;  %v12959_v8 = vld [vmem:[%s19579_s1 + $0x28] sm:$0xff]  }
   0x5   :  { %1914 = vst [vmem:[#allocation2 + $0xd4] sm:$0xf] %v19586_v1  ;;  %1915 = vst [vmem:[#allocation2 + $0x1a4] sm:$0xf] %v19586_v1  ;;  %12450 = vmatprep.subr.bf16.mxu1 %v12968_v6  ;;  %v12972_v9 = vld [vmem:[%s19578_s0 + $0x8] ss:$12 sps:$4 sm:$0xff]  }
   0x6   :  { %1916 = vst [vmem:[#allocation2 + $0x1a8] sm:$0xf] %v19586_v1  ;;  %1917 = vst [vmem:[#allocation2 + $0x1ac] sm:$0xf] %v19586_v1  ;;  %880 = vmatpush1.bf16.msra.mxu0 %v12955_v2  ;;  %12451 = vmatpush3.bf16.msra.mxu1 %v12968_v6  ;;  %v12975_v10 = vld [vmem:[%s19578_s0 + $0x4] ss:$12 sps:$4 sm:$0xff]  }
   0x7   :  { %881 = vmatprep.subr.bf16.mxu0 %v19586_v1  ;;  %12452 = vmatprep.subr.bf16.mxu1 %v12970_v7  ;;  %v12976_v11 = vld [vmem:[%s19578_s0 + $0x20] ss:$12 sps:$4 sm:$0xff]   ;;  %v12960_v12 = vld [vmem:[%s19579_s1 + $0x30] sm:$0xff]   ;;  %v12980_v13 = vld [vmem:[%s19578_s0 + $0x38] ss:$12 sps:$4 sm:$0xff]  }
   0x8   :  { %12454 = vmatprep.mubr.msk.bf16.mxu1 %vm780_vm0, %v12972_v9  ;;  %909 = vmatprep.mubr.bf16.mxu0 %v12975_v10  ;;  %v12961_v14 = vld [vmem:[%s19579_s1 + $0x38] sm:$0xff]   ;;  %v12988_v16 = vld [vmem:[%s19578_s0 + $0x68] ss:$12 sps:$4 sm:$0xff]   ;;  %v12962_v17 = vld [vmem:[%s19579_s1 + $0x40] sm:$0xff]  }
   0x9   :  { %v12983_v15 = vld [vmem:[%s19578_s0 + $0x50] ss:$12 sps:$4 sm:$0xff]   ;;  %v12963_v18 = vld [vmem:[%s19579_s1 + $0x48] sm:$0xff]   ;;  %v12996_v20 = vld [vmem:[%s19578_s0 + $0x98] ss:$12 sps:$4 sm:$0xff]  }
   0xa   :  { %882 = vmatpush1.bf16.msra.mxu0 %v12956_v3  ;;  %12453 = vmatpush3.bf16.msra.mxu1 %v12970_v7  ;;  %v12991_v19 = vld [vmem:[%s19578_s0 + $0x80] ss:$12 sps:$4 sm:$0xff]   ;;  %v12964_v21 = vld [vmem:[%s19579_s1 + $0x50] sm:$0xff]   ;;  %v12965_v22 = vld [vmem:[%s19579_s1 + $0x58] sm:$0xff]  }
   0xb   :  { %883 = vmatprep.subr.bf16.mxu0 %v19586_v1  ;;  %12598 = vmatprep.subr.bf16.mxu1 %v19586_v1  ;;  %v12999_v23 = vld [vmem:[%s19578_s0 + $0xb0] ss:$12 sps:$4 sm:$0xff]   ;;  %v13004_v24 = vld [vmem:[%s19578_s0 + $0xc8] ss:$12 sps:$4 sm:$0xff]   ;;  %v12966_v25 = vld [vmem:[%s19579_s1 + $0x60] sm:$0xff]  }
   0xc   :  { %v12967_v26 = vld [vmem:[%s19579_s1 + $0x68] sm:$0xff]   ;;  %v13012_v28 = vld [vmem:[%s19578_s0 + $0xf8] ss:$12 sps:$4 sm:$0xff]   ;;  %v12969_v29 = vld [vmem:[%s19579_s1 + $0x70] sm:$0xff]  }
   0xd   :  { %12455 = vmatmul.mubr.msk.bf16.vlgmr.msra.gmra.mrb[0].mxu1 %vm780_vm0, %v12976_v11  ;;  %v13007_v27 = vld [vmem:[%s19578_s0 + $0xe0] ss:$12 sps:$4 sm:$0xff]   ;;  %v12971_v30 = vld [vmem:[%s19579_s1 + $0x78] sm:$0xff]   ;;  %v13020_v33 = vld [vmem:[%s19578_s0 + $0x128] ss:$12 sps:$4 sm:$0xff]  }
   0xe   :  { %884 = vmatpush1.bf16.msra.mxu0 %v12957_v4  ;;  %12458 = vmatprep.mubr.msk.bf16.mxu1 %vm780_vm0, %v12980_v13  ;;  %v13015_v31 = vld [vmem:[%s19578_s0 + $0x110] ss:$12 sps:$4 sm:$0xff]   ;;  %v12973_v32 = vld [vmem:[%s19578_s0] ss:$12 sps:$4 sm:$0xff]   ;;  %v12979_v36 = vld [vmem:[%s19578_s0 + $0x18] ss:$12 sps:$4 sm:$0xff]  }
   0xf   :  { %885 = vmatprep.subr.bf16.mxu0 %v19586_v1  ;;  %v12977_v34 = vld [vmem:[%s19578_s0 + $0x1c] ss:$12 sps:$4 sm:$0xff]   ;;  %v13023_v35 = vld [vmem:[%s19578_s0 + $0x140] ss:$12 sps:$4 sm:$0xff]   ;;  %v13028_v37 = vld [vmem:[%s19578_s0 + $0x158] ss:$12 sps:$4 sm:$0xff]  }
  0x10   :  { %v12981_v38 = vld [vmem:[%s19578_s0 + $0x34] ss:$12 sps:$4 sm:$0xff]   ;;  %v13031_v39 = vld [vmem:[%s19578_s0 + $0x170] ss:$12 sps:$4 sm:$0xff]   ;;  %v12985_v42 = vld [vmem:[%s19578_s0 + $0x4c] ss:$12 sps:$4 sm:$0xff]  }
  0x11   :  { %v12984_v40 = vld [vmem:[%s19578_s0 + $0x30] ss:$12 sps:$4 sm:$0xff]   ;;  %v13036_v41 = vld [vmem:[%s19578_s0 + $0x188] ss:$12 sps:$4 sm:$0xff]   ;;  %v13039_v43 = vld [vmem:[%s19578_s0 + $0x1a0] ss:$12 sps:$4 sm:$0xff]  }
  0x12   :  { %886 = vmatpush1.bf16.msra.mxu0 %v12958_v5  ;;  %v12987_v44 = vld [vmem:[%s19578_s0 + $0x48] ss:$12 sps:$4 sm:$0xff]   ;;  %v13044_v45 = vld [vmem:[%s19578_s0 + $0x1b8] ss:$12 sps:$4 sm:$0xff]   ;;  %v13047_v47 = vld [vmem:[%s19578_s0 + $0x1d0] ss:$12 sps:$4 sm:$0xff]  }
  0x13   :  { %887 = vmatprep.subr.bf16.mxu0 %v19586_v1  ;;  %v12989_v46 = vld [vmem:[%s19578_s0 + $0x64] ss:$12 sps:$4 sm:$0xff]   ;;  %v12992_v48 = vld [vmem:[%s19578_s0 + $0x60] ss:$12 sps:$4 sm:$0xff]   ;;  %v13052_v49 = vld [vmem:[%s19578_s0 + $0x1e8] ss:$12 sps:$4 sm:$0xff]  }
  0x14   :  { %v12993_v50 = vld [vmem:[%s19578_s0 + $0x7c] ss:$12 sps:$4 sm:$0xff]   ;;  %v13055_v51 = vld [vmem:[%s19578_s0 + $0x200] ss:$12 sps:$4 sm:$0xff]   ;;  %v12995_v52 = vld [vmem:[%s19578_s0 + $0x78] ss:$12 sps:$4 sm:$0xff]  }
  0x15   :  { %12459 = vmatmul.mubr.msk.bf16.gmra.mrb[4].mxu1 %vm780_vm0, %v12983_v15  ;;  %v12997_v53 = vld [vmem:[%s19578_s0 + $0x94] ss:$12 sps:$4 sm:$0xff]   ;;  %v13060_v54 = vld [vmem:[%s19578_s0 + $0x218] ss:$12 sps:$4 sm:$0xff]   ;;  %v13063_v55 = vld [vmem:[%s19578_s0 + $0x230] ss:$12 sps:$4 sm:$0xff]  }
  0x16   :  { %888 = vmatpush1.bf16.msra.mxu0 %v12959_v8  ;;  %12462 = vmatprep.mubr.msk.bf16.mxu1 %vm780_vm0, %v12988_v16  ;;  %v13000_v56 = vld [vmem:[%s19578_s0 + $0x90] ss:$12 sps:$4 sm:$0xff]   ;;  %v13001_v57 = vld [vmem:[%s19578_s0 + $0xac] ss:$12 sps:$4 sm:$0xff]   ;;  %v13003_v58 = vld [vmem:[%s19578_s0 + $0xa8] ss:$12 sps:$4 sm:$0xff]  }
  0x17   :  { %889 = vmatprep.subr.bf16.mxu0 %v19586_v1  ;;  %v13005_v59 = vld [vmem:[%s19578_s0 + $0xc4] ss:$12 sps:$4 sm:$0xff]   ;;  %v13068_v60 = vld [vmem:[%s19578_s0 + $0x248] ss:$12 sps:$4 sm:$0xff]   ;;  %v13071_v61 = vld [vmem:[%s19578_s0 + $0x260] ss:$12 sps:$4 sm:$0xff]  }
  0x18   :  { %v13008_v62 = vld [vmem:[%s19578_s0 + $0xc0] ss:$12 sps:$4 sm:$0xff]   ;;  %v13009_v63 = vld [vmem:[%s19578_s0 + $0xdc] ss:$12 sps:$4 sm:$0xff]   ;;  %v13011_v0 = vld [vmem:[%s19578_s0 + $0xd8] ss:$12 sps:$4 sm:$0xff]  }
  0x19   :  { %v13013_v2 = vld [vmem:[%s19578_s0 + $0xf4] ss:$12 sps:$4 sm:$0xff]  }
  0x1a   :  { %890 = vmatpush1.bf16.msra.mxu0 %v12960_v12 }
  0x1b   :  { %891 = vmatprep.subr.bf16.mxu0 %v19586_v1 }
  0x1d   :  { %12463 = vmatmul.mubr.msk.bf16.gmra.mrb[8].mxu1 %vm780_vm0, %v12991_v19 }
  0x1e   :  { %892 = vmatpush1.bf16.msra.mxu0 %v12961_v14  ;;  %12466 = vmatprep.mubr.msk.bf16.mxu1 %vm780_vm0, %v12996_v20 }
  0x1f   :  { %893 = vmatprep.subr.bf16.mxu0 %v19586_v1 }
  0x22   :  { %894 = vmatpush1.bf16.msra.mxu0 %v12962_v17 }
  0x23   :  { %895 = vmatprep.subr.bf16.mxu0 %v19586_v1 }
  0x25   :  { %12467 = vmatmul.mubr.msk.bf16.gmra.mrb[12].mxu1 %vm780_vm0, %v12999_v23 }
  0x26   :  { %896 = vmatpush1.bf16.msra.mxu0 %v12963_v18  ;;  %12470 = vmatprep.mubr.msk.bf16.mxu1 %vm780_vm0, %v13004_v24 }
  0x27   :  { %897 = vmatprep.subr.bf16.mxu0 %v19586_v1 }
  0x2a   :  { %898 = vmatpush1.bf16.msra.mxu0 %v12964_v21 }
  0x2b   :  { %899 = vmatprep.subr.bf16.mxu0 %v19586_v1 }
  0x2d   :  { %12471 = vmatmul.mubr.msk.bf16.gmra.mrb[16].mxu1 %vm780_vm0, %v13007_v27 }
  0x2e   :  { %900 = vmatpush1.bf16.msra.mxu0 %v12965_v22  ;;  %12474 = vmatprep.mubr.msk.bf16.mxu1 %vm780_vm0, %v13012_v28 }
  0x2f   :  { %901 = vmatprep.subr.bf16.mxu0 %v19586_v1 }
  0x32   :  { %902 = vmatpush1.bf16.msra.mxu0 %v12966_v25 }
  0x33   :  { %903 = vmatprep.subr.bf16.mxu0 %v19586_v1 }
  0x35   :  { %12475 = vmatmul.mubr.msk.bf16.gmra.mrb[20].mxu1 %vm780_vm0, %v13015_v31 }
  0x36   :  { %904 = vmatpush1.bf16.msra.mxu0 %v12967_v26  ;;  %12478 = vmatprep.mubr.msk.bf16.mxu1 %vm780_vm0, %v13020_v33 }
  0x37   :  { %905 = vmatprep.subr.bf16.mxu0 %v19586_v1 }
  0x3a   :  { %906 = vmatpush1.bf16.msra.mxu0 %v12969_v29 }
  0x3b   :  { %907 = vmatprep.subr.bf16.mxu0 %v19586_v1 }
  0x3d   :  { %12479 = vmatmul.mubr.msk.bf16.gmra.mrb[24].mxu1 %vm780_vm0, %v13023_v35 }
  0x3e   :  { %908 = vmatpush1.bf16.msra.mxu0 %v12971_v30  ;;  %12482 = vmatprep.mubr.msk.bf16.mxu1 %vm780_vm0, %v13028_v37 }
  0x3f   :  { %9703 = vmatprep.subr.bf16.mxu0 %v19586_v1 }
  0x41   :  { %910 = vmatmul.mubr.bf16.vlgmr.msra.gmra.mrb[0].mxu0 %v12973_v32 }
  0x42   :  { %917 = vmatprep.mubr.bf16.mxu0 %v12977_v34 }
  0x45   :  { %12483 = vmatmul.mubr.msk.bf16.gmra.mrb[28].mxu1 %vm780_vm0, %v13031_v39 }
  0x46   :  { %12486 = vmatprep.mubr.msk.bf16.mxu1 %vm780_vm0, %v13036_v41 }
  0x49   :  { %918 = vmatmul.mubr.bf16.gmra.mrb[4].mxu0 %v12979_v36 }
  0x4a   :  { %925 = vmatprep.mubr.bf16.mxu0 %v12981_v38 }
  0x4d   :  { %12487 = vmatmul.mubr.msk.bf16.gmra.mrb[32].mxu1 %vm780_vm0, %v13039_v43 }
  0x4e   :  { %12490 = vmatprep.mubr.msk.bf16.mxu1 %vm780_vm0, %v13044_v45 }
  0x51   :  { %926 = vmatmul.mubr.bf16.gmra.mrb[8].mxu0 %v12984_v40 }
  0x52   :  { %933 = vmatprep.mubr.bf16.mxu0 %v12985_v42 }
  0x55   :  { %12491 = vmatmul.mubr.msk.bf16.gmra.mrb[36].mxu1 %vm780_vm0, %v13047_v47 }
  0x56   :  { %12494 = vmatprep.mubr.msk.bf16.mxu1 %vm780_vm0, %v13052_v49 }
  0x59   :  { %934 = vmatmul.mubr.bf16.gmra.mrb[12].mxu0 %v12987_v44 }
  0x5a   :  { %941 = vmatprep.mubr.bf16.mxu0 %v12989_v46 }
  0x5d   :  { %12495 = vmatmul.mubr.msk.bf16.gmra.mrb[40].mxu1 %vm780_vm0, %v13055_v51 }
  0x5e   :  { %12498 = vmatprep.mubr.msk.bf16.mxu1 %vm780_vm0, %v13060_v54 }
  0x61   :  { %942 = vmatmul.mubr.bf16.gmra.mrb[16].mxu0 %v12992_v48 }
  0x62   :  { %949 = vmatprep.mubr.bf16.mxu0 %v12993_v50 }
  0x65   :  { %12499 = vmatmul.mubr.msk.bf16.gmra.mrb[44].mxu1 %vm780_vm0, %v13063_v55 }
  0x66   :  { %12502 = vmatprep.mubr.msk.bf16.mxu1 %vm780_vm0, %v13068_v60 }
  0x69   :  { %950 = vmatmul.mubr.bf16.gmra.mrb[20].mxu0 %v12995_v52 }
  0x6a   :  { %957 = vmatprep.mubr.bf16.mxu0 %v12997_v53 }
  0x6d   :  { %12503 = vmatmul.mubr.msk.bf16.gmra.mrb[48].mxu1 %vm780_vm0, %v13071_v61 }
  0x71   :  { %958 = vmatmul.mubr.bf16.gmra.mrb[24].mxu0 %v13000_v56 }
  0x72   :  { %965 = vmatprep.mubr.bf16.mxu0 %v13001_v57 }
  0x79   :  { %966 = vmatmul.mubr.bf16.gmra.mrb[28].mxu0 %v13003_v58 }
  0x7a   :  { %973 = vmatprep.mubr.bf16.mxu0 %v13005_v59 }
  0x81   :  { %974 = vmatmul.mubr.bf16.gmra.mrb[32].mxu0 %v13008_v62 }
  0x82   :  { %981 = vmatprep.mubr.bf16.mxu0 %v13009_v63 }
  0x83   :  { %12 = vsyncpa [#allocation5], 0  ;;  %v13076_v3 = vld [vmem:[%s19578_s0 + $0x278] ss:$12 sps:$4 sm:$0xff]   ;;  %v13079_v4 = vld [vmem:[%s19578_s0 + $0x290] ss:$12 sps:$4 sm:$0xff]  }
  0x84   :  { %12506 = vmatprep.mubr.msk.bf16.mxu1 %vm780_vm0, %v13076_v3  ;;  %v13016_v5 = vld [vmem:[%s19578_s0 + $0xf0] ss:$12 sps:$4 sm:$0xff]   ;;  %v13017_v6 = vld [vmem:[%s19578_s0 + $0x10c] ss:$12 sps:$4 sm:$0xff]   ;;  %v13019_v7 = vld [vmem:[%s19578_s0 + $0x108] ss:$12 sps:$4 sm:$0xff]  }
  0x85   :  { %12507 = vmatmul.mubr.msk.bf16.gmra.mrb[52].mxu1 %vm780_vm0, %v13079_v4  ;;  %v13021_v8 = vld [vmem:[%s19578_s0 + $0x124] ss:$12 sps:$4 sm:$0xff]   ;;  %vm1918_vm1 = vcmask 1040384   ;;  %vm1919_vm2 = vsmask.f32 256  ;;  %v19700_v10 = vmov 0 }
  0x86   :  { %v1924_v9 = vld [vmem:[#allocation2 + $0xc] sm:$0x1]  ;;  %vm13628_vm3 = vmand %vm1918_vm1, %vm1919_vm2  ;;  %vm2029_vm4 = vsmask.f32 7938  ;;  %v19703_v12 = vmov 0  ;;  %vm2942_vm8 = vcmask 1043456  }
  0x87   :  { %v19701_v10 = vsel %vm13628_vm3, 4294967295, %v19700_v10  ;;  %v1925_v11 = vsel %vm13628_vm3, 0, %v1924_v9  ;;  %vm13635_vm5 = vmand %vm1918_vm1, %vm2029_vm4  ;;  %v2034_v13 = vld [vmem:[#allocation2 + $0x14] sm:$0x1]  ;;  %v13024_v15 = vld [vmem:[%s19578_s0 + $0x120] ss:$12 sps:$4 sm:$0xff]  }
  0x88   :  { %19702 = vst [vmem:[#allocation7_spill] sm:$0xff] %v19701_v10  ;;  %1926 = vst [vmem:[#allocation2 + $0xc] sm:$0x1] %v1925_v11  ;;  %v19704_v12 = vsel %vm13635_vm5, 4294967295, %v19703_v12  ;;  %v2035_v14 = vsel %vm13635_vm5, 0, %v2034_v13  ;;  %vm4675_vm12 = vcmask 1042432  }
  0x89   :  { %982 = vmatmul.mubr.bf16.gmra.mrb[36].mxu0 %v13011_v0  ;;  %19705 = vst [vmem:[#allocation8_spill] sm:$0xff] %v19704_v12  ;;  %2036 = vst [vmem:[#allocation2 + $0x14] sm:$0x1] %v2035_v14  ;;  %v13084_v16 = vld [vmem:[%s19578_s0 + $0x2a8] ss:$12 sps:$4 sm:$0xff]   ;;  %vm4676_vm13 = vcmask 1046532  }
  0x8a   :  { %989 = vmatprep.mubr.bf16.mxu0 %v13013_v2  ;;  %v13025_v17 = vld [vmem:[%s19578_s0 + $0x13c] ss:$12 sps:$4 sm:$0xff]   ;;  %v13087_v18 = vld [vmem:[%s19578_s0 + $0x2c0] ss:$12 sps:$4 sm:$0xff]   ;;  %12510 = vmatprep.mubr.msk.bf16.mxu1 %vm780_vm0, %v13084_v16  ;;  %v1927_v19 = vld [vmem:[#allocation2 + $0x18] sm:$0x1] }
  0x8b   :  { %v1928_v20 = vsel %vm13628_vm3, 0, %v1927_v19  ;;  %v2037_v21 = vld [vmem:[#allocation2 + $0x20] sm:$0x1]  ;;  %v13027_v23 = vld [vmem:[%s19578_s0 + $0x138] ss:$12 sps:$4 sm:$0xff]   ;;  %vm15110_vm9 = vmand %vm2942_vm8, %vm2029_vm4 }
  0x8c   :  { %1929 = vst [vmem:[#allocation2 + $0x18] sm:$0x1] %v1928_v20  ;;  %v2038_v22 = vsel %vm13635_vm5, 0, %v2037_v21  ;;  %v13029_v24 = vld [vmem:[%s19578_s0 + $0x154] ss:$12 sps:$4 sm:$0xff]   ;;  %vm16154_vm14 = vmor %vm4675_vm12, %vm4676_vm13 }
  0x8d   :  { %12511 = vmatmul.mubr.msk.bf16.gmra.mrb[56].mxu1 %vm780_vm0, %v13087_v18  ;;  %2039 = vst [vmem:[#allocation2 + $0x20] sm:$0x1] %v2038_v22  ;;  %v1930_v25 = vld [vmem:[#allocation2 + $0x24] sm:$0x1]  ;;  %v2040_v27 = vld [vmem:[#allocation2 + $0x2c] sm:$0x1] }
  0x8e   :  { %v1931_v26 = vsel %vm13628_vm3, 0, %v1930_v25  ;;  %v2041_v28 = vsel %vm13635_vm5, 0, %v2040_v27  ;;  %v13032_v29 = vld [vmem:[%s19578_s0 + $0x150] ss:$12 sps:$4 sm:$0xff]   ;;  %v13092_v30 = vld [vmem:[%s19578_s0 + $0x2d8] ss:$12 sps:$4 sm:$0xff]  }
  0x8f   :  { %1932 = vst [vmem:[#allocation2 + $0x24] sm:$0x1] %v1931_v26  ;;  %2042 = vst [vmem:[#allocation2 + $0x2c] sm:$0x1] %v2041_v28  ;;  %v13033_v31 = vld [vmem:[%s19578_s0 + $0x16c] ss:$12 sps:$4 sm:$0xff]   ;;  %12514 = vmatprep.mubr.msk.bf16.mxu1 %vm780_vm0, %v13092_v30 }
  0x90   :  { %v13095_v32 = vld [vmem:[%s19578_s0 + $0x2f0] ss:$12 sps:$4 sm:$0xff]   ;;  %v2043_v35 = vld [vmem:[#allocation2 + $0x38] sm:$0x1]  ;;  %v13035_v37 = vld [vmem:[%s19578_s0 + $0x168] ss:$12 sps:$4 sm:$0xff]  }
  0x91   :  { %990 = vmatmul.mubr.bf16.gmra.mrb[40].mxu0 %v13016_v5  ;;  %v1933_v33 = vld [vmem:[#allocation2 + $0x30] sm:$0x1]  ;;  %v2044_v36 = vsel %vm13635_vm5, 0, %v2043_v35  ;;  %v1936_v39 = vld [vmem:[#allocation2 + $0x3c] sm:$0x1] }
  0x92   :  { %997 = vmatprep.mubr.bf16.mxu0 %v13017_v6  ;;  %v1934_v34 = vsel %vm13628_vm3, 0, %v1933_v33  ;;  %2045 = vst [vmem:[#allocation2 + $0x38] sm:$0x1] %v2044_v36  ;;  %v13037_v38 = vld [vmem:[%s19578_s0 + $0x184] ss:$12 sps:$4 sm:$0xff]   ;;  %v1937_v40 = vsel %vm13628_vm3, 0, %v1936_v39 }
  0x93   :  { %1935 = vst [vmem:[#allocation2 + $0x30] sm:$0x1] %v1934_v34  ;;  %1938 = vst [vmem:[#allocation2 + $0x3c] sm:$0x1] %v1937_v40  ;;  %v2046_v41 = vld [vmem:[#allocation2 + $0x44] sm:$0x1] }
  0x94   :  { %v2047_v42 = vsel %vm13635_vm5, 0, %v2046_v41  ;;  %v13040_v43 = vld [vmem:[%s19578_s0 + $0x180] ss:$12 sps:$4 sm:$0xff]   ;;  %v13041_v44 = vld [vmem:[%s19578_s0 + $0x19c] ss:$12 sps:$4 sm:$0xff]  }
  0x95   :  { %12515 = vmatmul.mubr.msk.bf16.gmra.mrb[60].mxu1 %vm780_vm0, %v13095_v32  ;;  %2048 = vst [vmem:[#allocation2 + $0x44] sm:$0x1] %v2047_v42  ;;  %v1939_v45 = vld [vmem:[#allocation2 + $0x48] sm:$0x1]  ;;  %v2049_v47 = vld [vmem:[#allocation2 + $0x50] sm:$0x1] }
  0x96   :  { %v1940_v46 = vsel %vm13628_vm3, 0, %v1939_v45  ;;  %v2050_v48 = vsel %vm13635_vm5, 0, %v2049_v47  ;;  %v13043_v49 = vld [vmem:[%s19578_s0 + $0x198] ss:$12 sps:$4 sm:$0xff]   ;;  %v13045_v50 = vld [vmem:[%s19578_s0 + $0x1b4] ss:$12 sps:$4 sm:$0xff]  }
  0x97   :  { %1941 = vst [vmem:[#allocation2 + $0x48] sm:$0x1] %v1940_v46  ;;  %2051 = vst [vmem:[#allocation2 + $0x50] sm:$0x1] %v2050_v48  ;;  %v1942_v51 = vld [vmem:[#allocation2 + $0x54] sm:$0x1] }
  0x98   :  { %v1943_v52 = vsel %vm13628_vm3, 0, %v1942_v51  ;;  %v2052_v53 = vld [vmem:[#allocation2 + $0x5c] sm:$0x1]  ;;  %v13049_v56 = vld [vmem:[%s19578_s0 + $0x1cc] ss:$12 sps:$4 sm:$0xff]  }
  0x99   :  { %998 = vmatmul.mubr.bf16.gmra.mrb[44].mxu0 %v13019_v7  ;;  %1944 = vst [vmem:[#allocation2 + $0x54] sm:$0x1] %v1943_v52  ;;  %v2053_v54 = vsel %vm13635_vm5, 0, %v2052_v53  ;;  %v13048_v55 = vld [vmem:[%s19578_s0 + $0x1b0] ss:$12 sps:$4 sm:$0xff]  }
  0x9a   :  { %1005 = vmatprep.mubr.bf16.mxu0 %v13021_v8  ;;  %2054 = vst [vmem:[#allocation2 + $0x5c] sm:$0x1] %v2053_v54  ;;  %v1945_v57 = vld [vmem:[#allocation2 + $0x60] sm:$0x1]  ;;  %v2055_v59 = vld [vmem:[#allocation2 + $0x68] sm:$0x1] }
  0x9b   :  { %v1946_v58 = vsel %vm13628_vm3, 0, %v1945_v57  ;;  %v2056_v60 = vsel %vm13635_vm5, 0, %v2055_v59  ;;  %v13051_v61 = vld [vmem:[%s19578_s0 + $0x1c8] ss:$12 sps:$4 sm:$0xff]   ;;  %v13053_v62 = vld [vmem:[%s19578_s0 + $0x1e4] ss:$12 sps:$4 sm:$0xff]  }
  0x9c   :  { %1947 = vst [vmem:[#allocation2 + $0x60] sm:$0x1] %v1946_v58  ;;  %2057 = vst [vmem:[#allocation2 + $0x68] sm:$0x1] %v2056_v60  ;;  %v1948_v63 = vld [vmem:[#allocation2 + $0x6c] sm:$0x1] }
  0x9d   :  { %v1949_v0 = vsel %vm13628_vm3, 0, %v1948_v63  ;;  %v2058_v2 = vld [vmem:[#allocation2 + $0x74] sm:$0x1]  ;;  %v13056_v4 = vld [vmem:[%s19578_s0 + $0x1e0] ss:$12 sps:$4 sm:$0xff]  }
  0x9e   :  { %1950 = vst [vmem:[#allocation2 + $0x6c] sm:$0x1] %v1949_v0  ;;  %v2059_v3 = vsel %vm13635_vm5, 0, %v2058_v2  ;;  %v13057_v5 = vld [vmem:[%s19578_s0 + $0x1fc] ss:$12 sps:$4 sm:$0xff]  }
  0x9f   :  { %2060 = vst [vmem:[#allocation2 + $0x74] sm:$0x1] %v2059_v3  ;;  %v1951_v6 = vld [vmem:[#allocation2 + $0x78] sm:$0x1]  ;;  %v2061_v8 = vld [vmem:[#allocation2 + $0x80] sm:$0x1] }
  0xa0   :  { %v1952_v7 = vsel %vm13628_vm3, 0, %v1951_v6  ;;  %v2062_v9 = vsel %vm13635_vm5, 0, %v2061_v8  ;;  %v13059_v11 = vld [vmem:[%s19578_s0 + $0x1f8] ss:$12 sps:$4 sm:$0xff]   ;;  %v13061_v13 = vld [vmem:[%s19578_s0 + $0x214] ss:$12 sps:$4 sm:$0xff]  }
  0xa1   :  { %1006 = vmatmul.mubr.bf16.gmra.mrb[48].mxu0 %v13024_v15  ;;  %1953 = vst [vmem:[#allocation2 + $0x78] sm:$0x1] %v1952_v7  ;;  %2063 = vst [vmem:[#allocation2 + $0x80] sm:$0x1] %v2062_v9  ;;  %v1954_v14 = vld [vmem:[#allocation2 + $0x84] sm:$0x1] }
  0xa2   :  { %1013 = vmatprep.mubr.bf16.mxu0 %v13025_v17  ;;  %v1955_v15 = vsel %vm13628_vm3, 0, %v1954_v14  ;;  %v2064_v17 = vld [vmem:[#allocation2 + $0x8c] sm:$0x1]  ;;  %v13064_v20 = vld [vmem:[%s19578_s0 + $0x210] ss:$12 sps:$4 sm:$0xff]  }
  0xa3   :  { %1956 = vst [vmem:[#allocation2 + $0x84] sm:$0x1] %v1955_v15  ;;  %v2065_v19 = vsel %vm13635_vm5, 0, %v2064_v17  ;;  %v13065_v22 = vld [vmem:[%s19578_s0 + $0x22c] ss:$12 sps:$4 sm:$0xff]  }
  0xa4   :  { %2066 = vst [vmem:[#allocation2 + $0x8c] sm:$0x1] %v2065_v19  ;;  %v2067_v27 = vld [vmem:[#allocation2 + $0x98] sm:$0x1]  ;;  %v13067_v30 = vld [vmem:[%s19578_s0 + $0x228] ss:$12 sps:$4 sm:$0xff]  }
  0xa5   :  { %v13069_v32 = vld [vmem:[%s19578_s0 + $0x244] ss:$12 sps:$4 sm:$0xff]   ;;  %v1960_v34 = vld [vmem:[#allocation2 + $0x9c] sm:$0x1]  ;;  %v13072_v40 = vld [vmem:[%s19578_s0 + $0x240] ss:$12 sps:$4 sm:$0xff]  }
  0xa6   :  { %v1961_v35 = vsel %vm13628_vm3, 0, %v1960_v34  ;;  %v13073_v42 = vld [vmem:[%s19578_s0 + $0x25c] ss:$12 sps:$4 sm:$0xff]   ;;  %v2073_v47 = vld [vmem:[#allocation2 + $0xb0] sm:$0x1] }
  0xa7   :  { %1962 = vst [vmem:[#allocation2 + $0x9c] sm:$0x1] %v1961_v35  ;;  %v13077_v52 = vld [vmem:[%s19578_s0 + $0x274] ss:$12 sps:$4 sm:$0xff]   ;;  %v2076_v57 = vld [vmem:[#allocation2 + $0xbc] sm:$0x1] }
  0xa8   :  { %v1966_v54 = vld [vmem:[#allocation2 + $0xb4] sm:$0x1]  ;;  %v2077_v59 = vsel %vm13635_vm5, 0, %v2076_v57  ;;  %v13080_v60 = vld [vmem:[%s19578_s0 + $0x270] ss:$12 sps:$4 sm:$0xff]  }
  0xa9   :  { %1014 = vmatmul.mubr.bf16.gmra.mrb[52].mxu0 %v13027_v23  ;;  %2078 = vst [vmem:[#allocation2 + $0xbc] sm:$0x1] %v2077_v59  ;;  %v1969_v0 = vld [vmem:[#allocation2 + $0xc0] sm:$0x1]  ;;  %v13085_v15 = vld [vmem:[%s19578_s0 + $0x2a4] ss:$12 sps:$4 sm:$0xff]  }
  0xaa   :  { %1021 = vmatprep.mubr.bf16.mxu0 %v13029_v24  ;;  %v1957_v24 = vld [vmem:[#allocation2 + $0x90] sm:$0x1]  ;;  %v1970_v2 = vsel %vm13628_vm3, 0, %v1969_v0  ;;  %v13088_v34 = vld [vmem:[%s19578_s0 + $0x2a0] ss:$12 sps:$4 sm:$0xff]  }
  0xab   :  { %v1958_v25 = vsel %vm13628_vm3, 0, %v1957_v24  ;;  %1971 = vst [vmem:[#allocation2 + $0xc0] sm:$0x1] %v1970_v2  ;;  %v13091_v57 = vld [vmem:[%s19578_s0 + $0x2b8] ss:$12 sps:$4 sm:$0xff]  }
  0xac   :  { %1959 = vst [vmem:[#allocation2 + $0x90] sm:$0x1] %v1958_v25  ;;  %v2088_v25 = vld [vmem:[#allocation2 + $0xec] sm:$0x1]  ;;  %vm2299_vm6 = vsmask.f32 4368 }
  0xad   :  { %vm14632_vm7 = vmor %vm1919_vm2, %vm2299_vm6  ;;  %vm3552_vm10 = vsmask.f32 3328  ;;  %vm3553_vm11 = vsmask.f32 7440 }
  0xae   :  { %vm16171_vm15 = vmor %vm3552_vm10, %vm3553_vm11 }
  0xb1   :  { %1022 = vmatmul.mubr.bf16.gmra.mrb[56].mxu0 %v13032_v29  ;;  %v2068_v29 = vsel %vm13635_vm5, 0, %v2067_v27 }
  0xb2   :  { %1029 = vmatprep.mubr.bf16.mxu0 %v13033_v31  ;;  %2069 = vst [vmem:[#allocation2 + $0x98] sm:$0x1] %v2068_v29 }
  0xb9   :  { %1030 = vmatmul.mubr.bf16.gmra.mrb[60].mxu0 %v13035_v37  ;;  %v2070_v37 = vld [vmem:[#allocation2 + $0xa4] sm:$0x1] }
  0xba   :  { %1037 = vmatprep.mubr.bf16.mxu0 %v13037_v38  ;;  %v2071_v39 = vsel %vm13635_vm5, 0, %v2070_v37 }
  0xbb   :  { %2072 = vst [vmem:[#allocation2 + $0xa4] sm:$0x1] %v2071_v39  ;;  %v13089_v39 = vld [vmem:[%s19578_s0 + $0x2bc] ss:$12 sps:$4 sm:$0xff]  }
  0xc1   :  { %1038 = vmatmul.mubr.bf16.gmra.mrb[64].mxu0 %v13040_v43 }
  0xc2   :  { %1045 = vmatprep.mubr.bf16.mxu0 %v13041_v44  ;;  %v1963_v44 = vld [vmem:[#allocation2 + $0xa8] sm:$0x1] }
  0xc3   :  { %v1964_v45 = vsel %vm13628_vm3, 0, %v1963_v44  ;;  %v1981_v44 = vld [vmem:[#allocation2 + $0xf0] sm:$0x1] }
  0xc4   :  { %1965 = vst [vmem:[#allocation2 + $0xa8] sm:$0x1] %v1964_v45  ;;  %v1982_v45 = vsel %vm13628_vm3, 0, %v1981_v44 }
  0xc5   :  { %1983 = vst [vmem:[#allocation2 + $0xf0] sm:$0x1] %v1982_v45 }
  0xc9   :  { %1046 = vmatmul.mubr.bf16.gmra.mrb[68].mxu0 %v13043_v49  ;;  %v2074_v49 = vsel %vm13635_vm5, 0, %v2073_v47 }
  0xca   :  { %1053 = vmatprep.mubr.bf16.mxu0 %v13045_v50  ;;  %v13075_v50 = vld [vmem:[%s19578_s0 + $0x258] ss:$12 sps:$4 sm:$0xff]   ;;  %2075 = vst [vmem:[#allocation2 + $0xb0] sm:$0x1] %v2074_v49 }
  0xcb   :  { %v2091_v49 = vld [vmem:[#allocation2 + $0xf8] sm:$0x1] }
  0xd1   :  { %1054 = vmatmul.mubr.bf16.gmra.mrb[72].mxu0 %v13048_v55  ;;  %v1967_v55 = vsel %vm13628_vm3, 0, %v1966_v54  ;;  %v2092_v54 = vsel %vm13635_vm5, 0, %v2091_v49 }
  0xd2   :  { %1061 = vmatprep.mubr.bf16.mxu0 %v13049_v56  ;;  %1968 = vst [vmem:[#allocation2 + $0xb4] sm:$0x1] %v1967_v55  ;;  %2093 = vst [vmem:[#allocation2 + $0xf8] sm:$0x1] %v2092_v54  ;;  %v13099_v54 = vld [vmem:[%s19578_s0 + $0x2e8] ss:$12 sps:$4 sm:$0xff]  }
  0xd9   :  { %1062 = vmatmul.mubr.bf16.gmra.mrb[76].mxu0 %v13051_v61 }
  0xda   :  { %1069 = vmatprep.mubr.bf16.mxu0 %v13053_v62  ;;  %v13081_v62 = vld [vmem:[%s19578_s0 + $0x28c] ss:$12 sps:$4 sm:$0xff]  }
  0xe0   :  { %v13755_v16 = vpop.f32.mrb[0].mxu1 }
  0xe1   :  { %1070 = vmatmul.mubr.bf16.gmra.mrb[80].mxu0 %v13056_v4  ;;  %v13757_v18 = vpop.f32.mrb[1].mxu1  ;;  %v2079_v4 = vld [vmem:[#allocation2 + $0xc8] sm:$0x1] }
  0xe2   :  { %1077 = vmatprep.mubr.bf16.mxu0 %v13057_v5  ;;  %v13764_v21 = vpop.f32.mrb[2].mxu1  ;;  %v2080_v7 = vsel %vm13635_vm5, 0, %v2079_v4  ;;  %v1984_v4 = vld [vmem:[#allocation2 + $0xfc] sm:$0x1] }
  0xe3   :  { %v13769_v23 = vpop.f32.mrb[3].mxu1  ;;  %2081 = vst [vmem:[#allocation2 + $0xc8] sm:$0x1] %v2080_v7 }
  0xe8   :  { %v13773_v26 = vpop.f32.mrb[4].mxu1 }
  0xe9   :  { %1078 = vmatmul.mubr.bf16.gmra.mrb[84].mxu0 %v13059_v11  ;;  %v13775_v28 = vpop.f32.mrb[5].mxu1  ;;  %v13083_v11 = vld [vmem:[%s19578_s0 + $0x288] ss:$12 sps:$4 sm:$0xff]  }
  0xea   :  { %1085 = vmatprep.mubr.bf16.mxu0 %v13061_v13  ;;  %v13782_v31 = vpop.f32.mrb[6].mxu1 }
  0xeb   :  { %v13787_v33 = vpop.f32.mrb[7].mxu1 }
  0xf0   :  { %v13791_v36 = vpop.f32.mrb[8].mxu1 }
  0xf1   :  { %1086 = vmatmul.mubr.bf16.gmra.mrb[88].mxu0 %v13064_v20  ;;  %v13793_v38 = vpop.f32.mrb[9].mxu1  ;;  %v1978_v20 = vld [vmem:[#allocation2 + $0xe4] sm:$0x1] }
  0xf2   :  { %1093 = vmatprep.mubr.bf16.mxu0 %v13065_v22  ;;  %v13800_v41 = vpop.f32.mrb[10].mxu1  ;;  %v1979_v22 = vsel %vm13628_vm3, 0, %v1978_v20  ;;  %v13096_v20 = vld [vmem:[%s19578_s0 + $0x2d0] ss:$12 sps:$4 sm:$0xff]  }
  0xf3   :  { %v13805_v43 = vpop.f32.mrb[11].mxu1  ;;  %1980 = vst [vmem:[#allocation2 + $0xe4] sm:$0x1] %v1979_v22 }
  0xf8   :  { %v13809_v46 = vpop.f32.mrb[12].mxu1 }
  0xf9   :  { %1094 = vmatmul.mubr.bf16.gmra.mrb[92].mxu0 %v13067_v30  ;;  %v13811_v48 = vpop.f32.mrb[13].mxu1  ;;  %v2089_v30 = vsel %vm13635_vm5, 0, %v2088_v25 }
  0xfa   :  { %1101 = vmatprep.mubr.bf16.mxu0 %v13069_v32  ;;  %v13818_v51 = vpop.f32.mrb[14].mxu1  ;;  %2090 = vst [vmem:[#allocation2 + $0xec] sm:$0x1] %v2089_v30 }
  0xfb   :  { %v13823_v53 = vpop.f32.mrb[15].mxu1 }
 0x100   :  { %v13827_v56 = vpop.f32.mrb[16].mxu1 }
 0x101   :  { %1102 = vmatmul.mubr.bf16.gmra.mrb[96].mxu0 %v13072_v40  ;;  %v13829_v58 = vpop.f32.mrb[17].mxu1 }
 0x102   :  { %1109 = vmatprep.mubr.bf16.mxu0 %v13073_v42  ;;  %v13836_v61 = vpop.f32.mrb[18].mxu1 }
 0x103   :  { %v13841_v63 = vpop.f32.mrb[19].mxu1 }
 0x108   :  { %v13845_v3 = vpop.f32.mrb[20].mxu1 }
 0x109   :  { %1110 = vmatmul.mubr.bf16.gmra.mrb[100].mxu0 %v13075_v50  ;;  %v13847_v6 = vpop.f32.mrb[21].mxu1 }
 0x10a   :  { %1117 = vmatprep.mubr.bf16.mxu0 %v13077_v52  ;;  %v13857_v13 = vpop.f32.mrb[22].mxu1 }
 0x10b   :  { %v13862_v17 = vpop.f32.mrb[23].mxu1 }
 0x110   :  { %v13869_v24 = vpop.f32.mrb[24].mxu1 }
 0x111   :  { %1118 = vmatmul.mubr.bf16.gmra.mrb[104].mxu0 %v13080_v60  ;;  %v13871_v29 = vpop.f32.mrb[25].mxu1 }
 0x112   :  { %1125 = vmatprep.mubr.bf16.mxu0 %v13081_v62  ;;  %v13881_v35 = vpop.f32.mrb[26].mxu1  ;;  %v13093_v62 = vld [vmem:[%s19578_s0 + $0x2d4] ss:$12 sps:$4 sm:$0xff]  }
 0x113   :  { %v13886_v40 = vpop.f32.mrb[27].mxu1 }
 0x114   :  { %v911_v5 = vpop.f32.mrb[0].mxu0 }
 0x115   :  { %v13852_v8 = vadd.f32 %v13757_v18, %v911_v5  ;;  %v913_v9 = vpop.f32.mrb[1].mxu0  ;;  %v1985_v5 = vsel %vm13628_vm3, 0, %v1984_v4  ;;  %v1990_v4 = vld [vmem:[#allocation2 + $0x114] sm:$0x1] }
 0x116   :  { %v914_v14 = vpop.f32.mrb[2].mxu0  ;;  %1986 = vst [vmem:[#allocation2 + $0xfc] sm:$0x1] %v1985_v5  ;;  %v2094_v9 = vld [vmem:[#allocation2 + $0x104] sm:$0x1] }
 0x117   :  { %19706 = vst [vmem:[#allocation9_spill] sm:$0xff] %v13852_v8  ;;  %v13865_v19 = vadd.f32 %v13769_v23, %v914_v14  ;;  %v916_v18 = vpop.f32.mrb[3].mxu0 }
 0x118   :  { %v13893_v47 = vpop.f32.mrb[28].mxu1 }
 0x119   :  { %19707 = vst [vmem:[#allocation10_spill] sm:$0xff] %v13865_v19  ;;  %1126 = vmatmul.mubr.bf16.gmra.mrb[108].mxu0 %v13083_v11  ;;  %v13895_v52 = vpop.f32.mrb[29].mxu1 }
 0x11a   :  { %1133 = vmatprep.mubr.bf16.mxu0 %v13085_v15  ;;  %v13905_v59 = vpop.f32.mrb[30].mxu1  ;;  %v2095_v15 = vsel %vm13635_vm5, 0, %v2094_v9  ;;  %v2100_v9 = vld [vmem:[#allocation2 + $0x11c] sm:$0x1] }
 0x11b   :  { %v13910_v0 = vpop.f32.mrb[31].mxu1  ;;  %2096 = vst [vmem:[#allocation2 + $0x104] sm:$0x1] %v2095_v15 }
 0x11c   :  { %v919_v27 = vpop.f32.mrb[4].mxu0 }
 0x11d   :  { %v13876_v23 = vadd.f32 %v13755_v16, %v919_v27  ;;  %v921_v32 = vpop.f32.mrb[5].mxu0  ;;  %v13097_v27 = vld [vmem:[%s19578_s0 + $0x2ec] ss:$12 sps:$4 sm:$0xff]  }
 0x11e   :  { %v922_v37 = vpop.f32.mrb[6].mxu0 }
 0x11f   :  { %19708 = vst [vmem:[#allocation11_spill] sm:$0xff] %v13876_v23  ;;  %v13889_v42 = vadd.f32 %v13764_v21, %v922_v37  ;;  %v924_v16 = vpop.f32.mrb[7].mxu0 }
 0x120   :  { %v13917_v7 = vpop.f32.mrb[32].mxu1  ;;  %v2097_v16 = vld [vmem:[#allocation2 + $0x110] sm:$0x1] }
 0x121   :  { %19709 = vst [vmem:[#allocation12_spill] sm:$0xff] %v13889_v42  ;;  %1134 = vmatmul.mubr.bf16.gmra.mrb[112].mxu0 %v13088_v34  ;;  %v13919_v14 = vpop.f32.mrb[33].mxu1  ;;  %v1987_v34 = vld [vmem:[#allocation2 + $0x108] sm:$0x1]  ;;  %v2098_v49 = vsel %vm13635_vm5, 0, %v2097_v16 }
 0x122   :  { %1141 = vmatprep.mubr.bf16.mxu0 %v13089_v39  ;;  %v13929_v22 = vpop.f32.mrb[34].mxu1  ;;  %v1988_v37 = vsel %vm13628_vm3, 0, %v1987_v34  ;;  %2099 = vst [vmem:[#allocation2 + $0x110] sm:$0x1] %v2098_v49  ;;  %v1993_v16 = vld [vmem:[#allocation2 + $0x120] sm:$0x1] }
 0x123   :  { %v13934_v30 = vpop.f32.mrb[35].mxu1  ;;  %1989 = vst [vmem:[#allocation2 + $0x108] sm:$0x1] %v1988_v37  ;;  %v2103_v49 = vld [vmem:[#allocation2 + $0x128] sm:$0x1] }
 0x124   :  { %v927_v50 = vpop.f32.mrb[8].mxu0 }
 0x125   :  { %v13900_v21 = vadd.f32 %v13775_v28, %v927_v50  ;;  %v929_v55 = vpop.f32.mrb[9].mxu0 }
 0x126   :  { %v930_v60 = vpop.f32.mrb[10].mxu0 }
 0x127   :  { %19710 = vst [vmem:[#allocation13_spill] sm:$0xff] %v13900_v21  ;;  %v13913_v2 = vadd.f32 %v13787_v33, %v930_v60  ;;  %v932_v28 = vpop.f32.mrb[11].mxu0 }
 0x128   :  { %v13941_v39 = vpop.f32.mrb[36].mxu1 }
 0x129   :  { %19711 = vst [vmem:[#allocation14_spill] sm:$0xff] %v13913_v2  ;;  %1142 = vmatmul.mubr.bf16.gmra.mrb[116].mxu0 %v13091_v57  ;;  %v13943_v45 = vpop.f32.mrb[37].mxu1 }
 0x12a   :  { %1149 = vmatprep.mubr.bf16.mxu0 %v13093_v62  ;;  %v13953_v55 = vpop.f32.mrb[38].mxu1 }
 0x12b   :  { %v13955_v60 = vpop.f32.mrb[39].mxu1 }
 0x12c   :  { %v935_v11 = vpop.f32.mrb[12].mxu0 }
 0x12d   :  { %v13924_v33 = vadd.f32 %v13773_v26, %v935_v11  ;;  %v937_v18 = vpop.f32.mrb[13].mxu0 }
 0x12e   :  { %v938_v25 = vpop.f32.mrb[14].mxu0  ;;  %v2101_v18 = vsel %vm13635_vm5, 0, %v2100_v9 }
 0x12f   :  { %v13937_v32 = vadd.f32 %v13782_v31, %v938_v25  ;;  %v940_v26 = vpop.f32.mrb[15].mxu0  ;;  %2102 = vst [vmem:[#allocation2 + $0x11c] sm:$0x1] %v2101_v18 }
 0x130   :  { %v13962_v5 = vpop.f32.mrb[40].mxu1 }
 0x131   :  { %19712 = vst [vmem:[#allocation15_spill] sm:$0xff] %v13937_v32  ;;  %1150 = vmatmul.mubr.bf16.gmra.mrb[120].mxu0 %v13096_v20  ;;  %v13964_v15 = vpop.f32.mrb[41].mxu1 }
 0x132   :  { %1157 = vmatprep.mubr.bf16.mxu0 %v13097_v27  ;;  %v13971_v25 = vpop.f32.mrb[42].mxu1 }
 0x133   :  { %v13973_v26 = vpop.f32.mrb[43].mxu1 }
 0x134   :  { %v943_v44 = vpop.f32.mrb[16].mxu0 }
 0x135   :  { %v13948_v31 = vadd.f32 %v13793_v38, %v943_v44  ;;  %v945_v50 = vpop.f32.mrb[17].mxu0  ;;  %v1991_v38 = vsel %vm13628_vm3, 0, %v1990_v4  ;;  %v1994_v44 = vsel %vm13628_vm3, 0, %v1993_v16 }
 0x136   :  { %v946_v57 = vpop.f32.mrb[18].mxu0  ;;  %1992 = vst [vmem:[#allocation2 + $0x114] sm:$0x1] %v1991_v38  ;;  %1995 = vst [vmem:[#allocation2 + $0x120] sm:$0x1] %v1994_v44 }
 0x137   :  { %v13958_v62 = vadd.f32 %v13805_v43, %v946_v57  ;;  %v948_v28 = vpop.f32.mrb[19].mxu0 }
 0x138   :  { %v13980_v50 = vpop.f32.mrb[44].mxu1 }
 0x139   :  { %19713 = vst [vmem:[#allocation16_spill] sm:$0xff] %v13958_v62  ;;  %1158 = vmatmul.mubr.bf16.gmra.mrb[124].mxu0 %v13099_v54  ;;  %v2104_v54 = vsel %vm13635_vm5, 0, %v2103_v49  ;;  %v13984_v57 = vpop.f32.mrb[45].mxu1 }
 0x13a   :  { %2105 = vst [vmem:[#allocation2 + $0x128] sm:$0x1] %v2104_v54  ;;  %v13989_v4 = vpop.f32.mrb[46].mxu1 }
 0x13b   :  { %v13991_v9 = vpop.f32.mrb[47].mxu1 }
 0x13c   :  { %v951_v11 = vpop.f32.mrb[20].mxu0 }
 0x13d   :  { %v13969_v20 = vadd.f32 %v13791_v36, %v951_v11  ;;  %v953_v43 = vpop.f32.mrb[21].mxu0 }
 0x13e   :  { %v954_v27 = vpop.f32.mrb[22].mxu0  ;;  %v1996_v43 = vld [vmem:[#allocation2 + $0x12c] sm:$0x1] }
 0x13f   :  { %19714 = vst [vmem:[#allocation17_spill] sm:$0xff] %v13969_v20  ;;  %v13976_v34 = vadd.f32 %v13800_v41, %v954_v27  ;;  %v956_v37 = vpop.f32.mrb[23].mxu0  ;;  %v1997_v27 = vsel %vm13628_vm3, 0, %v1996_v43 }
 0x140   :  { %1998 = vst [vmem:[#allocation2 + $0x12c] sm:$0x1] %v1997_v27  ;;  %v2106_v37 = vld [vmem:[#allocation2 + $0x134] sm:$0x1]  ;;  %v14008_v43 = vpop.f32.mrb[48].mxu1 }
 0x141   :  { %19715 = vst [vmem:[#allocation18_spill] sm:$0xff] %v13976_v34  ;;  %19719 = vst [vmem:[#allocation22_spill] sm:$0xff] %v14008_v43  ;;  %v1528_v43 = vmul.f32 %v13889_v42, %v13889_v42 }
 0x144   :  { %v959_v36 = vpop.f32.mrb[24].mxu0 }
 0x145   :  { %v13987_v28 = vadd.f32 %v13811_v48, %v959_v36  ;;  %v961_v41 = vpop.f32.mrb[25].mxu0  ;;  %v2107_v48 = vsel %vm13635_vm5, 0, %v2106_v37  ;;  %v14012_v37 = vpop.f32.mrb[49].mxu1 }
 0x146   :  { %v962_v38 = vpop.f32.mrb[26].mxu0  ;;  %2108 = vst [vmem:[#allocation2 + $0x134] sm:$0x1] %v2107_v48  ;;  %v1999_v41 = vld [vmem:[#allocation2 + $0x138] sm:$0x1]  ;;  %v14017_v48 = vpop.f32.mrb[50].mxu1 }
 0x147   :  { %19716 = vst [vmem:[#allocation19_spill] sm:$0xff] %v13987_v28  ;;  %v13994_v11 = vadd.f32 %v13823_v53, %v962_v38  ;;  %v964_v18 = vpop.f32.mrb[27].mxu0  ;;  %v2000_v38 = vsel %vm13628_vm3, 0, %v1999_v41  ;;  %19720 = vst [vmem:[#allocation23_spill] sm:$0xff] %v14017_v48 }
 0x148   :  { %2001 = vst [vmem:[#allocation2 + $0x138] sm:$0x1] %v2000_v38  ;;  %v2109_v18 = vld [vmem:[#allocation2 + $0x140] sm:$0x1] }
 0x149   :  { %19717 = vst [vmem:[#allocation20_spill] sm:$0xff] %v13994_v11 }
 0x14c   :  { %v967_v16 = vpop.f32.mrb[28].mxu0 }
 0x14d   :  { %v14001_v44 = vadd.f32 %v13809_v46, %v967_v16  ;;  %v969_v49 = vpop.f32.mrb[29].mxu0  ;;  %v2110_v46 = vsel %vm13635_vm5, 0, %v2109_v18  ;;  %v1525_v18 = vmul.f32 %v13852_v8, %v13852_v8 }
 0x14e   :  { %v970_v36 = vpop.f32.mrb[30].mxu0  ;;  %2111 = vst [vmem:[#allocation2 + $0x140] sm:$0x1] %v2110_v46  ;;  %v2002_v46 = vld [vmem:[#allocation2 + $0x144] sm:$0x1] }
 0x14f   :  { %v14004_v53 = vadd.f32 %v13818_v51, %v970_v36  ;;  %v972_v54 = vpop.f32.mrb[31].mxu0  ;;  %v14019_v36 = vpop.f32.mrb[51].mxu1 }
 0x150   :  { %19721 = vst [vmem:[#allocation24_spill] sm:$0xff] %v14019_v36  ;;  %v1526_v54 = vmul.f32 %v13865_v19, %v13865_v19 }
 0x151   :  { %19718 = vst [vmem:[#allocation21_spill] sm:$0xff] %v14004_v53 }
 0x152   :  { %v1589_v1 = vadd.f32 %v1526_v54, %v1525_v18 }
 0x154   :  { %v975_v27 = vpop.f32.mrb[32].mxu0 }
 0x155   :  { %v14015_v16 = vadd.f32 %v13829_v58, %v975_v27  ;;  %v977_v51 = vpop.f32.mrb[33].mxu0  ;;  %v1455_v58 = vadd.f32 %v13865_v19, %v13852_v8  ;;  %v1527_v27 = vmul.f32 %v13876_v23, %v13876_v23 }
 0x156   :  { %v978_v49 = vpop.f32.mrb[34].mxu0  ;;  %v2003_v51 = vsel %vm13628_vm3, 0, %v2002_v46 }
 0x157   :  { %v14024_v41 = vadd.f32 %v13841_v63, %v978_v49  ;;  %v980_v38 = vpop.f32.mrb[35].mxu0  ;;  %v1456_v48 = vadd.f32 %v1455_v58, %v13876_v23  ;;  %2004 = vst [vmem:[#allocation2 + $0x144] sm:$0x1] %v2003_v51  ;;  %v2112_v63 = vld [vmem:[#allocation2 + $0x14c] sm:$0x1]  ;;  %v13100_v49 = vld [vmem:[%s19582_s4 + $0x80] sm:$0xff]   ;;  %v1590_v8 = vadd.f32 %v1589_v1, %v1527_v27  ;;  %v1529_v51 = vmul.f32 %v13900_v21, %v13900_v21 }
 0x158   :  { %v2113_v19 = vsel %vm13635_vm5, 0, %v2112_v63  ;;  %12614 = vmatpush1.bf16.msra.mxu1 %v13100_v49  ;;  %v19723_v58 = vmov 0  }
 0x159   :  { %19722 = vst [vmem:[#allocation25_spill] sm:$0xff] %v14024_v41  ;;  %2114 = vst [vmem:[#allocation2 + $0x14c] sm:$0x1] %v2113_v19  ;;  %12599 = vmatprep.subr.bf16.mxu1 %v19723_v58  ;;  %v1457_v46 = vadd.f32 %v1456_v48, %v13889_v42  ;;  %v1591_v27 = vadd.f32 %v1590_v8, %v1528_v43  ;;  %v2115_v48 = vld [vmem:[#allocation2 + $0x158] sm:$0x1] }
 0x15a   :  { %v2116_v8 = vsel %vm13635_vm5, 0, %v2115_v48 }
 0x15b   :  { %v1458_v23 = vadd.f32 %v1457_v46, %v13900_v21  ;;  %v1592_v49 = vadd.f32 %v1591_v27, %v1529_v51  ;;  %v1531_v51 = vmul.f32 %v13924_v33, %v13924_v33  ;;  %2117 = vst [vmem:[#allocation2 + $0x158] sm:$0x1] %v2116_v8 }
 0x15c   :  { %v983_v38 = vpop.f32.mrb[36].mxu0 }
 0x15d   :  { %v14043_v36 = vadd.f32 %v13827_v56, %v983_v38  ;;  %v985_v54 = vpop.f32.mrb[37].mxu0  ;;  %v2005_v56 = vld [vmem:[#allocation2 + $0x150] sm:$0x1]  ;;  %v1530_v38 = vmul.f32 %v13913_v2, %v13913_v2  ;;  %v1459_v46 = vadd.f32 %v1458_v23, %v13913_v2 }
 0x15e   :  { %v986_v18 = vpop.f32.mrb[38].mxu0  ;;  %v2006_v19 = vsel %vm13628_vm3, 0, %v2005_v56  ;;  %v13101_v54 = vld [vmem:[%s19582_s4 + $0x88] sm:$0xff]  }
 0x15f   :  { %v14050_v63 = vadd.f32 %v13836_v61, %v986_v18  ;;  %v988_v1 = vpop.f32.mrb[39].mxu0  ;;  %2007 = vst [vmem:[#allocation2 + $0x150] sm:$0x1] %v2006_v19  ;;  %v14060_v61 = vpop.f32.mrb[52].mxu1  ;;  %12615 = vmatpush1.bf16.msra.mxu1 %v13101_v54  ;;  %v1593_v48 = vadd.f32 %v1592_v49, %v1530_v38  ;;  %v1460_v42 = vadd.f32 %v1459_v46, %v13924_v33  ;;  %v2118_v49 = vld [vmem:[#allocation2 + $0x164] sm:$0x1] }
 0x160   :  { %19724 = vst [vmem:[#allocation26_spill] sm:$0xff] %v14060_v61  ;;  %v14064_v43 = vpop.f32.mrb[53].mxu1  ;;  %12600 = vmatprep.subr.bf16.mxu1 %v19723_v58  ;;  %v2119_v38 = vsel %vm13635_vm5, 0, %v2118_v49 }
 0x161   :  { %v14072_v56 = vpop.f32.mrb[54].mxu1  ;;  %v1594_v61 = vadd.f32 %v1593_v48, %v1531_v51  ;;  %v1461_v8 = vadd.f32 %v1460_v42, %v13937_v32  ;;  %2120 = vst [vmem:[#allocation2 + $0x164] sm:$0x1] %v2119_v38 }
 0x162   :  { %v14074_v21 = vpop.f32.mrb[55].mxu1 }
 0x163   :  { %v1462_v51 = vadd.f32 %v1461_v8, %v13948_v31  ;;  %v14112_v38 = vpop.f32.mrb[56].mxu1 }
 0x164   :  { %v991_v18 = vpop.f32.mrb[40].mxu0 }
 0x165   :  { %v14070_v1 = vadd.f32 %v13847_v6, %v991_v18  ;;  %v993_v27 = vpop.f32.mrb[41].mxu0  ;;  %v1532_v6 = vmul.f32 %v13937_v32, %v13937_v32  ;;  %v2008_v18 = vld [vmem:[#allocation2 + $0x15c] sm:$0x1] }
 0x166   :  { %v994_v19 = vpop.f32.mrb[42].mxu0  ;;  %v2009_v54 = vsel %vm13628_vm3, 0, %v2008_v18  ;;  %v1533_v27 = vmul.f32 %v13948_v31, %v13948_v31 }
 0x167   :  { %v14079_v23 = vadd.f32 %v13862_v17, %v994_v19  ;;  %v996_v2 = vpop.f32.mrb[43].mxu0  ;;  %2010 = vst [vmem:[#allocation2 + $0x15c] sm:$0x1] %v2009_v54  ;;  %v13102_v17 = vld [vmem:[%s19582_s4 + $0x90] sm:$0xff]   ;;  %v1595_v46 = vadd.f32 %v1594_v61, %v1532_v6  ;;  %v1534_v54 = vmul.f32 %v13958_v62, %v13958_v62  ;;  %v1463_v61 = vadd.f32 %v1462_v51, %v13958_v62  ;;  %v2011_v6 = vld [vmem:[#allocation2 + $0x168] sm:$0x1] }
 0x168   :  { %12616 = vmatpush1.bf16.msra.mxu1 %v13102_v17  ;;  %v2012_v8 = vsel %vm13628_vm3, 0, %v2011_v6  ;;  %v1538_v62 = vmul.f32 %v13994_v11, %v13994_v11 }
 0x169   :  { %12601 = vmatprep.subr.bf16.mxu1 %v19723_v58  ;;  %v1596_v18 = vadd.f32 %v1595_v46, %v1533_v27  ;;  %2013 = vst [vmem:[#allocation2 + $0x168] sm:$0x1] %v2012_v8  ;;  %v2121_v27 = vld [vmem:[#allocation2 + $0x170] sm:$0x1] }
 0x16a   :  { %v2122_v51 = vsel %vm13635_vm5, 0, %v2121_v27 }
 0x16b   :  { %v1597_v17 = vadd.f32 %v1596_v18, %v1534_v54  ;;  %v1536_v18 = vmul.f32 %v13976_v34, %v13976_v34  ;;  %2123 = vst [vmem:[#allocation2 + $0x170] sm:$0x1] %v2122_v51 }
 0x16c   :  { %v999_v2 = vpop.f32.mrb[44].mxu0 }
 0x16d   :  { %v14095_v19 = vadd.f32 %v13845_v3, %v999_v2  ;;  %v1001_v42 = vpop.f32.mrb[45].mxu0  ;;  %v1535_v3 = vmul.f32 %v13969_v20, %v13969_v20  ;;  %v1464_v2 = vadd.f32 %v1463_v61, %v13969_v20 }
 0x16e   :  { %v1002_v48 = vpop.f32.mrb[46].mxu0  ;;  %v14116_v42 = vpop.f32.mrb[57].mxu1 }
 0x16f   :  { %v14101_v32 = vadd.f32 %v13857_v13, %v1002_v48  ;;  %v1004_v49 = vpop.f32.mrb[47].mxu0  ;;  %v13103_v13 = vld [vmem:[%s19582_s4 + $0x98] sm:$0xff]   ;;  %v1598_v48 = vadd.f32 %v1597_v17, %v1535_v3  ;;  %v14123_v61 = vpop.f32.mrb[58].mxu1  ;;  %v1465_v27 = vadd.f32 %v1464_v2, %v13976_v34  ;;  %v1537_v3 = vmul.f32 %v13987_v28, %v13987_v28  ;;  %v13104_v34 = vld [vmem:[%s19582_s4 + $0xa0] sm:$0xff]  }
 0x170   :  { %12617 = vmatpush1.bf16.msra.mxu1 %v13103_v13  ;;  %v14125_v8 = vpop.f32.mrb[59].mxu1  ;;  %v2014_v13 = vld [vmem:[#allocation2 + $0x174] sm:$0x1]  ;;  %v2124_v2 = vld [vmem:[#allocation2 + $0x17c] sm:$0x1] }
 0x171   :  { %12602 = vmatprep.subr.bf16.mxu1 %v19723_v58  ;;  %v1466_v51 = vadd.f32 %v1465_v27, %v13987_v28  ;;  %v2017_v28 = vld [vmem:[#allocation2 + $0x180] sm:$0x1] }
 0x174   :  { %v1007_v46 = vpop.f32.mrb[48].mxu0  ;;  %12618 = vmatpush1.bf16.msra.mxu1 %v13104_v34 }
 0x175   :  { %v14121_v54 = vadd.f32 %v13871_v29, %v1007_v46  ;;  %v1009_v49 = vpop.f32.mrb[49].mxu0  ;;  %v1599_v46 = vadd.f32 %v1598_v48, %v1536_v18  ;;  %v2125_v48 = vsel %vm13635_vm5, 0, %v2124_v2  ;;  %v1467_v18 = vadd.f32 %v1466_v51, %v13994_v11  ;;  %12603 = vmatprep.subr.bf16.mxu1 %v19723_v58 }
 0x176   :  { %v1010_v6 = vpop.f32.mrb[50].mxu0  ;;  %v2015_v49 = vsel %vm13628_vm3, 0, %v2014_v13  ;;  %2126 = vst [vmem:[#allocation2 + $0x17c] sm:$0x1] %v2125_v48  ;;  %v1540_v11 = vmul.f32 %v14004_v53, %v14004_v53 }
 0x177   :  { %v14132_v17 = vadd.f32 %v13886_v40, %v1010_v6  ;;  %v1012_v29 = vpop.f32.mrb[51].mxu0  ;;  %v1600_v20 = vadd.f32 %v1599_v46, %v1537_v3  ;;  %2016 = vst [vmem:[#allocation2 + $0x174] sm:$0x1] %v2015_v49  ;;  %v1539_v6 = vmul.f32 %v14001_v44, %v14001_v44  ;;  %v1468_v13 = vadd.f32 %v1467_v18, %v14001_v44 }
 0x178   :  { %v1549_v10 = vmul.f32 %v14121_v54, %v14121_v54 }
 0x179   :  { %v1601_v46 = vadd.f32 %v1600_v20, %v1538_v62  ;;  %v1469_v34 = vadd.f32 %v1468_v13, %v14004_v53  ;;  %v2127_v62 = vld [vmem:[#allocation2 + $0x188] sm:$0x1]  ;;  %v14165_v20 = vpop.f32.mrb[60].mxu1 }
 0x17a   :  { %v2128_v18 = vsel %vm13635_vm5, 0, %v2127_v62  ;;  %v1542_v62 = vmul.f32 %v14024_v41, %v14024_v41 }
 0x17b   :  { %v1602_v51 = vadd.f32 %v1601_v46, %v1539_v6  ;;  %v14169_v6 = vpop.f32.mrb[61].mxu1  ;;  %2129 = vst [vmem:[#allocation2 + $0x188] sm:$0x1] %v2128_v18 }
 0x17c   :  { %v1015_v40 = vpop.f32.mrb[52].mxu0  ;;  %v14175_v13 = vpop.f32.mrb[62].mxu1 }
 0x17d   :  { %v14148_v27 = vadd.f32 %v13869_v24, %v1015_v40  ;;  %v1017_v3 = vpop.f32.mrb[53].mxu0  ;;  %v2018_v24 = vsel %vm13628_vm3, 0, %v2017_v28  ;;  %v1541_v40 = vmul.f32 %v14015_v16, %v14015_v16  ;;  %v1603_v28 = vadd.f32 %v1602_v51, %v1540_v11 }
 0x17e   :  { %v1018_v29 = vpop.f32.mrb[54].mxu0  ;;  %2019 = vst [vmem:[#allocation2 + $0x180] sm:$0x1] %v2018_v24  ;;  %v1470_v3 = vadd.f32 %v1469_v34, %v14015_v16  ;;  %v14177_v24 = vpop.f32.mrb[63].mxu1  ;;  %v1543_v34 = vmul.f32 %v14043_v36, %v14043_v36 }
 0x17f   :  { %v14153_v49 = vadd.f32 %v13881_v35, %v1018_v29  ;;  %v1020_v2 = vpop.f32.mrb[55].mxu0  ;;  %v13105_v35 = vld [vmem:[%s19582_s4 + $0xa8] sm:$0xff]   ;;  %v1604_v53 = vadd.f32 %v1603_v28, %v1541_v40  ;;  %v2130_v40 = vld [vmem:[#allocation2 + $0x194] sm:$0x1] }
 0x180   :  { %12619 = vmatpush1.bf16.msra.mxu1 %v13105_v35  ;;  %v2020_v35 = vld [vmem:[#allocation2 + $0x18c] sm:$0x1] }
 0x181   :  { %12604 = vmatprep.subr.bf16.mxu1 %v19723_v58  ;;  %v1605_v18 = vadd.f32 %v1604_v53, %v1542_v62 }
 0x184   :  { %v1023_v48 = vpop.f32.mrb[56].mxu0 }
 0x185   :  { %v14173_v29 = vadd.f32 %v13895_v52, %v1023_v48  ;;  %v1025_v46 = vpop.f32.mrb[57].mxu0  ;;  %v1471_v52 = vadd.f32 %v1470_v3, %v14024_v41  ;;  %v2021_v48 = vsel %vm13628_vm3, 0, %v2020_v35  ;;  %v2131_v3 = vsel %vm13635_vm5, 0, %v2130_v40 }
 0x186   :  { %v1026_v2 = vpop.f32.mrb[58].mxu0  ;;  %2022 = vst [vmem:[#allocation2 + $0x18c] sm:$0x1] %v2021_v48  ;;  %2132 = vst [vmem:[#allocation2 + $0x194] sm:$0x1] %v2131_v3  ;;  %v1545_v35 = vmul.f32 %v14070_v1, %v14070_v1  ;;  %v1546_v3 = vmul.f32 %v14079_v23, %v14079_v23 }
 0x187   :  { %v14183_v11 = vadd.f32 %v13910_v0, %v1026_v2  ;;  %v1028_v51 = vpop.f32.mrb[59].mxu0  ;;  %v1472_v46 = vadd.f32 %v1471_v52, %v14043_v36  ;;  %v13106_v0 = vld [vmem:[%s19582_s4 + $0xb0] sm:$0xff]   ;;  %v1606_v2 = vadd.f32 %v1605_v18, %v1543_v34 }
 0x188   :  { %v1544_v51 = vmul.f32 %v14050_v63, %v14050_v63  ;;  %12620 = vmatpush1.bf16.msra.mxu1 %v13106_v0 }
 0x189   :  { %12605 = vmatprep.subr.bf16.mxu1 %v19723_v58  ;;  %v1473_v52 = vadd.f32 %v1472_v46, %v14050_v63 }
 0x18a   :  { %v1607_v18 = vadd.f32 %v1606_v2, %v1544_v51 }
 0x18b   :  { %v1474_v40 = vadd.f32 %v1473_v52, %v14070_v1 }
 0x18c   :  { %v1031_v28 = vpop.f32.mrb[60].mxu0  ;;  %v1608_v0 = vadd.f32 %v1607_v18, %v1545_v35 }
 0x18d   :  { %v14199_v41 = vadd.f32 %v13893_v47, %v1031_v28  ;;  %v1033_v53 = vpop.f32.mrb[61].mxu0  ;;  %v2023_v47 = vld [vmem:[#allocation2 + $0x198] sm:$0x1] }
 0x18e   :  { %v1034_v62 = vpop.f32.mrb[62].mxu0  ;;  %v2024_v28 = vsel %vm13628_vm3, 0, %v2023_v47  ;;  %v1475_v53 = vadd.f32 %v1474_v40, %v14079_v23  ;;  %v1609_v52 = vadd.f32 %v1608_v0, %v1546_v3 }
 0x18f   :  { %v14206_v48 = vadd.f32 %v13905_v59, %v1034_v62  ;;  %v1036_v34 = vpop.f32.mrb[63].mxu0  ;;  %2025 = vst [vmem:[#allocation2 + $0x198] sm:$0x1] %v2024_v28  ;;  %v1547_v59 = vmul.f32 %v14095_v19, %v14095_v19  ;;  %v1548_v28 = vmul.f32 %v14101_v32, %v14101_v32 }
 0x190   :  { %v1476_v34 = vadd.f32 %v1475_v53, %v14095_v19 }
 0x191   :  { %v1610_v47 = vadd.f32 %v1609_v52, %v1547_v59  ;;  %v1550_v59 = vmul.f32 %v14132_v17, %v14132_v17 }
 0x192   :  { %v1477_v40 = vadd.f32 %v1476_v34, %v14101_v32 }
 0x194   :  { %v1039_v46 = vpop.f32.mrb[64].mxu0 }
 0x195   :  { %v14217_v62 = vadd.f32 %v13919_v14, %v1039_v46  ;;  %v1041_v2 = vpop.f32.mrb[65].mxu0  ;;  %v1611_v46 = vadd.f32 %v1610_v47, %v1548_v28 }
 0x196   :  { %v1042_v51 = vpop.f32.mrb[66].mxu0  ;;  %v1478_v2 = vadd.f32 %v1477_v40, %v14121_v54 }
 0x197   :  { %v14221_v35 = vadd.f32 %v13934_v30, %v1042_v51  ;;  %v1044_v18 = vpop.f32.mrb[67].mxu0  ;;  %v1612_v53 = vadd.f32 %v1611_v46, %v1549_v10  ;;  %v1552_v10 = vmul.f32 %v14153_v49, %v14153_v49 }
 0x198   :  { %v1479_v34 = vadd.f32 %v1478_v2, %v14132_v17  ;;  %v1551_v18 = vmul.f32 %v14148_v27, %v14148_v27  ;;  %v1553_v2 = vmul.f32 %v14173_v29, %v14173_v29 }
 0x199   :  { %v1613_v47 = vadd.f32 %v1612_v53, %v1550_v59 }
 0x19a   :  { %v1480_v28 = vadd.f32 %v1479_v34, %v14148_v27 }
 0x19b   :  { %v1614_v40 = vadd.f32 %v1613_v47, %v1551_v18  ;;  %v1554_v18 = vmul.f32 %v14183_v11, %v14183_v11 }
 0x19c   :  { %v1047_v14 = vpop.f32.mrb[68].mxu0 }
 0x19d   :  { %v14230_v0 = vadd.f32 %v13917_v7, %v1047_v14  ;;  %v1049_v3 = vpop.f32.mrb[69].mxu0  ;;  %v1615_v59 = vadd.f32 %v1614_v40, %v1552_v10 }
 0x19e   :  { %v1050_v30 = vpop.f32.mrb[70].mxu0  ;;  %v1481_v3 = vadd.f32 %v1480_v28, %v14153_v49  ;;  %v1555_v28 = vmul.f32 %v14199_v41, %v14199_v41 }
 0x19f   :  { %v14235_v51 = vadd.f32 %v13929_v22, %v1050_v30  ;;  %v1052_v52 = vpop.f32.mrb[71].mxu0  ;;  %v1616_v34 = vadd.f32 %v1615_v59, %v1553_v2 }
 0x1a0   :  { %v1482_v52 = vadd.f32 %v1481_v3, %v14173_v29 }
 0x1a2   :  { %v1483_v47 = vadd.f32 %v1482_v52, %v14183_v11  ;;  %v1557_v52 = vmul.f32 %v14217_v62, %v14217_v62 }
 0x1a4   :  { %v1055_v7 = vpop.f32.mrb[72].mxu0  ;;  %v1484_v40 = vadd.f32 %v1483_v47, %v14199_v41 }
 0x1a5   :  { %v14244_v14 = vadd.f32 %v13943_v45, %v1055_v7  ;;  %v1057_v46 = vpop.f32.mrb[73].mxu0 }
 0x1a6   :  { %v1058_v22 = vpop.f32.mrb[74].mxu0  ;;  %v1485_v59 = vadd.f32 %v1484_v40, %v14206_v48 }
 0x1a7   :  { %v14250_v30 = vadd.f32 %v13955_v60, %v1058_v22  ;;  %v1060_v53 = vpop.f32.mrb[75].mxu0  ;;  %v1617_v22 = vadd.f32 %v1616_v34, %v1554_v18 }
 0x1a8   :  { %v1556_v53 = vmul.f32 %v14206_v48, %v14206_v48 }
 0x1a9   :  { %v1618_v2 = vadd.f32 %v1617_v22, %v1555_v28  ;;  %v1558_v28 = vmul.f32 %v14221_v35, %v14221_v35 }
 0x1ac   :  { %v1063_v45 = vpop.f32.mrb[76].mxu0 }
 0x1ad   :  { %v14259_v7 = vadd.f32 %v13941_v39, %v1063_v45  ;;  %v1065_v46 = vpop.f32.mrb[77].mxu0  ;;  %v1619_v45 = vadd.f32 %v1618_v2, %v1556_v53 }
 0x1ae   :  { %v1066_v60 = vpop.f32.mrb[78].mxu0  ;;  %v1486_v46 = vadd.f32 %v1485_v59, %v14217_v62 }
 0x1af   :  { %v14263_v10 = vadd.f32 %v13953_v55, %v1066_v60  ;;  %v1068_v3 = vpop.f32.mrb[79].mxu0  ;;  %v1620_v47 = vadd.f32 %v1619_v45, %v1557_v52  ;;  %v1560_v52 = vmul.f32 %v14235_v51, %v14235_v51 }
 0x1b0   :  { %v1487_v40 = vadd.f32 %v1486_v46, %v14221_v35  ;;  %v1559_v3 = vmul.f32 %v14230_v0, %v14230_v0  ;;  %v1561_v46 = vmul.f32 %v14244_v14, %v14244_v14 }
 0x1b1   :  { %v1621_v2 = vadd.f32 %v1620_v47, %v1558_v28 }
 0x1b2   :  { %v1488_v53 = vadd.f32 %v1487_v40, %v14230_v0 }
 0x1b3   :  { %v1622_v59 = vadd.f32 %v1621_v2, %v1559_v3  ;;  %v1562_v2 = vmul.f32 %v14250_v30, %v14250_v30 }
 0x1b4   :  { %v1071_v39 = vpop.f32.mrb[80].mxu0 }
 0x1b5   :  { %v14272_v34 = vadd.f32 %v13964_v15, %v1071_v39  ;;  %v1073_v18 = vpop.f32.mrb[81].mxu0  ;;  %v1623_v40 = vadd.f32 %v1622_v59, %v1560_v52 }
 0x1b6   :  { %v1074_v55 = vpop.f32.mrb[82].mxu0  ;;  %v2133_v18 = vld [vmem:[#allocation2 + $0x1a0] sm:$0x1] }
 0x1b7   :  { %v14277_v60 = vadd.f32 %v13973_v26, %v1074_v55  ;;  %v1076_v22 = vpop.f32.mrb[83].mxu0  ;;  %v1489_v55 = vadd.f32 %v1488_v53, %v14235_v51  ;;  %v1624_v3 = vadd.f32 %v1623_v40, %v1561_v46 }
 0x1b8   :  { %v2134_v22 = vsel %vm13635_vm5, 0, %v2133_v18 }
 0x1b9   :  { %2135 = vst [vmem:[#allocation2 + $0x1a0] sm:$0x1] %v2134_v22  ;;  %v1625_v18 = vadd.f32 %v1624_v3, %v1562_v2  ;;  %v1564_v22 = vmul.f32 %v14263_v10, %v14263_v10 }
 0x1bc   :  { %v1079_v15 = vpop.f32.mrb[84].mxu0 }
 0x1bd   :  { %v14286_v39 = vadd.f32 %v13962_v5, %v1079_v15  ;;  %v1081_v45 = vpop.f32.mrb[85].mxu0  ;;  %v1490_v5 = vadd.f32 %v1489_v55, %v14244_v14 }
 0x1be   :  { %v1082_v26 = vpop.f32.mrb[86].mxu0  ;;  %v1563_v45 = vmul.f32 %v14259_v7, %v14259_v7 }
 0x1bf   :  { %v14292_v47 = vadd.f32 %v13971_v25, %v1082_v26  ;;  %v1084_v28 = vpop.f32.mrb[87].mxu0  ;;  %v1491_v53 = vadd.f32 %v1490_v5, %v14250_v30  ;;  %v1565_v5 = vmul.f32 %v14272_v34, %v14272_v34 }
 0x1c0   :  { %v1626_v46 = vadd.f32 %v1625_v18, %v1563_v45  ;;  %v1566_v45 = vmul.f32 %v14277_v60, %v14277_v60 }
 0x1c1   :  { %19725 = vst [vmem:[#allocation27_spill] sm:$0xff] %v14292_v47  ;;  %v1492_v59 = vadd.f32 %v1491_v53, %v14259_v7 }
 0x1c3   :  { %v1493_v40 = vadd.f32 %v1492_v59, %v14263_v10 }
 0x1c4   :  { %v1087_v15 = vpop.f32.mrb[88].mxu0 }
 0x1c5   :  { %v14303_v25 = vadd.f32 %v13984_v57, %v1087_v15  ;;  %v1089_v26 = vpop.f32.mrb[89].mxu0  ;;  %v1627_v15 = vadd.f32 %v1626_v46, %v1564_v22 }
 0x1c6   :  { %v1090_v28 = vpop.f32.mrb[90].mxu0  ;;  %v1494_v26 = vadd.f32 %v1493_v40, %v14272_v34 }
 0x1c7   :  { %v14307_v52 = vadd.f32 %v13991_v9, %v1090_v28  ;;  %v1092_v55 = vpop.f32.mrb[91].mxu0  ;;  %v1628_v53 = vadd.f32 %v1627_v15, %v1565_v5  ;;  %v1568_v5 = vmul.f32 %v14292_v47, %v14292_v47 }
 0x1c8   :  { %v1495_v59 = vadd.f32 %v1494_v26, %v14277_v60  ;;  %v1567_v55 = vmul.f32 %v14286_v39, %v14286_v39  ;;  %v1569_v26 = vmul.f32 %v14303_v25, %v14303_v25 }
 0x1c9   :  { %v1629_v46 = vadd.f32 %v1628_v53, %v1566_v45 }
 0x1ca   :  { %v1496_v22 = vadd.f32 %v1495_v59, %v14286_v39 }
 0x1cb   :  { %v1630_v40 = vadd.f32 %v1629_v46, %v1567_v55  ;;  %v1570_v46 = vmul.f32 %v14307_v52, %v14307_v52 }
 0x1cc   :  { %v1095_v57 = vpop.f32.mrb[92].mxu0 }
 0x1cd   :  { %v14316_v3 = vadd.f32 %v13980_v50, %v1095_v57  ;;  %v1097_v2 = vpop.f32.mrb[93].mxu0  ;;  %v1631_v45 = vadd.f32 %v1630_v40, %v1568_v5  ;;  %v19729_v5 = vld [vmem:[#allocation23_spill] sm:$0xff] }
 0x1ce   :  { %v1098_v9 = vpop.f32.mrb[94].mxu0  ;;  %v1497_v2 = vadd.f32 %v1496_v22, %v14292_v47 }
 0x1cf   :  { %v14321_v28 = vadd.f32 %v13989_v4, %v1098_v9  ;;  %v1100_v18 = vpop.f32.mrb[95].mxu0  ;;  %v19727_v9 = vld [vmem:[#allocation24_spill] sm:$0xff]  ;;  %v1632_v55 = vadd.f32 %v1631_v45, %v1569_v26  ;;  %v1571_v22 = vmul.f32 %v14316_v3, %v14316_v3 }
 0x1d0   :  { %v1498_v59 = vadd.f32 %v1497_v2, %v14303_v25 }
 0x1d4   :  { %v1103_v50 = vpop.f32.mrb[96].mxu0 }
 0x1d5   :  { %v14330_v57 = vadd.f32 %v14012_v37, %v1103_v50  ;;  %v1105_v15 = vpop.f32.mrb[97].mxu0  ;;  %v1499_v50 = vadd.f32 %v1498_v59, %v14307_v52  ;;  %v1572_v59 = vmul.f32 %v14321_v28, %v14321_v28 }
 0x1d6   :  { %v1106_v4 = vpop.f32.mrb[98].mxu0  ;;  %v19728_v15 = vld [vmem:[#allocation22_spill] sm:$0xff] }
 0x1d7   :  { %19726 = vst [vmem:[#allocation28_spill] sm:$0xff] %v14330_v57  ;;  %v14336_v18 = vadd.f32 %v19727_v9, %v1106_v4  ;;  %v1108_v53 = vpop.f32.mrb[99].mxu0  ;;  %v1633_v9 = vadd.f32 %v1632_v55, %v1570_v46  ;;  %v1500_v40 = vadd.f32 %v1499_v50, %v14316_v3 }
 0x1d8   :  { %v13107_v53 = vld [vmem:[%s19582_s4 + $0xb8] sm:$0xff]  }
 0x1d9   :  { %v1634_v45 = vadd.f32 %v1633_v9, %v1571_v22  ;;  %12621 = vmatpush1.bf16.msra.mxu1 %v13107_v53 }
 0x1da   :  { %12606 = vmatprep.subr.bf16.mxu1 %v19723_v58 }
 0x1db   :  { %v1635_v46 = vadd.f32 %v1634_v45, %v1572_v59 }
 0x1dc   :  { %v1111_v37 = vpop.f32.mrb[100].mxu0 }
 0x1dd   :  { %v14345_v12 = vadd.f32 %v19728_v15, %v1111_v37  ;;  %v1113_v47 = vpop.f32.mrb[101].mxu0  ;;  %v1501_v37 = vadd.f32 %v1500_v40, %v14321_v28 }
 0x1de   :  { %v1114_v4 = vpop.f32.mrb[102].mxu0  ;;  %v1573_v47 = vmul.f32 %v14330_v57, %v14330_v57 }
 0x1df   :  { %v14349_v2 = vadd.f32 %v19729_v5, %v1114_v4  ;;  %v1116_v26 = vpop.f32.mrb[103].mxu0  ;;  %v1502_v50 = vadd.f32 %v1501_v37, %v14330_v57  ;;  %v1574_v5 = vmul.f32 %v14336_v18, %v14336_v18  ;;  %v1575_v45 = vmul.f32 %v14345_v12, %v14345_v12 }
 0x1e0   :  { %v1636_v9 = vadd.f32 %v1635_v46, %v1573_v47  ;;  %v19731_v46 = vld [vmem:[#allocation26_spill] sm:$0xff] }
 0x1e1   :  { %19730 = vst [vmem:[#allocation24_spill] sm:$0xff] %v14349_v2  ;;  %v1503_v53 = vadd.f32 %v1502_v50, %v14336_v18  ;;  %v1576_v47 = vmul.f32 %v14349_v2, %v14349_v2 }
 0x1e2   :  { %v1637_v59 = vadd.f32 %v1636_v9, %v1574_v5 }
 0x1e3   :  { %v1504_v37 = vadd.f32 %v1503_v53, %v14345_v12 }
 0x1e4   :  { %v1119_v55 = vpop.f32.mrb[104].mxu0 }
 0x1e5   :  { %v14362_v15 = vadd.f32 %v14064_v43, %v1119_v55  ;;  %v1121_v4 = vpop.f32.mrb[105].mxu0  ;;  %v1638_v55 = vadd.f32 %v1637_v59, %v1575_v45 }
 0x1e6   :  { %v1122_v22 = vpop.f32.mrb[106].mxu0 }
 0x1e7   :  { %v14367_v40 = vadd.f32 %v14074_v21, %v1122_v22  ;;  %v1124_v26 = vpop.f32.mrb[107].mxu0  ;;  %v1505_v22 = vadd.f32 %v1504_v37, %v14349_v2  ;;  %v1577_v50 = vmul.f32 %v14362_v15, %v14362_v15  ;;  %v1639_v5 = vadd.f32 %v1638_v55, %v1576_v47 }
 0x1e9   :  { %v1506_v53 = vadd.f32 %v1505_v22, %v14362_v15  ;;  %v1640_v45 = vadd.f32 %v1639_v5, %v1577_v50  ;;  %v1578_v59 = vmul.f32 %v14367_v40, %v14367_v40 }
 0x1ec   :  { %v1127_v43 = vpop.f32.mrb[108].mxu0 }
 0x1ed   :  { %v14376_v4 = vadd.f32 %v19731_v46, %v1127_v43  ;;  %v1129_v57 = vpop.f32.mrb[109].mxu0 }
 0x1ee   :  { %v1130_v21 = vpop.f32.mrb[110].mxu0  ;;  %v1507_v57 = vadd.f32 %v1506_v53, %v14367_v40 }
 0x1ef   :  { %19732 = vst [vmem:[#allocation22_spill] sm:$0xff] %v14376_v4  ;;  %v14382_v26 = vadd.f32 %v14072_v56, %v1130_v21  ;;  %v1132_v9 = vpop.f32.mrb[111].mxu0  ;;  %v1579_v37 = vmul.f32 %v14376_v4, %v14376_v4  ;;  %v1641_v21 = vadd.f32 %v1640_v45, %v1578_v59 }
 0x1f0   :  { %v1508_v55 = vadd.f32 %v1507_v57, %v14376_v4 }
 0x1f1   :  { %19733 = vst [vmem:[#allocation23_spill] sm:$0xff] %v14382_v26  ;;  %v1642_v50 = vadd.f32 %v1641_v21, %v1579_v37  ;;  %v1580_v9 = vmul.f32 %v14382_v26, %v14382_v26 }
 0x1f2   :  { %v1509_v5 = vadd.f32 %v1508_v55, %v14382_v26 }
 0x1f4   :  { %v1135_v43 = vpop.f32.mrb[112].mxu0 }
 0x1f5   :  { %v14391_v46 = vadd.f32 %v14116_v42, %v1135_v43  ;;  %v1137_v2 = vpop.f32.mrb[113].mxu0  ;;  %v1643_v43 = vadd.f32 %v1642_v50, %v1580_v9 }
 0x1f6   :  { %v1138_v56 = vpop.f32.mrb[114].mxu0 }
 0x1f7   :  { %19734 = vst [vmem:[#allocation26_spill] sm:$0xff] %v14391_v46  ;;  %v14395_v47 = vadd.f32 %v14125_v8, %v1138_v56  ;;  %v1140_v22 = vpop.f32.mrb[115].mxu0  ;;  %v1581_v53 = vmul.f32 %v14391_v46, %v14391_v46  ;;  %v1510_v2 = vadd.f32 %v1509_v5, %v14391_v46 }
 0x1f9   :  { %19735 = vst [vmem:[#allocation29_spill] sm:$0xff] %v14395_v47  ;;  %v1644_v57 = vadd.f32 %v1643_v43, %v1581_v53  ;;  %v1582_v37 = vmul.f32 %v14395_v47, %v14395_v47  ;;  %v1511_v55 = vadd.f32 %v1510_v2, %v14395_v47 }
 0x1fb   :  { %v1645_v50 = vadd.f32 %v1644_v57, %v1582_v37 }
 0x1fc   :  { %v1143_v42 = vpop.f32.mrb[116].mxu0 }
 0x1fd   :  { %v14404_v45 = vadd.f32 %v14112_v38, %v1143_v42  ;;  %v1145_v59 = vpop.f32.mrb[117].mxu0 }
 0x1fe   :  { %v1146_v8 = vpop.f32.mrb[118].mxu0 }
 0x1ff   :  { %19736 = vst [vmem:[#allocation30_spill] sm:$0xff] %v14404_v45  ;;  %v14409_v56 = vadd.f32 %v14123_v61, %v1146_v8  ;;  %v1148_v21 = vpop.f32.mrb[119].mxu0  ;;  %v1583_v22 = vmul.f32 %v14404_v45, %v14404_v45  ;;  %v1512_v9 = vadd.f32 %v1511_v55, %v14404_v45 }
 0x201   :  { %19737 = vst [vmem:[#allocation31_spill] sm:$0xff] %v14409_v56  ;;  %v1646_v5 = vadd.f32 %v1645_v50, %v1583_v22  ;;  %v1584_v53 = vmul.f32 %v14409_v56, %v14409_v56  ;;  %v1513_v59 = vadd.f32 %v1512_v9, %v14409_v56 }
 0x203   :  { %v1647_v37 = vadd.f32 %v1646_v5, %v1584_v53 }
 0x204   :  { %v1151_v38 = vpop.f32.mrb[120].mxu0 }
 0x205   :  { %v14418_v42 = vadd.f32 %v14169_v6, %v1151_v38  ;;  %v1153_v43 = vpop.f32.mrb[121].mxu0 }
 0x206   :  { %v1154_v61 = vpop.f32.mrb[122].mxu0 }
 0x207   :  { %19738 = vst [vmem:[#allocation32_spill] sm:$0xff] %v14418_v42  ;;  %v1585_v2 = vmul.f32 %v14418_v42, %v14418_v42  ;;  %v14424_v8 = vadd.f32 %v14177_v24, %v1154_v61  ;;  %v1156_v57 = vpop.f32.mrb[123].mxu0  ;;  %v1514_v21 = vadd.f32 %v1513_v59, %v14418_v42 }
 0x209   :  { %19739 = vst [vmem:[#allocation33_spill] sm:$0xff] %v14424_v8  ;;  %v1648_v55 = vadd.f32 %v1647_v37, %v1585_v2  ;;  %v1586_v22 = vmul.f32 %v14424_v8, %v14424_v8  ;;  %v1515_v50 = vadd.f32 %v1514_v21, %v14424_v8 }
 0x20b   :  { %v1649_v56 = vadd.f32 %v1648_v55, %v1586_v22 }
 0x20c   :  { %v1159_v6 = vpop.f32.mrb[124].mxu0 }
 0x20d   :  { %v1449_v38 = vadd.f32 %v14165_v20, %v1159_v6  ;;  %v1161_v9 = vpop.f32.mrb[125].mxu0 }
 0x20e   :  { %v1162_v43 = vpop.f32.mrb[126].mxu0 }
 0x20f   :  { %v1516_v45 = vadd.f32 %v1515_v50, %v1449_v38  ;;  %v1587_v47 = vmul.f32 %v1449_v38, %v1449_v38  ;;  %v1452_v24 = vadd.f32 %v14175_v13, %v1162_v43  ;;  %v1164_v61 = vpop.f32.mrb[127].mxu0 }
 0x210   :  { %v13108_v61 = vld [vmem:[%s19582_s4] sm:$0xff]  }
 0x211   :  { %v1650_v5 = vadd.f32 %v1649_v56, %v1587_v47  ;;  %v1517_v53 = vadd.f32 %v1516_v45, %v1452_v24  ;;  %v1588_v59 = vmul.f32 %v1452_v24, %v1452_v24  ;;  %v1670_v56 = vlaneseq  ;;  %9704 = vmatpush1.bf16.msra.mxu0 %v13108_v61  ;;  %v19746_v61 = vld [vmem:[#allocation14_spill] sm:$0xff] }
 0x212   :  { %9705 = vmatprep.subr.bf16.mxu0 %v19723_v58 }
 0x213   :  { %v1518_v2 = vrot.slane %v1517_v53, 4  ;;  %v1651_v57 = vadd.f32 %v1650_v5, %v1588_v59  ;;  %v1666_v59 = vld [vmem:[%s19581_s3] sm:$0x1] }
 0x215   :  { %v1519_v37 = vadd.f32 %v1518_v2, %v1517_v53  ;;  %v1652_v42 = vrot.slane %v1651_v57, 4  ;;  %v13111_v53 = vld [vmem:[%s19582_s4 + $0x10] sm:$0xff]  }
 0x217   :  { %v1520_v46 = vrot.slane %v1519_v37, 2  ;;  %v1653_v26 = vadd.f32 %v1652_v42, %v1651_v57  ;;  %v1671_v42 = vshrl.u32 %v1670_v56, 7 }
 0x219   :  { %v1521_v21 = vadd.f32 %v1520_v46, %v1519_v37  ;;  %v1654_v8 = vrot.slane %v1653_v26, 2  ;;  %v14442_v46 = vsub.s32 0, %v1671_v42 }
 0x21b   :  { %v1522_v20 = vrot.slane %v1521_v21, 1  ;;  %v1655_v6 = vadd.f32 %v1654_v8, %v1653_v26  ;;  %v13110_v26 = vld [vmem:[%s19582_s4 + $0x8] sm:$0xff]   ;;  %19740 = vst [vmem:[#allocation34_spill] sm:$0xff] %v14442_v46 }
 0x21c   :  { %9706 = vmatpush1.bf16.msra.mxu0 %v13110_v26 }
 0x21d   :  { %v1523_v9 = vadd.f32 %v1522_v20, %v1521_v21  ;;  %v1656_v55 = vrot.slane %v1655_v6, 1  ;;  %9707 = vmatprep.subr.bf16.mxu0 %v19723_v58 }
 0x21f   :  { %v1524_v22 = vmul.f32 0.001953125, %v1523_v9  ;;  %v1657_v50 = vadd.f32 %v1656_v55, %v1655_v6  ;;  %v19741_v6 = vld [vmem:[#allocation9_spill] sm:$0xff]  ;;  %v13113_v55 = vld [vmem:[%s19582_s4 + $0x18] sm:$0xff]  }
 0x220   :  { %9708 = vmatpush1.bf16.msra.mxu0 %v13111_v53  ;;  %v19748_v53 = vld [vmem:[#allocation16_spill] sm:$0xff] }
 0x221   :  { %v1658_v4 = vmul.f32 0.001953125, %v1657_v50  ;;  %v1659_v13 = vmul.f32 %v1524_v22, %v1524_v22  ;;  %9709 = vmatprep.subr.bf16.mxu0 %v19723_v58 }
 0x223   :  { %v1660_v43 = vsub.f32 %v1658_v4, %v1659_v13  ;;  %v1662_v4 = vld [vmem:[%s19580_s2] sm:$0x1]  ;;  %v19743_v13 = vld [vmem:[#allocation11_spill] sm:$0xff] }
 0x224   :  { %9710 = vmatpush1.bf16.msra.mxu0 %v13113_v55 }
 0x225   :  { %v1661_v47 = vmax.f32 %v1660_v43, 0.0  ;;  %9711 = vmatprep.subr.bf16.mxu0 %v19723_v58 }
 0x227   :  { %v1663_v45 = vadd.f32 1e-05, %v1661_v47  ;;  %v19744_v47 = vld [vmem:[#allocation12_spill] sm:$0xff] }
 0x229   :  { %13268 = vrsqrt.f32 %v1663_v45 }
 0x233   :  { %v13269_v8 = vpop.eup %13268 }
 0x234   :  { %v1665_v5 = vmul.f32 %v13269_v8, %v1662_v4  ;;  %v19747_v4 = vld [vmem:[#allocation15_spill] sm:$0xff] }
 0x236   :  { %v1667_v2 = vmul.f32 %v1665_v5, %v1524_v22  ;;  %v14452_v57 = vrot.slane %v1665_v5, %v14442_v46  ;;  %v19742_v22 = vld [vmem:[#allocation10_spill] sm:$0xff] }
 0x238   :  { %v1668_v37 = vsub.f32 %v1666_v59, %v1667_v2  ;;  %v1737_v21 = vmul.f32 %v14452_v57, %v1449_v38  ;;  %v1738_v20 = vmul.f32 %v14452_v57, %v1452_v24  ;;  %v14459_v9 = vmul.f32 %v14452_v57, %v19741_v6  ;;  %v19745_v24 = vld [vmem:[#allocation13_spill] sm:$0xff]  ;;  %v19750_v6 = vld [vmem:[#allocation18_spill] sm:$0xff] }
 0x239   :  { %v14466_v50 = vmul.f32 %v14452_v57, %v19742_v22  ;;  %v14470_v43 = vmul.f32 %v14452_v57, %v19743_v13  ;;  %v14474_v38 = vmul.f32 %v14452_v57, %v19744_v47  ;;  %v14478_v45 = vmul.f32 %v14452_v57, %v19745_v24  ;;  %v19749_v2 = vld [vmem:[#allocation17_spill] sm:$0xff]  ;;  %v19752_v47 = vld [vmem:[#allocation20_spill] sm:$0xff] }
 0x23a   :  { %v14481_v56 = vrot.slane %v1668_v37, %v14442_v46  ;;  %v14485_v42 = vmul.f32 %v14452_v57, %v19746_v61  ;;  %v14489_v26 = vmul.f32 %v14452_v57, %v13924_v33  ;;  %v14493_v8 = vmul.f32 %v14452_v57, %v19747_v4  ;;  %v13114_v61 = vld [vmem:[%s19582_s4 + $0x20] sm:$0xff]  }
 0x23b   :  { %v14497_v5 = vmul.f32 %v14452_v57, %v13948_v31  ;;  %v14501_v59 = vmul.f32 %v14452_v57, %v19748_v53  ;;  %v14505_v37 = vmul.f32 %v14452_v57, %v19749_v2  ;;  %v14509_v33 = vmul.f32 %v14452_v57, %v19750_v6  ;;  %v19751_v31 = vld [vmem:[#allocation19_spill] sm:$0xff]  ;;  %v19753_v53 = vld [vmem:[#allocation21_spill] sm:$0xff]  ;;  %9712 = vmatpush1.bf16.msra.mxu0 %v13114_v61 }
 0x23c   :  { %v1807_v55 = vadd.f32 %v14481_v56, %v1737_v21  ;;  %v1808_v22 = vadd.f32 %v14481_v56, %v1738_v20  ;;  %v14516_v13 = vmul.f32 %v14452_v57, %v19751_v31  ;;  %v14520_v24 = vmul.f32 %v14452_v57, %v19752_v47  ;;  %v19754_v2 = vld [vmem:[#allocation25_spill] sm:$0xff]  ;;  %9713 = vmatprep.subr.bf16.mxu0 %v19723_v58 }
 0x23d   :  { %v14527_v4 = vmul.f32 %v14452_v57, %v14001_v44  ;;  %v14531_v21 = vmul.f32 %v14452_v57, %v19753_v53  ;;  %v14535_v20 = vmul.f32 %v14452_v57, %v14015_v16  ;;  %v14539_v6 = vmul.f32 %v14452_v57, %v19754_v2 }
 0x23e   :  { %v1871_v31 = vmax.f32 %v1807_v55, 0.0  ;;  %v1872_v47 = vmax.f32 %v1808_v22, 0.0  ;;  %v14543_v46 = vmul.f32 %v14452_v57, %v14043_v36  ;;  %v14547_v44 = vmul.f32 %v14452_v57, %v14050_v63 }
 0x23f   :  { %v14551_v53 = vmul.f32 %v14452_v57, %v14070_v1  ;;  %v14555_v16 = vmul.f32 %v14452_v57, %v14079_v23  ;;  %v14559_v55 = vmul.f32 %v14452_v57, %v14095_v19  ;;  %v14563_v36 = vmul.f32 %v14452_v57, %v14101_v32  ;;  %v13116_v19 = vld [vmem:[%s19582_s4 + $0x28] sm:$0xff]  }
 0x240   :  { %v14566_v63 = vpack.c.bf16 %v1871_v31, %v1871_v31  ;;  %v12375_v22 = vpack.c.bf16 %v1872_v47, %v1872_v47  ;;  %v14570_v1 = vmul.f32 %v14452_v57, %v14121_v54  ;;  %v14574_v23 = vmul.f32 %v14452_v57, %v14132_v17  ;;  %9714 = vmatpush1.bf16.msra.mxu0 %v13116_v19 }
 0x241   :  { %v14581_v32 = vmul.f32 %v14452_v57, %v14148_v27  ;;  %v14585_v61 = vmul.f32 %v14452_v57, %v14153_v49  ;;  %v14589_v54 = vmul.f32 %v14452_v57, %v14173_v29  ;;  %v14593_v17 = vmul.f32 %v14452_v57, %v14183_v11  ;;  %9715 = vmatprep.subr.bf16.mxu0 %v19723_v58 }
 0x242   :  { %v2829_v2 = vshrl.u32 %v14566_v63, 16  ;;  %v2837_v31 = vshrl.u32 %v12375_v22, 16  ;;  %v2840_v47 = vshll.u32 %v12375_v22, 16  ;;  %v14598_v27 = vmul.f32 %v14452_v57, %v14199_v41 }
 0x243   :  { %v14602_v49 = vmul.f32 %v14452_v57, %v14206_v48  ;;  %v14606_v29 = vmul.f32 %v14452_v57, %v14217_v62  ;;  %v14610_v11 = vmul.f32 %v14452_v57, %v14221_v35  ;;  %v14614_v22 = vmul.f32 %v14452_v57, %v14230_v0  ;;  %v13117_v35 = vld [vmem:[%s19582_s4 + $0x30] sm:$0xff]  }
 0x244   :  { %v14617_v41 = vrot.slane %v2829_v2, 7  ;;  %v2839_v19 = vrot.slane %v2837_v31, 7  ;;  %v14621_v48 = vmul.f32 %v14452_v57, %v14235_v51  ;;  %v14625_v62 = vmul.f32 %v14452_v57, %v14244_v14  ;;  %v3165_v2 = vld [vmem:[#allocation2 + $0x1a0] sm:$0x1]  ;;  %9716 = vmatpush1.bf16.msra.mxu0 %v13117_v35 }
 0x245   :  { %19755 = vst [vmem:[#allocation9_spill] sm:$0xff] %v14610_v11  ;;  %19756 = vst [vmem:[#allocation10_spill] sm:$0xff] %v14614_v22  ;;  %v19760_v0 = vmov 0  ;;  %v14638_v31 = vmul.f32 %v14452_v57, %v14250_v30  ;;  %v14642_v51 = vmul.f32 %v14452_v57, %v14259_v7  ;;  %v14646_v14 = vmul.f32 %v14452_v57, %v14263_v10  ;;  %9717 = vmatprep.subr.bf16.mxu0 %v19723_v58 }
 0x246   :  { %19757 = vst [vmem:[#allocation11_spill] sm:$0xff] %v14617_v41  ;;  %19758 = vst [vmem:[#allocation12_spill] sm:$0xff] %v14621_v48  ;;  %v19761_v0 = vsel %vm14632_vm7, 4294967295, %v19760_v0  ;;  %v2835_v48 = vrot.slane %v14617_v41, 4  ;;  %v2842_v22 = vor.u32 %v2840_v47, %v2839_v19  ;;  %v2844_v11 = vrot.slane %v2839_v19, 4  ;;  %v19771_v19 = vld [vmem:[#allocation26_spill] sm:$0xff] }
 0x247   :  { %19759 = vst [vmem:[#allocation13_spill] sm:$0xff] %v14625_v62  ;;  %19762 = vst [vmem:[#allocation14_spill] sm:$0xff] %v19761_v0  ;;  %v14650_v62 = vmul.f32 %v14452_v57, %v14272_v34  ;;  %v14655_v30 = vmul.f32 %v14452_v57, %v14277_v60  ;;  %v14659_v7 = vmul.f32 %v14452_v57, %v14286_v39  ;;  %v19773_v0 = vld [vmem:[#allocation29_spill] sm:$0xff]  ;;  %v19774_v41 = vld [vmem:[#allocation30_spill] sm:$0xff] }
 0x248   :  { %19763 = vst [vmem:[#allocation15_spill] sm:$0xff] %v14642_v51  ;;  %v19764_v51 = vld [vmem:[#allocation27_spill] sm:$0xff]  ;;  %v14667_v34 = vmul.f32 %v14452_v57, %v14303_v25  ;;  %v14671_v47 = vmul.f32 %v14452_v57, %v14307_v52  ;;  %v2843_v60 = vsel %vm14632_vm7, %v2835_v48, %v2842_v22  ;;  %v3166_v39 = vsel %vm13628_vm3, %v2844_v11, %v3165_v2  ;;  %v13119_v52 = vld [vmem:[%s19582_s4 + $0x38] sm:$0xff]  }
 0x249   :  { %v14663_v10 = vmul.f32 %v14452_v57, %v19764_v51  ;;  %v14680_v35 = vmul.f32 %v14452_v57, %v14316_v3  ;;  %v14684_v25 = vmul.f32 %v14452_v57, %v14321_v28  ;;  %3164 = vst [vmem:[#allocation2 + $0x19c] sm:$0xf] %v2843_v60  ;;  %3167 = vst [vmem:[#allocation2 + $0x1a0] sm:$0x1] %v3166_v39  ;;  %v19766_v51 = vld [vmem:[#allocation28_spill] sm:$0xff]  ;;  %v19769_v39 = vld [vmem:[#allocation22_spill] sm:$0xff]  ;;  %9718 = vmatpush1.bf16.msra.mxu0 %v13119_v52 }
 0x24a   :  { %v14691_v22 = vmul.f32 %v14452_v57, %v19766_v51  ;;  %v14695_v11 = vmul.f32 %v14452_v57, %v14336_v18  ;;  %v14699_v3 = vmul.f32 %v14452_v57, %v14345_v12  ;;  %v19767_v28 = vld [vmem:[#allocation24_spill] sm:$0xff]  ;;  %v14707_v2 = vmul.f32 %v14452_v57, %v14362_v15  ;;  %v19770_v51 = vld [vmem:[#allocation23_spill] sm:$0xff]  ;;  %9719 = vmatprep.subr.bf16.mxu0 %v19723_v58 }
 0x24b   :  { %v14703_v48 = vmul.f32 %v14452_v57, %v19767_v28  ;;  %v14711_v60 = vmul.f32 %v14452_v57, %v14367_v40  ;;  %v14715_v18 = vmul.f32 %v14452_v57, %v19769_v39  ;;  %v14719_v12 = vmul.f32 %v14452_v57, %v19770_v51  ;;  %v19777_v51 = vld [vmem:[#allocation32_spill] sm:$0xff] }
 0x24c   :  { %v14723_v28 = vmul.f32 %v14452_v57, %v19771_v19  ;;  %v14727_v15 = vmul.f32 %v14452_v57, %v19773_v0  ;;  %v14731_v40 = vmul.f32 %v14452_v57, %v19774_v41  ;;  %v14740_v52 = vmul.f32 %v14452_v57, %v19777_v51  ;;  %v19778_v19 = vld [vmem:[#allocation33_spill] sm:$0xff] }
 0x24d   :  { %19768 = vst [vmem:[#allocation16_spill] sm:$0xff] %v14711_v60  ;;  %v19775_v60 = vld [vmem:[#allocation31_spill] sm:$0xff]  ;;  %v14749_v41 = vadd.f32 %v14481_v56, %v14459_v9  ;;  %v14760_v51 = vadd.f32 %v14481_v56, %v14470_v43  ;;  %v14768_v9 = vadd.f32 %v14481_v56, %v14478_v45  ;;  %v14780_v43 = vadd.f32 %v14481_v56, %v14493_v8 }
 0x24e   :  { %19772 = vst [vmem:[#allocation17_spill] sm:$0xff] %v14723_v28  ;;  %v14735_v39 = vmul.f32 %v14452_v57, %v19775_v60  ;;  %v14744_v28 = vmul.f32 %v14452_v57, %v19778_v19  ;;  %v13120_v60 = vld [vmem:[%s19582_s4 + $0x40] sm:$0xff]   ;;  %v14764_v57 = vadd.f32 %v14481_v56, %v14474_v38  ;;  %v14772_v19 = vadd.f32 %v14481_v56, %v14485_v42 }
 0x24f   :  { %v14784_v38 = vadd.f32 %v14481_v56, %v14497_v5  ;;  %9720 = vmatpush1.bf16.msra.mxu0 %v13120_v60  ;;  %v14788_v45 = vadd.f32 %v14481_v56, %v14501_v59  ;;  %v14792_v42 = vadd.f32 %v14481_v56, %v14505_v37  ;;  %v14800_v8 = vadd.f32 %v14481_v56, %v14516_v13  ;;  %v13109_v5 = vld [vmem:[%s19582_s4 + $0xc0] sm:$0xff]   ;;  %v13122_v60 = vld [vmem:[%s19582_s4 + $0x48] sm:$0xff]  }
 0x250   :  { %19776 = vst [vmem:[#allocation18_spill] sm:$0xff] %v14735_v39  ;;  %v14756_v39 = vadd.f32 %v14481_v56, %v14466_v50  ;;  %v14776_v50 = vadd.f32 %v14481_v56, %v14489_v26  ;;  %v14796_v26 = vadd.f32 %v14481_v56, %v14509_v33  ;;  %9721 = vmatprep.subr.bf16.mxu0 %v19723_v58 }
 0x251   :  { %v14808_v59 = vadd.f32 %v14481_v56, %v14520_v24  ;;  %v14812_v37 = vadd.f32 %v14481_v56, %v14527_v4  ;;  %v14816_v33 = vadd.f32 %v14481_v56, %v14531_v21  ;;  %v14820_v13 = vadd.f32 %v14481_v56, %v14535_v20  ;;  %12622 = vmatpush1.bf16.msra.mxu1 %v13109_v5  ;;  %v13123_v5 = vld [vmem:[%s19582_s4 + $0x50] sm:$0xff]  }
 0x252   :  { %v14827_v24 = vadd.f32 %v14481_v56, %v14539_v6  ;;  %v14831_v4 = vadd.f32 %v14481_v56, %v14543_v46  ;;  %v14835_v21 = vadd.f32 %v14481_v56, %v14547_v44  ;;  %v14839_v20 = vadd.f32 %v14481_v56, %v14551_v53  ;;  %12607 = vmatprep.subr.bf16.mxu1 %v19723_v58 }
 0x253   :  { %v14843_v0 = vadd.f32 %v14481_v56, %v14555_v16  ;;  %v14847_v6 = vadd.f32 %v14481_v56, %v14559_v55  ;;  %v14851_v46 = vadd.f32 %v14481_v56, %v14563_v36  ;;  %v14855_v44 = vadd.f32 %v14481_v56, %v14570_v1  ;;  %v13112_v1 = vld [vmem:[%s19582_s4 + $0xc8] sm:$0xff]   ;;  %9722 = vmatpush1.bf16.msra.mxu0 %v13122_v60 }
 0x254   :  { %19779 = vst [vmem:[#allocation19_spill] sm:$0xff] %v14827_v24  ;;  %v14860_v53 = vadd.f32 %v14481_v56, %v14574_v23  ;;  %v14864_v16 = vadd.f32 %v14481_v56, %v14581_v32  ;;  %v14868_v55 = vadd.f32 %v14481_v56, %v14585_v61  ;;  %v14872_v36 = vadd.f32 %v14481_v56, %v14589_v54 }
 0x255   :  { %19780 = vst [vmem:[#allocation20_spill] sm:$0xff] %v14843_v0  ;;  %19781 = vst [vmem:[#allocation21_spill] sm:$0xff] %v14847_v6  ;;  %v14879_v23 = vadd.f32 %v14481_v56, %v14593_v17  ;;  %v14883_v32 = vadd.f32 %v14481_v56, %v14598_v27  ;;  %v14887_v61 = vadd.f32 %v14481_v56, %v14602_v49  ;;  %9723 = vmatprep.subr.bf16.mxu0 %v19723_v58  ;;  %v19790_v17 = vld [vmem:[#allocation9_spill] sm:$0xff]  ;;  %v19791_v27 = vld [vmem:[#allocation10_spill] sm:$0xff]  ;;  %v19816_v0 = vmov 0 }
 0x256   :  { %19782 = vst [vmem:[#allocation25_spill] sm:$0xff] %v14851_v46  ;;  %19783 = vst [vmem:[#allocation27_spill] sm:$0xff] %v14855_v44  ;;  %v14891_v54 = vadd.f32 %v14481_v56, %v14606_v29  ;;  %v14899_v60 = vadd.f32 %v14481_v56, %v19790_v17  ;;  %v19792_v49 = vld [vmem:[#allocation12_spill] sm:$0xff]  ;;  %v19793_v29 = vld [vmem:[#allocation13_spill] sm:$0xff]  ;;  %12623 = vmatpush1.bf16.msra.mxu1 %v13112_v1  ;;  %v14932_v1 = vadd.f32 %v14481_v56, %v14655_v30 }
 0x257   :  { %19784 = vst [vmem:[#allocation28_spill] sm:$0xff] %v14860_v53  ;;  %19785 = vst [vmem:[#allocation24_spill] sm:$0xff] %v14872_v36  ;;  %v19794_v36 = vld [vmem:[#allocation15_spill] sm:$0xff]  ;;  %12608 = vmatprep.subr.bf16.mxu1 %v19723_v58  ;;  %9724 = vmatpush1.bf16.msra.mxu0 %v13123_v5  ;;  %v14951_v30 = vadd.f32 %v14481_v56, %v14671_v47  ;;  %v13125_v5 = vld [vmem:[%s19582_s4 + $0x58] sm:$0xff]   ;;  %v14971_v47 = vadd.f32 %v14481_v56, %v14695_v11  ;;  %v19817_v0 = vsel %vm15110_vm9, 4294967295, %v19816_v0 }
 0x258   :  { %19786 = vst [vmem:[#allocation22_spill] sm:$0xff] %v14879_v23  ;;  %19787 = vst [vmem:[#allocation23_spill] sm:$0xff] %v14883_v32  ;;  %v14903_v32 = vadd.f32 %v14481_v56, %v19791_v27  ;;  %v14915_v23 = vadd.f32 %v14481_v56, %v14638_v31  ;;  %v14919_v17 = vadd.f32 %v14481_v56, %v19794_v36  ;;  %9725 = vmatprep.subr.bf16.mxu0 %v19723_v58  ;;  %v13127_v46 = vld [vmem:[%s19582_s4 + $0xf0] sm:$0xff]   ;;  %v13131_v44 = vld [vmem:[%s19582_s4 + $0x78] sm:$0xff]  }
 0x259   :  { %19788 = vst [vmem:[#allocation26_spill] sm:$0xff] %v14887_v61  ;;  %19789 = vst [vmem:[#allocation29_spill] sm:$0xff] %v14891_v54  ;;  %v14907_v61 = vadd.f32 %v14481_v56, %v19792_v49  ;;  %v14911_v54 = vadd.f32 %v14481_v56, %v19793_v29  ;;  %v14923_v27 = vadd.f32 %v14481_v56, %v14646_v14  ;;  %v19802_v29 = vld [vmem:[#allocation16_spill] sm:$0xff] }
 0x25a   :  { %v14927_v49 = vadd.f32 %v14481_v56, %v14650_v62  ;;  %19795 = vst [vmem:[#allocation30_spill] sm:$0xff] %v14932_v1  ;;  %v14936_v31 = vadd.f32 %v14481_v56, %v14659_v7  ;;  %v14940_v36 = vadd.f32 %v14481_v56, %v14663_v10  ;;  %v14944_v14 = vadd.f32 %v14481_v56, %v14667_v34  ;;  %v13115_v62 = vld [vmem:[%s19582_s4 + $0xd0] sm:$0xff]   ;;  %v3161_v53 = vld [vmem:[#allocation2 + $0x198] sm:$0xf] }
 0x25b   :  { %v14955_v7 = vadd.f32 %v14481_v56, %v14680_v35  ;;  %v14959_v10 = vadd.f32 %v14481_v56, %v14684_v25  ;;  %v14963_v34 = vadd.f32 %v14481_v56, %v14691_v22  ;;  %19799 = vst [vmem:[#allocation9_spill] sm:$0xff] %v14971_v47  ;;  %v14975_v35 = vadd.f32 %v14481_v56, %v14699_v3 }
 0x25c   :  { %v14979_v25 = vadd.f32 %v14481_v56, %v14703_v48  ;;  %v14983_v22 = vadd.f32 %v14481_v56, %v14707_v2  ;;  %12624 = vmatpush1.bf16.msra.mxu1 %v13115_v62  ;;  %v14991_v11 = vadd.f32 %v14481_v56, %v14715_v18  ;;  %v14995_v3 = vadd.f32 %v14481_v56, %v14719_v12  ;;  %v19806_v18 = vld [vmem:[#allocation18_spill] sm:$0xff] }
 0x25d   :  { %19796 = vst [vmem:[#allocation31_spill] sm:$0xff] %v14955_v7  ;;  %19797 = vst [vmem:[#allocation32_spill] sm:$0xff] %v14959_v10  ;;  %12609 = vmatprep.subr.bf16.mxu1 %v19723_v58  ;;  %v15004_v2 = vadd.f32 %v14481_v56, %v14727_v15  ;;  %v15008_v62 = vadd.f32 %v14481_v56, %v14731_v40  ;;  %v15016_v12 = vadd.f32 %v14481_v56, %v14740_v52  ;;  %v13126_v52 = vld [vmem:[%s19582_s4 + $0x60] sm:$0xff]  }
 0x25e   :  { %19798 = vst [vmem:[#allocation33_spill] sm:$0xff] %v14963_v34  ;;  %19800 = vst [vmem:[#allocation10_spill] sm:$0xff] %v14975_v35  ;;  %v14987_v34 = vadd.f32 %v14481_v56, %v19802_v29  ;;  %v19803_v35 = vld [vmem:[#allocation17_spill] sm:$0xff]  ;;  %v15012_v29 = vadd.f32 %v14481_v56, %v19806_v18  ;;  %9726 = vmatpush1.bf16.msra.mxu0 %v13125_v5  ;;  %v15023_v15 = vadd.f32 %v14481_v56, %v14744_v28  ;;  %v13128_v28 = vld [vmem:[%s19582_s4 + $0x68] sm:$0xff]  }
 0x25f   :  { %19801 = vst [vmem:[#allocation12_spill] sm:$0xff] %v14983_v22  ;;  %v14999_v48 = vadd.f32 %v14481_v56, %v19803_v35  ;;  %19804 = vst [vmem:[#allocation13_spill] sm:$0xff] %v15004_v2  ;;  %v13118_v35 = vld [vmem:[%s19582_s4 + $0xd8] sm:$0xff]   ;;  %v19808_v2 = vld [vmem:[#allocation11_spill] sm:$0xff]  ;;  %v19809_v40 = vshll.u32 %v14566_v63, 16  ;;  %9727 = vmatprep.subr.bf16.mxu0 %v19723_v58  ;;  %v19823_v47 = vmax.f32 %v14749_v41, 0.0 }
 0x260   :  { %19805 = vst [vmem:[#allocation15_spill] sm:$0xff] %v15008_v62  ;;  %19807 = vst [vmem:[#allocation16_spill] sm:$0xff] %v15012_v29  ;;  %12625 = vmatpush1.bf16.msra.mxu1 %v13118_v35  ;;  %v13121_v35 = vld [vmem:[%s19582_s4 + $0xe0] sm:$0xff]   ;;  %v13124_v18 = vld [vmem:[%s19582_s4 + $0xe8] sm:$0xff]   ;;  %v19824_v7 = vmax.f32 %v14756_v39, 0.0  ;;  %v19825_v22 = vmax.f32 %v14760_v51, 0.0 }
 0x261   :  { %v15028_v62 = vor.u32 %v19809_v40, %v19808_v2  ;;  %12610 = vmatprep.subr.bf16.mxu1 %v19723_v58  ;;  %v19810_v40 = vld [vmem:[#allocation24_spill] sm:$0xff]  ;;  %v19811_v63 = vld [vmem:[#allocation22_spill] sm:$0xff]  ;;  %v13129_v2 = vld [vmem:[%s19582_s4 + $0x70] sm:$0xff]   ;;  %19818 = vst [vmem:[#allocation17_spill] sm:$0xff] %v19817_v0  ;;  %v19827_v41 = vmax.f32 %v14768_v9, 0.0  ;;  %v19828_v39 = vmax.f32 %v14772_v19, 0.0 }
 0x262   :  { %9728 = vmatpush1.bf16.msra.mxu0 %v13126_v52  ;;  %v19812_v29 = vld [vmem:[#allocation23_spill] sm:$0xff]  ;;  %v19813_v5 = vld [vmem:[#allocation26_spill] sm:$0xff]  ;;  %v19814_v24 = vld [vmem:[#allocation29_spill] sm:$0xff]  ;;  %v15136_v52 = vpack.c.bf16 %v19823_v47, %v19823_v47  ;;  %v19829_v51 = vmax.f32 %v14776_v50, 0.0  ;;  %v19831_v9 = vmax.f32 %v14784_v38, 0.0  ;;  %v19832_v19 = vmax.f32 %v14788_v45, 0.0 }
 0x263   :  { %9729 = vmatprep.subr.bf16.mxu0 %v19723_v58  ;;  %v3162_v1 = vsel %vm15110_vm9, %v15028_v62, %v3161_v53  ;;  %v15157_v47 = vpack.c.bf16 %v19827_v41, %v19827_v41  ;;  %v19833_v50 = vmax.f32 %v14792_v42, 0.0  ;;  %v19835_v38 = vmax.f32 %v14800_v8, 0.0  ;;  %v19849_v56 = vld [vmem:[#allocation25_spill] sm:$0xff]  ;;  %v19853_v0 = vld [vmem:[#allocation28_spill] sm:$0xff] }
 0x264   :  { %12626 = vmatpush1.bf16.msra.mxu1 %v13121_v35  ;;  %v13130_v35 = vld [vmem:[%s19582_s4 + $0xf8] sm:$0xff]   ;;  %3163 = vst [vmem:[#allocation2 + $0x198] sm:$0xf] %v3162_v1  ;;  %v15182_v41 = vpack.c.bf16 %v19832_v19, %v19832_v19  ;;  %v19836_v45 = vmax.f32 %v14808_v59, 0.0  ;;  %v19837_v42 = vmax.f32 %v14812_v37, 0.0  ;;  %v19839_v8 = vmax.f32 %v14820_v13, 0.0 }
 0x265   :  { %12611 = vmatprep.subr.bf16.mxu1 %v19723_v58  ;;  %v15187_v1 = vpack.c.bf16 %v19833_v50, %v19833_v50  ;;  %v19840_v50 = vld [vmem:[#allocation19_spill] sm:$0xff]  ;;  %v19842_v37 = vmax.f32 %v14831_v4, 0.0  ;;  %v19844_v13 = vmax.f32 %v14839_v20, 0.0 }
 0x266   :  { %9730 = vmatpush1.bf16.msra.mxu0 %v13128_v28  ;;  %v19820_v10 = vld [vmem:[#allocation13_spill] sm:$0xff]  ;;  %v15218_v19 = vpack.c.bf16 %v19839_v8, %v19839_v8  ;;  %v19841_v59 = vmax.f32 %v19840_v50, 0.0 }
 0x267   :  { %9731 = vmatprep.subr.bf16.mxu0 %v19723_v58  ;;  %v19821_v28 = vld [vmem:[#allocation15_spill] sm:$0xff]  ;;  %v19822_v6 = vld [vmem:[#allocation16_spill] sm:$0xff] }
 0x268   :  { %12627 = vmatpush1.bf16.msra.mxu1 %v13124_v18  ;;  %v15141_v18 = vpack.c.bf16 %v19824_v7, %v19824_v7  ;;  %v15162_v7 = vpack.c.bf16 %v19828_v39, %v19828_v39  ;;  %v15198_v39 = vpack.c.bf16 %v19835_v38, %v19835_v38  ;;  %v15228_v38 = vpack.c.bf16 %v19842_v37, %v19842_v37 }
 0x269   :  { %12612 = vmatprep.subr.bf16.mxu1 %v19723_v58 }
 0x26a   :  { %9732 = vmatpush1.bf16.msra.mxu0 %v13129_v2  ;;  %v19819_v2 = vld [vmem:[#allocation10_spill] sm:$0xff] }
 0x26b   :  { %9733 = vmatprep.subr.bf16.mxu0 %v19723_v58 }
 0x26c   :  { %12628 = vmatpush1.bf16.msra.mxu1 %v13127_v46  ;;  %v15146_v46 = vpack.c.bf16 %v19825_v22, %v19825_v22  ;;  %v15167_v22 = vpack.c.bf16 %v19829_v51, %v19829_v51  ;;  %v15203_v51 = vpack.c.bf16 %v19836_v45, %v19836_v45 }
 0x26d   :  { %12613 = vmatprep.subr.bf16.mxu1 %v19723_v58 }
 0x26e   :  { %9734 = vmatpush1.bf16.msra.mxu0 %v13131_v44  ;;  %v19826_v44 = vmax.f32 %v14764_v57, 0.0  ;;  %v19830_v57 = vmax.f32 %v14780_v43, 0.0  ;;  %v19834_v43 = vmax.f32 %v14796_v26, 0.0  ;;  %v19838_v26 = vmax.f32 %v14816_v33, 0.0 }
 0x26f   :  { %9992 = vmatprep.subr.bf16.mxu0 %v19723_v58  ;;  %v19843_v33 = vmax.f32 %v14835_v21, 0.0  ;;  %v19850_v21 = vmax.f32 %v19849_v56, 0.0  ;;  %v19856_v56 = vmax.f32 %v14868_v55, 0.0  ;;  %v19860_v55 = vmax.f32 %v19813_v5, 0.0 }
 0x270   :  { %v15152_v53 = vpack.c.bf16 %v19826_v44, %v19826_v44  ;;  %12629 = vmatpush1.bf16.msra.mxu1 %v13130_v35  ;;  %v15172_v62 = vpack.c.bf16 %v19830_v57, %v19830_v57  ;;  %v15177_v44 = vpack.c.bf16 %v19831_v9, %v19831_v9  ;;  %v15193_v35 = vpack.c.bf16 %v19834_v43, %v19834_v43 }
 0x271   :  { %10281 = vmatprep.subr.bf16.mxu1 %v19723_v58  ;;  %v15208_v57 = vpack.c.bf16 %v19837_v42, %v19837_v42  ;;  %v15213_v9 = vpack.c.bf16 %v19838_v26, %v19838_v26  ;;  %v15223_v43 = vpack.c.bf16 %v19841_v59, %v19841_v59  ;;  %v15233_v45 = vpack.c.bf16 %v19843_v33, %v19843_v33  ;;  %v19845_v26 = vld [vmem:[#allocation20_spill] sm:$0xff]  ;;  %v19847_v59 = vld [vmem:[#allocation21_spill] sm:$0xff]  ;;  %v19851_v58 = vld [vmem:[#allocation27_spill] sm:$0xff] }
 0x272   :  { %v15238_v42 = vpack.c.bf16 %v19844_v13, %v19844_v13  ;;  %v19846_v8 = vmax.f32 %v19845_v26, 0.0  ;;  %v19848_v4 = vmax.f32 %v19847_v59, 0.0  ;;  %v15253_v33 = vpack.c.bf16 %v19850_v21, %v19850_v21 }
 0x273   :  { %v19852_v20 = vmax.f32 %v19851_v58, 0.0  ;;  %v19854_v26 = vmax.f32 %v19853_v0, 0.0  ;;  %v19855_v59 = vmax.f32 %v14864_v16, 0.0  ;;  %v15273_v21 = vpack.c.bf16 %v19856_v56, %v19856_v56 }
 0x274   :  { %v15243_v50 = vpack.c.bf16 %v19846_v8, %v19846_v8  ;;  %v15248_v37 = vpack.c.bf16 %v19848_v4, %v19848_v4  ;;  %v19857_v58 = vmax.f32 %v19810_v40, 0.0  ;;  %v19858_v0 = vmax.f32 %v19811_v63, 0.0 }
 0x275   :  { %v15258_v13 = vpack.c.bf16 %v19852_v20, %v19852_v20  ;;  %v15263_v8 = vpack.c.bf16 %v19854_v26, %v19854_v26  ;;  %v15268_v4 = vpack.c.bf16 %v19855_v59, %v19855_v59  ;;  %v19859_v16 = vmax.f32 %v19812_v29, 0.0 }
 0x276   :  { %v15278_v20 = vpack.c.bf16 %v19857_v58, %v19857_v58  ;;  %v15283_v26 = vpack.c.bf16 %v19858_v0, %v19858_v0  ;;  %v15293_v56 = vpack.c.bf16 %v19860_v55, %v19860_v55  ;;  %v19861_v40 = vmax.f32 %v19814_v24, 0.0 }
 0x277   :  { %v15288_v59 = vpack.c.bf16 %v19859_v16, %v19859_v16  ;;  %v19862_v63 = vmax.f32 %v14899_v60, 0.0  ;;  %v19863_v29 = vmax.f32 %v14903_v32, 0.0  ;;  %v19864_v5 = vmax.f32 %v14907_v61, 0.0 }
 0x278   :  { %v15298_v58 = vpack.c.bf16 %v19861_v40, %v19861_v40  ;;  %v19865_v24 = vmax.f32 %v14911_v54, 0.0  ;;  %v19867_v60 = vmax.f32 %v14915_v23, 0.0  ;;  %v19868_v32 = vmax.f32 %v14919_v17, 0.0 }
 0x279   :  { %v15303_v0 = vpack.c.bf16 %v19862_v63, %v19862_v63  ;;  %v15308_v16 = vpack.c.bf16 %v19863_v29, %v19863_v29  ;;  %v15313_v55 = vpack.c.bf16 %v19864_v5, %v19864_v5  ;;  %v19869_v61 = vmax.f32 %v14923_v27, 0.0 }
 0x27a   :  { %v15318_v40 = vpack.c.bf16 %v19865_v24, %v19865_v24  ;;  %v15323_v63 = vpack.c.bf16 %v19867_v60, %v19867_v60  ;;  %v15328_v29 = vpack.c.bf16 %v19868_v32, %v19868_v32  ;;  %v19870_v54 = vmax.f32 %v14927_v49, 0.0 }
 0x27b   :  { %v15333_v5 = vpack.c.bf16 %v19869_v61, %v19869_v61  ;;  %v19874_v17 = vmax.f32 %v14936_v31, 0.0  ;;  %v19876_v27 = vmax.f32 %v14940_v36, 0.0  ;;  %v19878_v49 = vmax.f32 %v14944_v14, 0.0 }
 0x27c   :  { %19866 = vst [vmem:[#allocation18_spill] sm:$0xff] %v15318_v40  ;;  %v15338_v24 = vpack.c.bf16 %v19870_v54, %v19870_v54  ;;  %v19871_v40 = vld [vmem:[#allocation30_spill] sm:$0xff] }
 0x27d   :  { %v19872_v23 = vmax.f32 %v19871_v40, 0.0  ;;  %v15348_v32 = vpack.c.bf16 %v19874_v17, %v19874_v17  ;;  %v15353_v61 = vpack.c.bf16 %v19876_v27, %v19876_v27  ;;  %v15358_v54 = vpack.c.bf16 %v19878_v49, %v19878_v49 }
 0x27e   :  { %v19880_v40 = vmax.f32 %v14951_v30, 0.0 }
 0x27f   :  { %v15343_v60 = vpack.c.bf16 %v19872_v23, %v19872_v23  ;;  %19875 = vst [vmem:[#allocation24_spill] sm:$0xff] %v15348_v32  ;;  %19877 = vst [vmem:[#allocation22_spill] sm:$0xff] %v15353_v61  ;;  %v19883_v32 = vld [vmem:[#allocation32_spill] sm:$0xff]  ;;  %v19886_v61 = vld [vmem:[#allocation33_spill] sm:$0xff] }
 0x280   :  { %19879 = vst [vmem:[#allocation23_spill] sm:$0xff] %v15358_v54  ;;  %v15363_v23 = vpack.c.bf16 %v19880_v40, %v19880_v40  ;;  %v19884_v36 = vmax.f32 %v19883_v32, 0.0  ;;  %v19887_v14 = vmax.f32 %v19886_v61, 0.0  ;;  %v19888_v54 = vld [vmem:[#allocation9_spill] sm:$0xff]  ;;  %v19891_v32 = vmax.f32 %v14979_v25, 0.0 }
 0x281   :  { %19873 = vst [vmem:[#allocation11_spill] sm:$0xff] %v15343_v60  ;;  %v19881_v60 = vld [vmem:[#allocation31_spill] sm:$0xff]  ;;  %v19889_v30 = vmax.f32 %v19888_v54, 0.0  ;;  %v19894_v54 = vmax.f32 %v14987_v34, 0.0  ;;  %v19898_v25 = vmax.f32 %v14995_v3, 0.0  ;;  %v19902_v34 = vmax.f32 %v19820_v10, 0.0 }
 0x282   :  { %v19882_v31 = vmax.f32 %v19881_v60, 0.0  ;;  %v15373_v27 = vpack.c.bf16 %v19884_v36, %v19884_v36  ;;  %v15378_v49 = vpack.c.bf16 %v19887_v14, %v19887_v14  ;;  %v19890_v60 = vmax.f32 %v19819_v2, 0.0 }
 0x283   :  { %v15383_v40 = vpack.c.bf16 %v19889_v30, %v19889_v30  ;;  %v15393_v36 = vpack.c.bf16 %v19891_v32, %v19891_v32  ;;  %v15403_v30 = vpack.c.bf16 %v19894_v54, %v19894_v54  ;;  %v19896_v2 = vmax.f32 %v14991_v11, 0.0 }
 0x284   :  { %v15368_v17 = vpack.c.bf16 %v19882_v31, %v19882_v31  ;;  %19885 = vst [vmem:[#allocation26_spill] sm:$0xff] %v15373_v27  ;;  %v15388_v31 = vpack.c.bf16 %v19890_v60, %v19890_v60  ;;  %v19892_v27 = vld [vmem:[#allocation12_spill] sm:$0xff]  ;;  %v15413_v32 = vpack.c.bf16 %v19898_v25, %v19898_v25  ;;  %v15423_v54 = vpack.c.bf16 %v19902_v34, %v19902_v34 }
 0x285   :  { %v19893_v61 = vmax.f32 %v19892_v27, 0.0  ;;  %19895 = vst [vmem:[#allocation29_spill] sm:$0xff] %v15403_v30  ;;  %v15408_v60 = vpack.c.bf16 %v19896_v2, %v19896_v2  ;;  %v19900_v27 = vmax.f32 %v14999_v48, 0.0  ;;  %v19904_v11 = vmax.f32 %v19821_v28, 0.0 }
 0x286   :  { %19899 = vst [vmem:[#allocation13_spill] sm:$0xff] %v15413_v32  ;;  %19903 = vst [vmem:[#allocation16_spill] sm:$0xff] %v15423_v54  ;;  %v19906_v3 = vmax.f32 %v19822_v6, 0.0  ;;  %v19908_v48 = vmax.f32 %v15016_v12, 0.0  ;;  %v19910_v10 = vmax.f32 %v15023_v15, 0.0  ;;  %v2302_v28 = vshrl.u32 %v15136_v52, 16 }
 0x287   :  { %v15398_v14 = vpack.c.bf16 %v19893_v61, %v19893_v61  ;;  %19897 = vst [vmem:[#allocation10_spill] sm:$0xff] %v15408_v60  ;;  %v15418_v61 = vpack.c.bf16 %v19900_v27, %v19900_v27  ;;  %v15428_v2 = vpack.c.bf16 %v19904_v11, %v19904_v11  ;;  %v2305_v11 = vshll.u32 %v15136_v52, 16 }
 0x288   :  { %v15433_v25 = vpack.c.bf16 %v19906_v3, %v19906_v3  ;;  %v15438_v27 = vpack.c.bf16 %v19908_v48, %v19908_v48  ;;  %v15443_v34 = vpack.c.bf16 %v19910_v10, %v19910_v10  ;;  %v2313_v6 = vshll.u32 %v15141_v18, 16 }
 0x289   :  { %19901 = vst [vmem:[#allocation15_spill] sm:$0xff] %v15418_v61  ;;  %19905 = vst [vmem:[#allocation19_spill] sm:$0xff] %v15428_v2  ;;  %v2310_v2 = vshrl.u32 %v15141_v18, 16  ;;  %v2319_v3 = vshrl.u32 %v15146_v46, 16  ;;  %v2322_v12 = vshll.u32 %v15146_v46, 16  ;;  %v2327_v48 = vshrl.u32 %v15152_v53, 16 }
 0x28a   :  { %19907 = vst [vmem:[#allocation20_spill] sm:$0xff] %v15433_v25  ;;  %19909 = vst [vmem:[#allocation21_spill] sm:$0xff] %v15438_v27  ;;  %v2304_v25 = vrot.slane %v2302_v28, 7  ;;  %v2330_v15 = vshll.u32 %v15152_v53, 16  ;;  %v2339_v52 = vshll.u32 %v15157_v47, 16  ;;  %v2344_v28 = vshrl.u32 %v15162_v7, 16 }
 0x28b   :  { %19911 = vst [vmem:[#allocation25_spill] sm:$0xff] %v15443_v34  ;;  %v15453_v27 = vrot.slane %v2310_v2, 7  ;;  %v2321_v10 = vrot.slane %v2319_v3, 7  ;;  %v2336_v34 = vshrl.u32 %v15157_v47, 16  ;;  %v15459_v18 = vrot.slane %v2327_v48, 7 }
 0x28c   :  { %v15457_v54 = vor.u32 %v2305_v11, %v2304_v25  ;;  %v2308_v61 = vrot.slane %v2304_v25, 4  ;;  %v15468_v47 = vrot.slane %v2344_v28, 7  ;;  %v2347_v48 = vshll.u32 %v15162_v7, 16  ;;  %v15895_v11 = vld [vmem:[#allocation2 + $0xe4] sm:$0xf] }
 0x28d   :  { %v2315_v46 = vor.u32 %v2313_v6, %v15453_v27  ;;  %v15464_v60 = vor.u32 %v2322_v12, %v2321_v10  ;;  %v2325_v53 = vrot.slane %v2321_v10, 4  ;;  %v2332_v2 = vor.u32 %v2330_v15, %v15459_v18 }
 0x28e   :  { %19912 = vst [vmem:[#allocation27_spill] sm:$0xff] %v15457_v54  ;;  %v2338_v30 = vrot.slane %v2336_v34, 7  ;;  %v2353_v54 = vshrl.u32 %v15167_v22, 16  ;;  %v2356_v6 = vshll.u32 %v15167_v22, 16  ;;  %v2349_v34 = vor.u32 %v2347_v48, %v15468_v47 }
 0x28f   :  { %v2316_v25 = vsel %vm14632_vm7, %v2308_v61, %v2315_v46  ;;  %v2333_v12 = vsel %vm14632_vm7, %v2325_v53, %v2332_v2  ;;  %v2361_v61 = vshrl.u32 %v15172_v62, 16  ;;  %v2364_v7 = vshll.u32 %v15172_v62, 16 }
 0x290   :  { %v15477_v10 = vor.u32 %v2339_v52, %v2338_v30  ;;  %v2342_v15 = vrot.slane %v2338_v30, 4  ;;  %2947 = vst [vmem:[#allocation2 + $0x10] sm:$0xf] %v2316_v25  ;;  %v2355_v28 = vrot.slane %v2353_v54, 7  ;;  %2954 = vst [vmem:[#allocation2 + $0x1c] sm:$0xf] %v2333_v12 }
 0x291   :  { %v2370_v46 = vshrl.u32 %v15177_v44, 16  ;;  %v2373_v22 = vshll.u32 %v15177_v44, 16  ;;  %v2378_v53 = vshrl.u32 %v15182_v41, 16  ;;  %v2381_v52 = vshll.u32 %v15182_v41, 16 }
 0x292   :  { %v2350_v30 = vsel %vm14632_vm7, %v2342_v15, %v2349_v34  ;;  %v15489_v2 = vor.u32 %v2356_v6, %v2355_v28  ;;  %v2359_v25 = vrot.slane %v2355_v28, 4  ;;  %v15491_v54 = vrot.slane %v2361_v61, 7 }
 0x293   :  { %v2372_v48 = vrot.slane %v2370_v46, 7  ;;  %v15493_v3 = vrot.slane %v2378_v53, 7  ;;  %v2387_v62 = vshrl.u32 %v15187_v1, 16  ;;  %v2390_v12 = vshll.u32 %v15187_v1, 16  ;;  %2961 = vst [vmem:[#allocation2 + $0x28] sm:$0xf] %v2350_v30 }
 0x294   :  { %v2366_v44 = vor.u32 %v2364_v7, %v15491_v54  ;;  %v2395_v32 = vshrl.u32 %v15193_v35, 16  ;;  %v2398_v6 = vshll.u32 %v15193_v35, 16  ;;  %v2404_v7 = vshrl.u32 %v15198_v39, 16 }
 0x295   :  { %v15501_v15 = vor.u32 %v2373_v22, %v2372_v48  ;;  %v2376_v34 = vrot.slane %v2372_v48, 4  ;;  %v2383_v28 = vor.u32 %v2381_v52, %v15493_v3  ;;  %v2389_v1 = vrot.slane %v2387_v62, 7 }
 0x296   :  { %v2367_v46 = vsel %vm14632_vm7, %v2359_v25, %v2366_v44  ;;  %v15507_v53 = vrot.slane %v2395_v32, 7  ;;  %v2407_v35 = vshll.u32 %v15198_v39, 16  ;;  %v2412_v22 = vshrl.u32 %v15203_v51, 16 }
 0x297   :  { %v2384_v30 = vsel %vm14632_vm7, %v2376_v34, %v2383_v28  ;;  %v2415_v48 = vshll.u32 %v15203_v51, 16  ;;  %2968 = vst [vmem:[#allocation2 + $0x34] sm:$0xf] %v2367_v46  ;;  %v15515_v52 = vor.u32 %v2390_v12, %v2389_v1  ;;  %v2393_v61 = vrot.slane %v2389_v1, 4 }
 0x298   :  { %v2400_v25 = vor.u32 %v2398_v6, %v15507_v53  ;;  %2975 = vst [vmem:[#allocation2 + $0x40] sm:$0xf] %v2384_v30  ;;  %v2406_v62 = vrot.slane %v2404_v7, 7  ;;  %v15519_v44 = vrot.slane %v2412_v22, 7  ;;  %v2421_v34 = vshrl.u32 %v15208_v57, 16 }
 0x299   :  { %v2424_v39 = vshll.u32 %v15208_v57, 16  ;;  %v2429_v51 = vshrl.u32 %v15213_v9, 16  ;;  %v2432_v12 = vshll.u32 %v15213_v9, 16  ;;  %v2438_v46 = vshrl.u32 %v15218_v19, 16 }
 0x29a   :  { %v2401_v28 = vsel %vm14632_vm7, %v2393_v61, %v2400_v25  ;;  %v15528_v6 = vor.u32 %v2407_v35, %v2406_v62  ;;  %v2410_v1 = vrot.slane %v2406_v62, 4  ;;  %v2417_v7 = vor.u32 %v2415_v48, %v15519_v44 }
 0x29b   :  { %2982 = vst [vmem:[#allocation2 + $0x4c] sm:$0xf] %v2401_v28  ;;  %v2423_v22 = vrot.slane %v2421_v34, 7  ;;  %v15532_v32 = vrot.slane %v2429_v51, 7  ;;  %v2440_v57 = vrot.slane %v2438_v46, 7  ;;  %v2441_v61 = vshll.u32 %v15218_v19, 16 }
 0x29c   :  { %v2418_v25 = vsel %vm14632_vm7, %v2410_v1, %v2417_v7  ;;  %v2446_v9 = vshrl.u32 %v15223_v43, 16  ;;  %v2449_v35 = vshll.u32 %v15223_v43, 16  ;;  %v2455_v62 = vshrl.u32 %v15228_v38, 16 }
 0x29d   :  { %v15540_v41 = vor.u32 %v2424_v39, %v2423_v22  ;;  %v2427_v48 = vrot.slane %v2423_v22, 4  ;;  %v2434_v28 = vor.u32 %v2432_v12, %v15532_v32  ;;  %2989 = vst [vmem:[#allocation2 + $0x58] sm:$0xf] %v2418_v25  ;;  %v15544_v51 = vor.u32 %v2441_v61, %v2440_v57 }
 0x29e   :  { %v2444_v19 = vrot.slane %v2440_v57, 4  ;;  %v15546_v46 = vrot.slane %v2446_v9, 7  ;;  %v2457_v1 = vrot.slane %v2455_v62, 7  ;;  %v2458_v43 = vshll.u32 %v15228_v38, 16 }
 0x29f   :  { %v2435_v7 = vsel %vm14632_vm7, %v2427_v48, %v2434_v28  ;;  %v2463_v39 = vshrl.u32 %v15233_v45, 16  ;;  %v2466_v22 = vshll.u32 %v15233_v45, 16  ;;  %v2472_v61 = vshrl.u32 %v15238_v42, 16 }
 0x2a0   :  { %v2451_v12 = vor.u32 %v2449_v35, %v15546_v46  ;;  %v2461_v25 = vrot.slane %v2457_v1, 4  ;;  %2996 = vst [vmem:[#allocation2 + $0x64] sm:$0xf] %v2435_v7  ;;  %v15556_v57 = vor.u32 %v2458_v43, %v2457_v1  ;;  %v2475_v62 = vshll.u32 %v15238_v42, 16 }
 0x2a1   :  { %v15558_v9 = vrot.slane %v2463_v39, 7  ;;  %v2480_v38 = vshrl.u32 %v15243_v50, 16  ;;  %v2474_v45 = vrot.slane %v2472_v61, 7  ;;  %v2483_v35 = vshll.u32 %v15243_v50, 16 }
 0x2a2   :  { %v2452_v48 = vsel %vm14632_vm7, %v2444_v19, %v2451_v12  ;;  %v2489_v28 = vshrl.u32 %v15248_v37, 16  ;;  %v2492_v43 = vshll.u32 %v15248_v37, 16  ;;  %v2497_v19 = vshrl.u32 %v15253_v33, 16 }
 0x2a3   :  { %v2468_v34 = vor.u32 %v2466_v22, %v15558_v9  ;;  %v15568_v1 = vrot.slane %v2480_v38, 7  ;;  %3003 = vst [vmem:[#allocation2 + $0x70] sm:$0xf] %v2452_v48  ;;  %v15571_v42 = vor.u32 %v2475_v62, %v2474_v45  ;;  %v2478_v39 = vrot.slane %v2474_v45, 4 }
 0x2a4   :  { %v2491_v30 = vrot.slane %v2489_v28, 7  ;;  %v2500_v61 = vshll.u32 %v15253_v33, 16  ;;  %v15581_v37 = vrot.slane %v2497_v19, 7  ;;  %v2506_v62 = vshrl.u32 %v15258_v13, 16 }
 0x2a5   :  { %v2469_v50 = vsel %vm14632_vm7, %v2461_v25, %v2468_v34  ;;  %v2485_v12 = vor.u32 %v2483_v35, %v15568_v1  ;;  %v2509_v45 = vshll.u32 %v15258_v13, 16  ;;  %v2514_v34 = vshrl.u32 %v15263_v8, 16 }
 0x2a6   :  { %v15579_v38 = vor.u32 %v2492_v43, %v2491_v30  ;;  %v2495_v7 = vrot.slane %v2491_v30, 4  ;;  %3010 = vst [vmem:[#allocation2 + $0x7c] sm:$0xf] %v2469_v50  ;;  %v2517_v25 = vshll.u32 %v15263_v8, 16  ;;  %v2502_v35 = vor.u32 %v2500_v61, %v15581_v37 }
 0x2a7   :  { %v2486_v48 = vsel %vm14632_vm7, %v2478_v39, %v2485_v12  ;;  %v2508_v28 = vrot.slane %v2506_v62, 7  ;;  %v2523_v30 = vshrl.u32 %v15268_v4, 16  ;;  %v15592_v43 = vrot.slane %v2514_v34, 7 }
 0x2a8   :  { %3017 = vst [vmem:[#allocation2 + $0x88] sm:$0xf] %v2486_v48  ;;  %v2526_v19 = vshll.u32 %v15268_v4, 16  ;;  %v2531_v39 = vshrl.u32 %v15273_v21, 16  ;;  %v2534_v13 = vshll.u32 %v15273_v21, 16  ;;  %v2503_v50 = vsel %vm14632_vm7, %v2495_v7, %v2502_v35 }
 0x2a9   :  { %v15599_v8 = vor.u32 %v2509_v45, %v2508_v28  ;;  %v2512_v12 = vrot.slane %v2508_v28, 4  ;;  %v2525_v61 = vrot.slane %v2523_v30, 7  ;;  %v2519_v62 = vor.u32 %v2517_v25, %v15592_v43  ;;  %3024 = vst [vmem:[#allocation2 + $0x94] sm:$0xf] %v2503_v50 }
 0x2aa   :  { %v15603_v48 = vrot.slane %v2531_v39, 7  ;;  %v2540_v34 = vshrl.u32 %v15278_v20, 16  ;;  %v2543_v21 = vshll.u32 %v15278_v20, 16  ;;  %v2548_v7 = vshrl.u32 %v15283_v26, 16 }
 0x2ab   :  { %v15606_v4 = vor.u32 %v2526_v19, %v2525_v61  ;;  %v2529_v22 = vrot.slane %v2525_v61, 4  ;;  %v2520_v45 = vsel %vm14632_vm7, %v2512_v12, %v2519_v62  ;;  %v2551_v39 = vshll.u32 %v15283_v26, 16 }
 0x2ac   :  { %v2536_v35 = vor.u32 %v2534_v13, %v15603_v48  ;;  %v2542_v28 = vrot.slane %v2540_v34, 7  ;;  %v15614_v30 = vrot.slane %v2548_v7, 7  ;;  %v2557_v19 = vshrl.u32 %v15288_v59, 16  ;;  %3031 = vst [vmem:[#allocation2 + $0xa0] sm:$0xf] %v2520_v45 }
 0x2ad   :  { %v2560_v50 = vshll.u32 %v15288_v59, 16  ;;  %v2565_v13 = vshrl.u32 %v15293_v56, 16  ;;  %v2568_v26 = vshll.u32 %v15293_v56, 16  ;;  %v2574_v59 = vshrl.u32 %v15298_v58, 16 }
 0x2ae   :  { %v2537_v20 = vsel %vm14632_vm7, %v2529_v22, %v2536_v35  ;;  %v15621_v61 = vor.u32 %v2543_v21, %v2542_v28  ;;  %v2546_v12 = vrot.slane %v2542_v28, 4  ;;  %v2553_v62 = vor.u32 %v2551_v39, %v15614_v30 }
 0x2af   :  { %v2559_v7 = vrot.slane %v2557_v19, 7  ;;  %3038 = vst [vmem:[#allocation2 + $0xac] sm:$0xf] %v2537_v20  ;;  %v15627_v25 = vrot.slane %v2565_v13, 7  ;;  %v2577_v45 = vshll.u32 %v15298_v58, 16  ;;  %v2582_v22 = vshrl.u32 %v15303_v0, 16 }
 0x2b0   :  { %v2554_v21 = vsel %vm14632_vm7, %v2546_v12, %v2553_v62  ;;  %v2585_v39 = vshll.u32 %v15303_v0, 16  ;;  %v2576_v20 = vrot.slane %v2574_v59, 7  ;;  %v2591_v58 = vshrl.u32 %v15308_v16, 16 }
 0x2b1   :  { %19914 = vst [vmem:[#allocation28_spill] sm:$0xff] %v15627_v25  ;;  %v15634_v35 = vor.u32 %v2560_v50, %v2559_v7  ;;  %v2563_v28 = vrot.slane %v2559_v7, 4  ;;  %v2570_v19 = vor.u32 %v2568_v26, %v15627_v25  ;;  %v15639_v13 = vrot.slane %v2582_v22, 7  ;;  %3045 = vst [vmem:[#allocation2 + $0xb8] sm:$0xf] %v2554_v21  ;;  %v19919_v21 = vld [vmem:[#allocation18_spill] sm:$0xff] }
 0x2b2   :  { %v2594_v34 = vshll.u32 %v15308_v16, 16  ;;  %v2599_v33 = vshrl.u32 %v15313_v55, 16  ;;  %v2602_v50 = vshll.u32 %v15313_v55, 16  ;;  %v15647_v0 = vor.u32 %v2577_v45, %v2576_v20 }
 0x2b3   :  { %19915 = vst [vmem:[#allocation30_spill] sm:$0xff] %v15634_v35  ;;  %19916 = vst [vmem:[#allocation31_spill] sm:$0xff] %v15639_v13  ;;  %v2571_v12 = vsel %vm14632_vm7, %v2563_v28, %v2570_v19  ;;  %v2580_v62 = vrot.slane %v2576_v20, 4  ;;  %v2587_v7 = vor.u32 %v2585_v39, %v15639_v13  ;;  %v2593_v59 = vrot.slane %v2591_v58, 7  ;;  %v15826_v35 = vld [vmem:[#allocation2 + $0x80] sm:$0x1] }
 0x2b4   :  { %19917 = vst [vmem:[#allocation32_spill] sm:$0xff] %v15647_v0  ;;  %v15651_v22 = vrot.slane %v2599_v33, 7  ;;  %v2608_v56 = vshrl.u32 %v19919_v21, 16  ;;  %3052 = vst [vmem:[#allocation2 + $0xc4] sm:$0xf] %v2571_v12  ;;  %v2611_v55 = vshll.u32 %v19919_v21, 16 }
 0x2b5   :  { %v2588_v16 = vsel %vm14632_vm7, %v2580_v62, %v2587_v7  ;;  %v2616_v28 = vshrl.u32 %v15323_v63, 16  ;;  %v2619_v45 = vshll.u32 %v15323_v63, 16  ;;  %v15659_v19 = vor.u32 %v2594_v34, %v2593_v59 }
 0x2b6   :  { %19918 = vst [vmem:[#allocation33_spill] sm:$0xff] %v15651_v22  ;;  %v2597_v39 = vrot.slane %v2593_v59, 4  ;;  %v2604_v20 = vor.u32 %v2602_v50, %v15651_v22  ;;  %3059 = vst [vmem:[#allocation2 + $0xe8] sm:$0xf] %v2588_v16  ;;  %v2610_v58 = vrot.slane %v2608_v56, 7  ;;  %v2625_v12 = vshrl.u32 %v15328_v29, 16 }
 0x2b7   :  { %19920 = vst [vmem:[#allocation9_spill] sm:$0xff] %v15659_v19  ;;  %v15663_v26 = vrot.slane %v2616_v28, 7  ;;  %v2628_v62 = vshll.u32 %v15328_v29, 16  ;;  %v2633_v63 = vshrl.u32 %v15333_v5, 16  ;;  %v2636_v34 = vshll.u32 %v15333_v5, 16  ;;  %v19924_v5 = vld [vmem:[#allocation11_spill] sm:$0xff] }
 0x2b8   :  { %v2605_v7 = vsel %vm14632_vm7, %v2597_v39, %v2604_v20  ;;  %v2642_v59 = vshrl.u32 %v15338_v24, 16  ;;  %v15672_v50 = vor.u32 %v2611_v55, %v2610_v58  ;;  %v2614_v21 = vrot.slane %v2610_v58, 4  ;;  %v19929_v16 = vld [vmem:[#allocation22_spill] sm:$0xff] }
 0x2b9   :  { %19921 = vst [vmem:[#allocation12_spill] sm:$0xff] %v15663_v26  ;;  %v2621_v56 = vor.u32 %v2619_v45, %v15663_v26  ;;  %3066 = vst [vmem:[#allocation2 + $0xf4] sm:$0xf] %v2605_v7  ;;  %v2627_v28 = vrot.slane %v2625_v12, 7  ;;  %v15676_v33 = vrot.slane %v2633_v63, 7  ;;  %v2645_v39 = vshll.u32 %v15338_v24, 16 }
 0x2ba   :  { %19922 = vst [vmem:[#allocation14_spill] sm:$0xff] %v15672_v50  ;;  %v2644_v29 = vrot.slane %v2642_v59, 7  ;;  %v2650_v22 = vshrl.u32 %v19924_v5, 16  ;;  %v2653_v55 = vshll.u32 %v19924_v5, 16  ;;  %v19925_v50 = vld [vmem:[#allocation24_spill] sm:$0xff] }
 0x2bb   :  { %19923 = vst [vmem:[#allocation18_spill] sm:$0xff] %v15676_v33  ;;  %v2622_v20 = vsel %vm14632_vm7, %v2614_v21, %v2621_v56  ;;  %v2659_v58 = vshrl.u32 %v19925_v50, 16  ;;  %v15684_v19 = vor.u32 %v2628_v62, %v2627_v28  ;;  %v2631_v45 = vrot.slane %v2627_v28, 4  ;;  %v15807_v26 = vld [vmem:[#allocation2 + $0x54] sm:$0xf] }
 0x2bc   :  { %v2638_v7 = vor.u32 %v2636_v34, %v15676_v33  ;;  %3073 = vst [vmem:[#allocation2 + $0x100] sm:$0xf] %v2622_v20  ;;  %v15688_v63 = vor.u32 %v2645_v39, %v2644_v29  ;;  %v2648_v24 = vrot.slane %v2644_v29, 4  ;;  %v15690_v59 = vrot.slane %v2650_v22, 7  ;;  %v19930_v39 = vld [vmem:[#allocation23_spill] sm:$0xff] }
 0x2bd   :  { %19926 = vst [vmem:[#allocation11_spill] sm:$0xff] %v15684_v19  ;;  %v2661_v21 = vrot.slane %v2659_v58, 7  ;;  %v2662_v5 = vshll.u32 %v19925_v50, 16  ;;  %v2667_v62 = vshrl.u32 %v19929_v16, 16  ;;  %v2670_v28 = vshll.u32 %v19929_v16, 16 }
 0x2be   :  { %19927 = vst [vmem:[#allocation24_spill] sm:$0xff] %v15688_v63  ;;  %19928 = vst [vmem:[#allocation35_spill] sm:$0xff] %v15690_v59  ;;  %v2639_v56 = vsel %vm14632_vm7, %v2631_v45, %v2638_v7  ;;  %v2655_v34 = vor.u32 %v2653_v55, %v15690_v59  ;;  %v2676_v63 = vshrl.u32 %v19930_v39, 16  ;;  %v2679_v58 = vshll.u32 %v19930_v39, 16  ;;  %v19935_v59 = vld [vmem:[#allocation26_spill] sm:$0xff] }
 0x2bf   :  { %v2665_v20 = vrot.slane %v2661_v21, 4  ;;  %3080 = vst [vmem:[#allocation2 + $0x10c] sm:$0xf] %v2639_v56  ;;  %v15700_v22 = vor.u32 %v2662_v5, %v2661_v21  ;;  %v15702_v29 = vrot.slane %v2667_v62, 7  ;;  %v2684_v50 = vshrl.u32 %v15363_v23, 16 }
 0x2c0   :  { %v2656_v45 = vsel %vm14632_vm7, %v2648_v24, %v2655_v34  ;;  %v2678_v16 = vrot.slane %v2676_v63, 7  ;;  %v2687_v55 = vshll.u32 %v15363_v23, 16  ;;  %v2693_v7 = vshrl.u32 %v15368_v17, 16  ;;  %v2972_v33 = vld [vmem:[#allocation2 + $0x3c] sm:$0xf] }
 0x2c1   :  { %19931 = vst [vmem:[#allocation22_spill] sm:$0xff] %v15700_v22  ;;  %19932 = vst [vmem:[#allocation23_spill] sm:$0xff] %v15702_v29  ;;  %v2672_v12 = vor.u32 %v2670_v28, %v15702_v29  ;;  %v15712_v21 = vrot.slane %v2684_v50, 7  ;;  %v2696_v5 = vshll.u32 %v15368_v17, 16  ;;  %v2701_v24 = vshrl.u32 %v19935_v59, 16 }
 0x2c2   :  { %3087 = vst [vmem:[#allocation2 + $0x118] sm:$0xf] %v2656_v45  ;;  %v15715_v62 = vor.u32 %v2679_v58, %v2678_v16  ;;  %v2682_v39 = vrot.slane %v2678_v16, 4  ;;  %v2695_v22 = vrot.slane %v2693_v7, 7  ;;  %v2704_v34 = vshll.u32 %v19935_v59, 16 }
 0x2c3   :  { %19933 = vst [vmem:[#allocation36_spill] sm:$0xff] %v15712_v21  ;;  %v2673_v23 = vsel %vm14632_vm7, %v2665_v20, %v2672_v12  ;;  %v2689_v63 = vor.u32 %v2687_v55, %v15712_v21  ;;  %v15725_v17 = vrot.slane %v2701_v24, 7  ;;  %v2710_v58 = vshrl.u32 %v15378_v49, 16  ;;  %v2969_v29 = vld [vmem:[#allocation2 + $0x38] sm:$0x1] }
 0x2c4   :  { %19934 = vst [vmem:[#allocation37_spill] sm:$0xff] %v15715_v62  ;;  %v15723_v50 = vor.u32 %v2696_v5, %v2695_v22  ;;  %v2699_v56 = vrot.slane %v2695_v22, 4  ;;  %3094 = vst [vmem:[#allocation2 + $0x124] sm:$0xf] %v2673_v23  ;;  %v2713_v16 = vshll.u32 %v15378_v49, 16  ;;  %v2718_v12 = vshrl.u32 %v15383_v40, 16 }
 0x2c5   :  { %19937 = vst [vmem:[#allocation38_spill] sm:$0xff] %v15725_v17  ;;  %v2690_v45 = vsel %vm14632_vm7, %v2682_v39, %v2689_v63  ;;  %v2721_v20 = vshll.u32 %v15383_v40, 16  ;;  %v2706_v55 = vor.u32 %v2704_v34, %v15725_v17  ;;  %v2712_v7 = vrot.slane %v2710_v58, 7  ;;  %v19942_v17 = vld [vmem:[#allocation29_spill] sm:$0xff]  ;;  %v2965_v62 = vld [vmem:[#allocation2 + $0x30] sm:$0xf] }
 0x2c6   :  { %19936 = vst [vmem:[#allocation26_spill] sm:$0xff] %v15723_v50  ;;  %v2727_v22 = vshrl.u32 %v15388_v31, 16  ;;  %3101 = vst [vmem:[#allocation2 + $0x130] sm:$0xf] %v2690_v45  ;;  %v15736_v5 = vrot.slane %v2718_v12, 7  ;;  %v2730_v24 = vshll.u32 %v15388_v31, 16 }
 0x2c7   :  { %v2735_v39 = vshrl.u32 %v15393_v36, 16  ;;  %v2738_v49 = vshll.u32 %v15393_v36, 16  ;;  %v2707_v23 = vsel %vm14632_vm7, %v2699_v56, %v2706_v55  ;;  %v15743_v40 = vor.u32 %v2713_v16, %v2712_v7  ;;  %v15820_v19 = vld [vmem:[#allocation2 + $0x6c] sm:$0xf] }
 0x2c8   :  { %19938 = vst [vmem:[#allocation39_spill] sm:$0xff] %v15736_v5  ;;  %v2716_v63 = vrot.slane %v2712_v7, 4  ;;  %v2729_v34 = vrot.slane %v2727_v22, 7  ;;  %v2723_v58 = vor.u32 %v2721_v20, %v15736_v5  ;;  %v2744_v12 = vshrl.u32 %v15398_v14, 16  ;;  %3108 = vst [vmem:[#allocation2 + $0x13c] sm:$0xf] %v2707_v23 }
 0x2c9   :  { %19939 = vst [vmem:[#allocation40_spill] sm:$0xff] %v15743_v40  ;;  %v15747_v45 = vrot.slane %v2735_v39, 7  ;;  %v2747_v36 = vshll.u32 %v15398_v14, 16  ;;  %v2752_v56 = vshrl.u32 %v19942_v17, 16  ;;  %v2755_v39 = vshll.u32 %v19942_v17, 16  ;;  %v19944_v23 = vld [vmem:[#allocation10_spill] sm:$0xff] }
 0x2ca   :  { %v15750_v31 = vor.u32 %v2730_v24, %v2729_v34  ;;  %v2733_v28 = vrot.slane %v2729_v34, 4  ;;  %v2724_v16 = vsel %vm14632_vm7, %v2716_v63, %v2723_v58  ;;  %v2746_v7 = vrot.slane %v2744_v12, 7  ;;  %v19946_v58 = vld [vmem:[#allocation13_spill] sm:$0xff] }
 0x2cb   :  { %19940 = vst [vmem:[#allocation41_spill] sm:$0xff] %v15747_v45  ;;  %v2740_v55 = vor.u32 %v2738_v49, %v15747_v45  ;;  %v15758_v22 = vrot.slane %v2752_v56, 7  ;;  %v2761_v24 = vshrl.u32 %v19944_v23, 16  ;;  %v2764_v34 = vshll.u32 %v19944_v23, 16  ;;  %3115 = vst [vmem:[#allocation2 + $0x148] sm:$0xf] %v2724_v16 }
 0x2cc   :  { %19941 = vst [vmem:[#allocation42_spill] sm:$0xff] %v15750_v31  ;;  %v15765_v59 = vor.u32 %v2747_v36, %v2746_v7  ;;  %v2750_v63 = vrot.slane %v2746_v7, 4  ;;  %v2769_v49 = vshrl.u32 %v19946_v58, 16  ;;  %v2772_v17 = vshll.u32 %v19946_v58, 16  ;;  %v19948_v23 = vld [vmem:[#allocation15_spill] sm:$0xff] }
 0x2cd   :  { %19943 = vst [vmem:[#allocation29_spill] sm:$0xff] %v15758_v22  ;;  %v2741_v14 = vsel %vm14632_vm7, %v2733_v28, %v2740_v55  ;;  %v2757_v20 = vor.u32 %v2755_v39, %v15758_v22  ;;  %v2763_v56 = vrot.slane %v2761_v24, 7  ;;  %v2778_v16 = vshrl.u32 %v19948_v23, 16  ;;  %v19949_v28 = vld [vmem:[#allocation16_spill] sm:$0xff]  ;;  %v2944_v22 = vld [vmem:[#allocation2 + $0xc] sm:$0xf] }
 0x2ce   :  { %19945 = vst [vmem:[#allocation10_spill] sm:$0xff] %v15765_v59  ;;  %3122 = vst [vmem:[#allocation2 + $0x154] sm:$0xf] %v2741_v14  ;;  %v15771_v45 = vrot.slane %v2769_v49, 7  ;;  %v2781_v31 = vshll.u32 %v19948_v23, 16  ;;  %v2786_v36 = vshrl.u32 %v19949_v28, 16 }
 0x2cf   :  { %v2758_v55 = vsel %vm14632_vm7, %v2750_v63, %v2757_v20  ;;  %v15778_v7 = vor.u32 %v2764_v34, %v2763_v56  ;;  %v2767_v39 = vrot.slane %v2763_v56, 4  ;;  %v2789_v12 = vshll.u32 %v19949_v28, 16  ;;  %v2948_v23 = vld [vmem:[#allocation2 + $0x14] sm:$0x1]  ;;  %v19953_v20 = vld [vmem:[#allocation20_spill] sm:$0xff] }
 0x2d0   :  { %19947 = vst [vmem:[#allocation13_spill] sm:$0xff] %v15771_v45  ;;  %v2774_v24 = vor.u32 %v2772_v17, %v15771_v45  ;;  %v2780_v58 = vrot.slane %v2778_v16, 7  ;;  %v15783_v49 = vrot.slane %v2786_v36, 7  ;;  %3129 = vst [vmem:[#allocation2 + $0x160] sm:$0xf] %v2758_v55  ;;  %v19952_v59 = vld [vmem:[#allocation19_spill] sm:$0xff] }
 0x2d1   :  { %19950 = vst [vmem:[#allocation15_spill] sm:$0xff] %v15778_v7  ;;  %v2795_v5 = vshrl.u32 %v19952_v59, 16  ;;  %v2798_v40 = vshll.u32 %v19952_v59, 16  ;;  %v2803_v34 = vshrl.u32 %v19953_v20, 16  ;;  %v2806_v63 = vshll.u32 %v19953_v20, 16  ;;  %v19956_v59 = vld [vmem:[#allocation21_spill] sm:$0xff] }
 0x2d2   :  { %19951 = vst [vmem:[#allocation16_spill] sm:$0xff] %v15783_v49  ;;  %v2951_v56 = vld [vmem:[#allocation2 + $0x18] sm:$0xf]  ;;  %v2955_v28 = vld [vmem:[#allocation2 + $0x20] sm:$0x1]  ;;  %v2775_v17 = vsel %vm14632_vm7, %v2767_v39, %v2774_v24  ;;  %v15791_v16 = vor.u32 %v2781_v31, %v2780_v58  ;;  %v2784_v36 = vrot.slane %v2780_v58, 4  ;;  %v2791_v55 = vor.u32 %v2789_v12, %v15783_v49 }
 0x2d3   :  { %v2958_v7 = vld [vmem:[#allocation2 + $0x24] sm:$0xf]  ;;  %v2797_v45 = vrot.slane %v2795_v5, 7  ;;  %v15795_v50 = vrot.slane %v2803_v34, 7  ;;  %v2812_v21 = vshrl.u32 %v19956_v59, 16  ;;  %v2815_v31 = vshll.u32 %v19956_v59, 16 }
 0x2d4   :  { %19954 = vst [vmem:[#allocation19_spill] sm:$0xff] %v15791_v16  ;;  %3136 = vst [vmem:[#allocation2 + $0x16c] sm:$0xf] %v2775_v17  ;;  %v2962_v20 = vld [vmem:[#allocation2 + $0x2c] sm:$0x1]  ;;  %v2792_v39 = vsel %vm14632_vm7, %v2784_v36, %v2791_v55  ;;  %v19957_v24 = vld [vmem:[#allocation25_spill] sm:$0xff] }
 0x2d5   :  { %19955 = vst [vmem:[#allocation20_spill] sm:$0xff] %v15795_v50  ;;  %v2820_v58 = vshrl.u32 %v19957_v24, 16  ;;  %v2823_v12 = vshll.u32 %v19957_v24, 16  ;;  %v2976_v14 = vld [vmem:[#allocation2 + $0x44] sm:$0x1]  ;;  %v15803_v49 = vor.u32 %v2798_v40, %v2797_v45  ;;  %v2801_v16 = vrot.slane %v2797_v45, 4 }
 0x2d6   :  { %v2979_v5 = vld [vmem:[#allocation2 + $0x48] sm:$0xf]  ;;  %v2983_v34 = vld [vmem:[#allocation2 + $0x50] sm:$0x1]  ;;  %v2808_v17 = vor.u32 %v2806_v63, %v15795_v50  ;;  %3143 = vst [vmem:[#allocation2 + $0x178] sm:$0xf] %v2792_v39 }
 0x2d7   :  { %19958 = vst [vmem:[#allocation21_spill] sm:$0xff] %v15803_v49  ;;  %v2990_v36 = vld [vmem:[#allocation2 + $0x5c] sm:$0x1]  ;;  %v15809_v55 = vld [vmem:[#allocation2 + $0x60] sm:$0xf]  ;;  %v2814_v13 = vrot.slane %v2812_v21, 7 }
 0x2d8   :  { %v2997_v59 = vld [vmem:[#allocation2 + $0x68] sm:$0x1]  ;;  %v15811_v0 = vrot.slane %v2820_v58, 7  ;;  %v19959_v24 = vld [vmem:[#allocation27_spill] sm:$0xff]  ;;  %v19961_v45 = vrot.slane %v15453_v27, 4  ;;  %v2809_v21 = vsel %vm14632_vm7, %v2801_v16, %v2808_v17  ;;  %v2952_v27 = vsel %vm15110_vm9, %v15464_v60, %v2951_v56 }
 0x2d9   :  { %v2945_v40 = vsel %vm15110_vm9, %v19959_v24, %v2944_v22  ;;  %v15822_v39 = vld [vmem:[#allocation2 + $0x74] sm:$0x1]  ;;  %v15824_v50 = vld [vmem:[#allocation2 + $0x78] sm:$0xf]  ;;  %v19963_v22 = vrot.slane %v15459_v18, 4  ;;  %v2959_v58 = vsel %vm15110_vm9, %v15477_v10, %v2958_v7  ;;  %v2818_v60 = vrot.slane %v2814_v13, 4 }
 0x2da   :  { %v2949_v63 = vsel %vm13628_vm3, %v19961_v45, %v2948_v23  ;;  %2946 = vst [vmem:[#allocation2 + $0xc] sm:$0xf] %v2945_v40  ;;  %v15840_v24 = vld [vmem:[#allocation2 + $0x84] sm:$0xf]  ;;  %v15842_v45 = vld [vmem:[#allocation2 + $0x8c] sm:$0x1]  ;;  %v15848_v40 = vor.u32 %v2815_v31, %v2814_v13  ;;  %v2825_v18 = vor.u32 %v2823_v12, %v15811_v0  ;;  %v2966_v12 = vsel %vm15110_vm9, %v15489_v2, %v2965_v62 }
 0x2db   :  { %2950 = vst [vmem:[#allocation2 + $0x14] sm:$0x1] %v2949_v63  ;;  %v2956_v23 = vsel %vm13628_vm3, %v19963_v22, %v2955_v28  ;;  %v15844_v16 = vld [vmem:[#allocation2 + $0x90] sm:$0xf]  ;;  %v15846_v17 = vld [vmem:[#allocation2 + $0x98] sm:$0x1]  ;;  %v2973_v22 = vsel %vm15110_vm9, %v15501_v15, %v2972_v33  ;;  %v2980_v33 = vsel %vm15110_vm9, %v15515_v52, %v2979_v5 }
 0x2dc   :  { %v2827_v56 = vrot.slane %v15811_v0, 4  ;;  %2953 = vst [vmem:[#allocation2 + $0x18] sm:$0xf] %v2952_v27  ;;  %2957 = vst [vmem:[#allocation2 + $0x20] sm:$0x1] %v2956_v23  ;;  %v19964_v31 = vrot.slane %v15468_v47, 4  ;;  %v2826_v2 = vsel %vm14632_vm7, %v2818_v60, %v2825_v18 }
 0x2dd   :  { %2960 = vst [vmem:[#allocation2 + $0x24] sm:$0xf] %v2959_v58  ;;  %3150 = vst [vmem:[#allocation2 + $0x184] sm:$0xf] %v2809_v21  ;;  %v15852_v10 = vld [vmem:[#allocation2 + $0x9c] sm:$0xf] }
 0x2de   :  { %v15854_v7 = vld [vmem:[#allocation2 + $0xa4] sm:$0x1]  ;;  %v15856_v28 = vld [vmem:[#allocation2 + $0xa8] sm:$0xf]  ;;  %v15858_v63 = vld [vmem:[#allocation2 + $0xb0] sm:$0x1]  ;;  %v2963_v13 = vsel %vm13628_vm3, %v19964_v31, %v2962_v20 }
 0x2df   :  { %v19965_v27 = vrot.slane %v15491_v54, 4  ;;  %v15874_v23 = vld [vmem:[#allocation2 + $0xb4] sm:$0xf]  ;;  %v15876_v58 = vld [vmem:[#allocation2 + $0xbc] sm:$0x1]  ;;  %v19966_v54 = vrot.slane %v15493_v3, 4  ;;  %v2987_v3 = vsel %vm15110_vm9, %v15528_v6, %v15807_v26 }
 0x2e0   :  { %v15878_v47 = vld [vmem:[#allocation2 + $0xc0] sm:$0xf]  ;;  %v15880_v20 = vld [vmem:[#allocation2 + $0xc8] sm:$0x1]  ;;  %2964 = vst [vmem:[#allocation2 + $0x2c] sm:$0x1] %v2963_v13 }
 0x2e1   :  { %v2970_v21 = vsel %vm13628_vm3, %v19965_v27, %v2969_v29  ;;  %2967 = vst [vmem:[#allocation2 + $0x30] sm:$0xf] %v2966_v12  ;;  %2974 = vst [vmem:[#allocation2 + $0x3c] sm:$0xf] %v2973_v22  ;;  %v2977_v15 = vsel %vm13628_vm3, %v19966_v54, %v2976_v14  ;;  %v19967_v29 = vrot.slane %v15507_v53, 4  ;;  %v19968_v53 = vrot.slane %v15519_v44, 4 }
 0x2e2   :  { %2971 = vst [vmem:[#allocation2 + $0x38] sm:$0x1] %v2970_v21  ;;  %v15897_v60 = vld [vmem:[#allocation2 + $0xec] sm:$0x1]  ;;  %v15899_v18 = vld [vmem:[#allocation2 + $0xf0] sm:$0xf]  ;;  %v2994_v14 = vsel %vm15110_vm9, %v15540_v41, %v15809_v55  ;;  %v3001_v41 = vsel %vm15110_vm9, %v15544_v51, %v15820_v19 }
 0x2e3   :  { %v2984_v62 = vsel %vm13628_vm3, %v19967_v29, %v2983_v34  ;;  %v15901_v31 = vld [vmem:[#allocation2 + $0xf8] sm:$0x1]  ;;  %2978 = vst [vmem:[#allocation2 + $0x44] sm:$0x1] %v2977_v15  ;;  %2981 = vst [vmem:[#allocation2 + $0x48] sm:$0xf] %v2980_v33  ;;  %v2991_v52 = vsel %vm13628_vm3, %v19968_v53, %v2990_v36  ;;  %v3008_v36 = vsel %vm15110_vm9, %v15556_v57, %v15824_v50 }
 0x2e4   :  { %2985 = vst [vmem:[#allocation2 + $0x50] sm:$0x1] %v2984_v62  ;;  %v19969_v5 = vrot.slane %v15532_v32, 4  ;;  %3157 = vst [vmem:[#allocation2 + $0x190] sm:$0xf] %v2826_v2  ;;  %v19970_v32 = vrot.slane %v15546_v46, 4  ;;  %v3015_v57 = vsel %vm15110_vm9, %v15571_v42, %v15840_v24  ;;  %v3022_v50 = vsel %vm15110_vm9, %v15579_v38, %v15844_v16 }
 0x2e5   :  { %v15919_v13 = vld [vmem:[#allocation2 + $0xfc] sm:$0xf]  ;;  %v15921_v12 = vld [vmem:[#allocation2 + $0x104] sm:$0x1]  ;;  %v15923_v6 = vld [vmem:[#allocation2 + $0x108] sm:$0xf]  ;;  %v3029_v38 = vsel %vm15110_vm9, %v15599_v8, %v15852_v10  ;;  %v3036_v16 = vsel %vm15110_vm9, %v15606_v4, %v15856_v28  ;;  %v3043_v4 = vsel %vm15110_vm9, %v15621_v61, %v15874_v23 }
 0x2e6   :  { %v2998_v34 = vsel %vm13628_vm3, %v19969_v5, %v2997_v59  ;;  %v15925_v44 = vld [vmem:[#allocation2 + $0x110] sm:$0x1]  ;;  %2988 = vst [vmem:[#allocation2 + $0x54] sm:$0xf] %v2987_v3  ;;  %2992 = vst [vmem:[#allocation2 + $0x5c] sm:$0x1] %v2991_v52  ;;  %v3005_v26 = vsel %vm13628_vm3, %v19970_v32, %v15822_v39 }
 0x2e7   :  { %2995 = vst [vmem:[#allocation2 + $0x60] sm:$0xf] %v2994_v14  ;;  %2999 = vst [vmem:[#allocation2 + $0x68] sm:$0x1] %v2998_v34  ;;  %v19971_v55 = vrot.slane %v15558_v9, 4  ;;  %v19972_v9 = vrot.slane %v15568_v1, 4 }
 0x2e8   :  { %v15945_v27 = vld [vmem:[#allocation2 + $0x114] sm:$0xf]  ;;  %v15947_v51 = vld [vmem:[#allocation2 + $0x11c] sm:$0x1]  ;;  %v15949_v19 = vld [vmem:[#allocation2 + $0x120] sm:$0xf] }
 0x2e9   :  { %v3012_v59 = vsel %vm13628_vm3, %v19971_v55, %v15826_v35  ;;  %v15951_v46 = vld [vmem:[#allocation2 + $0x128] sm:$0x1]  ;;  %3002 = vst [vmem:[#allocation2 + $0x6c] sm:$0xf] %v3001_v41  ;;  %3006 = vst [vmem:[#allocation2 + $0x74] sm:$0x1] %v3005_v26  ;;  %v3019_v35 = vsel %vm13628_vm3, %v19972_v9, %v15842_v45 }
 0x2ea   :  { %3009 = vst [vmem:[#allocation2 + $0x78] sm:$0xf] %v3008_v36  ;;  %3013 = vst [vmem:[#allocation2 + $0x80] sm:$0x1] %v3012_v59  ;;  %v19973_v39 = vrot.slane %v15581_v37, 4  ;;  %v19974_v37 = vrot.slane %v15592_v43, 4 }
 0x2eb   :  { %v15971_v22 = vld [vmem:[#allocation2 + $0x12c] sm:$0xf]  ;;  %v15973_v42 = vld [vmem:[#allocation2 + $0x134] sm:$0x1]  ;;  %v15975_v24 = vld [vmem:[#allocation2 + $0x138] sm:$0xf] }
 0x2ec   :  { %v3026_v21 = vsel %vm13628_vm3, %v19973_v39, %v15846_v17  ;;  %v15977_v1 = vld [vmem:[#allocation2 + $0x140] sm:$0x1]  ;;  %3016 = vst [vmem:[#allocation2 + $0x84] sm:$0xf] %v3015_v57  ;;  %3020 = vst [vmem:[#allocation2 + $0x8c] sm:$0x1] %v3019_v35  ;;  %v3033_v45 = vsel %vm13628_vm3, %v19974_v37, %v15854_v7 }
 0x2ed   :  { %3023 = vst [vmem:[#allocation2 + $0x90] sm:$0xf] %v3022_v50  ;;  %3027 = vst [vmem:[#allocation2 + $0x98] sm:$0x1] %v3026_v21  ;;  %v19975_v17 = vrot.slane %v15603_v48, 4  ;;  %v19976_v48 = vrot.slane %v15614_v30, 4 }
 0x2ee   :  { %v15997_v54 = vld [vmem:[#allocation2 + $0x144] sm:$0xf]  ;;  %v3116_v8 = vld [vmem:[#allocation2 + $0x14c] sm:$0x1]  ;;  %v15999_v10 = vld [vmem:[#allocation2 + $0x150] sm:$0xf] }
 0x2ef   :  { %v3040_v2 = vsel %vm13628_vm3, %v19975_v17, %v15858_v63  ;;  %v3123_v43 = vld [vmem:[#allocation2 + $0x158] sm:$0x1]  ;;  %3030 = vst [vmem:[#allocation2 + $0x9c] sm:$0xf] %v3029_v38  ;;  %3034 = vst [vmem:[#allocation2 + $0xa4] sm:$0x1] %v3033_v45  ;;  %v3047_v7 = vsel %vm13628_vm3, %v19976_v48, %v15876_v58 }
 0x2f0   :  { %3037 = vst [vmem:[#allocation2 + $0xa8] sm:$0xf] %v3036_v16  ;;  %3041 = vst [vmem:[#allocation2 + $0xb0] sm:$0x1] %v3040_v2  ;;  %v19977_v28 = vld [vmem:[#allocation30_spill] sm:$0xff]  ;;  %v19978_v15 = vld [vmem:[#allocation28_spill] sm:$0xff] }
 0x2f1   :  { %v3050_v63 = vsel %vm15110_vm9, %v19977_v28, %v15878_v47  ;;  %v19979_v33 = vrot.slane %v19978_v15, 4  ;;  %v16019_v62 = vld [vmem:[#allocation2 + $0x15c] sm:$0xf]  ;;  %v3130_v61 = vld [vmem:[#allocation2 + $0x164] sm:$0x1]  ;;  %v19981_v3 = vld [vmem:[#allocation31_spill] sm:$0xff] }
 0x2f2   :  { %v16021_v23 = vld [vmem:[#allocation2 + $0x168] sm:$0xf]  ;;  %v3137_v30 = vld [vmem:[#allocation2 + $0x170] sm:$0x1]  ;;  %3044 = vst [vmem:[#allocation2 + $0xb4] sm:$0xf] %v3043_v4 }
 0x2f3   :  { %v3054_v29 = vsel %vm13628_vm3, %v19979_v33, %v15880_v20  ;;  %3048 = vst [vmem:[#allocation2 + $0xbc] sm:$0x1] %v3047_v7  ;;  %3051 = vst [vmem:[#allocation2 + $0xc0] sm:$0xf] %v3050_v63  ;;  %v19980_v58 = vld [vmem:[#allocation32_spill] sm:$0xff]  ;;  %v19982_v53 = vrot.slane %v19981_v3, 4 }
 0x2f4   :  { %3055 = vst [vmem:[#allocation2 + $0xc8] sm:$0x1] %v3054_v29  ;;  %v3057_v47 = vsel %vm15110_vm9, %v19980_v58, %v15895_v11  ;;  %v19983_v52 = vld [vmem:[#allocation9_spill] sm:$0xff]  ;;  %v3140_v32 = vld [vmem:[#allocation2 + $0x174] sm:$0xf]  ;;  %v19986_v11 = vld [vmem:[#allocation14_spill] sm:$0xff] }
 0x2f5   :  { %v3061_v20 = vsel %vm13628_vm3, %v19982_v53, %v15897_v60  ;;  %v3064_v14 = vsel %vm15110_vm9, %v19983_v52, %v15899_v18  ;;  %v19984_v5 = vld [vmem:[#allocation33_spill] sm:$0xff]  ;;  %v3144_v26 = vld [vmem:[#allocation2 + $0x17c] sm:$0x1]  ;;  %3058 = vst [vmem:[#allocation2 + $0xe4] sm:$0xf] %v3057_v47  ;;  %v3071_v60 = vsel %vm15110_vm9, %v19986_v11, %v15919_v13  ;;  %v19989_v59 = vld [vmem:[#allocation11_spill] sm:$0xff] }
 0x2f6   :  { %v19985_v34 = vrot.slane %v19984_v5, 4  ;;  %3062 = vst [vmem:[#allocation2 + $0xec] sm:$0x1] %v3061_v20  ;;  %3065 = vst [vmem:[#allocation2 + $0xf0] sm:$0xf] %v3064_v14  ;;  %v19987_v36 = vld [vmem:[#allocation12_spill] sm:$0xff] }
 0x2f7   :  { %v19988_v18 = vrot.slane %v19987_v36, 4  ;;  %v19990_v57 = vld [vmem:[#allocation18_spill] sm:$0xff]  ;;  %v3147_v50 = vld [vmem:[#allocation2 + $0x180] sm:$0xf]  ;;  %3072 = vst [vmem:[#allocation2 + $0xfc] sm:$0xf] %v3071_v60 }
 0x2f8   :  { %v3068_v41 = vsel %vm13628_vm3, %v19985_v34, %v15901_v31  ;;  %v3078_v31 = vsel %vm15110_vm9, %v19989_v59, %v15923_v6  ;;  %v19991_v9 = vrot.slane %v19990_v57, 4  ;;  %v3151_v39 = vld [vmem:[#allocation2 + $0x188] sm:$0x1]  ;;  %v19992_v13 = vld [vmem:[#allocation24_spill] sm:$0xff]  ;;  %v19993_v21 = vld [vmem:[#allocation35_spill] sm:$0xff] }
 0x2f9   :  { %3069 = vst [vmem:[#allocation2 + $0xf8] sm:$0x1] %v3068_v41  ;;  %v3075_v55 = vsel %vm13628_vm3, %v19988_v18, %v15921_v12  ;;  %3079 = vst [vmem:[#allocation2 + $0x108] sm:$0xf] %v3078_v31  ;;  %v3085_v12 = vsel %vm15110_vm9, %v19992_v13, %v15945_v27  ;;  %v19994_v6 = vrot.slane %v19993_v21, 4  ;;  %v19995_v37 = vld [vmem:[#allocation22_spill] sm:$0xff] }
 0x2fa   :  { %v3082_v35 = vsel %vm13628_vm3, %v19991_v9, %v15925_v44  ;;  %3076 = vst [vmem:[#allocation2 + $0x104] sm:$0x1] %v3075_v55  ;;  %v3092_v44 = vsel %vm15110_vm9, %v19995_v37, %v15949_v19  ;;  %v19996_v45 = vld [vmem:[#allocation23_spill] sm:$0xff]  ;;  %v3154_v2 = vld [vmem:[#allocation2 + $0x18c] sm:$0xf]  ;;  %v19998_v27 = vld [vmem:[#allocation37_spill] sm:$0xff] }
 0x2fb   :  { %3083 = vst [vmem:[#allocation2 + $0x110] sm:$0x1] %v3082_v35  ;;  %v3089_v38 = vsel %vm13628_vm3, %v19994_v6, %v15947_v51  ;;  %v19997_v16 = vrot.slane %v19996_v45, 4  ;;  %v3158_v4 = vld [vmem:[#allocation2 + $0x194] sm:$0x1]  ;;  %v3099_v51 = vsel %vm15110_vm9, %v19998_v27, %v15971_v22  ;;  %v19999_v48 = vld [vmem:[#allocation36_spill] sm:$0xff] }
 0x2fc   :  { %3086 = vst [vmem:[#allocation2 + $0x114] sm:$0xf] %v3085_v12  ;;  %3090 = vst [vmem:[#allocation2 + $0x11c] sm:$0x1] %v3089_v38  ;;  %v20000_v19 = vrot.slane %v19999_v48, 4  ;;  %v20001_v28 = vld [vmem:[#allocation26_spill] sm:$0xff] }
 0x2fd   :  { %v3096_v17 = vsel %vm13628_vm3, %v19997_v16, %v15951_v46  ;;  %3093 = vst [vmem:[#allocation2 + $0x120] sm:$0xf] %v3092_v44  ;;  %v3106_v46 = vsel %vm15110_vm9, %v20001_v28, %v15975_v24  ;;  %v20002_v63 = vld [vmem:[#allocation38_spill] sm:$0xff]  ;;  %v1921_v29 = vld [vmem:[#allocation2] sm:$0x1]  ;;  %v20004_v22 = vld [vmem:[#allocation40_spill] sm:$0xff] }
 0x2fe   :  { %3097 = vst [vmem:[#allocation2 + $0x128] sm:$0x1] %v3096_v17  ;;  %v3103_v7 = vsel %vm13628_vm3, %v20000_v19, %v15973_v42  ;;  %v20003_v15 = vrot.slane %v20002_v63, 4  ;;  %3100 = vst [vmem:[#allocation2 + $0x12c] sm:$0xf] %v3099_v51  ;;  %v3113_v42 = vsel %vm15110_vm9, %v20004_v22, %v15997_v54  ;;  %v20005_v58 = vld [vmem:[#allocation39_spill] sm:$0xff] }
 0x2ff   :  { %3104 = vst [vmem:[#allocation2 + $0x134] sm:$0x1] %v3103_v7  ;;  %3107 = vst [vmem:[#allocation2 + $0x138] sm:$0xf] %v3106_v46  ;;  %v20006_v47 = vrot.slane %v20005_v58, 4  ;;  %v20007_v3 = vld [vmem:[#allocation42_spill] sm:$0xff] }
 0x300   :  { %v3110_v33 = vsel %vm13628_vm3, %v20003_v15, %v15977_v1  ;;  %v3120_v1 = vsel %vm15110_vm9, %v20007_v3, %v15999_v10  ;;  %v20008_v53 = vld [vmem:[#allocation41_spill] sm:$0xff]  ;;  %v2031_v14 = vld [vmem:[#allocation2 + $0x8] sm:$0x1]  ;;  %3114 = vst [vmem:[#allocation2 + $0x144] sm:$0xf] %v3113_v42  ;;  %v20013_v11 = vld [vmem:[#allocation15_spill] sm:$0xff] }
 0x301   :  { %3111 = vst [vmem:[#allocation2 + $0x140] sm:$0x1] %v3110_v33  ;;  %v3117_v24 = vsel %vm13628_vm3, %v20006_v47, %v3116_v8  ;;  %v20009_v20 = vrot.slane %v20008_v53, 4  ;;  %v3457_v5 = vld [vmem:[#allocation2 + $0x4] sm:$0xf]  ;;  %v20010_v54 = vld [vmem:[#allocation10_spill] sm:$0xff] }
 0x302   :  { %3118 = vst [vmem:[#allocation2 + $0x14c] sm:$0x1] %v3117_v24  ;;  %3121 = vst [vmem:[#allocation2 + $0x150] sm:$0xf] %v3120_v1  ;;  %v3127_v8 = vsel %vm15110_vm9, %v20010_v54, %v16019_v62  ;;  %v20011_v34 = vld [vmem:[#allocation29_spill] sm:$0xff]  ;;  %v20016_v62 = vld [vmem:[#allocation19_spill] sm:$0xff] }
 0x303   :  { %v3124_v52 = vsel %vm13628_vm3, %v20009_v20, %v3123_v43  ;;  %v20012_v41 = vrot.slane %v20011_v34, 4  ;;  %v3134_v43 = vsel %vm15110_vm9, %v20013_v11, %v16021_v23  ;;  %v20014_v60 = vld [vmem:[#allocation13_spill] sm:$0xff]  ;;  %v4519_v55 = vld [vmem:[#allocation2 + $0x90] sm:$0xe]  ;;  %v4520_v59 = vld [vmem:[#allocation2 + $0x94] sm:$0xf] }
 0x304   :  { %3125 = vst [vmem:[#allocation2 + $0x158] sm:$0x1] %v3124_v52  ;;  %v20015_v36 = vrot.slane %v20014_v60, 4  ;;  %v3459_v31 = vld [vmem:[#allocation2 + $0xc] sm:$0xf]  ;;  %v20017_v57 = vld [vmem:[#allocation16_spill] sm:$0xff] }
 0x305   :  { %v3131_v10 = vsel %vm13628_vm3, %v20012_v41, %v3130_v61  ;;  %3128 = vst [vmem:[#allocation2 + $0x15c] sm:$0xf] %v3127_v8  ;;  %3135 = vst [vmem:[#allocation2 + $0x168] sm:$0xf] %v3134_v43  ;;  %v3141_v61 = vsel %vm15110_vm9, %v20016_v62, %v3140_v32  ;;  %v20018_v9 = vrot.slane %v20017_v57, 4  ;;  %v20019_v35 = vld [vmem:[#allocation21_spill] sm:$0xff]  ;;  %v3155_v32 = vsel %vm15110_vm9, %v15848_v40, %v3154_v2 }
 0x306   :  { %v3138_v18 = vsel %vm13628_vm3, %v20015_v36, %v3137_v30  ;;  %3132 = vst [vmem:[#allocation2 + $0x164] sm:$0x1] %v3131_v10  ;;  %v3148_v30 = vsel %vm15110_vm9, %v20019_v35, %v3147_v50  ;;  %v20020_v13 = vld [vmem:[#allocation20_spill] sm:$0xff]  ;;  %v3460_v38 = vld [vmem:[#allocation2 + $0x10] sm:$0xf]  ;;  %v1922_v50 = vsel %vm13628_vm3, 0, %v1921_v29 }
 0x307   :  { %3139 = vst [vmem:[#allocation2 + $0x170] sm:$0x1] %v3138_v18  ;;  %v3145_v23 = vsel %vm13628_vm3, %v20018_v9, %v3144_v26  ;;  %v20021_v12 = vrot.slane %v20020_v13, 4  ;;  %v13132_v6 = vld [vmem:[#allocation2 + $0x9c] sm:$0xff]   ;;  %3142 = vst [vmem:[#allocation2 + $0x174] sm:$0xf] %v3141_v61  ;;  %v3159_v26 = vsel %vm13628_vm3, %v2827_v56, %v3158_v4 }
 0x308   :  { %3146 = vst [vmem:[#allocation2 + $0x17c] sm:$0x1] %v3145_v23  ;;  %3149 = vst [vmem:[#allocation2 + $0x180] sm:$0xf] %v3148_v30  ;;  %v4521_v44 = vld [vmem:[#allocation2 + $0x98] sm:$0x1]  ;;  %10120 = vmatprep.mubr.bf16.mxu1 %v13132_v6 }
 0x309   :  { %v3152_v21 = vsel %vm13628_vm3, %v20021_v12, %v3151_v39  ;;  %v2032_v39 = vsel %vm13635_vm5, 0, %v2031_v14  ;;  %v3461_v45 = vld [vmem:[#allocation2 + $0x14] sm:$0x1]  ;;  %3156 = vst [vmem:[#allocation2 + $0x18c] sm:$0xf] %v3155_v32  ;;  %v3565_v25 = vshll.u32 %v3457_v5, 16 }
 0x30a   :  { %3153 = vst [vmem:[#allocation2 + $0x188] sm:$0x1] %v3152_v21  ;;  %3160 = vst [vmem:[#allocation2 + $0x194] sm:$0x1] %v3159_v26  ;;  %v3569_v0 = vshrl.u32 %v3457_v5, 16  ;;  %v11932_v40 = vrot.slane %v4519_v55, 9 }
 0x30b   :  { %1923 = vst [vmem:[#allocation2] sm:$0x1] %v1922_v50  ;;  %2033 = vst [vmem:[#allocation2 + $0x8] sm:$0x1] %v2032_v39  ;;  %v4764_v56 = vrot.slane %v4520_v59, 5  ;;  %v16152_v17 = vrot.slane %v3565_v25, 5 }
 0x30c   :  { %v3462_v16 = vld [vmem:[#allocation2 + $0x18] sm:$0xf]  ;;  %v3571_v2 = vrot.slane %v3569_v0, 4  ;;  %v4767_v27 = vrot.slane %v4521_v44, 5  ;;  %v3580_v51 = vshrl.u32 %v3459_v31, 16  ;;  %v3583_v7 = vshll.u32 %v3459_v31, 16 }
 0x30d   :  { %v4765_v48 = vsel %vm16154_vm14, %v11932_v40, %v4764_v56  ;;  %v4766_v19 = vrot.slane %v4764_v56, 4  ;;  %v3589_v28 = vshll.u32 %v3460_v38, 16  ;;  %v3593_v15 = vshrl.u32 %v3460_v38, 16  ;;  %v13134_v22 = vld [vmem:[%s19582_s4 + $0x100] sm:$0xff]   ;;  %v13135_v1 = vld [vmem:[#allocation2 + $0xa8] sm:$0xff]   ;;  %v13141_v6 = vld [vmem:[%s19582_s4 + $0x110] sm:$0xff]  }
 0x30e   :  { %v3572_v46 = vor.u32 %v3571_v2, %v16152_v17  ;;  %v3582_v63 = vrot.slane %v3580_v51, 4  ;;  %v3599_v33 = vshll.u32 %v3461_v45, 16  ;;  %v3585_v42 = vrot.slane %v3583_v7, 5  ;;  %v3463_v52 = vld [vmem:[#allocation2 + $0x1c] sm:$0xf]  ;;  %v13138_v43 = vld [vmem:[%s19582_s4 + $0x108] sm:$0xff]  }
 0x30f   :  { %v4768_v29 = vsel %vm16154_vm14, %v4766_v19, %v4767_v27  ;;  %v3591_v58 = vrot.slane %v3589_v28, 5  ;;  %v3604_v47 = vshrl.u32 %v3462_v16, 16  ;;  %v3595_v53 = vrot.slane %v3593_v15, 4  ;;  %v4522_v11 = vld [vmem:[#allocation2 + $0x9c] sm:$0xe] }
 0x310   :  { %v3573_v24 = vrot.slane %v3572_v46, 4  ;;  %v11964_v3 = vcombine.low %v4765_v48, %v4768_v29  ;;  %v3601_v20 = vrot.slane %v3599_v33, 5  ;;  %v3586_v54 = vor.u32 %v3585_v42, %v3582_v63  ;;  %v4523_v59 = vld [vmem:[#allocation2 + $0xa0] sm:$0xf]  ;;  %v4524_v26 = vld [vmem:[#allocation2 + $0xa4] sm:$0x1] }
 0x311   :  { %v3596_v10 = vor.u32 %v3595_v53, %v3591_v58  ;;  %v3606_v36 = vrot.slane %v3604_v47, 4  ;;  %v3607_v18 = vshll.u32 %v3462_v16, 16  ;;  %v3613_v55 = vshll.u32 %v3463_v52, 16  ;;  %v3464_v30 = vld [vmem:[#allocation2 + $0x20] sm:$0x1] }
 0x312   :  { %v3456_v14 = vld [vmem:[#allocation2] sm:$0xf]  ;;  %v3458_v5 = vld [vmem:[#allocation2 + $0x8] sm:$0x1]  ;;  %10121 = vmatmul.mubr.bf16.vlgmr.msra.gmra.mrb[64].mxu1 %v11964_v3  ;;  %v3587_v60 = vrot.slane %v3586_v54, 4  ;;  %v20027_v23 = vmov 0  }
 0x313   :  { %v3556_v8 = vshrl.u32 %v3456_v14, 16  ;;  %v3559_v34 = vshll.u32 %v3456_v14, 16  ;;  %v3575_v41 = vshll.u32 %v3458_v5, 16  ;;  %10282 = vmatpush1.bf16.msra.mxu1 %v13134_v22  ;;  %10128 = vmatprep.mubr.bf16.mxu1 %v13135_v1  ;;  %v3597_v9 = vrot.slane %v3596_v10, 4  ;;  %v3465_v50 = vld [vmem:[#allocation2 + $0x24] sm:$0xf] }
 0x314   :  { %10283 = vmatprep.subr.bf16.mxu1 %v20027_v23  ;;  %v3592_v35 = vsel %vm16171_vm15, %v3587_v60, %v3591_v58  ;;  %v3609_v13 = vrot.slane %v3607_v18, 5  ;;  %v16178_v12 = vrot.slane %v3613_v55, 5  ;;  %v3617_v21 = vshrl.u32 %v3463_v52, 16  ;;  %v3466_v0 = vld [vmem:[#allocation2 + $0x28] sm:$0xf]  ;;  %v13133_v63 = vld [vmem:[#allocation2] sm:$0xff]  }
 0x315   :  { %v3558_v62 = vrot.slane %v3556_v8, 4  ;;  %v3561_v61 = vrot.slane %v3559_v34, 5  ;;  %v3577_v57 = vrot.slane %v3575_v41, 5  ;;  %v3602_v32 = vsel %vm16171_vm15, %v3597_v9, %v3601_v20  ;;  %v3467_v27 = vld [vmem:[#allocation2 + $0x2c] sm:$0x1]  ;;  %v13145_v14 = vld [vmem:[%s19582_s4 + $0x118] sm:$0xff]  }
 0x316   :  { %v3610_v44 = vor.u32 %v3609_v13, %v3606_v36  ;;  %v3619_v45 = vrot.slane %v3617_v21, 4  ;;  %v11933_v25 = vrot.slane %v4522_v11, 9  ;;  %v11889_v56 = vcombine.low %v3592_v35, %v3602_v32  ;;  %v4525_v28 = vld [vmem:[#allocation2 + $0xa8] sm:$0xe]  ;;  %v3468_v20 = vld [vmem:[#allocation2 + $0x30] sm:$0xf] }
 0x317   :  { %v3562_v38 = vor.u32 %v3561_v61, %v3558_v62  ;;  %v3578_v39 = vsel %vm16171_vm15, %v3573_v24, %v3577_v57  ;;  %10284 = vmatpush1.bf16.msra.mxu1 %v13138_v43  ;;  %v3623_v16 = vshll.u32 %v3464_v30, 16  ;;  %v4771_v2 = vrot.slane %v4523_v59, 5  ;;  %v4526_v24 = vld [vmem:[#allocation2 + $0xac] sm:$0xf]  ;;  %v3469_v52 = vld [vmem:[#allocation2 + $0x34] sm:$0xf] }
 0x318   :  { %10285 = vmatprep.subr.bf16.mxu1 %v20027_v23  ;;  %v3620_v51 = vor.u32 %v3619_v45, %v16178_v12  ;;  %v4774_v48 = vrot.slane %v4524_v26, 5  ;;  %v3628_v19 = vshrl.u32 %v3465_v50, 16  ;;  %v3631_v7 = vshll.u32 %v3465_v50, 16  ;;  %v13137_v8 = vld [vmem:[#allocation2 + $0xb4] sm:$0xff]   ;;  %v4527_v41 = vld [vmem:[#allocation2 + $0xb0] sm:$0x1] }
 0x319   :  { %v3563_v40 = vrot.slane %v3562_v38, 4  ;;  %v16192_v15 = vrot.slane %v3610_v44, 4  ;;  %v4773_v33 = vrot.slane %v4771_v2, 4  ;;  %v3637_v29 = vshll.u32 %v3466_v0, 16  ;;  %v16210_v62 = vld [vmem:[#allocation2 + $0xb8] sm:$0xf] }
 0x31a   :  { %v3621_v42 = vrot.slane %v3620_v51, 4  ;;  %v4772_v58 = vsel %vm16154_vm14, %v11933_v25, %v4771_v2  ;;  %v3630_v47 = vrot.slane %v3628_v19, 4  ;;  %v3633_v1 = vrot.slane %v3631_v7, 5  ;;  %v3470_v30 = vld [vmem:[#allocation2 + $0x38] sm:$0x1]  ;;  %v13148_v13 = vld [vmem:[%s19582_s4 + $0x120] sm:$0xff]  }
 0x31b   :  { %v3568_v46 = vsel %vm16171_vm15, %v3563_v40, %v16152_v17  ;;  %10286 = vmatpush1.bf16.msra.mxu1 %v13141_v6  ;;  %v4775_v3 = vsel %vm16154_vm14, %v4773_v33, %v4774_v48  ;;  %v16198_v53 = vrot.slane %v3637_v29, 5  ;;  %v3641_v17 = vshrl.u32 %v3466_v0, 16  ;;  %v3471_v32 = vld [vmem:[#allocation2 + $0x3c] sm:$0xf]  ;;  %v13272_v26 = vld [vmem:[%s19582_s4 + $0x80] sm:$0xff]   ;;  %v13136_v2 = vld [vmem:[#allocation2 + $0xc] sm:$0xff]  }
 0x31c   :  { %v11888_v22 = vcombine.low %v3568_v46, %v3578_v39  ;;  %10287 = vmatprep.subr.bf16.mxu1 %v20027_v23  ;;  %v3625_v5 = vrot.slane %v3623_v16, 5  ;;  %v11965_v54 = vcombine.low %v4772_v58, %v4775_v3  ;;  %v3647_v34 = vshll.u32 %v3467_v27, 16  ;;  %v4528_v25 = vld [vmem:[#allocation2 + $0xb4] sm:$0xe]  ;;  %v3472_v7 = vld [vmem:[#allocation2 + $0x40] sm:$0xf] }
 0x31d   :  { %v11934_v10 = vrot.slane %v4525_v28, 9  ;;  %v3634_v11 = vor.u32 %v3633_v1, %v3630_v47  ;;  %v3643_v43 = vrot.slane %v3641_v17, 4  ;;  %v4778_v60 = vrot.slane %v4526_v24, 5  ;;  %v13152_v28 = vld [vmem:[%s19582_s4 + $0x128] sm:$0xff]   ;;  %v4530_v33 = vld [vmem:[#allocation2 + $0xbc] sm:$0x1] }
 0x31e   :  { %9735 = vmatprep.mubr.bf16.mxu0 %v11888_v22  ;;  %v3616_v36 = vsel %vm16171_vm15, %v16192_v15, %v16178_v12  ;;  %v3626_v18 = vsel %vm16171_vm15, %v3621_v42, %v3625_v5  ;;  %10129 = vmatmul.mubr.bf16.gmra.mrb[68].mxu1 %v11965_v54  ;;  %v3652_v55 = vshrl.u32 %v3468_v20, 16  ;;  %v3655_v59 = vshll.u32 %v3468_v20, 16  ;;  %v16239_v22 = vld [vmem:[#allocation2 + $0x44] sm:$0x1]  ;;  %v2085_v42 = vld [vmem:[#allocation2 + $0xe0] sm:$0x1] }
 0x31f   :  { %9736 = vmatmul.mubr.bf16.vlgmr.msra.gmra.mrb[128].mxu0 %v13133_v63  ;;  %10136 = vmatprep.mubr.bf16.mxu1 %v13137_v8  ;;  %v3635_v61 = vrot.slane %v3634_v11, 4  ;;  %v3644_v57 = vor.u32 %v3643_v43, %v16198_v53  ;;  %v4780_v9 = vrot.slane %v4778_v60, 4  ;;  %v4781_v35 = vrot.slane %v4527_v41, 5  ;;  %v13273_v58 = vld [vmem:[%s19582_s4 + $0x88] sm:$0xff]   ;;  %v13140_v47 = vld [vmem:[#allocation2 + $0xc0] sm:$0xff]  }
 0x320   :  { %9743 = vmatprep.mubr.bf16.mxu0 %v11889_v56  ;;  %10288 = vmatpush1.bf16.msra.mxu1 %v13145_v14  ;;  %v3654_v12 = vrot.slane %v3652_v55, 4  ;;  %v3657_v21 = vrot.slane %v3655_v59, 5  ;;  %v3661_v6 = vshll.u32 %v3469_v52, 16  ;;  %v3665_v38 = vshrl.u32 %v3469_v52, 16  ;;  %v3474_v17 = vld [vmem:[#allocation2 + $0x48] sm:$0xf] }
 0x321   :  { %10289 = vmatprep.subr.bf16.mxu1 %v20027_v23  ;;  %9993 = vmatpush1.bf16.msra.mxu0 %v13272_v26  ;;  %v3645_v50 = vrot.slane %v3644_v57, 4  ;;  %v3649_v39 = vrot.slane %v3647_v34, 5  ;;  %v4779_v44 = vsel %vm16154_vm14, %v11934_v10, %v4778_v60  ;;  %v4782_v45 = vsel %vm16154_vm14, %v4780_v9, %v4781_v35  ;;  %v13155_v10 = vld [vmem:[%s19582_s4 + $0x130] sm:$0xff]   ;;  %v3475_v55 = vld [vmem:[#allocation2 + $0x4c] sm:$0xf] }
 0x322   :  { %9994 = vmatprep.subr.bf16.mxu0 %v20027_v23  ;;  %v3658_v0 = vor.u32 %v3657_v21, %v3654_v12  ;;  %v16225_v40 = vrot.slane %v3661_v6, 5  ;;  %v3667_v56 = vrot.slane %v3665_v38, 4  ;;  %v3671_v16 = vshll.u32 %v3470_v30, 16  ;;  %v13274_v59 = vld [vmem:[%s19582_s4 + $0x90] sm:$0xff]   ;;  %v16268_v35 = vld [vmem:[#allocation2 + $0xe8] sm:$0xf] }
 0x323   :  { %v11890_v27 = vcombine.low %v3616_v36, %v3626_v18  ;;  %v3640_v51 = vsel %vm16171_vm15, %v3635_v61, %v16198_v53  ;;  %v11966_v48 = vcombine.low %v4779_v44, %v4782_v45  ;;  %v4785_v19 = vrot.slane %v16210_v62, 5  ;;  %v16245_v53 = vld [vmem:[#allocation2 + $0xd8] sm:$0xe]  ;;  %v4532_v18 = vld [vmem:[#allocation2 + $0xdc] sm:$0xf] }
 0x324   :  { %10290 = vmatpush1.bf16.msra.mxu1 %v13148_v13  ;;  %v3650_v46 = vsel %vm16171_vm15, %v3645_v50, %v3649_v39  ;;  %v16236_v63 = vrot.slane %v3658_v0, 4  ;;  %v3668_v15 = vor.u32 %v3667_v56, %v16225_v40  ;;  %v11935_v29 = vrot.slane %v4528_v25, 9  ;;  %v13139_v30 = vld [vmem:[#allocation2 + $0x18] sm:$0xff]   ;;  %v3476_v0 = vld [vmem:[#allocation2 + $0x50] sm:$0x1] }
 0x325   :  { %10291 = vmatprep.subr.bf16.mxu1 %v20027_v23  ;;  %9995 = vmatpush1.bf16.msra.mxu0 %v13273_v58  ;;  %v4787_v24 = vrot.slane %v4785_v19, 4  ;;  %v3676_v3 = vshrl.u32 %v3471_v32, 16  ;;  %v3679_v1 = vshll.u32 %v3471_v32, 16  ;;  %v3673_v52 = vrot.slane %v3671_v16, 5  ;;  %v13159_v38 = vld [vmem:[%s19582_s4 + $0x138] sm:$0xff]  }
 0x326   :  { %9996 = vmatprep.subr.bf16.mxu0 %v20027_v23  ;;  %10137 = vmatmul.mubr.bf16.gmra.mrb[72].mxu1 %v11966_v48  ;;  %v3669_v20 = vrot.slane %v3668_v15, 4  ;;  %v3685_v14 = vshll.u32 %v3472_v7, 16  ;;  %v3689_v5 = vshrl.u32 %v3472_v7, 16  ;;  %v11891_v54 = vcombine.low %v3640_v51, %v3650_v46  ;;  %v3478_v56 = vld [vmem:[#allocation2 + $0x58] sm:$0xf] }
 0x327   :  { %9744 = vmatmul.mubr.bf16.gmra.mrb[132].mxu0 %v13136_v2  ;;  %10144 = vmatprep.mubr.bf16.mxu1 %v13140_v47  ;;  %v4788_v8 = vrot.slane %v4530_v33, 5  ;;  %v3678_v34 = vrot.slane %v3676_v3, 4  ;;  %v3681_v41 = vrot.slane %v3679_v1, 5  ;;  %v3664_v11 = vsel %vm16171_vm15, %v16236_v63, %v16225_v40  ;;  %v13275_v16 = vld [vmem:[%s19582_s4 + $0x98] sm:$0xff]   ;;  %v13143_v2 = vld [vmem:[#allocation2 + $0xe4] sm:$0xff]  }
 0x328   :  { %9751 = vmatprep.mubr.bf16.mxu0 %v11890_v27  ;;  %10292 = vmatpush1.bf16.msra.mxu1 %v13152_v28  ;;  %v4786_v43 = vsel %vm16154_vm14, %v11935_v29, %v4785_v19  ;;  %v16257_v60 = vrot.slane %v3685_v14, 5  ;;  %v3691_v36 = vrot.slane %v3689_v5, 4  ;;  %v3695_v57 = vshll.u32 %v16239_v22, 16  ;;  %v3477_v19 = vld [vmem:[#allocation2 + $0x54] sm:$0xf]  ;;  %v13162_v33 = vld [vmem:[%s19582_s4 + $0x140] sm:$0xff]  }
 0x329   :  { %10293 = vmatprep.subr.bf16.mxu1 %v20027_v23  ;;  %9997 = vmatpush1.bf16.msra.mxu0 %v13274_v59  ;;  %v4789_v62 = vsel %vm16154_vm14, %v4787_v24, %v4788_v8  ;;  %v3682_v61 = vor.u32 %v3681_v41, %v3678_v34  ;;  %v2086_v9 = vsel %vm13635_vm5, 0, %v2085_v42  ;;  %v3674_v13 = vsel %vm16171_vm15, %v3669_v20, %v3673_v52  ;;  %v16287_v63 = vld [vmem:[#allocation2 + $0xe4] sm:$0xe]  ;;  %v4536_v47 = vld [vmem:[#allocation2 + $0xec] sm:$0x1] }
 0x32a   :  { %9998 = vmatprep.subr.bf16.mxu0 %v20027_v23  ;;  %v3692_v12 = vor.u32 %v3691_v36, %v16257_v60  ;;  %2087 = vst [vmem:[#allocation2 + $0xe0] sm:$0x1] %v2086_v9  ;;  %v11936_v21 = vrot.slane %v16245_v53, 9  ;;  %v3700_v6 = vshrl.u32 %v3474_v17, 16  ;;  %v4792_v32 = vrot.slane %v4532_v18, 5  ;;  %v13276_v20 = vld [vmem:[%s19582_s4 + $0xa0] sm:$0xff]  }
 0x32b   :  { %v3703_v26 = vshll.u32 %v3474_v17, 16  ;;  %v3709_v50 = vshll.u32 %v3475_v55, 16  ;;  %v3713_v39 = vshrl.u32 %v3475_v55, 16  ;;  %v11967_v44 = vcombine.low %v4786_v43, %v4789_v62  ;;  %v3479_v53 = vld [vmem:[#allocation2 + $0x5c] sm:$0x1]  ;;  %v13142_v18 = vld [vmem:[#allocation2 + $0x24] sm:$0xff]  }
 0x32c   :  { %10294 = vmatpush1.bf16.msra.mxu1 %v13155_v10  ;;  %v3683_v45 = vrot.slane %v3682_v61, 4  ;;  %v3693_v25 = vrot.slane %v3692_v12, 4  ;;  %v3702_v40 = vrot.slane %v3700_v6, 4  ;;  %v11892_v7 = vcombine.low %v3664_v11, %v3674_v13  ;;  %v16308_v34 = vld [vmem:[#allocation2 + $0xf4] sm:$0xf]  ;;  %v13277_v6 = vld [vmem:[%s19582_s4 + $0xa8] sm:$0xff]  }
 0x32d   :  { %10295 = vmatprep.subr.bf16.mxu1 %v20027_v23  ;;  %9999 = vmatpush1.bf16.msra.mxu0 %v13275_v16  ;;  %v3705_v27 = vrot.slane %v3703_v26, 5  ;;  %v16282_v51 = vrot.slane %v3709_v50, 5  ;;  %v3715_v48 = vrot.slane %v3713_v39, 4  ;;  %v3697_v28 = vrot.slane %v3695_v57, 5  ;;  %v3481_v36 = vld [vmem:[#allocation2 + $0x64] sm:$0xf] }
 0x32e   :  { %10000 = vmatprep.subr.bf16.mxu0 %v20027_v23  ;;  %10145 = vmatmul.mubr.bf16.gmra.mrb[76].mxu1 %v11967_v44  ;;  %v4793_v46 = vsel %vm16154_vm14, %v11936_v21, %v4792_v32  ;;  %v4799_v15 = vrot.slane %v16268_v35, 5  ;;  %v4794_v29 = vrot.slane %v4792_v32, 4  ;;  %v3719_v58 = vshll.u32 %v3476_v0, 16  ;;  %v3480_v57 = vld [vmem:[#allocation2 + $0x60] sm:$0xf]  ;;  %v13166_v21 = vld [vmem:[%s19582_s4 + $0x148] sm:$0xff]  }
 0x32f   :  { %9752 = vmatmul.mubr.bf16.gmra.mrb[136].mxu0 %v13139_v30  ;;  %10152 = vmatprep.mubr.bf16.mxu1 %v13143_v2  ;;  %v3706_v22 = vor.u32 %v3705_v27, %v3702_v40  ;;  %v3716_v42 = vor.u32 %v3715_v48, %v16282_v51  ;;  %v3688_v24 = vsel %vm16171_vm15, %v3683_v45, %v16257_v60  ;;  %v3724_v17 = vshrl.u32 %v3477_v19, 16  ;;  %v4537_v60 = vld [vmem:[#allocation2 + $0xf0] sm:$0xe]  ;;  %v4539_v45 = vld [vmem:[#allocation2 + $0xf8] sm:$0x1] }
 0x330   :  { %9759 = vmatprep.mubr.bf16.mxu0 %v11891_v54  ;;  %10296 = vmatpush1.bf16.msra.mxu1 %v13159_v38  ;;  %v3698_v3 = vsel %vm16171_vm15, %v3693_v25, %v3697_v28  ;;  %v4801_v1 = vrot.slane %v4799_v15, 4  ;;  %v11937_v5 = vrot.slane %v16287_v63, 9  ;;  %v3727_v54 = vshll.u32 %v3477_v19, 16  ;;  %v13146_v39 = vld [vmem:[#allocation2 + $0xf0] sm:$0xff]   ;;  %v16337_v2 = vld [vmem:[#allocation2 + $0x68] sm:$0x1] }
 0x331   :  { %10297 = vmatprep.subr.bf16.mxu1 %v20027_v23  ;;  %10001 = vmatpush1.bf16.msra.mxu0 %v13276_v20  ;;  %v4533_v52 = vld [vmem:[#allocation2 + $0xe0] sm:$0x1]  ;;  %v16305_v14 = vrot.slane %v3706_v22, 4  ;;  %v3733_v8 = vshll.u32 %v3478_v56, 16  ;;  %v4802_v10 = vrot.slane %v4536_v47, 5  ;;  %v3726_v11 = vrot.slane %v3724_v17, 4 }
 0x332   :  { %10002 = vmatprep.subr.bf16.mxu0 %v20027_v23  ;;  %v4795_v41 = vrot.slane %v4533_v52, 5  ;;  %v3737_v43 = vshrl.u32 %v3478_v56, 16  ;;  %v16311_v55 = vcombine.low %v3688_v24, %v3698_v3  ;;  %v3717_v59 = vrot.slane %v3716_v42, 4  ;;  %v16339_v48 = vld [vmem:[#allocation2 + $0x100] sm:$0xf]  ;;  %v13278_v35 = vld [vmem:[%s19582_s4 + $0xb0] sm:$0xff]  }
 0x333   :  { %v3721_v62 = vrot.slane %v3719_v58, 5  ;;  %v3729_v61 = vrot.slane %v3727_v54, 5  ;;  %v16317_v30 = vsel %vm16154_vm14, %v4801_v1, %v4802_v10  ;;  %v16319_v13 = vrot.slane %v3733_v8, 5  ;;  %v3483_v63 = vld [vmem:[#allocation2 + $0x6c] sm:$0xf]  ;;  %v13144_v17 = vld [vmem:[#allocation2 + $0x30] sm:$0xff]  }
 0x334   :  { %10298 = vmatpush1.bf16.msra.mxu1 %v13162_v33  ;;  %v4796_v9 = vsel %vm16154_vm14, %v4794_v29, %v4795_v41  ;;  %v3739_v12 = vrot.slane %v3737_v43, 4  ;;  %v3712_v32 = vsel %vm16171_vm15, %v16305_v14, %v16282_v51  ;;  %v3743_v50 = vshll.u32 %v3479_v53, 16  ;;  %v3484_v33 = vld [vmem:[#allocation2 + $0x70] sm:$0xf]  ;;  %v4540_v53 = vld [vmem:[#allocation2 + $0xfc] sm:$0xe] }
 0x335   :  { %10299 = vmatprep.subr.bf16.mxu1 %v20027_v23  ;;  %10003 = vmatpush1.bf16.msra.mxu0 %v13277_v6  ;;  %v11968_v38 = vcombine.low %v4793_v46, %v4796_v9  ;;  %v3730_v26 = vor.u32 %v3729_v61, %v3726_v11  ;;  %v11938_v25 = vrot.slane %v4537_v60, 9  ;;  %v4806_v0 = vrot.slane %v16308_v34, 5  ;;  %v13169_v29 = vld [vmem:[%s19582_s4 + $0x150] sm:$0xff]   ;;  %v4542_v54 = vld [vmem:[#allocation2 + $0x104] sm:$0x1]  ;;  %v13173_v60 = vld [vmem:[%s19582_s4 + $0x158] sm:$0xff]  }
 0x336   :  { %10004 = vmatprep.subr.bf16.mxu0 %v20027_v23  ;;  %v3740_v44 = vor.u32 %v3739_v12, %v16319_v13  ;;  %v3748_v40 = vshrl.u32 %v3480_v57, 16  ;;  %v3722_v56 = vsel %vm16171_vm15, %v3717_v59, %v3721_v62  ;;  %v3751_v27 = vshll.u32 %v3480_v57, 16  ;;  %v16373_v10 = vld [vmem:[#allocation2 + $0x74] sm:$0x1]  ;;  %v16375_v43 = vld [vmem:[#allocation2 + $0x10c] sm:$0xf] }
 0x337   :  { %9760 = vmatmul.mubr.bf16.gmra.mrb[140].mxu0 %v13142_v18  ;;  %10153 = vmatmul.mubr.bf16.gmra.mrb[80].mxu1 %v11968_v38  ;;  %v3731_v16 = vrot.slane %v3730_v26, 4  ;;  %v3757_v51 = vshll.u32 %v3481_v36, 16  ;;  %v4800_v19 = vsel %vm16154_vm14, %v11937_v5, %v4799_v15  ;;  %v4808_v28 = vrot.slane %v4806_v0, 4  ;;  %v13279_v12 = vld [vmem:[%s19582_s4 + $0xb8] sm:$0xff]   ;;  %v16390_v26 = vld [vmem:[#allocation2 + $0x108] sm:$0xe] }
 0x338   :  { %9767 = vmatprep.mubr.bf16.mxu0 %v11892_v7  ;;  %10160 = vmatprep.mubr.bf16.mxu1 %v13146_v39  ;;  %v3741_v7 = vrot.slane %v3740_v44, 4  ;;  %v3750_v46 = vrot.slane %v3748_v40, 4  ;;  %v3745_v22 = vrot.slane %v3743_v50, 5  ;;  %v3753_v42 = vrot.slane %v3751_v27, 5 }
 0x339   :  { %10300 = vmatpush1.bf16.msra.mxu1 %v13166_v21  ;;  %v16348_v58 = vrot.slane %v3757_v51, 5  ;;  %v3761_v47 = vshrl.u32 %v3481_v36, 16  ;;  %10005 = vmatpush1.bf16.msra.mxu0 %v13278_v35  ;;  %v16354_v15 = vcombine.low %v3712_v32, %v3722_v56  ;;  %v11969_v24 = vcombine.low %v4800_v19, %v16317_v30  ;;  %v13149_v36 = vld [vmem:[#allocation2 + $0xfc] sm:$0xff]   ;;  %v4545_v19 = vld [vmem:[#allocation2 + $0x110] sm:$0x1] }
 0x33a   :  { %10301 = vmatprep.subr.bf16.mxu1 %v20027_v23  ;;  %v16359_v3 = vsel %vm16154_vm14, %v11938_v25, %v4806_v0  ;;  %v4809_v1 = vrot.slane %v4539_v45, 5  ;;  %10006 = vmatprep.subr.bf16.mxu0 %v20027_v23  ;;  %v3736_v20 = vsel %vm16171_vm15, %v3731_v16, %v16319_v13  ;;  %v3746_v52 = vsel %vm16171_vm15, %v3741_v7, %v3745_v22  ;;  %v3486_v45 = vld [vmem:[#allocation2 + $0x78] sm:$0xf]  ;;  %v13176_v25 = vld [vmem:[%s19582_s4 + $0x160] sm:$0xff]  }
 0x33b   :  { %v3754_v14 = vor.u32 %v3753_v42, %v3750_v46  ;;  %v3763_v5 = vrot.slane %v3761_v47, 4  ;;  %v3767_v34 = vshll.u32 %v16337_v2, 16  ;;  %v4813_v41 = vrot.slane %v16339_v48, 5  ;;  %v3487_v2 = vld [vmem:[#allocation2 + $0x7c] sm:$0xf]  ;;  %v13280_v46 = vld [vmem:[%s19582_s4 + $0xc0] sm:$0xff]  }
 0x33c   :  { %v16369_v8 = vsel %vm16154_vm14, %v4808_v28, %v4809_v1  ;;  %v3772_v11 = vshrl.u32 %v3483_v63, 16  ;;  %v11939_v59 = vrot.slane %v4540_v53, 9  ;;  %v3775_v62 = vshll.u32 %v3483_v63, 16  ;;  %v16414_v28 = vld [vmem:[#allocation2 + $0x80] sm:$0x1] }
 0x33d   :  { %10302 = vmatpush1.bf16.msra.mxu1 %v13169_v29  ;;  %v3764_v18 = vor.u32 %v3763_v5, %v16348_v58  ;;  %v3781_v61 = vshll.u32 %v3484_v33, 16  ;;  %v3755_v57 = vrot.slane %v3754_v14, 4  ;;  %v4815_v9 = vrot.slane %v4813_v41, 4  ;;  %10007 = vmatpush1.bf16.msra.mxu0 %v13279_v12  ;;  %v13147_v63 = vld [vmem:[#allocation2 + $0x3c] sm:$0xff]   ;;  %v16427_v47 = vld [vmem:[#allocation2 + $0x118] sm:$0xf] }
 0x33e   :  { %10303 = vmatprep.subr.bf16.mxu1 %v20027_v23  ;;  %v3774_v30 = vrot.slane %v3772_v11, 4  ;;  %v3785_v13 = vshrl.u32 %v3484_v33, 16  ;;  %v16386_v21 = vcombine.low %v3736_v20, %v3746_v52  ;;  %v3777_v38 = vrot.slane %v3775_v62, 5  ;;  %10008 = vmatprep.subr.bf16.mxu0 %v20027_v23  ;;  %v3490_v53 = vld [vmem:[#allocation2 + $0x88] sm:$0xf]  ;;  %v13183_v12 = vld [vmem:[%s19582_s4 + $0x170] sm:$0xff]  }
 0x33f   :  { %9768 = vmatmul.mubr.bf16.gmra.mrb[144].mxu0 %v13144_v17  ;;  %10161 = vmatmul.mubr.bf16.gmra.mrb[84].mxu1 %v11969_v24  ;;  %v3765_v6 = vrot.slane %v3764_v18, 4  ;;  %v16388_v32 = vrot.slane %v3781_v61, 5  ;;  %v3769_v50 = vrot.slane %v3767_v34, 5  ;;  %v4816_v39 = vrot.slane %v4542_v54, 5  ;;  %v13180_v17 = vld [vmem:[%s19582_s4 + $0x168] sm:$0xff]  }
 0x340   :  { %9775 = vmatprep.mubr.bf16.mxu0 %v16311_v55  ;;  %10168 = vmatprep.mubr.bf16.mxu1 %v13149_v36  ;;  %v11970_v55 = vcombine.low %v16359_v3, %v16369_v8  ;;  %v3787_v44 = vrot.slane %v3785_v13, 4  ;;  %v16400_v0 = vsel %vm16154_vm14, %v11939_v59, %v4813_v41  ;;  %v3778_v40 = vor.u32 %v3777_v38, %v3774_v30  ;;  %v13151_v20 = vld [vmem:[#allocation2 + $0x108] sm:$0xff]   ;;  %v3489_v8 = vld [vmem:[#allocation2 + $0x84] sm:$0xf]  ;;  %v4548_v62 = vld [vmem:[#allocation2 + $0x11c] sm:$0x1] }
 0x341   :  { %10304 = vmatpush1.bf16.msra.mxu1 %v13173_v60  ;;  %v3791_v56 = vshll.u32 %v16373_v10, 16  ;;  %v4820_v16 = vrot.slane %v16375_v43, 5  ;;  %v3760_v27 = vsel %vm16171_vm15, %v3755_v57, %v16348_v58  ;;  %v16410_v51 = vsel %vm16154_vm14, %v4815_v9, %v4816_v39  ;;  %10009 = vmatpush1.bf16.msra.mxu0 %v13280_v46  ;;  %v16425_v58 = vld [vmem:[#allocation2 + $0x114] sm:$0xe]  ;;  %v13281_v60 = vld [vmem:[%s19582_s4 + $0xc8] sm:$0xff]  }
 0x342   :  { %10305 = vmatprep.subr.bf16.mxu1 %v20027_v23  ;;  %v3788_v48 = vor.u32 %v3787_v44, %v16388_v32  ;;  %v11940_v7 = vrot.slane %v16390_v26, 9  ;;  %v3770_v33 = vsel %vm16171_vm15, %v3765_v6, %v3769_v50  ;;  %v16421_v29 = vrot.slane %v3778_v40, 4  ;;  %10010 = vmatprep.subr.bf16.mxu0 %v20027_v23  ;;  %v3491_v30 = vld [vmem:[#allocation2 + $0x8c] sm:$0x1]  ;;  %v4550_v50 = vld [vmem:[#allocation2 + $0x124] sm:$0xf] }
 0x343   :  { %v4822_v22 = vrot.slane %v4820_v16, 4  ;;  %v3796_v42 = vshrl.u32 %v3486_v45, 16  ;;  %v3799_v24 = vshll.u32 %v3486_v45, 16  ;;  %v3805_v3 = vshll.u32 %v3487_v2, 16  ;;  %v3492_v40 = vld [vmem:[#allocation2 + $0x90] sm:$0xf] }
 0x344   :  { %v3789_v35 = vrot.slane %v3788_v48, 4  ;;  %v3809_v1 = vshrl.u32 %v3487_v2, 16  ;;  %v11971_v52 = vcombine.low %v16400_v0, %v16410_v51  ;;  %v3793_v14 = vrot.slane %v3791_v56, 5  ;;  %v13282_v56 = vld [vmem:[%s19582_s4 + $0xd0] sm:$0xff]   ;;  %v13150_v2 = vld [vmem:[#allocation2 + $0x48] sm:$0xff]  }
 0x345   :  { %10306 = vmatpush1.bf16.msra.mxu1 %v13176_v25  ;;  %v4823_v5 = vrot.slane %v4545_v19, 5  ;;  %v3798_v54 = vrot.slane %v3796_v42, 4  ;;  %v16437_v34 = vcombine.low %v3760_v27, %v3770_v33  ;;  %v3784_v41 = vsel %vm16171_vm15, %v16421_v29, %v16388_v32  ;;  %10011 = vmatpush1.bf16.msra.mxu0 %v13281_v60  ;;  %v3496_v60 = vld [vmem:[#allocation2 + $0xa0] sm:$0xf] }
 0x346   :  { %10307 = vmatprep.subr.bf16.mxu1 %v20027_v23  ;;  %v3801_v10 = vrot.slane %v3799_v24, 5  ;;  %v16443_v11 = vrot.slane %v3805_v3, 5  ;;  %v3794_v36 = vsel %vm16171_vm15, %v3789_v35, %v3793_v14  ;;  %v3811_v18 = vrot.slane %v3809_v1, 4  ;;  %10012 = vmatprep.subr.bf16.mxu0 %v20027_v23  ;;  %v4551_v3 = vld [vmem:[#allocation2 + $0x128] sm:$0x1] }
 0x347   :  { %9776 = vmatmul.mubr.bf16.gmra.mrb[148].mxu0 %v13147_v63  ;;  %10169 = vmatmul.mubr.bf16.gmra.mrb[88].mxu1 %v11970_v55  ;;  %v3815_v59 = vshll.u32 %v16414_v28, 16  ;;  %v11941_v57 = vrot.slane %v16425_v58, 9  ;;  %v4827_v9 = vrot.slane %v16427_v47, 5  ;;  %v3820_v13 = vshrl.u32 %v3489_v8, 16  ;;  %v4549_v55 = vld [vmem:[#allocation2 + $0x120] sm:$0xe] }
 0x348   :  { %9783 = vmatprep.mubr.bf16.mxu0 %v16354_v15  ;;  %v16452_v15 = vsel %vm16154_vm14, %v4822_v22, %v4823_v5  ;;  %10176 = vmatprep.mubr.bf16.mxu1 %v13151_v20  ;;  %v3802_v61 = vor.u32 %v3801_v10, %v3798_v54  ;;  %v3812_v6 = vor.u32 %v3811_v18, %v16443_v11  ;;  %v3823_v38 = vshll.u32 %v3489_v8, 16  ;;  %v3493_v58 = vld [vmem:[#allocation2 + $0x94] sm:$0xf]  ;;  %v3494_v20 = vld [vmem:[#allocation2 + $0x98] sm:$0x1] }
 0x349   :  { %10308 = vmatpush1.bf16.msra.mxu1 %v13180_v17  ;;  %v3829_v32 = vshll.u32 %v3490_v53, 16  ;;  %v3833_v26 = vshrl.u32 %v3490_v53, 16  ;;  %v16467_v39 = vsel %vm16154_vm14, %v11940_v7, %v4820_v16  ;;  %v4829_v45 = vrot.slane %v4827_v9, 4  ;;  %10013 = vmatpush1.bf16.msra.mxu0 %v13282_v56  ;;  %v13187_v16 = vld [vmem:[%s19582_s4 + $0x178] sm:$0xff]   ;;  %v16510_v54 = vld [vmem:[#allocation2 + $0x130] sm:$0xf] }
 0x34a   :  { %10309 = vmatprep.subr.bf16.mxu1 %v20027_v23  ;;  %v16469_v44 = vrot.slane %v3802_v61, 4  ;;  %v3822_v25 = vrot.slane %v3820_v13, 4  ;;  %v16474_v27 = vrot.slane %v3815_v59, 5  ;;  %v3825_v48 = vrot.slane %v3823_v38, 5  ;;  %10014 = vmatprep.subr.bf16.mxu0 %v20027_v23  ;;  %v13154_v47 = vld [vmem:[#allocation2 + $0x114] sm:$0xff]  }
 0x34b   :  { %v16476_v19 = vrot.slane %v3829_v32, 5  ;;  %v3835_v43 = vrot.slane %v3833_v26, 4  ;;  %v16482_v7 = vcombine.low %v3784_v41, %v3794_v36  ;;  %v11972_v28 = vcombine.low %v16467_v39, %v16452_v15  ;;  %v13283_v8 = vld [vmem:[%s19582_s4 + $0xd8] sm:$0xff]   ;;  %v4552_v13 = vld [vmem:[#allocation2 + $0x12c] sm:$0xe] }
 0x34c   :  { %v16486_v46 = vrot.slane %v3812_v6, 4  ;;  %v4830_v63 = vrot.slane %v4548_v62, 5  ;;  %v16490_v33 = vsel %vm16154_vm14, %v11941_v57, %v4827_v9  ;;  %v3826_v29 = vor.u32 %v3825_v48, %v3822_v25  ;;  %v3495_v10 = vld [vmem:[#allocation2 + $0x9c] sm:$0xf] }
 0x34d   :  { %10310 = vmatpush1.bf16.msra.mxu1 %v13183_v12  ;;  %v3836_v22 = vor.u32 %v3835_v43, %v16476_v19  ;;  %v3839_v42 = vshll.u32 %v3491_v30, 16  ;;  %v3808_v35 = vsel %vm16171_vm15, %v16469_v44, %v16443_v11  ;;  %v11942_v1 = vrot.slane %v4549_v55, 9  ;;  %10015 = vmatpush1.bf16.msra.mxu0 %v13283_v8  ;;  %v13153_v12 = vld [vmem:[#allocation2 + $0x54] sm:$0xff]  }
 0x34e   :  { %v16500_v24 = vsel %vm16154_vm14, %v4829_v45, %v4830_v63  ;;  %v4834_v53 = vrot.slane %v4550_v50, 5  ;;  %10311 = vmatprep.subr.bf16.mxu1 %v20027_v23  ;;  %v3844_v14 = vshrl.u32 %v3492_v40, 16  ;;  %v3847_v5 = vshll.u32 %v3492_v40, 16  ;;  %10016 = vmatprep.subr.bf16.mxu0 %v20027_v23  ;;  %v4554_v55 = vld [vmem:[#allocation2 + $0x134] sm:$0x1]  ;;  %v13284_v50 = vld [vmem:[%s19582_s4 + $0xe0] sm:$0xff]  }
 0x34f   :  { %9784 = vmatmul.mubr.bf16.gmra.mrb[152].mxu0 %v13150_v2  ;;  %10177 = vmatmul.mubr.bf16.gmra.mrb[92].mxu1 %v11971_v52  ;;  %v16508_v17 = vrot.slane %v3836_v22, 4  ;;  %v3818_v0 = vsel %vm16171_vm15, %v16486_v46, %v16474_v27  ;;  %v3853_v52 = vshll.u32 %v3493_v58, 16  ;;  %v3857_v41 = vshrl.u32 %v3493_v58, 16  ;;  %v13157_v45 = vld [vmem:[#allocation2 + $0x120] sm:$0xff]   ;;  %v16546_v46 = vld [vmem:[#allocation2 + $0x13c] sm:$0xf] }
 0x350   :  { %9791 = vmatprep.mubr.bf16.mxu0 %v16386_v21  ;;  %v16506_v21 = vrot.slane %v3826_v29, 4  ;;  %10184 = vmatprep.mubr.bf16.mxu1 %v13154_v47  ;;  %v4836_v51 = vrot.slane %v4834_v53, 4  ;;  %v11973_v36 = vcombine.low %v16490_v33, %v16500_v24  ;;  %v3841_v18 = vrot.slane %v3839_v42, 5  ;;  %v3498_v58 = vld [vmem:[#allocation2 + $0xa8] sm:$0xf] }
 0x351   :  { %10312 = vmatpush1.bf16.msra.mxu1 %v13187_v16  ;;  %v3846_v59 = vrot.slane %v3844_v14, 4  ;;  %v3849_v62 = vrot.slane %v3847_v5, 5  ;;  %v16525_v61 = vsel %vm16154_vm14, %v11942_v1, %v4834_v53  ;;  %v4837_v57 = vrot.slane %v4551_v3, 5  ;;  %10017 = vmatpush1.bf16.msra.mxu0 %v13284_v50  ;;  %v4560_v50 = vld [vmem:[#allocation2 + $0x14c] sm:$0x1] }
 0x352   :  { %10570 = vmatprep.subr.bf16.mxu1 %v20027_v23  ;;  %v16527_v9 = vrot.slane %v3853_v52, 5  ;;  %v3859_v30 = vrot.slane %v3857_v41, 4  ;;  %v3832_v6 = vsel %vm16171_vm15, %v16506_v21, %v16476_v19  ;;  %v3842_v38 = vsel %vm16171_vm15, %v16508_v17, %v3841_v18  ;;  %10018 = vmatprep.subr.bf16.mxu0 %v20027_v23  ;;  %v3497_v19 = vld [vmem:[#allocation2 + $0xa4] sm:$0x1]  ;;  %v13285_v21 = vld [vmem:[%s19582_s4 + $0xe8] sm:$0xff]  }
 0x353   :  { %v3850_v32 = vor.u32 %v3849_v62, %v3846_v59  ;;  %v3863_v26 = vshll.u32 %v3494_v20, 16  ;;  %v16541_v25 = vsel %vm16154_vm14, %v4836_v51, %v4837_v57  ;;  %v4841_v56 = vrot.slane %v16510_v54, 5  ;;  %v13156_v51 = vld [vmem:[#allocation2 + $0x60] sm:$0xff]   ;;  %v13286_v59 = vld [vmem:[%s19582_s4 + $0xf0] sm:$0xff]  }
 0x354   :  { %v3860_v40 = vor.u32 %v3859_v30, %v16527_v9  ;;  %v3868_v2 = vshrl.u32 %v3495_v10, 16  ;;  %v11943_v48 = vrot.slane %v4552_v13, 9  ;;  %v3871_v43 = vshll.u32 %v3495_v10, 16  ;;  %v4557_v10 = vld [vmem:[#allocation2 + $0x140] sm:$0x1]  ;;  %v13160_v62 = vld [vmem:[#allocation2 + $0x12c] sm:$0xff]  }
 0x355   :  { %v3851_v27 = vrot.slane %v3850_v32, 4  ;;  %v3877_v16 = vshll.u32 %v3496_v60, 16  ;;  %v4843_v29 = vrot.slane %v4841_v56, 4  ;;  %v4844_v22 = vrot.slane %v4554_v55, 5  ;;  %10019 = vmatpush1.bf16.msra.mxu0 %v13285_v21  ;;  %v3500_v30 = vld [vmem:[#allocation2 + $0xb0] sm:$0x1] }
 0x356   :  { %v3861_v63 = vrot.slane %v3860_v40, 4  ;;  %v3870_v42 = vrot.slane %v3868_v2, 4  ;;  %v3865_v47 = vrot.slane %v3863_v26, 5  ;;  %v3873_v3 = vrot.slane %v3871_v43, 5  ;;  %10020 = vmatprep.subr.bf16.mxu0 %v20027_v23  ;;  %v4558_v55 = vld [vmem:[#allocation2 + $0x144] sm:$0xe] }
 0x357   :  { %9792 = vmatmul.mubr.bf16.gmra.mrb[156].mxu0 %v13153_v12  ;;  %10185 = vmatmul.mubr.bf16.gmra.mrb[96].mxu1 %v11972_v28  ;;  %v16552_v1 = vrot.slane %v3877_v16, 5  ;;  %v3881_v53 = vshrl.u32 %v3496_v60, 16  ;;  %v16564_v15 = vcombine.low %v3832_v6, %v3842_v38  ;;  %v11974_v39 = vcombine.low %v16525_v61, %v16541_v25  ;;  %v3499_v28 = vld [vmem:[#allocation2 + $0xac] sm:$0xf] }
 0x358   :  { %9799 = vmatprep.mubr.bf16.mxu0 %v16437_v34  ;;  %10192 = vmatprep.mubr.bf16.mxu1 %v13157_v45  ;;  %v16562_v34 = vcombine.low %v3808_v35, %v3818_v0  ;;  %v3856_v17 = vsel %vm16171_vm15, %v3851_v27, %v16527_v9  ;;  %v3866_v20 = vsel %vm16171_vm15, %v3861_v63, %v3865_v47  ;;  %v4555_v35 = vld [vmem:[#allocation2 + $0x138] sm:$0xe]  ;;  %v3887_v5 = vshll.u32 %v3497_v19, 16  ;;  %v16579_v0 = vld [vmem:[#allocation2 + $0x148] sm:$0xf] }
 0x359   :  { %v16576_v11 = vsel %vm16154_vm14, %v4843_v29, %v4844_v22  ;;  %v3883_v44 = vrot.slane %v3881_v53, 4  ;;  %v3874_v14 = vor.u32 %v3873_v3, %v3870_v42  ;;  %v4848_v54 = vrot.slane %v16546_v46, 5  ;;  %10021 = vmatpush1.bf16.msra.mxu0 %v13286_v59  ;;  %v3502_v45 = vld [vmem:[#allocation2 + $0xb8] sm:$0xf]  ;;  %v3503_v3 = vld [vmem:[#allocation2 + $0xbc] sm:$0x1] }
 0x35a   :  { %v3892_v8 = vshrl.u32 %v3498_v58, 16  ;;  %v16583_v52 = vsel %vm16154_vm14, %v11943_v48, %v4841_v56  ;;  %v3895_v60 = vshll.u32 %v3498_v58, 16  ;;  %v3901_v18 = vshll.u32 %v3499_v28, 16  ;;  %10022 = vmatprep.subr.bf16.mxu0 %v20027_v23  ;;  %v3501_v48 = vld [vmem:[#allocation2 + $0xb4] sm:$0xf]  ;;  %v13287_v63 = vld [vmem:[%s19582_s4 + $0xf8] sm:$0xff]  }
 0x35b   :  { %v3884_v41 = vor.u32 %v3883_v44, %v16552_v1  ;;  %v11944_v57 = vrot.slane %v4555_v35, 9  ;;  %v4850_v9 = vrot.slane %v4848_v54, 4  ;;  %v3905_v12 = vshrl.u32 %v3499_v28, 16 }
 0x35c   :  { %v3894_v13 = vrot.slane %v3892_v8, 4  ;;  %v16590_v6 = vcombine.low %v3856_v17, %v3866_v20  ;;  %v11975_v38 = vcombine.low %v16583_v52, %v16576_v11  ;;  %v3897_v32 = vrot.slane %v3895_v60, 5  ;;  %v13158_v17 = vld [vmem:[#allocation2 + $0x6c] sm:$0xff]  }
 0x35d   :  { %v16594_v26 = vrot.slane %v3901_v18, 5  ;;  %v3875_v40 = vrot.slane %v3874_v14, 4  ;;  %v3889_v56 = vrot.slane %v3887_v5, 5  ;;  %v4851_v2 = vrot.slane %v4557_v10, 5  ;;  %10023 = vmatpush1.bf16.msra.mxu0 %v13287_v63  ;;  %v16618_v5 = vld [vmem:[#allocation2 + $0x154] sm:$0xf] }
 0x35e   :  { %v3907_v27 = vrot.slane %v3905_v12, 4  ;;  %v3885_v19 = vrot.slane %v3884_v41, 4  ;;  %v3898_v43 = vor.u32 %v3897_v32, %v3894_v13  ;;  %v3911_v16 = vshll.u32 %v3500_v30, 16  ;;  %v4565_v41 = vld [vmem:[#allocation2 + $0x160] sm:$0xf] }
 0x35f   :  { %9800 = vmatmul.mubr.bf16.gmra.mrb[160].mxu0 %v13156_v51  ;;  %10193 = vmatmul.mubr.bf16.gmra.mrb[100].mxu1 %v11973_v36  ;;  %v4855_v46 = vrot.slane %v16579_v0, 5  ;;  %v16610_v29 = vsel %vm16154_vm14, %v4850_v9, %v4851_v2  ;;  %v11945_v24 = vrot.slane %v4558_v55, 9  ;;  %v4858_v42 = vrot.slane %v4560_v50, 5  ;;  %v1975_v10 = vld [vmem:[#allocation2 + $0xd8] sm:$0x1] }
 0x360   :  { %9807 = vmatprep.mubr.bf16.mxu0 %v16482_v7  ;;  %10200 = vmatprep.mubr.bf16.mxu1 %v13160_v62  ;;  %v16606_v7 = vsel %vm16154_vm14, %v11944_v57, %v4848_v54  ;;  %v3908_v33 = vor.u32 %v3907_v27, %v16594_v26  ;;  %v3899_v36 = vrot.slane %v3898_v43, 4  ;;  %v3916_v58 = vshrl.u32 %v3501_v48, 16  ;;  %v3505_v62 = vld [vmem:[#allocation2 + $0xdc] sm:$0xf]  ;;  %v4561_v12 = vld [vmem:[#allocation2 + $0x150] sm:$0xe] }
 0x361   :  { %v4857_v22 = vrot.slane %v4855_v46, 4  ;;  %v3919_v53 = vshll.u32 %v3501_v48, 16  ;;  %v3925_v21 = vshll.u32 %v3502_v45, 16  ;;  %v3929_v28 = vshrl.u32 %v3502_v45, 16  ;;  %v13163_v57 = vld [vmem:[#allocation2 + $0x138] sm:$0xff]  }
 0x362   :  { %v3909_v47 = vrot.slane %v3908_v33, 4  ;;  %v3880_v20 = vsel %vm16171_vm15, %v3875_v40, %v16552_v1  ;;  %v3890_v44 = vsel %vm16171_vm15, %v3885_v19, %v3889_v56  ;;  %v3913_v35 = vrot.slane %v3911_v16, 5  ;;  %v4563_v32 = vld [vmem:[#allocation2 + $0x158] sm:$0x1]  ;;  %v4564_v50 = vld [vmem:[#allocation2 + $0x15c] sm:$0xe] }
 0x363   :  { %v3918_v14 = vrot.slane %v3916_v58, 4  ;;  %v11976_v54 = vcombine.low %v16606_v7, %v16610_v29  ;;  %v16624_v8 = vsel %vm16154_vm14, %v4857_v22, %v4858_v42  ;;  %v3921_v0 = vrot.slane %v3919_v53, 5  ;;  %v3506_v56 = vld [vmem:[#allocation2 + $0xe0] sm:$0x1]  ;;  %v4566_v19 = vld [vmem:[#allocation2 + $0x164] sm:$0x1] }
 0x364   :  { %v16626_v51 = vrot.slane %v3925_v21, 5  ;;  %v3904_v1 = vsel %vm16171_vm15, %v3899_v36, %v16594_v26  ;;  %v3914_v60 = vsel %vm16171_vm15, %v3909_v47, %v3913_v35  ;;  %v3931_v18 = vrot.slane %v3929_v28, 4  ;;  %v3508_v22 = vld [vmem:[#allocation2 + $0xe8] sm:$0xf]  ;;  %v13161_v42 = vld [vmem:[#allocation2 + $0x78] sm:$0xff]  }
 0x365   :  { %v3935_v59 = vshll.u32 %v3503_v3, 16  ;;  %v16634_v9 = vcombine.low %v3880_v20, %v3890_v44  ;;  %v16638_v30 = vsel %vm16154_vm14, %v11945_v24, %v4855_v46  ;;  %v3922_v13 = vor.u32 %v3921_v0, %v3918_v14  ;;  %v3507_v46 = vld [vmem:[#allocation2 + $0xe4] sm:$0xf]  ;;  %v16656_v21 = vld [vmem:[#allocation2 + $0x16c] sm:$0xf] }
 0x366   :  { %v4862_v26 = vrot.slane %v16618_v5, 5  ;;  %v11977_v55 = vcombine.low %v16638_v30, %v16624_v8  ;;  %v4869_v45 = vrot.slane %v4565_v41, 5  ;;  %v1976_v40 = vsel %vm13628_vm3, 0, %v1975_v10  ;;  %v13165_v35 = vld [vmem:[#allocation2 + $0x144] sm:$0xff]   ;;  %v3509_v5 = vld [vmem:[#allocation2 + $0xec] sm:$0x1] }
 0x367   :  { %9808 = vmatmul.mubr.bf16.gmra.mrb[164].mxu0 %v13158_v17  ;;  %10201 = vmatmul.mubr.bf16.gmra.mrb[104].mxu1 %v11974_v39  ;;  %v16649_v2 = vcombine.low %v3904_v1, %v3914_v60  ;;  %v3923_v27 = vrot.slane %v3922_v13, 4  ;;  %1977 = vst [vmem:[#allocation2 + $0xd8] sm:$0x1] %v1976_v40  ;;  %v3949_v61 = vshll.u32 %v3505_v62, 16  ;;  %v3937_v39 = vrot.slane %v3935_v59, 5 }
 0x368   :  { %9815 = vmatprep.mubr.bf16.mxu0 %v16562_v34  ;;  %v3932_v34 = vor.u32 %v3931_v18, %v16626_v51  ;;  %10208 = vmatprep.mubr.bf16.mxu1 %v13163_v57  ;;  %v4864_v48 = vrot.slane %v4862_v26, 4  ;;  %v11946_v43 = vrot.slane %v4561_v12, 9  ;;  %v3953_v16 = vshrl.u32 %v3505_v62, 16  ;;  %v4567_v18 = vld [vmem:[#allocation2 + $0x168] sm:$0xe] }
 0x369   :  { %v4865_v63 = vrot.slane %v4563_v32, 5  ;;  %v11947_v33 = vrot.slane %v4564_v50, 9  ;;  %v16651_v24 = vrot.slane %v3949_v61, 5  ;;  %v3959_v36 = vshll.u32 %v3506_v56, 16  ;;  %v4569_v59 = vld [vmem:[#allocation2 + $0x170] sm:$0x1] }
 0x36a   :  { %v3933_v25 = vrot.slane %v3932_v34, 4  ;;  %v3928_v58 = vsel %vm16171_vm15, %v3923_v27, %v16626_v51  ;;  %v4871_v47 = vrot.slane %v4869_v45, 4  ;;  %v4872_v3 = vrot.slane %v4566_v19, 5  ;;  %v3510_v40 = vld [vmem:[#allocation2 + $0xf0] sm:$0xf] }
 0x36b   :  { %v3955_v53 = vrot.slane %v3953_v16, 4  ;;  %v16662_v17 = vsel %vm16154_vm14, %v4864_v48, %v4865_v63  ;;  %v16664_v20 = vrot.slane %v3959_v36, 5  ;;  %v3964_v44 = vshrl.u32 %v3507_v46, 16  ;;  %v3511_v27 = vld [vmem:[#allocation2 + $0xf4] sm:$0xf] }
 0x36c   :  { %v3938_v28 = vsel %vm16171_vm15, %v3933_v25, %v3937_v39  ;;  %v3967_v0 = vshll.u32 %v3507_v46, 16  ;;  %v3973_v51 = vshll.u32 %v3508_v22, 16  ;;  %v3977_v41 = vshrl.u32 %v3508_v22, 16  ;;  %v13164_v39 = vld [vmem:[#allocation2 + $0x84] sm:$0xff]   ;;  %v3514_v29 = vld [vmem:[#allocation2 + $0x100] sm:$0xf] }
 0x36d   :  { %v3956_v14 = vor.u32 %v3955_v53, %v16651_v24  ;;  %v16670_v10 = vsel %vm16154_vm14, %v11946_v43, %v4862_v26  ;;  %v16674_v1 = vsel %vm16154_vm14, %v11947_v33, %v4869_v45  ;;  %v3966_v60 = vrot.slane %v3964_v44, 4  ;;  %v4571_v33 = vld [vmem:[#allocation2 + $0x178] sm:$0xf]  ;;  %v4577_v30 = vld [vmem:[#allocation2 + $0x190] sm:$0xf] }
 0x36e   :  { %v4876_v62 = vrot.slane %v16656_v21, 5  ;;  %v16680_v57 = vcombine.low %v3928_v58, %v3938_v28  ;;  %v16686_v13 = vsel %vm16154_vm14, %v4871_v47, %v4872_v3  ;;  %v3504_v12 = vld [vmem:[#allocation2 + $0xd8] sm:$0xf]  ;;  %v3969_v50 = vrot.slane %v3967_v0, 5  ;;  %v13168_v3 = vld [vmem:[#allocation2 + $0x150] sm:$0xff]  }
 0x36f   :  { %9816 = vmatmul.mubr.bf16.gmra.mrb[168].mxu0 %v13161_v42  ;;  %10209 = vmatmul.mubr.bf16.gmra.mrb[108].mxu1 %v11975_v38  ;;  %v3957_v32 = vrot.slane %v3956_v14, 4  ;;  %v3940_v26 = vshrl.u32 %v3504_v12, 16  ;;  %v3943_v34 = vshll.u32 %v3504_v12, 16  ;;  %v3975_v45 = vrot.slane %v3973_v51, 5  ;;  %v3512_v42 = vld [vmem:[#allocation2 + $0xf8] sm:$0x1] }
 0x370   :  { %9823 = vmatprep.mubr.bf16.mxu0 %v16564_v15  ;;  %v11978_v15 = vcombine.low %v16670_v10, %v16662_v17  ;;  %10216 = vmatprep.mubr.bf16.mxu1 %v13165_v35  ;;  %v3979_v52 = vrot.slane %v3977_v41, 4  ;;  %v3983_v38 = vshll.u32 %v3509_v5, 16  ;;  %v11948_v56 = vrot.slane %v4567_v18, 9  ;;  %v4570_v0 = vld [vmem:[#allocation2 + $0x174] sm:$0xe] }
 0x371   :  { %v3962_v11 = vsel %vm16171_vm15, %v3957_v32, %v16664_v20  ;;  %v3942_v48 = vrot.slane %v3940_v26, 4  ;;  %v3945_v19 = vrot.slane %v3943_v34, 5  ;;  %v3970_v61 = vor.u32 %v3969_v50, %v3966_v60  ;;  %v3513_v18 = vld [vmem:[#allocation2 + $0xfc] sm:$0xf] }
 0x372   :  { %v4878_v25 = vrot.slane %v4876_v62, 4  ;;  %v3980_v43 = vor.u32 %v3979_v52, %v3975_v45  ;;  %v4879_v16 = vrot.slane %v4569_v59, 5  ;;  %v3988_v46 = vshrl.u32 %v3510_v40, 16  ;;  %v3515_v52 = vld [vmem:[#allocation2 + $0x104] sm:$0x1] }
 0x373   :  { %v3991_v63 = vshll.u32 %v3510_v40, 16  ;;  %v3946_v36 = vor.u32 %v3945_v19, %v3942_v48  ;;  %v3971_v22 = vrot.slane %v3970_v61, 4  ;;  %v3997_v58 = vshll.u32 %v3511_v27, 16  ;;  %v4574_v48 = vld [vmem:[#allocation2 + $0x184] sm:$0xf] }
 0x374   :  { %v4001_v47 = vshrl.u32 %v3511_v27, 16  ;;  %v3981_v53 = vrot.slane %v3980_v43, 4  ;;  %v3985_v21 = vrot.slane %v3983_v38, 5  ;;  %v3990_v28 = vrot.slane %v3988_v46, 4  ;;  %v3516_v43 = vld [vmem:[#allocation2 + $0x108] sm:$0xf] }
 0x375   :  { %v3993_v20 = vrot.slane %v3991_v63, 5  ;;  %v3947_v44 = vrot.slane %v3946_v36, 4  ;;  %v3976_v35 = vsel %vm16171_vm15, %v3971_v22, %v3975_v45  ;;  %v16696_v14 = vsel %vm16154_vm14, %v4878_v25, %v4879_v16  ;;  %v4572_v45 = vld [vmem:[#allocation2 + $0x17c] sm:$0x1] }
 0x376   :  { %v16698_v5 = vrot.slane %v3997_v58, 5  ;;  %v3986_v51 = vsel %vm16171_vm15, %v3981_v53, %v3985_v21  ;;  %v4007_v60 = vshll.u32 %v3512_v42, 16  ;;  %v11979_v59 = vcombine.low %v16674_v1, %v16686_v13  ;;  %v3517_v58 = vld [vmem:[#allocation2 + $0x10c] sm:$0xf]  ;;  %v3521_v10 = vld [vmem:[#allocation2 + $0x11c] sm:$0x1] }
 0x377   :  { %9824 = vmatmul.mubr.bf16.gmra.mrb[172].mxu0 %v13164_v39  ;;  %10217 = vmatmul.mubr.bf16.gmra.mrb[112].mxu1 %v11976_v54  ;;  %v3994_v41 = vor.u32 %v3993_v20, %v3990_v28  ;;  %v3952_v12 = vsel %vm16171_vm15, %v3947_v44, %v16651_v24  ;;  %v16712_v32 = vsel %vm16154_vm14, %v11948_v56, %v4876_v62  ;;  %v4883_v7 = vrot.slane %v4571_v33, 5  ;;  %v13167_v54 = vld [vmem:[#allocation2 + $0x90] sm:$0xff]   ;;  %v4573_v56 = vld [vmem:[#allocation2 + $0x180] sm:$0xe]  ;;  %v4575_v20 = vld [vmem:[#allocation2 + $0x188] sm:$0x1] }
 0x378   :  { %9831 = vmatprep.mubr.bf16.mxu0 %v16590_v6  ;;  %v4003_v6 = vrot.slane %v4001_v47, 4  ;;  %10224 = vmatprep.mubr.bf16.mxu1 %v13168_v3  ;;  %v11980_v26 = vcombine.low %v16712_v32, %v16696_v14  ;;  %v11949_v40 = vrot.slane %v4570_v0, 9  ;;  %v16719_v38 = vcombine.low %v3952_v12, %v3962_v11  ;;  %v13171_v47 = vld [vmem:[#allocation2 + $0x15c] sm:$0xff]   ;;  %v13175_v13 = vld [vmem:[#allocation2 + $0xb4] sm:$0xff]  }
 0x379   :  { %v16716_v34 = vrot.slane %v3994_v41, 4  ;;  %v16721_v24 = vcombine.low %v3976_v35, %v3986_v51  ;;  %v4885_v27 = vrot.slane %v4883_v7, 4  ;;  %v4012_v62 = vshrl.u32 %v3513_v18, 16  ;;  %v3518_v51 = vld [vmem:[#allocation2 + $0x110] sm:$0x1] }
 0x37a   :  { %v4004_v50 = vor.u32 %v4003_v6, %v16698_v5  ;;  %v4009_v61 = vrot.slane %v4007_v60, 5  ;;  %v4015_v25 = vshll.u32 %v3513_v18, 16  ;;  %v4021_v39 = vshll.u32 %v3514_v29, 16 }
 0x37b   :  { %v4886_v16 = vrot.slane %v4572_v45, 5  ;;  %v4014_v46 = vrot.slane %v4012_v62, 4  ;;  %v4025_v63 = vshrl.u32 %v3514_v29, 16  ;;  %v4031_v33 = vshll.u32 %v3515_v52, 16 }
 0x37c   :  { %v4005_v19 = vrot.slane %v4004_v50, 4  ;;  %v4000_v11 = vsel %vm16171_vm15, %v16716_v34, %v16698_v5  ;;  %v16729_v36 = vsel %vm16154_vm14, %v11949_v40, %v4883_v7  ;;  %v4017_v22 = vrot.slane %v4015_v25, 5 }
 0x37d   :  { %v4023_v42 = vrot.slane %v4021_v39, 5  ;;  %v16736_v53 = vsel %vm16154_vm14, %v4885_v27, %v4886_v16  ;;  %v4027_v21 = vrot.slane %v4025_v63, 4  ;;  %v4033_v28 = vrot.slane %v4031_v33, 5  ;;  %v13174_v16 = vld [vmem:[#allocation2 + $0x168] sm:$0xff]  }
 0x37e   :  { %v4010_v3 = vsel %vm16171_vm15, %v4005_v19, %v4009_v61  ;;  %v4018_v44 = vor.u32 %v4017_v22, %v4014_v46  ;;  %v11950_v35 = vrot.slane %v4573_v56, 9  ;;  %v4890_v5 = vrot.slane %v4574_v48, 5  ;;  %v6374_v56 = vld [vmem:[#allocation2 + $0xc] sm:$0xe]  ;;  %v6375_v48 = vld [vmem:[#allocation2 + $0x10] sm:$0xf] }
 0x37f   :  { %9832 = vmatmul.mubr.bf16.gmra.mrb[176].mxu0 %v13167_v54  ;;  %10225 = vmatmul.mubr.bf16.gmra.mrb[116].mxu1 %v11977_v55  ;;  %v4036_v0 = vshrl.u32 %v3516_v43, 16  ;;  %v4039_v41 = vshll.u32 %v3516_v43, 16  ;;  %v4045_v6 = vshll.u32 %v3517_v58, 16  ;;  %v4049_v60 = vshrl.u32 %v3517_v58, 16  ;;  %v4576_v54 = vld [vmem:[#allocation2 + $0x18c] sm:$0xe] }
 0x380   :  { %9839 = vmatprep.mubr.bf16.mxu0 %v16634_v9  ;;  %10232 = vmatprep.mubr.bf16.mxu1 %v13171_v47  ;;  %v4028_v9 = vor.u32 %v4027_v21, %v4023_v42  ;;  %v4019_v18 = vrot.slane %v4018_v44, 4  ;;  %v4892_v12 = vrot.slane %v4890_v5, 4  ;;  %v4893_v7 = vrot.slane %v4575_v20, 5  ;;  %v13170_v55 = vld [vmem:[#allocation2 + $0x9c] sm:$0xff]   ;;  %v3519_v43 = vld [vmem:[#allocation2 + $0x114] sm:$0xf] }
 0x381   :  { %v4038_v29 = vrot.slane %v4036_v0, 4  ;;  %v4041_v50 = vrot.slane %v4039_v41, 5  ;;  %v4047_v45 = vrot.slane %v4045_v6, 5  ;;  %v4051_v8 = vrot.slane %v4049_v60, 4  ;;  %v4578_v22 = vld [vmem:[#allocation2 + $0x194] sm:$0x1] }
 0x382   :  { %v4029_v34 = vrot.slane %v4028_v9, 4  ;;  %v11981_v40 = vcombine.low %v16729_v36, %v16736_v53  ;;  %v4024_v52 = vsel %vm16171_vm15, %v4019_v18, %v4023_v42  ;;  %v16747_v27 = vsel %vm16154_vm14, %v4892_v12, %v4893_v7  ;;  %v6376_v21 = vld [vmem:[#allocation2 + $0x14] sm:$0x1]  ;;  %v5351_v18 = vld [vmem:[#allocation2 + $0x10] sm:$0xf] }
 0x383   :  { %v4055_v62 = vshll.u32 %v3518_v51, 16  ;;  %v4042_v61 = vor.u32 %v4041_v50, %v4038_v29  ;;  %v4052_v25 = vor.u32 %v4051_v8, %v4047_v45  ;;  %v11951_v39 = vrot.slane %v4576_v54, 9 }
 0x384   :  { %v4034_v19 = vsel %vm16171_vm15, %v4029_v34, %v4033_v28  ;;  %v16751_v46 = vcombine.low %v4000_v11, %v4010_v3  ;;  %v16755_v63 = vsel %vm16154_vm14, %v11950_v35, %v4890_v5  ;;  %v4897_v42 = vrot.slane %v4577_v30, 5  ;;  %v3520_v35 = vld [vmem:[#allocation2 + $0x118] sm:$0xf]  ;;  %v13172_v34 = vld [vmem:[#allocation2 + $0xa8] sm:$0xff]   ;;  %v5352_v30 = vld [vmem:[#allocation2 + $0x14] sm:$0x1] }
 0x385   :  { %v4057_v33 = vrot.slane %v4055_v62, 5  ;;  %v4043_v58 = vrot.slane %v4042_v61, 4  ;;  %v4053_v47 = vrot.slane %v4052_v25, 4  ;;  %v12048_v28 = vrot.slane %v6374_v56, 9 }
 0x386   :  { %v6568_v20 = vrot.slane %v6375_v48, 5  ;;  %v16761_v11 = vcombine.low %v4024_v52, %v4034_v19  ;;  %v11982_v3 = vcombine.low %v16755_v63, %v16747_v27  ;;  %v4899_v44 = vrot.slane %v4897_v42, 4  ;;  %v6378_v19 = vld [vmem:[#allocation2 + $0x1c] sm:$0xf] }
 0x387   :  { %9840 = vmatmul.mubr.bf16.gmra.mrb[180].mxu0 %v13170_v55  ;;  %10233 = vmatmul.mubr.bf16.gmra.mrb[120].mxu1 %v11978_v15  ;;  %v4060_v5 = vshrl.u32 %v3519_v43, 16  ;;  %v4058_v0 = vsel %vm16171_vm15, %v4053_v47, %v4057_v33  ;;  %v16771_v9 = vsel %vm16154_vm14, %v11951_v39, %v4897_v42  ;;  %v4900_v17 = vrot.slane %v4578_v22, 5  ;;  %v5350_v15 = vld [vmem:[#allocation2 + $0xc] sm:$0xf]  ;;  %v13177_v33 = vld [vmem:[#allocation2 + $0x174] sm:$0xff]  }
 0x388   :  { %9847 = vmatprep.mubr.bf16.mxu0 %v16649_v2  ;;  %10240 = vmatprep.mubr.bf16.mxu1 %v13174_v16  ;;  %v4048_v2 = vsel %vm16171_vm15, %v4043_v58, %v4047_v45  ;;  %v16775_v51 = vsel %vm16154_vm14, %v12048_v28, %v6568_v20  ;;  %v6571_v41 = vrot.slane %v6376_v21, 5  ;;  %v4063_v60 = vshll.u32 %v3519_v43, 16  ;;  %v6377_v16 = vld [vmem:[#allocation2 + $0x18] sm:$0xe]  ;;  %v6379_v21 = vld [vmem:[#allocation2 + $0x20] sm:$0x1] }
 0x389   :  { %v4062_v6 = vrot.slane %v4060_v5, 4  ;;  %v16779_v12 = vsel %vm16154_vm14, %v4899_v44, %v4900_v17  ;;  %v6570_v7 = vrot.slane %v6568_v20, 4  ;;  %v4069_v29 = vshll.u32 %v3520_v35, 16  ;;  %v3522_v5 = vld [vmem:[#allocation2 + $0x120] sm:$0xf] }
 0x38a   :  { %v4073_v54 = vshrl.u32 %v3520_v35, 16  ;;  %v16781_v50 = vcombine.low %v4048_v2, %v4058_v0  ;;  %v4065_v45 = vrot.slane %v4063_v60, 5  ;;  %v4079_v8 = vshll.u32 %v3521_v10, 16  ;;  %v3523_v10 = vld [vmem:[#allocation2 + $0x124] sm:$0xf] }
 0x38b   :  { %v5447_v55 = vshrl.u32 %v5350_v15, 16  ;;  %v4071_v52 = vrot.slane %v4069_v29, 5  ;;  %v5450_v56 = vshll.u32 %v5350_v15, 16  ;;  %v5456_v48 = vshll.u32 %v5351_v18, 16 }
 0x38c   :  { %v4075_v62 = vrot.slane %v4073_v54, 4  ;;  %v11983_v61 = vcombine.low %v16771_v9, %v16779_v12  ;;  %v4066_v25 = vor.u32 %v4065_v45, %v4062_v6  ;;  %v5460_v43 = vshrl.u32 %v5351_v18, 16  ;;  %v5362_v12 = vld [vmem:[#allocation2 + $0x3c] sm:$0xf] }
 0x38d   :  { %v5449_v39 = vrot.slane %v5447_v55, 4  ;;  %v16788_v22 = vsel %vm16154_vm14, %v6570_v7, %v6571_v41  ;;  %v5452_v58 = vrot.slane %v5450_v56, 5  ;;  %v5458_v47 = vrot.slane %v5456_v48, 5  ;;  %v5354_v48 = vld [vmem:[#allocation2 + $0x1c] sm:$0xf] }
 0x38e   :  { %v4076_v42 = vor.u32 %v4075_v62, %v4071_v52  ;;  %v4067_v28 = vrot.slane %v4066_v25, 4  ;;  %v5462_v20 = vrot.slane %v5460_v43, 4  ;;  %v5466_v44 = vshll.u32 %v5352_v30, 16 }
 0x38f   :  { %9848 = vmatmul.mubr.bf16.gmra.mrb[184].mxu0 %v13172_v34  ;;  %10241 = vmatmul.mubr.bf16.gmra.mrb[124].mxu1 %v11979_v59  ;;  %v6575_v35 = vrot.slane %v6378_v19, 5  ;;  %v4081_v2 = vrot.slane %v4079_v8, 5  ;;  %v5453_v0 = vor.u32 %v5452_v58, %v5449_v39  ;;  %v12049_v17 = vrot.slane %v6377_v16, 9  ;;  %v5353_v8 = vld [vmem:[#allocation2 + $0x18] sm:$0xf]  ;;  %v13179_v19 = vld [vmem:[#allocation2 + $0x180] sm:$0xff]  }
 0x390   :  { %9855 = vmatprep.mubr.bf16.mxu0 %v16680_v57  ;;  %10248 = vmatprep.mubr.bf16.mxu1 %v13177_v33  ;;  %v4077_v57 = vrot.slane %v4076_v42, 4  ;;  %v12080_v15 = vcombine.low %v16775_v51, %v16788_v22  ;;  %v4072_v41 = vsel %vm16171_vm15, %v4067_v28, %v4071_v52  ;;  %v5463_v6 = vor.u32 %v5462_v20, %v5458_v47  ;;  %v3524_v52 = vld [vmem:[#allocation2 + $0x128] sm:$0x1]  ;;  %v5355_v58 = vld [vmem:[#allocation2 + $0x20] sm:$0x1] }
 0x391   :  { %v6577_v1 = vrot.slane %v6575_v35, 4  ;;  %v5454_v60 = vrot.slane %v5453_v0, 4  ;;  %v4084_v18 = vshrl.u32 %v3522_v5, 16  ;;  %v4087_v7 = vshll.u32 %v3522_v5, 16  ;;  %v6380_v20 = vld [vmem:[#allocation2 + $0x24] sm:$0xe] }
 0x392   :  { %v4082_v59 = vsel %vm16171_vm15, %v4077_v57, %v4081_v2  ;;  %v5464_v29 = vrot.slane %v5463_v6, 4  ;;  %v5468_v54 = vrot.slane %v5466_v44, 5  ;;  %v6578_v34 = vrot.slane %v6379_v21, 5  ;;  %v6381_v57 = vld [vmem:[#allocation2 + $0x28] sm:$0xf]  ;;  %v13178_v6 = vld [vmem:[#allocation2 + $0xd8] sm:$0xff]  }
 0x393   :  { %v4093_v45 = vshll.u32 %v3523_v10, 16  ;;  %v16799_v30 = vcombine.low %v4072_v41, %v4082_v59  ;;  %v16803_v55 = vsel %vm16154_vm14, %v12049_v17, %v6575_v35  ;;  %v4086_v62 = vrot.slane %v4084_v18, 4  ;;  %v3525_v41 = vld [vmem:[#allocation2 + $0x12c] sm:$0xf]  ;;  %v13186_v51 = vld [vmem:[#allocation2 + $0xfc] sm:$0xff]  }
 0x394   :  { %v4089_v56 = vrot.slane %v4087_v7, 5  ;;  %v5459_v25 = vsel %vm16171_vm15, %v5454_v60, %v5458_v47  ;;  %v16809_v39 = vsel %vm16154_vm14, %v6577_v1, %v6578_v34  ;;  %v4097_v16 = vshrl.u32 %v3523_v10, 16  ;;  %v6382_v10 = vld [vmem:[#allocation2 + $0x2c] sm:$0x1]  ;;  %v3526_v7 = vld [vmem:[#allocation2 + $0x130] sm:$0xf] }
 0x395   :  { %v16811_v43 = vrot.slane %v4093_v45, 5  ;;  %v5469_v33 = vsel %vm16171_vm15, %v5464_v29, %v5468_v54  ;;  %v5471_v21 = vshrl.u32 %v5353_v8, 16  ;;  %v5474_v28 = vshll.u32 %v5353_v8, 16 }
 0x396   :  { %v4090_v42 = vor.u32 %v4089_v56, %v4086_v62  ;;  %v4099_v47 = vrot.slane %v4097_v16, 4  ;;  %v4103_v44 = vshll.u32 %v3524_v52, 16  ;;  %v5480_v35 = vshll.u32 %v5354_v48, 16  ;;  %v3527_v56 = vld [vmem:[#allocation2 + $0x134] sm:$0x1] }
 0x397   :  { %9856 = vmatmul.mubr.bf16.gmra.mrb[188].mxu0 %v13175_v13  ;;  %10249 = vmatmul.mubr.bf16.gmra.mrb[128].mxu1 %v11980_v26  ;;  %v5484_v5 = vshrl.u32 %v5354_v48, 16  ;;  %v5473_v0 = vrot.slane %v5471_v21, 4  ;;  %v5476_v17 = vrot.slane %v5474_v28, 5  ;;  %v16821_v1 = vcombine.low %v5459_v25, %v5469_v33 }
 0x398   :  { %9863 = vmatprep.mubr.bf16.mxu0 %v16719_v38  ;;  %10256 = vmatprep.mubr.bf16.mxu1 %v13179_v19  ;;  %v12081_v38 = vcombine.low %v16803_v55, %v16809_v39  ;;  %v4091_v2 = vrot.slane %v4090_v42, 4  ;;  %v4100_v14 = vor.u32 %v4099_v47, %v16811_v43  ;;  %v5482_v32 = vrot.slane %v5480_v35, 5  ;;  %v5356_v42 = vld [vmem:[#allocation2 + $0x24] sm:$0xf]  ;;  %v5357_v47 = vld [vmem:[#allocation2 + $0x28] sm:$0xf] }
 0x399   :  { %v5486_v26 = vrot.slane %v5484_v5, 4  ;;  %v5477_v13 = vor.u32 %v5476_v17, %v5473_v0  ;;  %v5490_v59 = vshll.u32 %v5355_v58, 16  ;;  %v12050_v60 = vrot.slane %v6380_v20, 9  ;;  %v13182_v58 = vld [vmem:[#allocation2 + $0x18c] sm:$0xff]  }
 0x39a   :  { %v6582_v18 = vrot.slane %v6381_v57, 5  ;;  %v4101_v29 = vrot.slane %v4100_v14, 4  ;;  %v4105_v54 = vrot.slane %v4103_v44, 5  ;;  %v4108_v45 = vshrl.u32 %v3525_v41, 16  ;;  %v5358_v57 = vld [vmem:[#allocation2 + $0x2c] sm:$0x1] }
 0x39b   :  { %v5487_v34 = vor.u32 %v5486_v26, %v5482_v32  ;;  %v4096_v8 = vsel %vm16171_vm15, %v4091_v2, %v16811_v43  ;;  %v5478_v52 = vrot.slane %v5477_v13, 4  ;;  %v4111_v48 = vshll.u32 %v3525_v41, 16 }
 0x39c   :  { %v6584_v62 = vrot.slane %v6582_v18, 4  ;;  %v6585_v25 = vrot.slane %v6382_v10, 5  ;;  %v4110_v16 = vrot.slane %v4108_v45, 4  ;;  %v4117_v33 = vshll.u32 %v3526_v7, 16  ;;  %v3528_v45 = vld [vmem:[#allocation2 + $0x138] sm:$0xf] }
 0x39d   :  { %v5488_v19 = vrot.slane %v5487_v34, 4  ;;  %v4106_v21 = vsel %vm16171_vm15, %v4101_v29, %v4105_v54  ;;  %v5492_v28 = vrot.slane %v5490_v59, 5  ;;  %v16832_v43 = vsel %vm16154_vm14, %v12050_v60, %v6582_v18  ;;  %v6383_v59 = vld [vmem:[#allocation2 + $0x30] sm:$0xe]  ;;  %v6385_v60 = vld [vmem:[#allocation2 + $0x38] sm:$0x1] }
 0x39e   :  { %v4113_v20 = vrot.slane %v4111_v48, 5  ;;  %v5483_v44 = vsel %vm16171_vm15, %v5478_v52, %v5482_v32  ;;  %v4119_v35 = vrot.slane %v4117_v33, 5  ;;  %v4121_v5 = vshrl.u32 %v3526_v7, 16  ;;  %v13181_v18 = vld [vmem:[#allocation2 + $0xe4] sm:$0xff]   ;;  %v3529_v48 = vld [vmem:[#allocation2 + $0x13c] sm:$0xf] }
 0x39f   :  { %9864 = vmatmul.mubr.bf16.gmra.mrb[192].mxu0 %v13178_v6  ;;  %10257 = vmatmul.mubr.bf16.gmra.mrb[132].mxu1 %v11981_v40  ;;  %v5493_v2 = vsel %vm16171_vm15, %v5488_v19, %v5492_v28  ;;  %v4127_v17 = vshll.u32 %v3527_v56, 16  ;;  %v5495_v10 = vshrl.u32 %v5356_v42, 16  ;;  %v5498_v36 = vshll.u32 %v5356_v42, 16  ;;  %v6384_v6 = vld [vmem:[#allocation2 + $0x34] sm:$0xf] }
 0x3a0   :  { %9871 = vmatprep.mubr.bf16.mxu0 %v16721_v24  ;;  %v16841_v24 = vsel %vm16154_vm14, %v6584_v62, %v6585_v25  ;;  %10264 = vmatprep.mubr.bf16.mxu1 %v13182_v58  ;;  %v4114_v0 = vor.u32 %v4113_v20, %v4110_v16  ;;  %v4123_v41 = vrot.slane %v4121_v5, 4  ;;  %v5504_v53 = vshll.u32 %v5357_v47, 16  ;;  %v3530_v42 = vld [vmem:[#allocation2 + $0x140] sm:$0x1]  ;;  %v13185_v58 = vld [vmem:[#allocation2 + $0x198] sm:$0xff]  }
 0x3a1   :  { %v5508_v40 = vshrl.u32 %v5357_v47, 16  ;;  %v16845_v14 = vcombine.low %v4096_v8, %v4106_v21  ;;  %v12082_v32 = vcombine.low %v16832_v43, %v16841_v24  ;;  %v5497_v13 = vrot.slane %v5495_v10, 4 }
 0x3a2   :  { %v4115_v26 = vrot.slane %v4114_v0, 4  ;;  %v4124_v7 = vor.u32 %v4123_v41, %v4119_v35  ;;  %v5500_v29 = vrot.slane %v5498_v36, 5  ;;  %v16849_v54 = vrot.slane %v5504_v53, 5 }
 0x3a3   :  { %v5510_v34 = vrot.slane %v5508_v40, 4  ;;  %v16851_v52 = vcombine.low %v5483_v44, %v5493_v2  ;;  %v4129_v62 = vrot.slane %v4127_v17, 5  ;;  %v5514_v56 = vshll.u32 %v5358_v57, 16  ;;  %v5359_v44 = vld [vmem:[#allocation2 + $0x30] sm:$0xf] }
 0x3a4   :  { %v6589_v8 = vrot.slane %v6384_v6, 5  ;;  %v4125_v19 = vrot.slane %v4124_v7, 4  ;;  %v5501_v25 = vor.u32 %v5500_v29, %v5497_v13  ;;  %v12051_v33 = vrot.slane %v6383_v59, 9  ;;  %v5360_v17 = vld [vmem:[#allocation2 + $0x34] sm:$0xf] }
 0x3a5   :  { %v5511_v16 = vor.u32 %v5510_v34, %v16849_v54  ;;  %v4120_v21 = vsel %vm16171_vm15, %v4115_v26, %v4119_v35  ;;  %v4132_v20 = vshrl.u32 %v3528_v45, 16  ;;  %v4135_v47 = vshll.u32 %v3528_v45, 16  ;;  %v13184_v40 = vld [vmem:[#allocation2 + $0xf0] sm:$0xff]  }
 0x3a6   :  { %v6591_v28 = vrot.slane %v6589_v8, 4  ;;  %v4130_v5 = vsel %vm16171_vm15, %v4125_v19, %v4129_v62  ;;  %v5502_v57 = vrot.slane %v5501_v25, 4  ;;  %v6592_v2 = vrot.slane %v6385_v60, 5  ;;  %v6386_v60 = vld [vmem:[#allocation2 + $0x3c] sm:$0xe] }
 0x3a7   :  { %9872 = vmatmul.mubr.bf16.gmra.mrb[196].mxu0 %v13181_v18  ;;  %10265 = vmatmul.mubr.bf16.gmra.mrb[136].mxu1 %v11982_v3  ;;  %v4141_v0 = vshll.u32 %v3529_v48, 16  ;;  %v5516_v10 = vrot.slane %v5514_v56, 5  ;;  %v4134_v41 = vrot.slane %v4132_v20, 4  ;;  %v4137_v35 = vrot.slane %v4135_v47, 5  ;;  %v5361_v3 = vld [vmem:[#allocation2 + $0x38] sm:$0x1] }
 0x3a8   :  { %9879 = vmatprep.mubr.bf16.mxu0 %v16751_v46  ;;  %10272 = vmatprep.mubr.bf16.mxu1 %v13185_v58  ;;  %v5512_v46 = vrot.slane %v5511_v16, 4  ;;  %v16862_v36 = vcombine.low %v4120_v21, %v4130_v5  ;;  %v5507_v53 = vsel %vm16171_vm15, %v5502_v57, %v16849_v54  ;;  %v16869_v27 = vsel %vm16154_vm14, %v12051_v33, %v6589_v8  ;;  %v6387_v54 = vld [vmem:[#allocation2 + $0x40] sm:$0xf]  ;;  %v3531_v19 = vld [vmem:[#allocation2 + $0x144] sm:$0xf] }
 0x3a9   :  { %v16873_v63 = vsel %vm16154_vm14, %v6591_v28, %v6592_v2  ;;  %v4138_v6 = vor.u32 %v4137_v35, %v4134_v41  ;;  %v4143_v26 = vrot.slane %v4141_v0, 5  ;;  %v4145_v13 = vshrl.u32 %v3529_v48, 16  ;;  %v3532_v48 = vld [vmem:[#allocation2 + $0x148] sm:$0xf]  ;;  %v6388_v5 = vld [vmem:[#allocation2 + $0x44] sm:$0x1] }
 0x3aa   :  { %v4151_v59 = vshll.u32 %v3530_v42, 16  ;;  %v5519_v18 = vshrl.u32 %v5359_v44, 16  ;;  %v5522_v7 = vshll.u32 %v5359_v44, 16  ;;  %v5528_v29 = vshll.u32 %v5360_v17, 16  ;;  %v3533_v0 = vld [vmem:[#allocation2 + $0x14c] sm:$0x1] }
 0x3ab   :  { %v5532_v34 = vshrl.u32 %v5360_v17, 16  ;;  %v5517_v45 = vsel %vm16171_vm15, %v5512_v46, %v5516_v10  ;;  %v4139_v62 = vrot.slane %v4138_v6, 4  ;;  %v4147_v56 = vrot.slane %v4145_v13, 4  ;;  %v5363_v13 = vld [vmem:[#allocation2 + $0x40] sm:$0xf] }
 0x3ac   :  { %v5538_v8 = vshll.u32 %v5361_v3, 16  ;;  %v5521_v25 = vrot.slane %v5519_v18, 4  ;;  %v5524_v16 = vrot.slane %v5522_v7, 5  ;;  %v5530_v33 = vrot.slane %v5528_v29, 5 }
 0x3ad   :  { %v5534_v58 = vrot.slane %v5532_v34, 4  ;;  %v12083_v42 = vcombine.low %v16869_v27, %v16873_v63  ;;  %v4144_v21 = vsel %vm16171_vm15, %v4139_v62, %v4143_v26  ;;  %v4148_v28 = vor.u32 %v4147_v56, %v4143_v26 }
 0x3ae   :  { %v4153_v20 = vrot.slane %v4151_v59, 5  ;;  %v5525_v47 = vor.u32 %v5524_v16, %v5521_v25  ;;  %v12052_v57 = vrot.slane %v6386_v60, 9  ;;  %v6596_v2 = vrot.slane %v6387_v54, 5  ;;  %v13189_v60 = vld [vmem:[%s19582_s4 + $0x180] sm:$0xff]   ;;  %v6390_v25 = vld [vmem:[#allocation2 + $0x4c] sm:$0xf] }
 0x3af   :  { %9880 = vmatmul.mubr.bf16.gmra.mrb[200].mxu0 %v13184_v40  ;;  %10273 = vmatmul.mubr.bf16.gmra.mrb[140].mxu1 %v11983_v61  ;;  %v5535_v44 = vor.u32 %v5534_v58, %v5530_v33  ;;  %v4156_v17 = vshrl.u32 %v3531_v19, 16  ;;  %v4159_v46 = vshll.u32 %v3531_v19, 16  ;;  %v4165_v10 = vshll.u32 %v3532_v48, 16  ;;  %v5364_v54 = vld [vmem:[#allocation2 + $0x44] sm:$0x1] }
 0x3b0   :  { %9887 = vmatprep.mubr.bf16.mxu0 %v16761_v11  ;;  %10313 = vmatprep.mubr.bf16.mxu1 %v12080_v15  ;;  %v4149_v11 = vrot.slane %v4148_v28, 4  ;;  %v16888_v41 = vcombine.low %v5507_v53, %v5517_v45  ;;  %v5526_v35 = vrot.slane %v5525_v47, 4  ;;  %v5540_v9 = vrot.slane %v5538_v8, 5  ;;  %v6389_v45 = vld [vmem:[#allocation2 + $0x48] sm:$0xe] }
 0x3b1   :  { %v5536_v3 = vrot.slane %v5535_v44, 4  ;;  %v6598_v40 = vrot.slane %v6596_v2, 4  ;;  %v4158_v6 = vrot.slane %v4156_v17, 4  ;;  %v4161_v26 = vrot.slane %v4159_v46, 5  ;;  %v6391_v28 = vld [vmem:[#allocation2 + $0x50] sm:$0x1] }
 0x3b2   :  { %v4154_v61 = vsel %vm16171_vm15, %v4149_v11, %v4153_v20  ;;  %v16896_v15 = vsel %vm16154_vm14, %v12052_v57, %v6596_v2  ;;  %v6599_v53 = vrot.slane %v6388_v5, 5  ;;  %v4167_v59 = vrot.slane %v4165_v10, 5  ;;  %v3534_v20 = vld [vmem:[#allocation2 + $0x150] sm:$0xf] }
 0x3b3   :  { %v16892_v22 = vcombine.low %v4144_v21, %v4154_v61  ;;  %v5531_v18 = vsel %vm16171_vm15, %v5526_v35, %v5530_v33  ;;  %v5541_v7 = vsel %vm16171_vm15, %v5536_v3, %v5540_v9  ;;  %v4162_v29 = vor.u32 %v4161_v26, %v4158_v6  ;;  %v13188_v9 = vld [vmem:[#allocation2 + $0x108] sm:$0xff]  }
 0x3b4   :  { %v4169_v34 = vshrl.u32 %v3532_v48, 16  ;;  %v4175_v62 = vshll.u32 %v3533_v0, 16  ;;  %v5543_v56 = vshrl.u32 %v5362_v12, 16  ;;  %v5546_v8 = vshll.u32 %v5362_v12, 16 }
 0x3b5   :  { %v5552_v19 = vshll.u32 %v5363_v13, 16  ;;  %v16908_v16 = vsel %vm16154_vm14, %v6598_v40, %v6599_v53  ;;  %v4163_v33 = vrot.slane %v4162_v29, 4  ;;  %v5556_v21 = vshrl.u32 %v5363_v13, 16 }
 0x3b6   :  { %v4171_v58 = vrot.slane %v4169_v34, 4  ;;  %v16911_v48 = vcombine.low %v5531_v18, %v5541_v7  ;;  %v5545_v47 = vrot.slane %v5543_v56, 4  ;;  %v5548_v44 = vrot.slane %v5546_v8, 5 }
 0x3b7   :  { %9888 = vmatmul.mubr.bf16.gmra.mrb[204].mxu0 %v13186_v51  ;;  %10314 = vmatmul.mubr.bf16.vlgmr.msra.gmra.mrb[144].mxu1 %v16821_v1  ;;  %v16913_v5 = vrot.slane %v5552_v19, 5  ;;  %v4177_v2 = vrot.slane %v4175_v62, 5  ;;  %v5558_v11 = vrot.slane %v5556_v21, 4  ;;  %v5562_v0 = vshll.u32 %v5364_v54, 16  ;;  %v3535_v1 = vld [vmem:[#allocation2 + $0x154] sm:$0xf] }
 0x3b8   :  { %9895 = vmatprep.mubr.bf16.mxu0 %v16781_v50  ;;  %10571 = vmatpush1.bf16.msra.mxu1 %v13189_v60  ;;  %v13192_v50 = vld [vmem:[%s19582_s4 + $0x188] sm:$0xff]   ;;  %v4172_v57 = vor.u32 %v4171_v58, %v4167_v59  ;;  %v4168_v17 = vsel %vm16171_vm15, %v4163_v33, %v4167_v59  ;;  %v5549_v46 = vor.u32 %v5548_v44, %v5545_v47  ;;  %v12053_v10 = vrot.slane %v6389_v45, 9  ;;  %v13195_v51 = vld [vmem:[%s19582_s4 + $0x190] sm:$0xff]   ;;  %v3536_v54 = vld [vmem:[#allocation2 + $0x158] sm:$0x1] }
 0x3b9   :  { %10321 = vmatprep.mubr.bf16.mxu1 %v12081_v38  ;;  %10572 = vmatprep.subr.bf16.mxu1 %v20027_v23  ;;  %v6603_v35 = vrot.slane %v6390_v25, 5  ;;  %v5559_v55 = vor.u32 %v5558_v11, %v16913_v5  ;;  %v4180_v39 = vshrl.u32 %v3534_v20, 16  ;;  %v4183_v38 = vshll.u32 %v3534_v20, 16  ;;  %v5365_v60 = vld [vmem:[#allocation2 + $0x48] sm:$0xf]  ;;  %v13198_v25 = vld [vmem:[%s19582_s4 + $0x198] sm:$0xff]  }
 0x3ba   :  { %v4173_v3 = vrot.slane %v4172_v57, 4  ;;  %v5550_v12 = vrot.slane %v5549_v46, 4  ;;  %v6606_v40 = vrot.slane %v6391_v28, 5  ;;  %v4189_v6 = vshll.u32 %v3535_v1, 16  ;;  %v5366_v45 = vld [vmem:[#allocation2 + $0x4c] sm:$0xf] }
 0x3bb   :  { %v6605_v61 = vrot.slane %v6603_v35, 4  ;;  %v5560_v13 = vrot.slane %v5559_v55, 4  ;;  %v4182_v53 = vrot.slane %v4180_v39, 4  ;;  %v4185_v59 = vrot.slane %v4183_v38, 5  ;;  %v5367_v58 = vld [vmem:[#allocation2 + $0x50] sm:$0x1] }
 0x3bc   :  { %10573 = vmatpush1.bf16.msra.mxu1 %v13192_v50  ;;  %v4178_v26 = vsel %vm16171_vm15, %v4173_v3, %v4177_v2  ;;  %v12084_v18 = vcombine.low %v16896_v15, %v16908_v16  ;;  %v5564_v29 = vrot.slane %v5562_v0, 5  ;;  %v16937_v34 = vsel %vm16154_vm14, %v12053_v10, %v6603_v35  ;;  %v6392_v20 = vld [vmem:[#allocation2 + $0x54] sm:$0xe]  ;;  %v6393_v57 = vld [vmem:[#allocation2 + $0x58] sm:$0xf]  ;;  %v13193_v15 = vld [vmem:[#allocation2 + $0x12c] sm:$0xff]  }
 0x3bd   :  { %v16932_v7 = vcombine.low %v4168_v17, %v4178_v26  ;;  %10574 = vmatprep.subr.bf16.mxu1 %v20027_v23  ;;  %v16942_v62 = vsel %vm16154_vm14, %v6605_v61, %v6606_v40  ;;  %v4186_v56 = vor.u32 %v4185_v59, %v4182_v53  ;;  %v16944_v8 = vrot.slane %v4189_v6, 5  ;;  %v6394_v46 = vld [vmem:[#allocation2 + $0x5c] sm:$0x1]  ;;  %v13190_v10 = vld [vmem:[#allocation2 + $0x114] sm:$0xff]   ;;  %v3538_v38 = vld [vmem:[#allocation2 + $0x160] sm:$0xf] }
 0x3be   :  { %v4193_v19 = vshrl.u32 %v3535_v1, 16  ;;  %v5555_v33 = vsel %vm16171_vm15, %v5550_v12, %v16913_v5  ;;  %v5567_v21 = vshrl.u32 %v5365_v60, 16  ;;  %v5570_v28 = vshll.u32 %v5365_v60, 16  ;;  %v3537_v1 = vld [vmem:[#allocation2 + $0x15c] sm:$0xf]  ;;  %v13201_v6 = vld [vmem:[%s19582_s4 + $0x1a0] sm:$0xff]  }
 0x3bf   :  { %9896 = vmatmul.mubr.bf16.gmra.mrb[208].mxu0 %v13188_v9  ;;  %10322 = vmatmul.mubr.bf16.gmra.mrb[148].mxu1 %v16851_v52  ;;  %v4199_v44 = vshll.u32 %v3536_v54, 16  ;;  %v5576_v50 = vshll.u32 %v5366_v45, 16  ;;  %v5580_v52 = vshrl.u32 %v5366_v45, 16  ;;  %v12085_v5 = vcombine.low %v16937_v34, %v16942_v62  ;;  %v3539_v53 = vld [vmem:[#allocation2 + $0x164] sm:$0x1] }
 0x3c0   :  { %9903 = vmatprep.mubr.bf16.mxu0 %v16799_v30  ;;  %v5565_v30 = vsel %vm16171_vm15, %v5560_v13, %v5564_v29  ;;  %10329 = vmatprep.mubr.bf16.mxu1 %v12082_v32  ;;  %v4195_v47 = vrot.slane %v4193_v19, 4  ;;  %v4187_v2 = vrot.slane %v4186_v56, 4  ;;  %v5569_v11 = vrot.slane %v5567_v21, 4  ;;  %v5368_v56 = vld [vmem:[#allocation2 + $0x54] sm:$0xf] }
 0x3c1   :  { %10575 = vmatpush1.bf16.msra.mxu1 %v13195_v51  ;;  %v5572_v0 = vrot.slane %v5570_v28, 5  ;;  %v16961_v17 = vcombine.low %v5555_v33, %v5565_v30  ;;  %v16964_v24 = vrot.slane %v5576_v50, 5  ;;  %v5582_v32 = vrot.slane %v5580_v52, 4  ;;  %v5369_v30 = vld [vmem:[#allocation2 + $0x58] sm:$0xf]  ;;  %v13204_v28 = vld [vmem:[%s19582_s4 + $0x1a8] sm:$0xff]  }
 0x3c2   :  { %10576 = vmatprep.subr.bf16.mxu1 %v20027_v23  ;;  %v4196_v43 = vor.u32 %v4195_v47, %v16944_v8  ;;  %v5586_v3 = vshll.u32 %v5367_v58, 16  ;;  %v12054_v55 = vrot.slane %v6392_v20, 9  ;;  %v6610_v39 = vrot.slane %v6393_v57, 5  ;;  %v13191_v20 = vld [vmem:[#allocation2 + $0x120] sm:$0xff]   ;;  %v5370_v47 = vld [vmem:[#allocation2 + $0x5c] sm:$0x1] }
 0x3c3   :  { %v5573_v35 = vor.u32 %v5572_v0, %v5569_v11  ;;  %v4201_v12 = vrot.slane %v4199_v44, 5  ;;  %v5583_v61 = vor.u32 %v5582_v32, %v16964_v24  ;;  %v4204_v40 = vshrl.u32 %v3537_v1, 16  ;;  %v6396_v11 = vld [vmem:[#allocation2 + $0x64] sm:$0xf]  ;;  %v6395_v32 = vld [vmem:[#allocation2 + $0x60] sm:$0xe] }
 0x3c4   :  { %v4197_v9 = vrot.slane %v4196_v43, 4  ;;  %v4192_v26 = vsel %vm16171_vm15, %v4187_v2, %v16944_v8  ;;  %v6612_v51 = vrot.slane %v6610_v39, 4  ;;  %v4207_v59 = vshll.u32 %v3537_v1, 16 }
 0x3c5   :  { %10577 = vmatpush1.bf16.msra.mxu1 %v13198_v25  ;;  %v5574_v13 = vrot.slane %v5573_v35, 4  ;;  %v5584_v60 = vrot.slane %v5583_v61, 4  ;;  %v6613_v29 = vrot.slane %v6394_v46, 5  ;;  %v4206_v54 = vrot.slane %v4204_v40, 4  ;;  %v6397_v46 = vld [vmem:[#allocation2 + $0x68] sm:$0x1] }
 0x3c6   :  { %10578 = vmatprep.subr.bf16.mxu1 %v20027_v23  ;;  %v4213_v45 = vshll.u32 %v3538_v38, 16  ;;  %v4202_v19 = vsel %vm16171_vm15, %v4197_v9, %v4201_v12  ;;  %v5588_v25 = vrot.slane %v5586_v3, 5  ;;  %v16980_v8 = vsel %vm16154_vm14, %v12054_v55, %v6610_v39  ;;  %v3540_v39 = vld [vmem:[#allocation2 + $0x168] sm:$0xf] }
 0x3c7   :  { %9904 = vmatmul.mubr.bf16.gmra.mrb[212].mxu0 %v13190_v10  ;;  %10330 = vmatmul.mubr.bf16.gmra.mrb[152].mxu1 %v16888_v41  ;;  %v4209_v33 = vrot.slane %v4207_v59, 5  ;;  %v16990_v41 = vsel %vm16154_vm14, %v6612_v51, %v6613_v29  ;;  %v4217_v21 = vshrl.u32 %v3538_v38, 16  ;;  %v5591_v44 = vshrl.u32 %v5368_v56, 16  ;;  %v13208_v38 = vld [vmem:[%s19582_s4 + $0x1b0] sm:$0xff]  }
 0x3c8   :  { %9911 = vmatprep.mubr.bf16.mxu0 %v16845_v14  ;;  %10337 = vmatprep.mubr.bf16.mxu1 %v12083_v42  ;;  %v5579_v14 = vsel %vm16171_vm15, %v5574_v13, %v16964_v24  ;;  %v16992_v58 = vrot.slane %v4213_v45, 5  ;;  %v5589_v27 = vsel %vm16171_vm15, %v5584_v60, %v5588_v25  ;;  %v4223_v42 = vshll.u32 %v3539_v53, 16  ;;  %v3542_v29 = vld [vmem:[#allocation2 + $0x170] sm:$0x1] }
 0x3c9   :  { %10579 = vmatpush1.bf16.msra.mxu1 %v13201_v6  ;;  %v4210_v63 = vor.u32 %v4209_v33, %v4206_v54  ;;  %v4219_v50 = vrot.slane %v4217_v21, 4  ;;  %v5594_v52 = vshll.u32 %v5368_v56, 16  ;;  %v5600_v57 = vshll.u32 %v5369_v30, 16  ;;  %v3541_v6 = vld [vmem:[#allocation2 + $0x16c] sm:$0xf]  ;;  %v13211_v33 = vld [vmem:[%s19582_s4 + $0x1b8] sm:$0xff]  }
 0x3ca   :  { %10580 = vmatprep.subr.bf16.mxu1 %v20027_v23  ;;  %v5604_v2 = vshrl.u32 %v5369_v30, 16  ;;  %v17000_v0 = vcombine.low %v4192_v26, %v4202_v19  ;;  %v12086_v1 = vcombine.low %v16980_v8, %v16990_v41  ;;  %v5593_v24 = vrot.slane %v5591_v44, 4  ;;  %v13221_v8 = vld [vmem:[%s19582_s4 + $0x1d0] sm:$0xff]   ;;  %v13196_v41 = vld [vmem:[#allocation2 + $0x144] sm:$0xff]  }
 0x3cb   :  { %v4211_v43 = vrot.slane %v4210_v63, 4  ;;  %v4220_v10 = vor.u32 %v4219_v50, %v16992_v58  ;;  %v5596_v35 = vrot.slane %v5594_v52, 5  ;;  %v17005_v3 = vrot.slane %v5600_v57, 5  ;;  %v5373_v63 = vld [vmem:[#allocation2 + $0x68] sm:$0x1] }
 0x3cc   :  { %v5606_v55 = vrot.slane %v5604_v2, 4  ;;  %v17010_v9 = vcombine.low %v5579_v14, %v5589_v27  ;;  %v4225_v12 = vrot.slane %v4223_v42, 5  ;;  %v5610_v61 = vshll.u32 %v5370_v47, 16  ;;  %v6398_v52 = vld [vmem:[#allocation2 + $0x6c] sm:$0xe]  ;;  %v13214_v2 = vld [vmem:[%s19582_s4 + $0x1c0] sm:$0xff]  }
 0x3cd   :  { %10581 = vmatpush1.bf16.msra.mxu1 %v13204_v28  ;;  %v6617_v40 = vrot.slane %v6396_v11, 5  ;;  %v4221_v26 = vrot.slane %v4220_v10, 4  ;;  %v5597_v13 = vor.u32 %v5596_v35, %v5593_v24  ;;  %v12055_v53 = vrot.slane %v6395_v32, 9  ;;  %v5372_v28 = vld [vmem:[#allocation2 + $0x64] sm:$0xf] }
 0x3ce   :  { %10582 = vmatprep.subr.bf16.mxu1 %v20027_v23  ;;  %v5607_v51 = vor.u32 %v5606_v55, %v17005_v3  ;;  %v4216_v59 = vsel %vm16171_vm15, %v4211_v43, %v16992_v58  ;;  %v4228_v54 = vshrl.u32 %v3540_v39, 16  ;;  %v4231_v45 = vshll.u32 %v3540_v39, 16  ;;  %v6399_v57 = vld [vmem:[#allocation2 + $0x70] sm:$0xf]  ;;  %v3543_v55 = vld [vmem:[#allocation2 + $0x174] sm:$0xf] }
 0x3cf   :  { %9912 = vmatmul.mubr.bf16.gmra.mrb[216].mxu0 %v13191_v20  ;;  %10338 = vmatmul.mubr.bf16.gmra.mrb[156].mxu1 %v16911_v48  ;;  %v6619_v60 = vrot.slane %v6617_v40, 4  ;;  %v17024_v56 = vrot.slane %v5597_v13, 4  ;;  %v6620_v19 = vrot.slane %v6397_v46, 5  ;;  %v4237_v25 = vshll.u32 %v3541_v6, 16  ;;  %v5371_v48 = vld [vmem:[#allocation2 + $0x60] sm:$0xf] }
 0x3d0   :  { %9919 = vmatprep.mubr.bf16.mxu0 %v16862_v36  ;;  %10345 = vmatprep.mubr.bf16.mxu1 %v12084_v18  ;;  %v4226_v36 = vsel %vm16171_vm15, %v4221_v26, %v4225_v12  ;;  %v5608_v30 = vrot.slane %v5607_v51, 4  ;;  %v5612_v14 = vrot.slane %v5610_v61, 5  ;;  %v4230_v58 = vrot.slane %v4228_v54, 4 }
 0x3d1   :  { %10583 = vmatpush1.bf16.msra.mxu1 %v13208_v38  ;;  %v4233_v21 = vrot.slane %v4231_v45, 5  ;;  %v17030_v16 = vcombine.low %v4216_v59, %v4226_v36  ;;  %v5603_v18 = vsel %vm16171_vm15, %v17024_v56, %v17005_v3  ;;  %v17038_v20 = vsel %vm16154_vm14, %v12055_v53, %v6617_v40  ;;  %v3544_v40 = vld [vmem:[#allocation2 + $0x178] sm:$0xf]  ;;  %v6400_v59 = vld [vmem:[#allocation2 + $0x74] sm:$0x1] }
 0x3d2   :  { %10584 = vmatprep.subr.bf16.mxu1 %v20027_v23  ;;  %v17042_v27 = vsel %vm16154_vm14, %v6619_v60, %v6620_v19  ;;  %v4239_v47 = vrot.slane %v4237_v25, 5  ;;  %v4241_v44 = vshrl.u32 %v3541_v6, 16  ;;  %v4247_v50 = vshll.u32 %v3542_v29, 16  ;;  %v3545_v45 = vld [vmem:[#allocation2 + $0x17c] sm:$0x1] }
 0x3d3   :  { %v4234_v42 = vor.u32 %v4233_v21, %v4230_v58  ;;  %v5615_v11 = vshrl.u32 %v5371_v48, 16  ;;  %v5618_v43 = vshll.u32 %v5371_v48, 16  ;;  %v5624_v24 = vshll.u32 %v5372_v28, 16  ;;  %v5374_v48 = vld [vmem:[#allocation2 + $0x6c] sm:$0xf] }
 0x3d4   :  { %v5628_v32 = vshrl.u32 %v5372_v28, 16  ;;  %v5613_v46 = vsel %vm16171_vm15, %v5608_v30, %v5612_v14  ;;  %v4243_v35 = vrot.slane %v4241_v44, 4  ;;  %v5634_v3 = vshll.u32 %v5373_v63, 16  ;;  %v5375_v28 = vld [vmem:[#allocation2 + $0x70] sm:$0xf] }
 0x3d5   :  { %10585 = vmatpush1.bf16.msra.mxu1 %v13211_v33  ;;  %v4235_v10 = vrot.slane %v4234_v42, 4  ;;  %v5617_v39 = vrot.slane %v5615_v11, 4  ;;  %v5620_v38 = vrot.slane %v5618_v43, 5  ;;  %v5626_v12 = vrot.slane %v5624_v24, 5  ;;  %v13194_v33 = vld [vmem:[#allocation2 + $0x138] sm:$0xff]   ;;  %v17080_v11 = vld [vmem:[%s19582_s4 + $0x200] sm:$0xff]  }
 0x3d6   :  { %10586 = vmatprep.subr.bf16.mxu1 %v20027_v23  ;;  %v5630_v61 = vrot.slane %v5628_v32, 4  ;;  %v12087_v6 = vcombine.low %v17038_v20, %v17042_v27  ;;  %v4244_v13 = vor.u32 %v4243_v35, %v4239_v47  ;;  %v4249_v51 = vrot.slane %v4247_v50, 5  ;;  %12518 = vmatprep.subr.bf16.mxu0 %v17080_v11 }
 0x3d7   :  { %9920 = vmatmul.mubr.bf16.gmra.mrb[220].mxu0 %v13193_v15  ;;  %10346 = vmatmul.mubr.bf16.gmra.mrb[160].mxu1 %v16961_v17  ;;  %v4240_v26 = vsel %vm16171_vm15, %v4235_v10, %v4239_v47  ;;  %v12056_v60 = vrot.slane %v6398_v52, 9  ;;  %v6624_v29 = vrot.slane %v6399_v57, 5  ;;  %v13217_v17 = vld [vmem:[%s19582_s4 + $0x1c8] sm:$0xff]   ;;  %v4252_v36 = vshrl.u32 %v3543_v55, 16  ;;  %v5376_v57 = vld [vmem:[#allocation2 + $0x74] sm:$0x1] }
 0x3d8   :  { %9927 = vmatprep.mubr.bf16.mxu0 %v16892_v22  ;;  %10353 = vmatprep.mubr.bf16.mxu1 %v12085_v5  ;;  %v5621_v22 = vor.u32 %v5620_v38, %v5617_v39  ;;  %v5631_v53 = vor.u32 %v5630_v61, %v5626_v12  ;;  %v4245_v54 = vrot.slane %v4244_v13, 4  ;;  %v4255_v56 = vshll.u32 %v3543_v55, 16  ;;  %v6402_v10 = vld [vmem:[#allocation2 + $0x7c] sm:$0xf]  ;;  %v6403_v38 = vld [vmem:[#allocation2 + $0x80] sm:$0x1] }
 0x3d9   :  { %10587 = vmatpush1.bf16.msra.mxu1 %v13214_v2  ;;  %v4261_v19 = vshll.u32 %v3544_v40, 16  ;;  %v17063_v25 = vcombine.low %v5603_v18, %v5613_v46  ;;  %v5636_v5 = vrot.slane %v5634_v3, 5  ;;  %v6626_v14 = vrot.slane %v6624_v29, 4  ;;  %v6401_v2 = vld [vmem:[#allocation2 + $0x78] sm:$0xe] }
 0x3da   :  { %10588 = vmatprep.subr.bf16.mxu1 %v20027_v23  ;;  %v5622_v34 = vrot.slane %v5621_v22, 4  ;;  %v5632_v62 = vrot.slane %v5631_v53, 4  ;;  %v4250_v30 = vsel %vm16171_vm15, %v4245_v54, %v4249_v51  ;;  %v4254_v58 = vrot.slane %v4252_v36, 4  ;;  %v3547_v53 = vld [vmem:[#allocation2 + $0x184] sm:$0xf] }
 0x3db   :  { %v4257_v21 = vrot.slane %v4255_v56, 5  ;;  %v17067_v15 = vcombine.low %v4240_v26, %v4250_v30  ;;  %v17071_v63 = vsel %vm16154_vm14, %v12056_v60, %v6624_v29  ;;  %v6627_v18 = vrot.slane %v6400_v59, 5 }
 0x3dc   :  { %v4263_v42 = vrot.slane %v4261_v19, 5  ;;  %v5627_v47 = vsel %vm16171_vm15, %v5622_v34, %v5626_v12  ;;  %v5637_v44 = vsel %vm16171_vm15, %v5632_v62, %v5636_v5  ;;  %v4265_v52 = vshrl.u32 %v3544_v40, 16 }
 0x3dd   :  { %10589 = vmatpush1.bf16.msra.mxu1 %v13217_v17  ;;  %v4258_v50 = vor.u32 %v4257_v21, %v4254_v58  ;;  %v4271_v43 = vshll.u32 %v3545_v45, 16  ;;  %v5639_v24 = vshrl.u32 %v5374_v48, 16  ;;  %v5642_v32 = vshll.u32 %v5374_v48, 16 }
 0x3de   :  { %10590 = vmatprep.subr.bf16.mxu1 %v20027_v23  ;;  %v5648_v46 = vshll.u32 %v5375_v28, 16  ;;  %v17087_v35 = vsel %vm16154_vm14, %v6626_v14, %v6627_v18  ;;  %v4267_v55 = vrot.slane %v4265_v52, 4  ;;  %v5652_v39 = vshrl.u32 %v5375_v28, 16  ;;  %v5377_v14 = vld [vmem:[#allocation2 + $0x78] sm:$0xf] }
 0x3df   :  { %9928 = vmatmul.mubr.bf16.gmra.mrb[224].mxu0 %v13194_v33  ;;  %10354 = vmatmul.mubr.bf16.gmra.mrb[164].mxu1 %v17010_v9  ;;  %v4259_v3 = vrot.slane %v4258_v50, 4  ;;  %v5641_v12 = vrot.slane %v5639_v24, 4  ;;  %v5644_v61 = vrot.slane %v5642_v32, 5  ;;  %v3546_v9 = vld [vmem:[#allocation2 + $0x180] sm:$0xf]  ;;  %v4273_v13 = vrot.slane %v4271_v43, 5 }
 0x3e0   :  { %9935 = vmatprep.mubr.bf16.mxu0 %v16932_v7  ;;  %10361 = vmatprep.mubr.bf16.mxu1 %v12086_v1  ;;  %v17093_v7 = vcombine.low %v5627_v47, %v5637_v44  ;;  %v17095_v40 = vrot.slane %v5648_v46, 5  ;;  %v4268_v26 = vor.u32 %v4267_v55, %v4263_v42  ;;  %v5654_v51 = vrot.slane %v5652_v39, 4  ;;  %v5378_v47 = vld [vmem:[#allocation2 + $0x7c] sm:$0xf]  ;;  %v6404_v24 = vld [vmem:[#allocation2 + $0x84] sm:$0xe] }
 0x3e1   :  { %v5658_v22 = vshll.u32 %v5376_v57, 16  ;;  %v4264_v59 = vsel %vm16171_vm15, %v4259_v3, %v4263_v42  ;;  %v5645_v60 = vor.u32 %v5644_v61, %v5641_v12  ;;  %v12057_v29 = vrot.slane %v6401_v2, 9  ;;  %10591 = vmatpush1.bf16.msra.mxu1 %v13221_v8  ;;  %v3548_v42 = vld [vmem:[#allocation2 + $0x188] sm:$0x1]  ;;  %v5379_v57 = vld [vmem:[#allocation2 + $0x80] sm:$0x1] }
 0x3e2   :  { %v6631_v17 = vrot.slane %v6402_v10, 5  ;;  %v4269_v1 = vrot.slane %v4268_v26, 4  ;;  %v5655_v54 = vor.u32 %v5654_v51, %v17095_v40  ;;  %v4276_v45 = vshrl.u32 %v3546_v9, 16  ;;  %10592 = vmatprep.subr.bf16.mxu1 %v20027_v23  ;;  %v6405_v32 = vld [vmem:[#allocation2 + $0x88] sm:$0xf] }
 0x3e3   :  { %v4279_v36 = vshll.u32 %v3546_v9, 16  ;;  %v5646_v56 = vrot.slane %v5645_v60, 4  ;;  %v6634_v34 = vrot.slane %v6403_v38, 5  ;;  %v4285_v62 = vshll.u32 %v3547_v53, 16  ;;  %v3549_v55 = vld [vmem:[#allocation2 + $0x18c] sm:$0xf] }
 0x3e4   :  { %v6633_v19 = vrot.slane %v6631_v17, 4  ;;  %v4274_v5 = vsel %vm16171_vm15, %v4269_v1, %v4273_v13  ;;  %v5656_v48 = vrot.slane %v5655_v54, 4  ;;  %v4278_v33 = vrot.slane %v4276_v45, 4  ;;  %v13197_v38 = vld [vmem:[#allocation2 + $0x150] sm:$0xff]  }
 0x3e5   :  { %v4281_v30 = vrot.slane %v4279_v36, 5  ;;  %v12088_v58 = vcombine.low %v17071_v63, %v17087_v35  ;;  %v17109_v21 = vcombine.low %v4264_v59, %v4274_v5  ;;  %v5660_v28 = vrot.slane %v5658_v22, 5  ;;  %v3551_v45 = vld [vmem:[#allocation2 + $0x194] sm:$0x1]  ;;  %v5380_v5 = vld [vmem:[#allocation2 + $0x84] sm:$0xf] }
 0x3e6   :  { %v17113_v18 = vsel %vm16154_vm14, %v12057_v29, %v6631_v17  ;;  %v17118_v44 = vsel %vm16154_vm14, %v6633_v19, %v6634_v34  ;;  %v4289_v52 = vshrl.u32 %v3547_v53, 16  ;;  %v5651_v63 = vsel %vm16171_vm15, %v5646_v56, %v17095_v40  ;;  %v3550_v53 = vld [vmem:[#allocation2 + $0x190] sm:$0xf]  ;;  %v6406_v17 = vld [vmem:[#allocation2 + $0x8c] sm:$0x1]  ;;  %v13228_v56 = vld [vmem:[%s19582_s4 + $0x1d8] sm:$0xff]  }
 0x3e7   :  { %9936 = vmatmul.mubr.bf16.gmra.mrb[228].mxu0 %v13196_v41  ;;  %10362 = vmatmul.mubr.bf16.gmra.mrb[168].mxu1 %v17063_v25  ;;  %v4282_v50 = vor.u32 %v4281_v30, %v4278_v33  ;;  %v5661_v2 = vsel %vm16171_vm15, %v5656_v48, %v5660_v28  ;;  %v5663_v25 = vshrl.u32 %v5377_v14, 16  ;;  %v5666_v43 = vshll.u32 %v5377_v14, 16  ;;  %v5381_v28 = vld [vmem:[#allocation2 + $0x88] sm:$0xf] }
 0x3e8   :  { %9943 = vmatprep.mubr.bf16.mxu0 %v17000_v0  ;;  %v4287_v0 = vrot.slane %v4285_v62, 5  ;;  %10369 = vmatprep.mubr.bf16.mxu1 %v12087_v6  ;;  %v4291_v46 = vrot.slane %v4289_v52, 4  ;;  %v4295_v10 = vshll.u32 %v3548_v42, 16  ;;  %v5672_v35 = vshll.u32 %v5378_v47, 16 }
 0x3e9   :  { %v5676_v3 = vshrl.u32 %v5378_v47, 16  ;;  %v12089_v20 = vcombine.low %v17113_v18, %v17118_v44  ;;  %v4283_v27 = vrot.slane %v4282_v50, 4  ;;  %v5665_v6 = vrot.slane %v5663_v25, 4  ;;  %10593 = vmatpush1.bf16.msra.mxu1 %v13228_v56  ;;  %v5382_v50 = vld [vmem:[#allocation2 + $0x8c] sm:$0x1] }
 0x3ea   :  { %v5668_v39 = vrot.slane %v5666_v43, 5  ;;  %v4292_v12 = vor.u32 %v4291_v46, %v4287_v0  ;;  %v17130_v61 = vrot.slane %v5672_v35, 5  ;;  %v5682_v9 = vshll.u32 %v5379_v57, 16  ;;  %10594 = vmatprep.subr.bf16.mxu1 %v20027_v23  ;;  %v6407_v25 = vld [vmem:[#allocation2 + $0x90] sm:$0xe] }
 0x3eb   :  { %v5678_v40 = vrot.slane %v5676_v3, 4  ;;  %v17132_v26 = vcombine.low %v5651_v63, %v5661_v2  ;;  %v12058_v51 = vrot.slane %v6404_v24, 9  ;;  %v6638_v22 = vrot.slane %v6405_v32, 5 }
 0x3ec   :  { %v5669_v13 = vor.u32 %v5668_v39, %v5665_v6  ;;  %v4293_v59 = vrot.slane %v4292_v12, 4  ;;  %v4297_v60 = vrot.slane %v4295_v10, 5  ;;  %v4300_v8 = vshrl.u32 %v3549_v55, 16  ;;  %v6408_v10 = vld [vmem:[#allocation2 + $0x94] sm:$0xf] }
 0x3ed   :  { %v5679_v29 = vor.u32 %v5678_v40, %v17130_v61  ;;  %v4288_v41 = vsel %vm16171_vm15, %v4283_v27, %v4287_v0  ;;  %v6640_v54 = vrot.slane %v6638_v22, 4  ;;  %v4303_v36 = vshll.u32 %v3549_v55, 16  ;;  %v13199_v0 = vld [vmem:[#allocation2 + $0x15c] sm:$0xff]   ;;  %v6409_v6 = vld [vmem:[#allocation2 + $0x98] sm:$0x1] }
 0x3ee   :  { %v17138_v1 = vrot.slane %v5669_v13, 4  ;;  %v4298_v19 = vsel %vm16171_vm15, %v4293_v59, %v4297_v60  ;;  %v17146_v34 = vrot.slane %v5682_v9, 5  ;;  %v4309_v62 = vshll.u32 %v3550_v53, 16  ;;  %v5383_v40 = vld [vmem:[#allocation2 + $0x90] sm:$0xf] }
 0x3ef   :  { %9944 = vmatmul.mubr.bf16.gmra.mrb[232].mxu0 %v13197_v38  ;;  %10370 = vmatmul.mubr.bf16.gmra.mrb[172].mxu1 %v17093_v7  ;;  %v17148_v48 = vrot.slane %v5679_v29, 4  ;;  %v17152_v33 = vsel %vm16154_vm14, %v12058_v51, %v6638_v22  ;;  %v6641_v30 = vrot.slane %v6406_v17, 5  ;;  %v4305_v14 = vrot.slane %v4303_v36, 5 }
 0x3f0   :  { %9951 = vmatprep.mubr.bf16.mxu0 %v17030_v16  ;;  %v4302_v16 = vrot.slane %v4300_v8, 4  ;;  %10377 = vmatprep.mubr.bf16.mxu1 %v12088_v58  ;;  %v17154_v7 = vcombine.low %v4288_v41, %v4298_v19  ;;  %v5675_v42 = vsel %vm16171_vm15, %v17138_v1, %v17130_v61  ;;  %v17160_v47 = vrot.slane %v4309_v62, 5  ;;  %v5385_v41 = vld [vmem:[#allocation2 + $0x98] sm:$0x1] }
 0x3f1   :  { %v4313_v58 = vshrl.u32 %v3550_v53, 16  ;;  %v17165_v52 = vsel %vm16154_vm14, %v6640_v54, %v6641_v30  ;;  %v4319_v63 = vshll.u32 %v3551_v45, 16  ;;  %v5687_v2 = vshrl.u32 %v5380_v5, 16  ;;  %v5384_v53 = vld [vmem:[#allocation2 + $0x94] sm:$0xf]  ;;  %v13200_v45 = vld [vmem:[#allocation2 + $0x168] sm:$0xff]  }
 0x3f2   :  { %v4306_v57 = vor.u32 %v4305_v14, %v4302_v16  ;;  %v5690_v24 = vshll.u32 %v5380_v5, 16  ;;  %v5696_v32 = vshll.u32 %v5381_v28, 16  ;;  %v5700_v46 = vshrl.u32 %v5381_v28, 16  ;;  %v6410_v16 = vld [vmem:[#allocation2 + $0x9c] sm:$0xe] }
 0x3f3   :  { %v4315_v43 = vrot.slane %v4313_v58, 4  ;;  %v5685_v35 = vsel %vm16171_vm15, %v17148_v48, %v17146_v34  ;;  %v5689_v55 = vrot.slane %v5687_v2, 4  ;;  %v5706_v27 = vshll.u32 %v5382_v50, 16  ;;  %v6412_v5 = vld [vmem:[#allocation2 + $0xa4] sm:$0x1] }
 0x3f4   :  { %v4307_v3 = vrot.slane %v4306_v57, 4  ;;  %v5692_v38 = vrot.slane %v5690_v24, 5  ;;  %v5698_v12 = vrot.slane %v5696_v32, 5  ;;  %v5702_v61 = vrot.slane %v5700_v46, 4  ;;  %v4483_v28 = vld [vmem:[#allocation2] sm:$0xe] }
 0x3f5   :  { %v4316_v39 = vor.u32 %v4315_v43, %v17160_v47  ;;  %v12090_v9 = vcombine.low %v17152_v33, %v17165_v52  ;;  %v4321_v51 = vrot.slane %v4319_v63, 5  ;;  %v6645_v22 = vrot.slane %v6408_v10, 5  ;;  %v4485_v58 = vld [vmem:[#allocation2 + $0x8] sm:$0x1]  ;;  %v5386_v63 = vld [vmem:[#allocation2 + $0x9c] sm:$0xf] }
 0x3f6   :  { %v4312_v13 = vsel %vm16171_vm15, %v4307_v3, %v17160_v47  ;;  %v5693_v60 = vor.u32 %v5692_v38, %v5689_v55  ;;  %v5703_v29 = vor.u32 %v5702_v61, %v5698_v12  ;;  %v12059_v17 = vrot.slane %v6407_v25, 9  ;;  %v4484_v47 = vld [vmem:[#allocation2 + $0x4] sm:$0xf] }
 0x3f7   :  { %9952 = vmatmul.mubr.bf16.gmra.mrb[236].mxu0 %v13199_v0  ;;  %10378 = vmatmul.mubr.bf16.gmra.mrb[176].mxu1 %v17132_v26  ;;  %v4317_v59 = vrot.slane %v4316_v39, 4  ;;  %v6648_v8 = vrot.slane %v6409_v6, 5  ;;  %v5711_v1 = vshrl.u32 %v5383_v40, 16  ;;  %v5714_v54 = vshll.u32 %v5383_v40, 16  ;;  %v5388_v40 = vld [vmem:[#allocation2 + $0xa4] sm:$0x1] }
 0x3f8   :  { %9959 = vmatprep.mubr.bf16.mxu0 %v17067_v15  ;;  %10385 = vmatprep.mubr.bf16.mxu1 %v12089_v20  ;;  %v6647_v15 = vrot.slane %v6645_v22, 4  ;;  %v5694_v36 = vrot.slane %v5693_v60, 4  ;;  %v5704_v56 = vrot.slane %v5703_v29, 4  ;;  %v5708_v19 = vrot.slane %v5706_v27, 5  ;;  %v6411_v20 = vld [vmem:[#allocation2 + $0xa0] sm:$0xf] }
 0x3f9   :  { %v5720_v34 = vshll.u32 %v5384_v53, 16  ;;  %v4322_v26 = vsel %vm16171_vm15, %v4317_v59, %v4321_v51  ;;  %v5713_v18 = vrot.slane %v5711_v1, 4  ;;  %v5716_v44 = vrot.slane %v5714_v54, 5  ;;  %v6414_v59 = vld [vmem:[#allocation2 + $0xac] sm:$0xf] }
 0x3fa   :  { %v17186_v62 = vsel %vm16154_vm14, %v6647_v15, %v6648_v8  ;;  %v12025_v48 = vcombine.low %v5675_v42, %v5685_v35  ;;  %v5699_v33 = vsel %vm16171_vm15, %v5694_v36, %v5698_v12  ;;  %v5709_v30 = vsel %vm16171_vm15, %v5704_v56, %v5708_v19  ;;  %v5387_v35 = vld [vmem:[#allocation2 + $0xa0] sm:$0xf]  ;;  %v6413_v15 = vld [vmem:[#allocation2 + $0xa8] sm:$0xe]  ;;  %v6415_v8 = vld [vmem:[#allocation2 + $0xb0] sm:$0x1] }
 0x3fb   :  { %v17194_v14 = vsel %vm16154_vm14, %v12059_v17, %v6645_v22  ;;  %v5717_v50 = vor.u32 %v5716_v44, %v5713_v18  ;;  %v17196_v0 = vrot.slane %v5720_v34, 5  ;;  %v5724_v52 = vshrl.u32 %v5384_v53, 16  ;;  %v4486_v56 = vld [vmem:[#allocation2 + $0xc] sm:$0xe]  ;;  %v5389_v18 = vld [vmem:[#allocation2 + $0xa8] sm:$0xf] }
 0x3fc   :  { %v5730_v57 = vshll.u32 %v5385_v41, 16  ;;  %v17198_v42 = vcombine.low %v4312_v13, %v4322_v26  ;;  %v12026_v2 = vcombine.low %v5699_v33, %v5709_v30  ;;  %v12091_v25 = vcombine.low %v17194_v14, %v17186_v62  ;;  %v13202_v41 = vld [vmem:[#allocation2 + $0x174] sm:$0xff]   ;;  %v4487_v62 = vld [vmem:[#allocation2 + $0x10] sm:$0xf]  ;;  %v5390_v33 = vld [vmem:[#allocation2 + $0xac] sm:$0xf] }
 0x3fd   :  { %v6652_v43 = vrot.slane %v6411_v20, 5  ;;  %v5726_v24 = vrot.slane %v5724_v52, 4  ;;  %v12060_v32 = vrot.slane %v6410_v16, 9  ;;  %v11920_v46 = vrot.slane %v4483_v28, 9 }
 0x3fe   :  { %v4680_v10 = vrot.slane %v4484_v47, 5  ;;  %v6655_v55 = vrot.slane %v6412_v5, 5  ;;  %v4683_v27 = vrot.slane %v4485_v58, 5  ;;  %v5735_v6 = vshrl.u32 %v5386_v63, 16  ;;  %v4488_v58 = vld [vmem:[#allocation2 + $0x14] sm:$0x1] }
 0x3ff   :  { %9960 = vmatmul.mubr.bf16.gmra.mrb[240].mxu0 %v13200_v45  ;;  %10386 = vmatmul.mubr.bf16.gmra.mrb[180].mxu1 %v12025_v48  ;;  %v6654_v3 = vrot.slane %v6652_v43, 4  ;;  %v5718_v39 = vrot.slane %v5717_v50, 4  ;;  %v5727_v38 = vor.u32 %v5726_v24, %v17196_v0  ;;  %v5732_v12 = vrot.slane %v5730_v57, 5 }
 0x400   :  { %9967 = vmatprep.mubr.bf16.mxu0 %v17109_v21  ;;  %10393 = vmatprep.mubr.bf16.mxu1 %v12090_v9  ;;  %v4682_v61 = vrot.slane %v4680_v10, 4  ;;  %v13232_v21 = vld [vmem:[%s19582_s4 + $0x1e0] sm:$0xff]   ;;  %v5737_v51 = vrot.slane %v5735_v6, 4  ;;  %v5738_v22 = vshll.u32 %v5386_v63, 16  ;;  %v5744_v53 = vshll.u32 %v5387_v35, 16 }
 0x401   :  { %v17209_v13 = vsel %vm16154_vm14, %v6654_v3, %v6655_v55  ;;  %v5728_v60 = vrot.slane %v5727_v38, 4  ;;  %v17213_v9 = vsel %vm16154_vm14, %v11920_v46, %v4680_v10  ;;  %v5748_v17 = vshrl.u32 %v5387_v35, 16  ;;  %10595 = vmatpush1.bf16.msra.mxu1 %v13232_v21  ;;  %v13203_v46 = vld [vmem:[#allocation2 + $0x180] sm:$0xff]   ;;  %v5391_v3 = vld [vmem:[#allocation2 + $0xb0] sm:$0x1] }
 0x402   :  { %v17217_v29 = vsel %vm16154_vm14, %v4682_v61, %v4683_v27  ;;  %v17221_v1 = vsel %vm16154_vm14, %v12060_v32, %v6652_v43  ;;  %v5740_v54 = vrot.slane %v5738_v22, 5  ;;  %v5746_v45 = vrot.slane %v5744_v53, 5  ;;  %10596 = vmatprep.subr.bf16.mxu1 %v20027_v23  ;;  %v6417_v55 = vld [vmem:[#allocation2 + $0xb8] sm:$0xf]  ;;  %v6416_v38 = vld [vmem:[#allocation2 + $0xb4] sm:$0xe] }
 0x403   :  { %v5754_v36 = vshll.u32 %v5388_v40, 16  ;;  %v5723_v19 = vsel %vm16171_vm15, %v5718_v39, %v17196_v0  ;;  %v12092_v34 = vcombine.low %v17221_v1, %v17209_v13  ;;  %v5750_v16 = vrot.slane %v5748_v17, 4  ;;  %v4489_v22 = vld [vmem:[#allocation2 + $0x18] sm:$0xe]  ;;  %v4490_v53 = vld [vmem:[#allocation2 + $0x1c] sm:$0xf] }
 0x404   :  { %v6659_v26 = vrot.slane %v6414_v59, 5  ;;  %v5733_v44 = vsel %vm16171_vm15, %v5728_v60, %v5732_v12  ;;  %v11952_v20 = vcombine.low %v17213_v9, %v17217_v29  ;;  %v5741_v5 = vor.u32 %v5740_v54, %v5737_v51  ;;  %v6418_v12 = vld [vmem:[#allocation2 + $0xbc] sm:$0x1]  ;;  %v6419_v1 = vld [vmem:[#allocation2 + $0xc0] sm:$0xe] }
 0x405   :  { %v12061_v48 = vrot.slane %v6413_v15, 9  ;;  %v5751_v30 = vor.u32 %v5750_v16, %v5746_v45  ;;  %v5756_v14 = vrot.slane %v5754_v36, 5  ;;  %v6662_v47 = vrot.slane %v6415_v8, 5  ;;  %v5392_v8 = vld [vmem:[#allocation2 + $0xb4] sm:$0xf] }
 0x406   :  { %v6661_v28 = vrot.slane %v6659_v26, 4  ;;  %v5742_v50 = vrot.slane %v5741_v5, 4  ;;  %v11921_v0 = vrot.slane %v4486_v56, 9  ;;  %v4687_v52 = vrot.slane %v4487_v62, 5  ;;  %v4491_v56 = vld [vmem:[#allocation2 + $0x20] sm:$0x1] }
 0x407   :  { %9968 = vmatmul.mubr.bf16.gmra.mrb[244].mxu0 %v13202_v41  ;;  %10394 = vmatmul.mubr.bf16.gmra.mrb[184].mxu1 %v12026_v2  ;;  %v5759_v57 = vshrl.u32 %v5389_v18, 16  ;;  %v5752_v63 = vrot.slane %v5751_v30, 4  ;;  %v5762_v24 = vshll.u32 %v5389_v18, 16  ;;  %v5768_v32 = vshll.u32 %v5390_v33, 16  ;;  %v5393_v18 = vld [vmem:[#allocation2 + $0xb8] sm:$0xf] }
 0x408   :  { %9975 = vmatprep.mubr.bf16.mxu0 %v17154_v7  ;;  %10401 = vmatprep.mubr.bf16.mxu1 %v12091_v25  ;;  %v17236_v43 = vsel %vm16154_vm14, %v6661_v28, %v6662_v47  ;;  %v12027_v7 = vcombine.low %v5723_v19, %v5733_v44  ;;  %v17240_v10 = vsel %vm16154_vm14, %v12061_v48, %v6659_v26  ;;  %v4689_v35 = vrot.slane %v4687_v52, 4  ;;  %v5394_v48 = vld [vmem:[#allocation2 + $0xbc] sm:$0x1] }
 0x409   :  { %v4690_v2 = vrot.slane %v4488_v58, 5  ;;  %v5747_v25 = vsel %vm16171_vm15, %v5742_v50, %v5746_v45  ;;  %v5757_v27 = vsel %vm16171_vm15, %v5752_v63, %v5756_v14  ;;  %v5761_v6 = vrot.slane %v5759_v57, 4  ;;  %v13233_v58 = vld [vmem:[%s19582_s4 + $0x1e8] sm:$0xff]  }
 0x40a   :  { %v5764_v39 = vrot.slane %v5762_v24, 5  ;;  %v12093_v61 = vcombine.low %v17240_v10, %v17236_v43  ;;  %v17252_v21 = vrot.slane %v5768_v32, 5  ;;  %v5772_v51 = vshrl.u32 %v5390_v33, 16  ;;  %v13205_v50 = vld [vmem:[#allocation2 + $0x18c] sm:$0xff]   ;;  %10597 = vmatpush1.bf16.msra.mxu1 %v13233_v58  ;;  %v6423_v58 = vld [vmem:[#allocation2 + $0xe8] sm:$0xf] }
 0x40b   :  { %v17250_v40 = vsel %vm16154_vm14, %v4689_v35, %v4690_v2  ;;  %v17256_v59 = vsel %vm16154_vm14, %v11921_v0, %v4687_v52  ;;  %v5778_v17 = vshll.u32 %v5391_v3, 16  ;;  %v6666_v15 = vrot.slane %v6417_v55, 5  ;;  %10598 = vmatprep.subr.bf16.mxu1 %v20027_v23 }
 0x40c   :  { %v5765_v60 = vor.u32 %v5764_v39, %v5761_v6  ;;  %v12028_v41 = vcombine.low %v5747_v25, %v5757_v27  ;;  %v11953_v54 = vcombine.low %v17256_v59, %v17250_v40  ;;  %v5774_v45 = vrot.slane %v5772_v51, 4  ;;  %v6421_v25 = vld [vmem:[#allocation2 + $0xc8] sm:$0x1]  ;;  %v5395_v6 = vld [vmem:[#allocation2 + $0xc0] sm:$0xf] }
 0x40d   :  { %v12062_v36 = vrot.slane %v6416_v38, 9  ;;  %v6668_v19 = vrot.slane %v6666_v15, 4  ;;  %v6669_v16 = vrot.slane %v6418_v12, 5  ;;  %v11922_v26 = vrot.slane %v4489_v22, 9  ;;  %v4493_v27 = vld [vmem:[#allocation2 + $0x28] sm:$0xf] }
 0x40e   :  { %v4694_v62 = vrot.slane %v4490_v53, 5  ;;  %v17261_v44 = vrot.slane %v5765_v60, 4  ;;  %v5775_v5 = vor.u32 %v5774_v45, %v17252_v21  ;;  %v5783_v33 = vshrl.u32 %v5392_v8, 16  ;;  %v4492_v51 = vld [vmem:[#allocation2 + $0x24] sm:$0xe] }
 0x40f   :  { %9976 = vmatmul.mubr.bf16.gmra.mrb[248].mxu0 %v13203_v46  ;;  %10402 = vmatmul.mubr.bf16.gmra.mrb[188].mxu1 %v12027_v7  ;;  %v5786_v30 = vshll.u32 %v5392_v8, 16  ;;  %v5780_v14 = vrot.slane %v5778_v17, 5  ;;  %v4697_v47 = vrot.slane %v4491_v56, 5  ;;  %v17276_v52 = vsel %vm16154_vm14, %v12062_v36, %v6666_v15  ;;  %v6420_v7 = vld [vmem:[#allocation2 + $0xc4] sm:$0xf] }
 0x410   :  { %9983 = vmatprep.mubr.bf16.mxu0 %v17198_v42  ;;  %10409 = vmatprep.mubr.bf16.mxu1 %v12092_v34  ;;  %v17269_v42 = vsel %vm16154_vm14, %v6668_v19, %v6669_v16  ;;  %v4696_v28 = vrot.slane %v4694_v62, 4  ;;  %v5776_v0 = vrot.slane %v5775_v5, 4  ;;  %v5785_v57 = vrot.slane %v5783_v33, 4  ;;  %v13206_v34 = vld [vmem:[#allocation2 + $0xc] sm:$0xff]   ;;  %v5396_v56 = vld [vmem:[#allocation2 + $0xc4] sm:$0xf] }
 0x411   :  { %v5788_v13 = vrot.slane %v5786_v30, 5  ;;  %v5792_v24 = vshll.u32 %v5393_v18, 16  ;;  %v5796_v32 = vshrl.u32 %v5393_v18, 16  ;;  %v5802_v46 = vshll.u32 %v5394_v48, 16  ;;  %v4494_v22 = vld [vmem:[#allocation2 + $0x2c] sm:$0x1] }
 0x412   :  { %v17280_v63 = vsel %vm16154_vm14, %v4696_v28, %v4697_v47  ;;  %v5771_v35 = vsel %vm16171_vm15, %v17261_v44, %v17252_v21  ;;  %v12094_v2 = vcombine.low %v17276_v52, %v17269_v42  ;;  %v17290_v3 = vsel %vm16154_vm14, %v11922_v26, %v4694_v62  ;;  %v5397_v18 = vld [vmem:[#allocation2 + $0xc8] sm:$0x1]  ;;  %v6428_v59 = vld [vmem:[#allocation2 + $0xfc] sm:$0xe] }
 0x413   :  { %v5789_v55 = vor.u32 %v5788_v13, %v5785_v57  ;;  %v5781_v39 = vsel %vm16171_vm15, %v5776_v0, %v5780_v14  ;;  %v11954_v38 = vcombine.low %v17290_v3, %v17280_v63  ;;  %v5794_v12 = vrot.slane %v5792_v24, 5  ;;  %v6422_v57 = vld [vmem:[#allocation2 + $0xe4] sm:$0xe]  ;;  %v4496_v13 = vld [vmem:[#allocation2 + $0x34] sm:$0xf] }
 0x414   :  { %v5798_v21 = vrot.slane %v5796_v32, 4  ;;  %v5804_v60 = vrot.slane %v5802_v46, 5  ;;  %v12063_v17 = vrot.slane %v6419_v1, 9  ;;  %v6673_v15 = vrot.slane %v6420_v7, 5  ;;  %v6424_v46 = vld [vmem:[#allocation2 + $0xec] sm:$0x1] }
 0x415   :  { %v5790_v53 = vrot.slane %v5789_v55, 4  ;;  %v6676_v45 = vrot.slane %v6421_v25, 5  ;;  %v4701_v36 = vrot.slane %v4493_v27, 5  ;;  %v5807_v19 = vshrl.u32 %v5395_v6, 16  ;;  %v4495_v7 = vld [vmem:[#allocation2 + $0x30] sm:$0xe] }
 0x416   :  { %v5799_v8 = vor.u32 %v5798_v21, %v5794_v12  ;;  %v6675_v16 = vrot.slane %v6673_v15, 4  ;;  %v11923_v26 = vrot.slane %v4492_v51, 9  ;;  %v4704_v62 = vrot.slane %v4494_v22, 5 }
 0x417   :  { %9984 = vmatmul.mubr.bf16.gmra.mrb[252].mxu0 %v13205_v50  ;;  %10410 = vmatmul.mubr.bf16.gmra.mrb[64].mxu1 %v12028_v41  ;;  %v5810_v44 = vshll.u32 %v5395_v6, 16  ;;  %v5795_v5 = vsel %vm16171_vm15, %v5790_v53, %v5794_v12  ;;  %v4703_v33 = vrot.slane %v4701_v36, 4  ;;  %v5809_v30 = vrot.slane %v5807_v19, 4  ;;  %v13207_v50 = vld [vmem:[#allocation2 + $0x18] sm:$0xff]   ;;  %v5398_v12 = vld [vmem:[#allocation2 + $0xe4] sm:$0xf] }
 0x418   :  { %10024 = vmatprep.mubr.bf16.mxu0 %v13206_v34  ;;  %10417 = vmatprep.mubr.bf16.mxu1 %v12093_v61  ;;  %v5800_v48 = vrot.slane %v5799_v8, 4  ;;  %v17304_v14 = vsel %vm16154_vm14, %v6675_v16, %v6676_v45  ;;  %v5816_v28 = vshll.u32 %v5396_v56, 16  ;;  %v5820_v47 = vshrl.u32 %v5396_v56, 16 }
 0x419   :  { %v5812_v41 = vrot.slane %v5810_v44, 5  ;;  %v12029_v0 = vcombine.low %v5771_v35, %v5781_v39  ;;  %v17310_v10 = vsel %vm16154_vm14, %v4703_v33, %v4704_v62  ;;  %v5826_v61 = vshll.u32 %v5397_v18, 16  ;;  %v13222_v35 = vld [vmem:[%s19582_s4 + $0x208] sm:$0xff]   ;;  %v4497_v39 = vld [vmem:[#allocation2 + $0x38] sm:$0x1]  ;;  %v13234_v44 = vld [vmem:[%s19582_s4 + $0x1f0] sm:$0xff]  }
 0x41a   :  { %v5805_v43 = vsel %vm16171_vm15, %v5800_v48, %v5804_v60  ;;  %v17314_v1 = vsel %vm16154_vm14, %v12063_v17, %v6673_v15  ;;  %v17318_v34 = vsel %vm16154_vm14, %v11923_v26, %v4701_v36  ;;  %v5818_v32 = vrot.slane %v5816_v28, 5  ;;  %v5399_v60 = vld [vmem:[#allocation2 + $0xe8] sm:$0xf]  ;;  %v5400_v36 = vld [vmem:[#allocation2 + $0xec] sm:$0x1]  ;;  %10599 = vmatpush1.bf16.msra.mxu1 %v13234_v44 }
 0x41b   :  { %v5813_v24 = vor.u32 %v5812_v41, %v5809_v30  ;;  %v17323_v55 = vcombine.low %v5795_v5, %v5805_v43  ;;  %v12095_v25 = vcombine.low %v17314_v1, %v17304_v14  ;;  %v5822_v27 = vrot.slane %v5820_v47, 4  ;;  %v6425_v18 = vld [vmem:[#allocation2 + $0xf0] sm:$0xe]  ;;  %v6427_v33 = vld [vmem:[#allocation2 + $0xf8] sm:$0x1]  ;;  %10600 = vmatprep.subr.bf16.mxu1 %v20027_v23 }
 0x41c   :  { %v6680_v6 = vrot.slane %v6423_v58, 5  ;;  %v11955_v21 = vcombine.low %v17318_v34, %v17310_v10  ;;  %v5828_v22 = vrot.slane %v5826_v61, 5  ;;  %v4708_v53 = vrot.slane %v4496_v13, 5  ;;  %v4498_v58 = vld [vmem:[#allocation2 + $0x3c] sm:$0xe] }
 0x41d   :  { %v5814_v51 = vrot.slane %v5813_v24, 4  ;;  %v5823_v17 = vor.u32 %v5822_v27, %v5818_v32  ;;  %v12064_v15 = vrot.slane %v6422_v57, 9  ;;  %v6683_v45 = vrot.slane %v6424_v46, 5  ;;  %v5401_v13 = vld [vmem:[#allocation2 + $0xf0] sm:$0xf]  ;;  %v13225_v24 = vld [vmem:[%s19582_s4 + $0x218] sm:$0xff]  }
 0x41e   :  { %v6682_v8 = vrot.slane %v6680_v6, 4  ;;  %v11924_v56 = vrot.slane %v4495_v7, 9  ;;  %v4710_v19 = vrot.slane %v4708_v53, 4  ;;  %v4711_v9 = vrot.slane %v4497_v39, 5  ;;  %v5409_v34 = vld [vmem:[#allocation2 + $0x110] sm:$0x1] }
 0x41f   :  { %10025 = vmatmul.mubr.bf16.vlgmr.msra.gmra.mrb[128].mxu0 %v11952_v20  ;;  %10418 = vmatmul.mubr.bf16.gmra.mrb[68].mxu1 %v12029_v0  ;;  %v5831_v29 = vshrl.u32 %v5398_v12, 16  ;;  %v13223_v20 = vld [vmem:[%s19582_s4 + $0x210] sm:$0xff]   ;;  %v5824_v16 = vrot.slane %v5823_v17, 4  ;;  %v5840_v62 = vshll.u32 %v5399_v60, 16  ;;  %v5819_v5 = vsel %vm16171_vm15, %v5814_v51, %v5818_v32  ;;  %v13209_v32 = vld [vmem:[#allocation2 + $0x24] sm:$0xff]  }
 0x420   :  { %10032 = vmatprep.mubr.bf16.mxu0 %v13207_v50  ;;  %12519 = vmatpush3.bf16.msra.mxu0 %v17080_v11  ;;  %v17341_v26 = vsel %vm16154_vm14, %v6682_v8, %v6683_v45  ;;  %v5834_v11 = vshll.u32 %v5398_v12, 16  ;;  %v17350_v48 = vsel %vm16154_vm14, %v4710_v19, %v4711_v9  ;;  %v5844_v52 = vshrl.u32 %v5399_v60, 16  ;;  %v4499_v50 = vld [vmem:[#allocation2 + $0x40] sm:$0xf] }
 0x421   :  { %12520 = vmatprep.subr.bf16.mxu0 %v13222_v35  ;;  %10425 = vmatprep.mubr.bf16.mxu1 %v12094_v2  ;;  %v5833_v42 = vrot.slane %v5831_v29, 4  ;;  %v6426_v2 = vld [vmem:[#allocation2 + $0xf4] sm:$0xf]  ;;  %v5829_v30 = vsel %vm16171_vm15, %v5824_v16, %v5828_v22  ;;  %v17356_v41 = vsel %vm16154_vm14, %v12064_v15, %v6680_v6  ;;  %v17358_v47 = vrot.slane %v5840_v62, 5  ;;  %v4500_v6 = vld [vmem:[#allocation2 + $0x44] sm:$0x1] }
 0x422   :  { %v5836_v28 = vrot.slane %v5834_v11, 5  ;;  %v12096_v0 = vcombine.low %v17356_v41, %v17341_v26  ;;  %v17364_v43 = vsel %vm16154_vm14, %v11924_v56, %v4708_v53  ;;  %v5846_v61 = vrot.slane %v5844_v52, 4  ;;  %v5402_v53 = vld [vmem:[#allocation2 + $0xf4] sm:$0xf]  ;;  %v5403_v15 = vld [vmem:[#allocation2 + $0xf8] sm:$0x1] }
 0x423   :  { %v5850_v57 = vshll.u32 %v5400_v36, 16  ;;  %v17370_v46 = vcombine.low %v5819_v5, %v5829_v30  ;;  %v11956_v7 = vcombine.low %v17364_v43, %v17350_v48  ;;  %v6687_v27 = vrot.slane %v6426_v2, 5  ;;  %v4502_v62 = vld [vmem:[#allocation2 + $0x4c] sm:$0xf]  ;;  %v6430_v52 = vld [vmem:[#allocation2 + $0x104] sm:$0x1] }
 0x424   :  { %12521 = vmatpush3.bf16.msra.mxu0 %v13222_v35  ;;  %v5837_v35 = vor.u32 %v5836_v28, %v5833_v42  ;;  %v5847_v39 = vor.u32 %v5846_v61, %v17358_v47  ;;  %v12065_v12 = vrot.slane %v6425_v18, 9  ;;  %v11925_v51 = vrot.slane %v4498_v58, 9  ;;  %v13210_v2 = vld [vmem:[#allocation2 + $0x30] sm:$0xff]  }
 0x425   :  { %12522 = vmatprep.subr.bf16.mxu0 %v13223_v20  ;;  %v4715_v22 = vrot.slane %v4499_v50, 5  ;;  %v6689_v60 = vrot.slane %v6687_v27, 4  ;;  %v6690_v17 = vrot.slane %v6427_v33, 5  ;;  %v5855_v8 = vshrl.u32 %v5401_v13, 16  ;;  %v4503_v58 = vld [vmem:[#allocation2 + $0x50] sm:$0x1] }
 0x426   :  { %v5838_v23 = vrot.slane %v5837_v35, 4  ;;  %v5848_v45 = vrot.slane %v5847_v39, 4  ;;  %v5852_v36 = vrot.slane %v5850_v57, 5  ;;  %v5858_v40 = vshll.u32 %v5401_v13, 16  ;;  %v13229_v50 = vld [vmem:[%s19582_s4 + $0x228] sm:$0xff]  }
 0x427   :  { %10033 = vmatmul.mubr.bf16.gmra.mrb[132].mxu0 %v11953_v54  ;;  %10426 = vmatmul.mubr.bf16.gmra.mrb[72].mxu1 %v17323_v55  ;;  %v4717_v56 = vrot.slane %v4715_v22, 4  ;;  %v13226_v54 = vld [vmem:[%s19582_s4 + $0x220] sm:$0xff]   ;;  %v17387_v19 = vsel %vm16154_vm14, %v6689_v60, %v6690_v17  ;;  %v4718_v9 = vrot.slane %v4500_v6, 5  ;;  %v5857_v55 = vrot.slane %v5855_v8, 4  ;;  %v5404_v35 = vld [vmem:[#allocation2 + $0xfc] sm:$0xf] }
 0x428   :  { %10040 = vmatprep.mubr.bf16.mxu0 %v13209_v32  ;;  %12523 = vmatpush3.bf16.msra.mxu0 %v13223_v20  ;;  %v5864_v29 = vshll.u32 %v5402_v53, 16  ;;  %v6429_v20 = vld [vmem:[#allocation2 + $0x100] sm:$0xf]  ;;  %v5843_v16 = vsel %vm16171_vm15, %v5838_v23, %v17358_v47  ;;  %v17394_v11 = vsel %vm16154_vm14, %v12065_v12, %v6687_v27  ;;  %v17398_v14 = vsel %vm16154_vm14, %v11925_v51, %v4715_v22  ;;  %v5406_v60 = vld [vmem:[#allocation2 + $0x104] sm:$0x1]  ;;  %v13230_v8 = vld [vmem:[%s19582_s4 + $0x230] sm:$0xff]  }
 0x429   :  { %12524 = vmatprep.subr.bf16.mxu0 %v13225_v24  ;;  %10433 = vmatprep.mubr.bf16.mxu1 %v12095_v25  ;;  %v5860_v1 = vrot.slane %v5858_v40, 5  ;;  %v4501_v25 = vld [vmem:[#allocation2 + $0x48] sm:$0xe]  ;;  %v5853_v18 = vsel %vm16171_vm15, %v5848_v45, %v5852_v36  ;;  %v17404_v44 = vsel %vm16154_vm14, %v4717_v56, %v4718_v9  ;;  %v5868_v42 = vshrl.u32 %v5402_v53, 16  ;;  %v5405_v12 = vld [vmem:[#allocation2 + $0x100] sm:$0xf] }
 0x42a   :  { %v17406_v5 = vrot.slane %v5864_v29, 5  ;;  %v12097_v33 = vcombine.low %v17394_v11, %v17387_v19  ;;  %v5874_v28 = vshll.u32 %v5403_v15, 16  ;;  %v6694_v47 = vrot.slane %v6429_v20, 5  ;;  %v6431_v15 = vld [vmem:[#allocation2 + $0x108] sm:$0xe] }
 0x42b   :  { %v5861_v30 = vor.u32 %v5860_v1, %v5857_v55  ;;  %v5870_v61 = vrot.slane %v5868_v42, 4  ;;  %v12066_v57 = vrot.slane %v6428_v59, 9  ;;  %v11926_v13 = vrot.slane %v4501_v25, 9  ;;  %v6432_v40 = vld [vmem:[#allocation2 + $0x10c] sm:$0xf]  ;;  %v13235_v55 = vld [vmem:[%s19582_s4 + $0x1f8] sm:$0xff]  }
 0x42c   :  { %12525 = vmatpush3.bf16.msra.mxu0 %v13225_v24  ;;  %v4722_v32 = vrot.slane %v4502_v62, 5  ;;  %v17416_v24 = vcombine.low %v5843_v16, %v5853_v18  ;;  %v11957_v27 = vcombine.low %v17398_v14, %v17404_v44  ;;  %v6696_v6 = vrot.slane %v6694_v47, 4  ;;  %v4504_v59 = vld [vmem:[#allocation2 + $0x54] sm:$0xe]  ;;  %v6433_v25 = vld [vmem:[#allocation2 + $0x110] sm:$0x1]  ;;  %10601 = vmatpush1.bf16.msra.mxu1 %v13235_v55 }
 0x42d   :  { %12526 = vmatprep.subr.bf16.mxu0 %v13226_v54  ;;  %v6697_v39 = vrot.slane %v6430_v52, 5  ;;  %v17420_v51 = vrot.slane %v5861_v30, 4  ;;  %v5871_v22 = vor.u32 %v5870_v61, %v17406_v5  ;;  %v17423_v53 = vrot.slane %v5874_v28, 5  ;;  %v4506_v62 = vld [vmem:[#allocation2 + $0x5c] sm:$0x1] }
 0x42e   :  { %v4724_v23 = vrot.slane %v4722_v32, 4  ;;  %v4725_v3 = vrot.slane %v4503_v58, 5  ;;  %v5882_v17 = vshll.u32 %v5404_v35, 16  ;;  %v17444_v36 = vsel %vm16154_vm14, %v11926_v13, %v4722_v32  ;;  %v5407_v30 = vld [vmem:[#allocation2 + $0x108] sm:$0xf]  ;;  %v13231_v28 = vld [vmem:[%s19582_s4 + $0x238] sm:$0xff]  }
 0x42f   :  { %10041 = vmatmul.mubr.bf16.gmra.mrb[136].mxu0 %v11954_v38  ;;  %10434 = vmatmul.mubr.bf16.gmra.mrb[76].mxu1 %v17370_v46  ;;  %v17428_v63 = vsel %vm16154_vm14, %v6696_v6, %v6697_v39  ;;  %v5879_v38 = vshrl.u32 %v5404_v35, 16  ;;  %v17436_v45 = vrot.slane %v5871_v22, 4  ;;  %v17440_v46 = vsel %vm16154_vm14, %v12066_v57, %v6694_v47  ;;  %v5408_v6 = vld [vmem:[#allocation2 + $0x10c] sm:$0xf] }
 0x430   :  { %10048 = vmatprep.mubr.bf16.mxu0 %v13210_v2  ;;  %12527 = vmatpush3.bf16.msra.mxu0 %v13226_v54  ;;  %v5888_v56 = vshll.u32 %v5405_v12, 16  ;;  %v17448_v54 = vsel %vm16154_vm14, %v4724_v23, %v4725_v3  ;;  %v5884_v26 = vrot.slane %v5882_v17, 5  ;;  %v5892_v41 = vshrl.u32 %v5405_v12, 16  ;;  %v6434_v17 = vld [vmem:[#allocation2 + $0x114] sm:$0xe] }
 0x431   :  { %12528 = vmatprep.subr.bf16.mxu0 %v13229_v50  ;;  %10441 = vmatprep.mubr.bf16.mxu1 %v12096_v0  ;;  %v5881_v9 = vrot.slane %v5879_v38, 4  ;;  %v4505_v0 = vld [vmem:[#allocation2 + $0x58] sm:$0xf]  ;;  %v5867_v29 = vsel %vm16171_vm15, %v17420_v51, %v17406_v5  ;;  %v12098_v20 = vcombine.low %v17440_v46, %v17428_v63  ;;  %v5898_v1 = vshll.u32 %v5406_v60, 16  ;;  %v13212_v5 = vld [vmem:[#allocation2 + $0x3c] sm:$0xff]  }
 0x432   :  { %v17459_v16 = vrot.slane %v5888_v56, 5  ;;  %v5894_v42 = vrot.slane %v5892_v41, 4  ;;  %v12067_v52 = vrot.slane %v6431_v15, 9  ;;  %v6701_v2 = vrot.slane %v6432_v40, 5  ;;  %v6435_v15 = vld [vmem:[#allocation2 + $0x118] sm:$0xf] }
 0x433   :  { %v5885_v18 = vor.u32 %v5884_v26, %v5881_v9  ;;  %v5877_v47 = vsel %vm16171_vm15, %v17436_v45, %v17423_v53  ;;  %v11958_v58 = vcombine.low %v17444_v36, %v17448_v54  ;;  %v4729_v61 = vrot.slane %v4505_v0, 5  ;;  %v6436_v45 = vld [vmem:[#allocation2 + $0x11c] sm:$0x1]  ;;  %v4508_v56 = vld [vmem:[#allocation2 + $0x64] sm:$0xf] }
 0x434   :  { %12529 = vmatpush3.bf16.msra.mxu0 %v13229_v50  ;;  %v11927_v50 = vrot.slane %v4504_v59, 9  ;;  %v5895_v13 = vor.u32 %v5894_v42, %v17459_v16  ;;  %v6703_v32 = vrot.slane %v6701_v2, 4  ;;  %v6704_v35 = vrot.slane %v6433_v25, 5  ;;  %v4507_v41 = vld [vmem:[#allocation2 + $0x60] sm:$0xe] }
 0x435   :  { %12530 = vmatprep.subr.bf16.mxu0 %v13230_v8  ;;  %v5886_v57 = vrot.slane %v5885_v18, 4  ;;  %v5900_v39 = vrot.slane %v5898_v1, 5  ;;  %v4731_v12 = vrot.slane %v4729_v61, 4  ;;  %v4732_v51 = vrot.slane %v4506_v62, 5  ;;  %v4509_v0 = vld [vmem:[#allocation2 + $0x68] sm:$0x1] }
 0x436   :  { %v5903_v22 = vshrl.u32 %v5407_v30, 16  ;;  %v5896_v53 = vrot.slane %v5895_v13, 4  ;;  %v17477_v23 = vsel %vm16154_vm14, %v12067_v52, %v6701_v2  ;;  %v17481_v10 = vsel %vm16154_vm14, %v6703_v32, %v6704_v35  ;;  %v5410_v62 = vld [vmem:[#allocation2 + $0x114] sm:$0xf]  ;;  %v13213_v18 = vld [vmem:[#allocation2 + $0x48] sm:$0xff]  }
 0x437   :  { %10049 = vmatmul.mubr.bf16.gmra.mrb[140].mxu0 %v11955_v21  ;;  %10442 = vmatmul.mubr.bf16.gmra.mrb[80].mxu1 %v17416_v24  ;;  %v5906_v21 = vshll.u32 %v5407_v30, 16  ;;  %v17488_v60 = vsel %vm16154_vm14, %v11927_v50, %v4729_v61  ;;  %v17492_v24 = vsel %vm16154_vm14, %v4731_v12, %v4732_v51  ;;  %v5912_v38 = vshll.u32 %v5408_v6, 16  ;;  %v5411_v30 = vld [vmem:[#allocation2 + $0x118] sm:$0xf]  ;;  %v5412_v12 = vld [vmem:[#allocation2 + $0x11c] sm:$0x1] }
 0x438   :  { %10056 = vmatprep.mubr.bf16.mxu0 %v13212_v5  ;;  %12531 = vmatpush3.bf16.msra.mxu0 %v13230_v8  ;;  %v5905_v3 = vrot.slane %v5903_v22, 4  ;;  %v5891_v8 = vsel %vm16171_vm15, %v5886_v57, %v17459_v16  ;;  %v5901_v19 = vsel %vm16171_vm15, %v5896_v53, %v5900_v39  ;;  %v12033_v40 = vcombine.low %v5867_v29, %v5877_v47  ;;  %v6437_v53 = vld [vmem:[#allocation2 + $0x120] sm:$0xe] }
 0x439   :  { %12532 = vmatprep.subr.bf16.mxu0 %v13231_v28  ;;  %10449 = vmatprep.mubr.bf16.mxu1 %v12097_v33  ;;  %v5908_v11 = vrot.slane %v5906_v21, 5  ;;  %v5916_v33 = vshrl.u32 %v5408_v6, 16  ;;  %v12099_v59 = vcombine.low %v17477_v23, %v17481_v10  ;;  %v11959_v9 = vcombine.low %v17488_v60, %v17492_v24  ;;  %v5420_v60 = vld [vmem:[#allocation2 + $0x13c] sm:$0xf]  ;;  %v5421_v24 = vld [vmem:[#allocation2 + $0x140] sm:$0x1] }
 0x43a   :  { %v5914_v26 = vrot.slane %v5912_v38, 5  ;;  %v5922_v1 = vshll.u32 %v5409_v34, 16  ;;  %v6708_v25 = vrot.slane %v6435_v15, 5  ;;  %v12034_v42 = vcombine.low %v5891_v8, %v5901_v19  ;;  %v6438_v34 = vld [vmem:[#allocation2 + $0x124] sm:$0xf] }
 0x43b   :  { %v5909_v55 = vor.u32 %v5908_v11, %v5905_v3  ;;  %v5918_v16 = vrot.slane %v5916_v33, 4  ;;  %v12068_v52 = vrot.slane %v6434_v17, 9  ;;  %v6711_v2 = vrot.slane %v6436_v45, 5  ;;  %v4511_v38 = vld [vmem:[#allocation2 + $0x70] sm:$0xf]  ;;  %v13215_v45 = vld [vmem:[#allocation2 + $0x54] sm:$0xff]  }
 0x43c   :  { %12533 = vmatpush3.bf16.msra.mxu0 %v13231_v28  ;;  %v4736_v29 = vrot.slane %v4508_v56, 5  ;;  %v6710_v50 = vrot.slane %v6708_v25, 4  ;;  %v11928_v61 = vrot.slane %v4507_v41, 9  ;;  %v4739_v57 = vrot.slane %v4509_v0, 5  ;;  %v4510_v11 = vld [vmem:[#allocation2 + $0x6c] sm:$0xe] }
 0x43d   :  { %v5910_v5 = vrot.slane %v5909_v55, 4  ;;  %v5919_v47 = vor.u32 %v5918_v16, %v5914_v26  ;;  %v5927_v13 = vshrl.u32 %v5410_v62, 16  ;;  %v5930_v32 = vshll.u32 %v5410_v62, 16  ;;  %v5413_v33 = vld [vmem:[#allocation2 + $0x120] sm:$0xf] }
 0x43e   :  { %v4738_v28 = vrot.slane %v4736_v29, 4  ;;  %v5924_v6 = vrot.slane %v5922_v1, 5  ;;  %v17508_v39 = vsel %vm16154_vm14, %v6710_v50, %v6711_v2  ;;  %v5936_v51 = vshll.u32 %v5411_v30, 16  ;;  %v4512_v0 = vld [vmem:[#allocation2 + $0x74] sm:$0x1] }
 0x43f   :  { %10057 = vmatmul.mubr.bf16.gmra.mrb[144].mxu0 %v11956_v7  ;;  %10450 = vmatmul.mubr.bf16.gmra.mrb[84].mxu1 %v12033_v40  ;;  %v5920_v35 = vrot.slane %v5919_v47, 4  ;;  %v5915_v48 = vsel %vm16171_vm15, %v5910_v5, %v5914_v26  ;;  %v5929_v7 = vrot.slane %v5927_v13, 4  ;;  %v5932_v22 = vrot.slane %v5930_v32, 5  ;;  %v5414_v62 = vld [vmem:[#allocation2 + $0x124] sm:$0xf] }
 0x440   :  { %10064 = vmatprep.mubr.bf16.mxu0 %v13213_v18  ;;  %10457 = vmatprep.mubr.bf16.mxu1 %v12098_v20  ;;  %v17517_v43 = vsel %vm16154_vm14, %v4738_v28, %v4739_v57  ;;  %v17523_v3 = vsel %vm16154_vm14, %v12068_v52, %v6708_v25  ;;  %v5938_v63 = vrot.slane %v5936_v51, 5  ;;  %v5940_v46 = vshrl.u32 %v5411_v30, 16  ;;  %v6439_v20 = vld [vmem:[#allocation2 + $0x128] sm:$0x1] }
 0x441   :  { %v5925_v21 = vsel %vm16171_vm15, %v5920_v35, %v5924_v6  ;;  %v12100_v17 = vcombine.low %v17523_v3, %v17508_v39  ;;  %v17529_v15 = vsel %vm16154_vm14, %v11928_v61, %v4736_v29  ;;  %v5933_v8 = vor.u32 %v5932_v22, %v5929_v7  ;;  %v5415_v50 = vld [vmem:[#allocation2 + $0x128] sm:$0x1]  ;;  %v6440_v35 = vld [vmem:[#allocation2 + $0x12c] sm:$0xe]  ;;  %v6441_v6 = vld [vmem:[#allocation2 + $0x130] sm:$0xf] }
 0x442   :  { %v5946_v19 = vshll.u32 %v5412_v12, 16  ;;  %v17531_v56 = vcombine.low %v5915_v48, %v5925_v21  ;;  %v11960_v40 = vcombine.low %v17529_v15, %v17517_v43  ;;  %v5942_v26 = vrot.slane %v5940_v46, 4  ;;  %v4514_v48 = vld [vmem:[#allocation2 + $0x7c] sm:$0xf]  ;;  %v5416_v21 = vld [vmem:[#allocation2 + $0x12c] sm:$0xf] }
 0x443   :  { %v6715_v41 = vrot.slane %v6438_v34, 5  ;;  %v5934_v55 = vrot.slane %v5933_v8, 4  ;;  %v12069_v16 = vrot.slane %v6437_v53, 9  ;;  %v6718_v1 = vrot.slane %v6439_v20, 5  ;;  %v6442_v20 = vld [vmem:[#allocation2 + $0x134] sm:$0x1] }
 0x444   :  { %v4743_v25 = vrot.slane %v4511_v38, 5  ;;  %v5943_v18 = vor.u32 %v5942_v26, %v5938_v63  ;;  %v11929_v2 = vrot.slane %v4510_v11, 9  ;;  %v5951_v29 = vshrl.u32 %v5413_v33, 16  ;;  %v13216_v11 = vld [vmem:[#allocation2 + $0x60] sm:$0xff]  }
 0x445   :  { %v6717_v52 = vrot.slane %v6715_v41, 4  ;;  %v5948_v30 = vrot.slane %v5946_v19, 5  ;;  %v4746_v47 = vrot.slane %v4512_v0, 5  ;;  %v5954_v61 = vshll.u32 %v5413_v33, 16  ;;  %v4515_v19 = vld [vmem:[#allocation2 + $0x80] sm:$0x1] }
 0x446   :  { %v4745_v5 = vrot.slane %v4743_v25, 4  ;;  %v5944_v28 = vrot.slane %v5943_v18, 4  ;;  %v5953_v13 = vrot.slane %v5951_v29, 4  ;;  %v5960_v32 = vshll.u32 %v5414_v62, 16  ;;  %v5417_v0 = vld [vmem:[#allocation2 + $0x130] sm:$0xf] }
 0x447   :  { %10065 = vmatmul.mubr.bf16.gmra.mrb[148].mxu0 %v11957_v27  ;;  %10458 = vmatmul.mubr.bf16.gmra.mrb[88].mxu1 %v12034_v42  ;;  %v17540_v57 = vsel %vm16154_vm14, %v6717_v52, %v6718_v1  ;;  %v5939_v14 = vsel %vm16171_vm15, %v5934_v55, %v5938_v63  ;;  %v5956_v27 = vrot.slane %v5954_v61, 5  ;;  %v5964_v42 = vshrl.u32 %v5414_v62, 16  ;;  %v5418_v1 = vld [vmem:[#allocation2 + $0x134] sm:$0x1]  ;;  %v6443_v18 = vld [vmem:[#allocation2 + $0x138] sm:$0xe] }
 0x448   :  { %10072 = vmatprep.mubr.bf16.mxu0 %v13215_v45  ;;  %10465 = vmatprep.mubr.bf16.mxu1 %v12099_v59  ;;  %v17549_v44 = vsel %vm16154_vm14, %v4745_v5, %v4746_v47  ;;  %v5949_v12 = vsel %vm16171_vm15, %v5944_v28, %v5948_v30  ;;  %v17555_v51 = vsel %vm16154_vm14, %v12069_v16, %v6715_v41  ;;  %v5962_v23 = vrot.slane %v5960_v32, 5  ;;  %v4513_v59 = vld [vmem:[#allocation2 + $0x78] sm:$0xe]  ;;  %v6444_v5 = vld [vmem:[#allocation2 + $0x13c] sm:$0xf] }
 0x449   :  { %v5970_v10 = vshll.u32 %v5415_v50, 16  ;;  %v12101_v7 = vcombine.low %v17555_v51, %v17540_v57  ;;  %v17561_v22 = vsel %vm16154_vm14, %v11929_v2, %v4743_v25  ;;  %v5957_v53 = vor.u32 %v5956_v27, %v5953_v13  ;;  %v6445_v50 = vld [vmem:[#allocation2 + $0x140] sm:$0x1]  ;;  %v4517_v27 = vld [vmem:[#allocation2 + $0x88] sm:$0xf]  ;;  %v13220_v51 = vld [vmem:[#allocation2 + $0x78] sm:$0xff]  }
 0x44a   :  { %v5966_v34 = vrot.slane %v5964_v42, 4  ;;  %v17563_v63 = vcombine.low %v5939_v14, %v5949_v12  ;;  %v11961_v46 = vcombine.low %v17561_v22, %v17549_v44  ;;  %v12070_v38 = vrot.slane %v6440_v35, 9  ;;  %v4516_v14 = vld [vmem:[#allocation2 + $0x84] sm:$0xe] }
 0x44b   :  { %v6722_v8 = vrot.slane %v6441_v6, 5  ;;  %v5958_v33 = vrot.slane %v5957_v53, 4  ;;  %v5972_v26 = vrot.slane %v5970_v10, 5  ;;  %v4750_v41 = vrot.slane %v4514_v48, 5  ;;  %v4518_v6 = vld [vmem:[#allocation2 + $0x8c] sm:$0x1] }
 0x44c   :  { %v5967_v45 = vor.u32 %v5966_v34, %v5962_v23  ;;  %v11930_v16 = vrot.slane %v4513_v59, 9  ;;  %v5975_v25 = vshrl.u32 %v5416_v21, 16  ;;  %v5978_v62 = vshll.u32 %v5416_v21, 16  ;;  %v8263_v53 = vld [vmem:[#allocation2 + $0x18] sm:$0xe] }
 0x44d   :  { %v6724_v55 = vrot.slane %v6722_v8, 4  ;;  %v6725_v2 = vrot.slane %v6442_v20, 5  ;;  %v4752_v29 = vrot.slane %v4750_v41, 4  ;;  %v4753_v30 = vrot.slane %v4515_v19, 5  ;;  %v8264_v19 = vld [vmem:[#allocation2 + $0x1c] sm:$0xf] }
 0x44e   :  { %v5968_v52 = vrot.slane %v5967_v45, 4  ;;  %v17573_v47 = vsel %vm16154_vm14, %v12070_v38, %v6722_v8  ;;  %v5977_v36 = vrot.slane %v5975_v25, 4  ;;  %v5980_v54 = vrot.slane %v5978_v62, 5  ;;  %v8265_v62 = vld [vmem:[#allocation2 + $0x20] sm:$0x1] }
 0x44f   :  { %10073 = vmatmul.mubr.bf16.gmra.mrb[152].mxu0 %v11958_v58  ;;  %10466 = vmatmul.mubr.bf16.gmra.mrb[92].mxu1 %v17531_v56  ;;  %v5984_v58 = vshll.u32 %v5417_v0, 16  ;;  %v5963_v28 = vsel %vm16171_vm15, %v5958_v33, %v5962_v23  ;;  %v17586_v13 = vsel %vm16154_vm14, %v6724_v55, %v6725_v2  ;;  %v5988_v32 = vshrl.u32 %v5417_v0, 16  ;;  %v5419_v0 = vld [vmem:[#allocation2 + $0x138] sm:$0xf] }
 0x450   :  { %10080 = vmatprep.mubr.bf16.mxu0 %v13216_v11  ;;  %10473 = vmatprep.mubr.bf16.mxu1 %v12100_v17  ;;  %v5973_v56 = vsel %vm16171_vm15, %v5968_v52, %v5972_v26  ;;  %v17590_v35 = vsel %vm16154_vm14, %v11930_v16, %v4750_v41  ;;  %v17594_v39 = vsel %vm16154_vm14, %v4752_v29, %v4753_v30  ;;  %v5994_v10 = vshll.u32 %v5418_v1, 16  ;;  %v13218_v11 = vld [vmem:[#allocation2 + $0x6c] sm:$0xff]  }
 0x451   :  { %v5981_v3 = vor.u32 %v5980_v54, %v5977_v36  ;;  %v17596_v17 = vrot.slane %v5984_v58, 5  ;;  %v5990_v23 = vrot.slane %v5988_v32, 4  ;;  %v12071_v59 = vrot.slane %v6443_v18, 9  ;;  %v6446_v54 = vld [vmem:[#allocation2 + $0x144] sm:$0xe] }
 0x452   :  { %v17575_v61 = vpop.f32.mrb[176].mxu0  ;;  %v6729_v48 = vrot.slane %v6444_v5, 5  ;;  %v17600_v21 = vcombine.low %v5963_v28, %v5973_v56  ;;  %v12102_v20 = vcombine.low %v17573_v47, %v17586_v13  ;;  %v4757_v8 = vrot.slane %v4517_v27, 5  ;;  %v6447_v58 = vld [vmem:[#allocation2 + $0x148] sm:$0xf] }
 0x453   :  { %20028 = vst [vmem:[#allocation25_spill] sm:$0xff] %v17575_v61  ;;  %v9835_v42 = vpop.f32.mrb[177].mxu0  ;;  %v5982_v38 = vrot.slane %v5981_v3, 4  ;;  %v5991_v33 = vor.u32 %v5990_v23, %v17596_v17  ;;  %v6732_v26 = vrot.slane %v6445_v50, 5  ;;  %v11931_v41 = vrot.slane %v4516_v14, 9 }
 0x454   :  { %v17598_v12 = vpop.f32.mrb[178].mxu0  ;;  %v6731_v45 = vrot.slane %v6729_v48, 4  ;;  %v11962_v55 = vcombine.low %v17590_v35, %v17594_v39  ;;  %v5996_v16 = vrot.slane %v5994_v10, 5  ;;  %v4759_v1 = vrot.slane %v4757_v8, 4  ;;  %v8266_v14 = vld [vmem:[#allocation2 + $0x24] sm:$0xe] }
 0x455   :  { %20029 = vst [vmem:[#allocation27_spill] sm:$0xff] %v17598_v12  ;;  %v9838_v34 = vpop.f32.mrb[179].mxu0  ;;  %v4760_v25 = vrot.slane %v4518_v6, 5  ;;  %v5992_v18 = vrot.slane %v5991_v33, 4  ;;  %v17612_v52 = vsel %vm16154_vm14, %v12071_v59, %v6729_v48  ;;  %v8457_v29 = vrot.slane %v8264_v19, 5 }
 0x456   :  { %v17616_v2 = vsel %vm16154_vm14, %v6731_v45, %v6732_v26  ;;  %v12176_v5 = vrot.slane %v8263_v53, 9  ;;  %v5999_v36 = vshrl.u32 %v5419_v0, 16  ;;  %v17635_v28 = vsel %vm16154_vm14, %v11931_v41, %v4757_v8  ;;  %v6448_v23 = vld [vmem:[#allocation2 + $0x14c] sm:$0x1]  ;;  %v8267_v53 = vld [vmem:[#allocation2 + $0x28] sm:$0xf] }
 0x457   :  { %10081 = vmatmul.mubr.bf16.gmra.mrb[156].mxu0 %v11959_v9  ;;  %10474 = vmatmul.mubr.bf16.gmra.mrb[96].mxu1 %v17563_v63  ;;  %v5987_v9 = vsel %vm16171_vm15, %v5982_v38, %v17596_v17  ;;  %v17624_v30 = vsel %vm16154_vm14, %v4759_v1, %v4760_v25  ;;  %v12103_v63 = vcombine.low %v17612_v52, %v17616_v2  ;;  %v8459_v56 = vrot.slane %v8457_v29, 4  ;;  %v8270_v33 = vld [vmem:[#allocation2 + $0x34] sm:$0xf]  ;;  %v8269_v1 = vld [vmem:[#allocation2 + $0x30] sm:$0xe] }
 0x458   :  { %10088 = vmatprep.mubr.bf16.mxu0 %v13218_v11  ;;  %10481 = vmatprep.mubr.bf16.mxu1 %v12101_v7  ;;  %v8460_v32 = vrot.slane %v8265_v62, 5  ;;  %v5997_v42 = vsel %vm16171_vm15, %v5992_v18, %v5996_v16  ;;  %v6001_v3 = vrot.slane %v5999_v36, 4  ;;  %v6002_v17 = vshll.u32 %v5419_v0, 16  ;;  %v8268_v16 = vld [vmem:[#allocation2 + $0x2c] sm:$0x1] }
 0x459   :  { %v6008_v6 = vshll.u32 %v5420_v60, 16  ;;  %v11963_v7 = vcombine.low %v17635_v28, %v17624_v30  ;;  %v6012_v59 = vshrl.u32 %v5420_v60, 16  ;;  %v6018_v48 = vshll.u32 %v5421_v24, 16  ;;  %v8271_v60 = vld [vmem:[#allocation2 + $0x38] sm:$0x1] }
 0x45a   :  { %v17626_v50 = vpop.f32.mrb[180].mxu0  ;;  %v17645_v10 = vsel %vm16154_vm14, %v8459_v56, %v8460_v32  ;;  %v17649_v38 = vsel %vm16154_vm14, %v12176_v5, %v8457_v29  ;;  %v6004_v8 = vrot.slane %v6002_v17, 5  ;;  %v6736_v11 = vrot.slane %v6447_v58, 5  ;;  %v5422_v58 = vld [vmem:[#allocation2 + $0x144] sm:$0xf] }
 0x45b   :  { %20030 = vst [vmem:[#allocation17_spill] sm:$0xff] %v17626_v50  ;;  %v9843_v27 = vpop.f32.mrb[181].mxu0  ;;  %v6010_v19 = vrot.slane %v6008_v6, 5  ;;  %v17651_v45 = vcombine.low %v5987_v9, %v5997_v42  ;;  %v12208_v26 = vcombine.low %v17649_v38, %v17645_v10  ;;  %v6014_v41 = vrot.slane %v6012_v59, 4  ;;  %v5423_v42 = vld [vmem:[#allocation2 + $0x148] sm:$0xf] }
 0x45c   :  { %v17639_v57 = vpop.f32.mrb[182].mxu0  ;;  %v12072_v0 = vrot.slane %v6446_v54, 9  ;;  %v6005_v25 = vor.u32 %v6004_v8, %v6001_v3  ;;  %v6738_v62 = vrot.slane %v6736_v11, 4  ;;  %v12177_v18 = vrot.slane %v8266_v14, 9  ;;  %v5424_v3 = vld [vmem:[#allocation2 + $0x14c] sm:$0x1] }
 0x45d   :  { %20031 = vst [vmem:[#allocation7_spill] sm:$0xff] %v17639_v57  ;;  %v9846_v34 = vpop.f32.mrb[183].mxu0  ;;  %v8464_v29 = vrot.slane %v8267_v53, 5  ;;  %v6015_v24 = vor.u32 %v6014_v41, %v6010_v19  ;;  %v6020_v9 = vrot.slane %v6018_v48, 5  ;;  %v6739_v5 = vrot.slane %v6448_v23, 5 }
 0x45e   :  { %v8471_v36 = vrot.slane %v8270_v33, 5  ;;  %v6006_v54 = vrot.slane %v6005_v25, 4  ;;  %v8467_v32 = vrot.slane %v8268_v16, 5  ;;  %v12178_v27 = vrot.slane %v8269_v1, 9  ;;  %v8273_v25 = vld [vmem:[#allocation2 + $0x40] sm:$0xf] }
 0x45f   :  { %10089 = vmatmul.mubr.bf16.gmra.mrb[160].mxu0 %v11960_v40  ;;  %10482 = vmatmul.mubr.bf16.gmra.mrb[100].mxu1 %v17600_v21  ;;  %v8466_v56 = vrot.slane %v8464_v29, 4  ;;  %v6016_v15 = vrot.slane %v6015_v24, 4  ;;  %v17666_v40 = vsel %vm16154_vm14, %v12072_v0, %v6736_v11  ;;  %v17670_v14 = vsel %vm16154_vm14, %v6738_v62, %v6739_v5  ;;  %v8272_v11 = vld [vmem:[#allocation2 + $0x3c] sm:$0xe]  ;;  %v13224_v62 = vld [vmem:[#allocation2 + $0x84] sm:$0xff]  }
 0x460   :  { %10096 = vmatprep.mubr.bf16.mxu0 %v13220_v51  ;;  %10489 = vmatprep.mubr.bf16.mxu1 %v12102_v20  ;;  %v8473_v21 = vrot.slane %v8471_v36, 4  ;;  %v6011_v6 = vsel %vm16171_vm15, %v6006_v54, %v6010_v19  ;;  %v17676_v23 = vsel %vm16154_vm14, %v12177_v18, %v8464_v29  ;;  %v6023_v13 = vshrl.u32 %v5422_v58, 16  ;;  %v6449_v20 = vld [vmem:[#allocation2 + $0x150] sm:$0xe]  ;;  %v6450_v51 = vld [vmem:[#allocation2 + $0x154] sm:$0xf] }
 0x461   :  { %v17680_v47 = vsel %vm16154_vm14, %v8466_v56, %v8467_v32  ;;  %v6021_v48 = vsel %vm16171_vm15, %v6016_v15, %v6020_v9  ;;  %v8474_v53 = vrot.slane %v8271_v60, 5  ;;  %v6026_v34 = vshll.u32 %v5422_v58, 16  ;;  %v6451_v19 = vld [vmem:[#allocation2 + $0x158] sm:$0x1]  ;;  %v8274_v9 = vld [vmem:[#allocation2 + $0x44] sm:$0x1] }
 0x462   :  { %v17659_v43 = vpop.f32.mrb[184].mxu0  ;;  %v6032_v8 = vshll.u32 %v5423_v42, 16  ;;  %v12104_v41 = vcombine.low %v17666_v40, %v17670_v14  ;;  %v17690_v0 = vsel %vm16154_vm14, %v12178_v27, %v8471_v36  ;;  %v6025_v16 = vrot.slane %v6023_v13, 4  ;;  %v8275_v56 = vld [vmem:[#allocation2 + $0x48] sm:$0xe] }
 0x463   :  { %20032 = vst [vmem:[#allocation30_spill] sm:$0xff] %v17659_v43  ;;  %v9851_v17 = vpop.f32.mrb[185].mxu0  ;;  %v6036_v1 = vshrl.u32 %v5423_v42, 16  ;;  %v17694_v18 = vsel %vm16154_vm14, %v8473_v21, %v8474_v53  ;;  %v6028_v29 = vrot.slane %v6026_v34, 5  ;;  %v6042_v24 = vshll.u32 %v5424_v3, 16 }
 0x464   :  { %v17682_v59 = vpop.f32.mrb[186].mxu0  ;;  %v17696_v60 = vrot.slane %v6032_v8, 5  ;;  %v12039_v5 = vcombine.low %v6011_v6, %v6021_v48  ;;  %v12209_v36 = vcombine.low %v17676_v23, %v17680_v47  ;;  %v6743_v54 = vrot.slane %v6450_v51, 5  ;;  %v8276_v32 = vld [vmem:[#allocation2 + $0x4c] sm:$0xf] }
 0x465   :  { %20033 = vst [vmem:[#allocation28_spill] sm:$0xff] %v17682_v59  ;;  %v9854_v33 = vpop.f32.mrb[187].mxu0  ;;  %v6038_v58 = vrot.slane %v6036_v1, 4  ;;  %v6029_v27 = vor.u32 %v6028_v29, %v6025_v16  ;;  %v12073_v42 = vrot.slane %v6449_v20, 9  ;;  %v12179_v15 = vrot.slane %v8272_v11, 9 }
 0x466   :  { %v8478_v21 = vrot.slane %v8273_v25, 5  ;;  %v8277_v17 = vld [vmem:[#allocation2 + $0x50] sm:$0x1]  ;;  %v12210_v44 = vcombine.low %v17690_v0, %v17694_v18  ;;  %v6746_v3 = vrot.slane %v6451_v19, 5  ;;  %v5426_v13 = vld [vmem:[#allocation2 + $0x154] sm:$0xf] }
 0x467   :  { %10097 = vmatmul.mubr.bf16.gmra.mrb[164].mxu0 %v11961_v46  ;;  %10490 = vmatmul.mubr.bf16.gmra.mrb[104].mxu1 %v17651_v45  ;;  %v6039_v22 = vor.u32 %v6038_v58, %v17696_v60  ;;  %v6745_v46 = vrot.slane %v6743_v54, 4  ;;  %v5425_v6 = vld [vmem:[#allocation2 + $0x150] sm:$0xf]  ;;  %v6030_v20 = vrot.slane %v6029_v27, 4  ;;  %v6044_v48 = vrot.slane %v6042_v24, 5 }
 0x468   :  { %10104 = vmatprep.mubr.bf16.mxu0 %v13224_v62  ;;  %10497 = vmatprep.mubr.bf16.mxu1 %v12103_v63  ;;  %v8480_v53 = vrot.slane %v8478_v21, 4  ;;  %v8481_v34 = vrot.slane %v8274_v9, 5  ;;  %v12180_v33 = vrot.slane %v8275_v56, 9  ;;  %v8485_v19 = vrot.slane %v8276_v32, 5  ;;  %v5427_v16 = vld [vmem:[#allocation2 + $0x158] sm:$0x1] }
 0x469   :  { %v6040_v8 = vrot.slane %v6039_v22, 4  ;;  %v17714_v11 = vsel %vm16154_vm14, %v6745_v46, %v6746_v3  ;;  %v17720_v25 = vsel %vm16154_vm14, %v12073_v42, %v6743_v54  ;;  %v17724_v52 = vsel %vm16154_vm14, %v12179_v15, %v8478_v21  ;;  %v6452_v62 = vld [vmem:[#allocation2 + $0x15c] sm:$0xe]  ;;  %v6453_v29 = vld [vmem:[#allocation2 + $0x160] sm:$0xf]  ;;  %v13227_v27 = vld [vmem:[#allocation2 + $0x90] sm:$0xff]  }
 0x46a   :  { %v17707_v51 = vpop.f32.mrb[188].mxu0  ;;  %v17728_v2 = vsel %vm16154_vm14, %v8480_v53, %v8481_v34  ;;  %v6047_v63 = vshrl.u32 %v5425_v6, 16  ;;  %v6035_v9 = vsel %vm16171_vm15, %v6030_v20, %v17696_v60  ;;  %v12105_v58 = vcombine.low %v17720_v25, %v17714_v11  ;;  %v6454_v32 = vld [vmem:[#allocation2 + $0x164] sm:$0x1]  ;;  %v8278_v46 = vld [vmem:[#allocation2 + $0x54] sm:$0xe] }
 0x46b   :  { %20034 = vst [vmem:[#allocation32_spill] sm:$0xff] %v17707_v51  ;;  %v9859_v45 = vpop.f32.mrb[189].mxu0  ;;  %v8487_v54 = vrot.slane %v8485_v19, 4  ;;  %v8488_v56 = vrot.slane %v8277_v17, 5  ;;  %v6045_v42 = vsel %vm16171_vm15, %v6040_v8, %v6044_v48  ;;  %v6050_v21 = vshll.u32 %v5425_v6, 16 }
 0x46c   :  { %v17716_v1 = vpop.f32.mrb[190].mxu0  ;;  %v6049_v15 = vrot.slane %v6047_v63, 4  ;;  %v6056_v22 = vshll.u32 %v5426_v13, 16  ;;  %v12211_v60 = vcombine.low %v17724_v52, %v17728_v2  ;;  %v17744_v3 = vsel %vm16154_vm14, %v12180_v33, %v8485_v19  ;;  %v8279_v48 = vld [vmem:[#allocation2 + $0x58] sm:$0xf] }
 0x46d   :  { %20035 = vst [vmem:[#allocation31_spill] sm:$0xff] %v17716_v1  ;;  %v9862_v24 = vpop.f32.mrb[191].mxu0  ;;  %v17748_v17 = vsel %vm16154_vm14, %v8487_v54, %v8488_v56  ;;  %v6060_v20 = vshrl.u32 %v5426_v13, 16  ;;  %v8281_v6 = vld [vmem:[#allocation2 + $0x60] sm:$0xe]  ;;  %v6052_v53 = vrot.slane %v6050_v21, 5  ;;  %v12040_v45 = vcombine.low %v6035_v9, %v6045_v42 }
 0x46e   :  { %v17750_v34 = vrot.slane %v6056_v22, 5  ;;  %v6066_v35 = vshll.u32 %v5427_v16, 16  ;;  %v6750_v39 = vrot.slane %v6453_v29, 5  ;;  %v12074_v63 = vrot.slane %v6452_v62, 9  ;;  %v8280_v19 = vld [vmem:[#allocation2 + $0x5c] sm:$0x1] }
 0x46f   :  { %10105 = vmatmul.mubr.bf16.gmra.mrb[168].mxu0 %v11962_v55  ;;  %v8282_v55 = vld [vmem:[#allocation2 + $0x64] sm:$0xf]  ;;  %10498 = vmatmul.mubr.bf16.gmra.mrb[108].mxu1 %v12039_v5  ;;  %v6062_v8 = vrot.slane %v6060_v20, 4  ;;  %v6753_v33 = vrot.slane %v6454_v32, 5  ;;  %v6053_v13 = vor.u32 %v6052_v53, %v6049_v15  ;;  %v12181_v56 = vrot.slane %v8278_v46, 9 }
 0x470   :  { %10112 = vmatprep.mubr.bf16.mxu0 %v13227_v27  ;;  %10505 = vmatprep.mubr.bf16.mxu1 %v12104_v41  ;;  %v6752_v54 = vrot.slane %v6750_v39, 4  ;;  %v8492_v27 = vrot.slane %v8279_v48, 5  ;;  %v8283_v21 = vld [vmem:[#allocation2 + $0x68] sm:$0x1]  ;;  %v5428_v16 = vld [vmem:[#allocation2 + $0x15c] sm:$0xf]  ;;  %v17768_v48 = vsel %vm16154_vm14, %v12074_v63, %v6750_v39 }
 0x471   :  { %v6063_v62 = vor.u32 %v6062_v8, %v17750_v34  ;;  %v12182_v9 = vrot.slane %v8281_v6, 9  ;;  %v8499_v32 = vrot.slane %v8282_v55, 5  ;;  %v5429_v42 = vld [vmem:[#allocation2 + $0x160] sm:$0xf]  ;;  %v6054_v20 = vrot.slane %v6053_v13, 4 }
 0x472   :  { %v17752_v24 = vpop.f32.mrb[192].mxu0  ;;  %v6068_v40 = vrot.slane %v6066_v35, 5  ;;  %v17764_v14 = vsel %vm16154_vm14, %v6752_v54, %v6753_v33  ;;  %v8494_v41 = vrot.slane %v8492_v27, 4  ;;  %v8495_v53 = vrot.slane %v8280_v19, 5  ;;  %v5430_v6 = vld [vmem:[#allocation2 + $0x164] sm:$0x1] }
 0x473   :  { %20036 = vst [vmem:[#allocation9_spill] sm:$0xff] %v17752_v24  ;;  %v9867_v29 = vpop.f32.mrb[193].mxu0  ;;  %v6064_v46 = vrot.slane %v6063_v62, 4  ;;  %v8501_v8 = vrot.slane %v8499_v32, 4  ;;  %v12106_v55 = vcombine.low %v17768_v48, %v17764_v14  ;;  %v17774_v35 = vsel %vm16154_vm14, %v12181_v56, %v8492_v27  ;;  %v6455_v54 = vld [vmem:[#allocation2 + $0x168] sm:$0xe] }
 0x474   :  { %v17760_v22 = vpop.f32.mrb[194].mxu0  ;;  %v17778_v33 = vsel %vm16154_vm14, %v12182_v9, %v8499_v32  ;;  %v6071_v13 = vshrl.u32 %v5428_v16, 16  ;;  %v6456_v29 = vld [vmem:[#allocation2 + $0x16c] sm:$0xf]  ;;  %v17785_v39 = vsel %vm16154_vm14, %v8494_v41, %v8495_v53  ;;  %v8502_v63 = vrot.slane %v8283_v21, 5 }
 0x475   :  { %20037 = vst [vmem:[#allocation33_spill] sm:$0xff] %v17760_v22  ;;  %v9870_v15 = vpop.f32.mrb[195].mxu0  ;;  %v6074_v19 = vshll.u32 %v5428_v16, 16  ;;  %v6080_v62 = vshll.u32 %v5429_v42, 16  ;;  %v6457_v56 = vld [vmem:[#allocation2 + $0x170] sm:$0x1]  ;;  %v6059_v27 = vsel %vm16171_vm15, %v6054_v20, %v17750_v34  ;;  %v6069_v30 = vsel %vm16171_vm15, %v6064_v46, %v6068_v40 }
 0x476   :  { %v6073_v28 = vrot.slane %v6071_v13, 4  ;;  %v8284_v9 = vld [vmem:[#allocation2 + $0x6c] sm:$0xe]  ;;  %v8285_v32 = vld [vmem:[#allocation2 + $0x70] sm:$0xf]  ;;  %v17797_v21 = vsel %vm16154_vm14, %v8501_v8, %v8502_v63  ;;  %v6090_v10 = vshll.u32 %v5430_v6, 16  ;;  %v12041_v53 = vcombine.low %v6059_v27, %v6069_v30 }
 0x477   :  { %10113 = vmatmul.mubr.bf16.gmra.mrb[172].mxu0 %v11963_v7  ;;  %v6084_v7 = vshrl.u32 %v5429_v42, 16  ;;  %10506 = vmatmul.mubr.bf16.gmra.mrb[112].mxu1 %v12040_v45  ;;  %v6076_v16 = vrot.slane %v6074_v19, 5  ;;  %v17799_v41 = vrot.slane %v6080_v62, 5  ;;  %v8286_v38 = vld [vmem:[#allocation2 + $0x74] sm:$0x1]  ;;  %v12075_v45 = vrot.slane %v6455_v54, 9 }
 0x478   :  { %12534 = vmatprep.mubr.bf16.mxu0 %v12208_v26  ;;  %10513 = vmatprep.mubr.bf16.mxu1 %v12105_v58  ;;  %v6757_v20 = vrot.slane %v6456_v29, 5  ;;  %v8287_v40 = vld [vmem:[#allocation2 + $0x78] sm:$0xe]  ;;  %v8288_v15 = vld [vmem:[#allocation2 + $0x7c] sm:$0xf]  ;;  %v12183_v13 = vrot.slane %v8284_v9, 9  ;;  %v12214_v11 = vcombine.low %v17778_v33, %v17797_v21 }
 0x479   :  { %v6086_v42 = vrot.slane %v6084_v7, 4  ;;  %v6077_v8 = vor.u32 %v6076_v16, %v6073_v28  ;;  %v8506_v6 = vrot.slane %v8285_v32, 5  ;;  %v8289_v63 = vld [vmem:[#allocation2 + $0x80] sm:$0x1]  ;;  %v5431_v19 = vld [vmem:[#allocation2 + $0x168] sm:$0xf] }
 0x47a   :  { %v17801_v26 = vpop.f32.mrb[196].mxu0  ;;  %v6759_v58 = vrot.slane %v6757_v20, 4  ;;  %v6760_v7 = vrot.slane %v6457_v56, 5  ;;  %v6092_v34 = vrot.slane %v6090_v10, 5  ;;  %v17815_v30 = vsel %vm16154_vm14, %v12075_v45, %v6757_v20  ;;  %v5432_v32 = vld [vmem:[#allocation2 + $0x16c] sm:$0xf] }
 0x47b   :  { %20038 = vst [vmem:[#allocation14_spill] sm:$0xff] %v17801_v26  ;;  %v9875_v46 = vpop.f32.mrb[197].mxu0  ;;  %v6087_v25 = vor.u32 %v6086_v42, %v17799_v41  ;;  %v6078_v29 = vrot.slane %v6077_v8, 4  ;;  %v8508_v5 = vrot.slane %v8506_v6, 4  ;;  %v8513_v9 = vrot.slane %v8288_v15, 5 }
 0x47c   :  { %v17808_v62 = vpop.f32.mrb[198].mxu0  ;;  %v8509_v46 = vrot.slane %v8286_v38, 5  ;;  %v17819_v28 = vsel %vm16154_vm14, %v6759_v58, %v6760_v7  ;;  %v5433_v16 = vld [vmem:[#allocation2 + $0x170] sm:$0x1]  ;;  %v17826_v56 = vsel %vm16154_vm14, %v12183_v13, %v8506_v6  ;;  %v12184_v38 = vrot.slane %v8287_v40, 9 }
 0x47d   :  { %20039 = vst [vmem:[#allocation12_spill] sm:$0xff] %v17808_v62  ;;  %v9878_v54 = vpop.f32.mrb[199].mxu0  ;;  %v6088_v27 = vrot.slane %v6087_v25, 4  ;;  %v6095_v42 = vshrl.u32 %v5431_v19, 16  ;;  %v6458_v45 = vld [vmem:[#allocation2 + $0x174] sm:$0xe]  ;;  %v6083_v23 = vsel %vm16171_vm15, %v6078_v29, %v17799_v41  ;;  %v12107_v47 = vcombine.low %v17815_v30, %v17819_v28 }
 0x47e   :  { %v17830_v10 = vsel %vm16154_vm14, %v8508_v5, %v8509_v46  ;;  %v6459_v20 = vld [vmem:[#allocation2 + $0x178] sm:$0xf]  ;;  %v8516_v15 = vrot.slane %v8289_v63, 5  ;;  %v8290_v8 = vld [vmem:[#allocation2 + $0x84] sm:$0xe]  ;;  %v6098_v6 = vshll.u32 %v5431_v19, 16  ;;  %v17855_v7 = vsel %vm16154_vm14, %v12184_v38, %v8513_v9 }
 0x47f   :  { %12535 = vmatmul.mubr.bf16.vlgmr.msra.gmra.mrb[0].mxu0 %v12209_v36  ;;  %v8515_v36 = vrot.slane %v8513_v9, 4  ;;  %v8291_v5 = vld [vmem:[#allocation2 + $0x88] sm:$0xf]  ;;  %10514 = vmatmul.mubr.bf16.gmra.mrb[116].mxu1 %v12041_v53  ;;  %v6093_v40 = vsel %vm16171_vm15, %v6088_v27, %v6092_v34  ;;  %v6097_v13 = vrot.slane %v6095_v42, 4  ;;  %v6104_v25 = vshll.u32 %v5432_v32, 16 }
 0x480   :  { %12538 = vmatprep.mubr.bf16.mxu0 %v12210_v44  ;;  %v6460_v0 = vld [vmem:[#allocation2 + $0x17c] sm:$0x1]  ;;  %v8294_v18 = vld [vmem:[#allocation2 + $0x94] sm:$0xf]  ;;  %10521 = vmatprep.mubr.bf16.mxu1 %v12106_v55  ;;  %v6108_v63 = vshrl.u32 %v5432_v32, 16  ;;  %v6114_v34 = vshll.u32 %v5433_v16, 16  ;;  %v12042_v48 = vcombine.low %v6083_v23, %v6093_v40 }
 0x481   :  { %v17851_v53 = vsel %vm16154_vm14, %v8515_v36, %v8516_v15  ;;  %v8292_v58 = vld [vmem:[#allocation2 + $0x8c] sm:$0x1]  ;;  %v6100_v54 = vrot.slane %v6098_v6, 5  ;;  %v6106_v29 = vrot.slane %v6104_v25, 5  ;;  %v6764_v46 = vrot.slane %v6459_v20, 5 }
 0x482   :  { %v17842_v44 = vpop.f32.mrb[200].mxu0  ;;  %v6110_v27 = vrot.slane %v6108_v63, 4  ;;  %v12076_v30 = vrot.slane %v6458_v45, 9  ;;  %v8293_v28 = vld [vmem:[#allocation2 + $0x90] sm:$0xe]  ;;  %v12185_v36 = vrot.slane %v8290_v8, 9  ;;  %v20042_v8 = vcombine.low %v17744_v3, %v17748_v17 }
 0x483   :  { %20040 = vst [vmem:[#allocation11_spill] sm:$0xff] %v17842_v44  ;;  %v9883_v19 = vpop.f32.mrb[201].mxu0  ;;  %v6101_v16 = vor.u32 %v6100_v54, %v6097_v13  ;;  %v6766_v42 = vrot.slane %v6764_v46, 4  ;;  %v8520_v15 = vrot.slane %v8291_v5, 5  ;;  %v5434_v9 = vld [vmem:[#allocation2 + $0x174] sm:$0xf] }
 0x484   :  { %v17857_v14 = vpop.f32.mrb[202].mxu0  ;;  %v8295_v19 = vld [vmem:[#allocation2 + $0x98] sm:$0x1]  ;;  %v6111_v38 = vor.u32 %v6110_v27, %v6106_v29  ;;  %v6116_v6 = vrot.slane %v6114_v34, 5  ;;  %v6767_v25 = vrot.slane %v6460_v0, 5  ;;  %v8527_v20 = vrot.slane %v8294_v18, 5 }
 0x485   :  { %20041 = vst [vmem:[#allocation18_spill] sm:$0xff] %v17857_v14  ;;  %v9886_v32 = vpop.f32.mrb[203].mxu0  ;;  %v5435_v41 = vld [vmem:[#allocation2 + $0x178] sm:$0xf]  ;;  %v6102_v23 = vrot.slane %v6101_v16, 4  ;;  %v8522_v40 = vrot.slane %v8520_v15, 4  ;;  %v6765_v13 = vsel %vm16154_vm14, %v12076_v30, %v6764_v46  ;;  %v17875_v2 = vsel %vm16154_vm14, %v12185_v36, %v8520_v15 }
 0x486   :  { %v8523_v45 = vrot.slane %v8292_v58, 5  ;;  %v12186_v63 = vrot.slane %v8293_v28, 9  ;;  %v5436_v32 = vld [vmem:[#allocation2 + $0x17c] sm:$0x1]  ;;  %v6112_v5 = vrot.slane %v6111_v38, 4  ;;  %v6768_v0 = vsel %vm16154_vm14, %v6766_v42, %v6767_v25 }
 0x487   :  { %12539 = vmatmul.mubr.bf16.gmra.mrb[4].mxu0 %v12211_v60  ;;  %v8529_v18 = vrot.slane %v8527_v20, 4  ;;  %v6462_v34 = vld [vmem:[#allocation2 + $0x184] sm:$0xf]  ;;  %10522 = vmatmul.mubr.bf16.gmra.mrb[120].mxu1 %v12042_v48  ;;  %v6107_v52 = vsel %vm16171_vm15, %v6102_v23, %v6106_v29  ;;  %v6119_v3 = vshrl.u32 %v5434_v9, 16  ;;  %v6461_v17 = vld [vmem:[#allocation2 + $0x180] sm:$0xe]  ;;  %v12108_v42 = vcombine.low %v6765_v13, %v6768_v0 }
 0x488   :  { %12542 = vmatprep.mubr.bf16.mxu0 %v20042_v8  ;;  %v17879_v60 = vsel %vm16154_vm14, %v8522_v40, %v8523_v45  ;;  %v8296_v58 = vld [vmem:[#allocation2 + $0x9c] sm:$0xe]  ;;  %v8297_v54 = vld [vmem:[#allocation2 + $0xa0] sm:$0xf]  ;;  %10529 = vmatprep.mubr.bf16.mxu1 %v12107_v47  ;;  %v6117_v48 = vsel %vm16171_vm15, %v6112_v5, %v6116_v6  ;;  %v8530_v27 = vrot.slane %v8295_v19, 5  ;;  %v6122_v29 = vshll.u32 %v5434_v9, 16 }
 0x489   :  { %v6128_v30 = vshll.u32 %v5435_v41, 16  ;;  %v6463_v28 = vld [vmem:[#allocation2 + $0x188] sm:$0x1]  ;;  %v17887_v36 = vsel %vm16154_vm14, %v12186_v63, %v8527_v20  ;;  %v6121_v15 = vrot.slane %v6119_v3, 4  ;;  %v6132_v38 = vshrl.u32 %v5435_v41, 16 }
 0x48a   :  { %v17881_v46 = vpop.f32.mrb[204].mxu0  ;;  %v8298_v25 = vld [vmem:[#allocation2 + $0xa4] sm:$0x1]  ;;  %v17893_v47 = vsel %vm16154_vm14, %v8529_v18, %v8530_v27  ;;  %v6124_v6 = vrot.slane %v6122_v29, 5  ;;  %v6138_v9 = vshll.u32 %v5436_v32, 16  ;;  %v12043_v5 = vcombine.low %v6107_v52, %v6117_v48 }
 0x48b   :  { %20043 = vst [vmem:[#allocation24_spill] sm:$0xff] %v17881_v46  ;;  %v9891_v16 = vpop.f32.mrb[205].mxu0  ;;  %v17895_v19 = vrot.slane %v6128_v30, 5  ;;  %v8299_v40 = vld [vmem:[#allocation2 + $0xa8] sm:$0xe]  ;;  %v6134_v63 = vrot.slane %v6132_v38, 4  ;;  %v20045_v27 = vcombine.low %v17774_v35, %v17785_v39 }
 0x48c   :  { %v17889_v23 = vpop.f32.mrb[206].mxu0  ;;  %v8300_v45 = vld [vmem:[#allocation2 + $0xac] sm:$0xf]  ;;  %v6771_v41 = vrot.slane %v6462_v34, 5  ;;  %v8301_v13 = vld [vmem:[#allocation2 + $0xb0] sm:$0x1]  ;;  %v6125_v0 = vor.u32 %v6124_v6, %v6121_v15 }
 0x48d   :  { %20044 = vst [vmem:[#allocation35_spill] sm:$0xff] %v17889_v23  ;;  %v9894_v8 = vpop.f32.mrb[207].mxu0  ;;  %v12077_v3 = vrot.slane %v6461_v17, 9  ;;  %v12187_v16 = vrot.slane %v8296_v58, 9  ;;  %v8534_v55 = vrot.slane %v8297_v54, 5  ;;  %v6135_v52 = vor.u32 %v6134_v63, %v17895_v19 }
 0x48e   :  { %v5437_v18 = vld [vmem:[#allocation2 + $0x180] sm:$0xf]  ;;  %v6773_v48 = vrot.slane %v6771_v41, 4  ;;  %v6774_v29 = vrot.slane %v6463_v28, 5  ;;  %v5438_v30 = vld [vmem:[#allocation2 + $0x184] sm:$0xf] }
 0x48f   :  { %12543 = vmatmul.mubr.bf16.gmra.mrb[8].mxu0 %v20045_v27  ;;  %v6126_v34 = vrot.slane %v6125_v0, 4  ;;  %v6140_v17 = vrot.slane %v6138_v9, 5  ;;  %v8536_v58 = vrot.slane %v8534_v55, 4  ;;  %v8537_v54 = vrot.slane %v8298_v25, 5  ;;  %v5439_v15 = vld [vmem:[#allocation2 + $0x188] sm:$0x1]  ;;  %10530 = vmatmul.mubr.bf16.gmra.mrb[124].mxu1 %v12043_v5 }
 0x490   :  { %12546 = vmatprep.mubr.bf16.mxu0 %v12214_v11  ;;  %v6136_v35 = vrot.slane %v6135_v52, 4  ;;  %v6775_v39 = vsel %vm16154_vm14, %v6773_v48, %v6774_v29  ;;  %v12188_v38 = vrot.slane %v8299_v40, 9  ;;  %v8541_v6 = vrot.slane %v8300_v45, 5  ;;  %v6464_v8 = vld [vmem:[#allocation2 + $0x18c] sm:$0xe]  ;;  %10537 = vmatprep.mubr.bf16.mxu1 %v12108_v42 }
 0x491   :  { %v6772_v33 = vsel %vm16154_vm14, %v12077_v3, %v6771_v41  ;;  %v17916_v21 = vsel %vm16154_vm14, %v12187_v16, %v8534_v55  ;;  %v8544_v11 = vrot.slane %v8301_v13, 5  ;;  %v6143_v28 = vshrl.u32 %v5437_v18, 16  ;;  %v6465_v25 = vld [vmem:[#allocation2 + $0x190] sm:$0xf]  ;;  %v8302_v0 = vld [vmem:[#allocation2 + $0xb4] sm:$0xe] }
 0x492   :  { %v17910_v63 = vpop.f32.mrb[208].mxu0  ;;  %v6131_v40 = vsel %vm16171_vm15, %v6126_v34, %v17895_v19  ;;  %v12109_v45 = vcombine.low %v6772_v33, %v6775_v39  ;;  %v17923_v5 = vsel %vm16154_vm14, %v8536_v58, %v8537_v54  ;;  %v8543_v42 = vrot.slane %v8541_v6, 4  ;;  %v6466_v27 = vld [vmem:[#allocation2 + $0x194] sm:$0x1]  ;;  %v8303_v52 = vld [vmem:[#allocation2 + $0xb8] sm:$0xf] }
 0x493   :  { %20046 = vst [vmem:[#allocation22_spill] sm:$0xff] %v17910_v63  ;;  %v9899_v9 = vpop.f32.mrb[209].mxu0  ;;  %v6141_v55 = vsel %vm16171_vm15, %v6136_v35, %v6140_v17  ;;  %v6145_v13 = vrot.slane %v6143_v28, 4  ;;  %v6146_v3 = vshll.u32 %v5437_v18, 16  ;;  %v6152_v16 = vshll.u32 %v5438_v30, 16 }
 0x494   :  { %v17925_v41 = vpop.f32.mrb[210].mxu0  ;;  %v17931_v19 = vsel %vm16154_vm14, %v12188_v38, %v8541_v6  ;;  %v17935_v29 = vsel %vm16154_vm14, %v8543_v42, %v8544_v11  ;;  %v6156_v34 = vshrl.u32 %v5438_v30, 16  ;;  %v6162_v58 = vshll.u32 %v5439_v15, 16  ;;  %v8304_v54 = vld [vmem:[#allocation2 + $0xbc] sm:$0x1] }
 0x495   :  { %20047 = vst [vmem:[#allocation23_spill] sm:$0xff] %v17925_v41  ;;  %v9902_v48 = vpop.f32.mrb[211].mxu0  ;;  %v6148_v39 = vrot.slane %v6146_v3, 5  ;;  %v6154_v33 = vrot.slane %v6152_v16, 5  ;;  %v12078_v17 = vrot.slane %v6464_v8, 9  ;;  %v6778_v35 = vrot.slane %v6465_v25, 5 }
 0x496   :  { %v17937_v18 = vld [vmem:[#allocation2 + $0xc0] sm:$0xe]  ;;  %v8306_v28 = vld [vmem:[#allocation2 + $0xc4] sm:$0xf]  ;;  %v20048_v9 = vcombine.low %v17826_v56, %v17830_v10  ;;  %v12044_v38 = vcombine.low %v6131_v40, %v6141_v55  ;;  %v6158_v15 = vrot.slane %v6156_v34, 4  ;;  %v20049_v8 = vcombine.low %v17855_v7, %v17851_v53 }
 0x497   :  { %v5440_v11 = vld [vmem:[#allocation2 + $0x18c] sm:$0xf]  ;;  %v6149_v25 = vor.u32 %v6148_v39, %v6145_v13  ;;  %v6780_v42 = vrot.slane %v6778_v35, 4  ;;  %v12189_v3 = vrot.slane %v8302_v0, 9  ;;  %v8548_v16 = vrot.slane %v8303_v52, 5 }
 0x498   :  { %12547 = vmatmul.mubr.bf16.gmra.mrb[12].mxu0 %v20048_v9  ;;  %v8307_v48 = vld [vmem:[#allocation2 + $0xc8] sm:$0x1]  ;;  %10538 = vmatmul.mubr.bf16.gmra.mrb[128].mxu1 %v12044_v38  ;;  %v6159_v56 = vor.u32 %v6158_v15, %v6154_v33  ;;  %v6164_v10 = vrot.slane %v6162_v58, 5  ;;  %v6781_v40 = vrot.slane %v6466_v27, 5  ;;  %v8555_v55 = vrot.slane %v8306_v28, 5 }
 0x499   :  { %12550 = vmatprep.mubr.bf16.mxu0 %v20049_v8  ;;  %v5441_v9 = vld [vmem:[#allocation2 + $0x190] sm:$0xf]  ;;  %10545 = vmatprep.mubr.bf16.mxu1 %v12109_v45  ;;  %v6150_v34 = vrot.slane %v6149_v25, 4  ;;  %v6779_v30 = vsel %vm16154_vm14, %v12078_v17, %v6778_v35  ;;  %v8550_v53 = vrot.slane %v8548_v16, 4  ;;  %v8551_v7 = vrot.slane %v8304_v54, 5 }
 0x49a   :  { %v17949_v6 = vpop.f32.mrb[212].mxu0  ;;  %v5442_v13 = vld [vmem:[#allocation2 + $0x194] sm:$0x1]  ;;  %v6160_v0 = vrot.slane %v6159_v56, 4  ;;  %v6782_v52 = vsel %vm16154_vm14, %v6780_v42, %v6781_v40  ;;  %v12190_v58 = vrot.slane %v17937_v18, 9  ;;  %v8557_v27 = vrot.slane %v8555_v55, 4 }
 0x49b   :  { %20050 = vst [vmem:[#allocation37_spill] sm:$0xff] %v17949_v6  ;;  %v9907_v39 = vpop.f32.mrb[213].mxu0  ;;  %v6468_v28 = vld [vmem:[#allocation2 + $0x19c] sm:$0xf]  ;;  %v6155_v45 = vsel %vm16171_vm15, %v6150_v34, %v6154_v33  ;;  %v17962_v17 = vsel %vm16154_vm14, %v12189_v3, %v8548_v16  ;;  %v17966_v54 = vsel %vm16154_vm14, %v8550_v53, %v8551_v7  ;;  %v6167_v35 = vshrl.u32 %v5440_v11, 16 }
 0x49c   :  { %v17956_v38 = vpop.f32.mrb[214].mxu0  ;;  %v6467_v15 = vld [vmem:[#allocation2 + $0x198] sm:$0xe]  ;;  %v2082_v8 = vld [vmem:[#allocation2 + $0xd4] sm:$0x1]  ;;  %v6165_v18 = vsel %vm16171_vm15, %v6160_v0, %v6164_v10  ;;  %v8558_v42 = vrot.slane %v8307_v48, 5  ;;  %v12110_v32 = vcombine.low %v6779_v30, %v6782_v52  ;;  %v20052_v53 = vcombine.low %v17875_v2, %v17879_v60 }
 0x49d   :  { %20051 = vst [vmem:[#allocation36_spill] sm:$0xff] %v17956_v38  ;;  %v9910_v25 = vpop.f32.mrb[215].mxu0  ;;  %v6170_v56 = vshll.u32 %v5440_v11, 16  ;;  %v6176_v40 = vshll.u32 %v5441_v9, 16  ;;  %v6469_v39 = vld [vmem:[#allocation2 + $0x1a0] sm:$0x1]  ;;  %v12045_v34 = vcombine.low %v6155_v45, %v6165_v18  ;;  %v20053_v30 = vcombine.low %v17887_v36, %v17893_v47 }
 0x49e   :  { %v8308_v33 = vld [vmem:[#allocation2 + $0xcc] sm:$0xe]  ;;  %v6169_v3 = vrot.slane %v6167_v35, 4  ;;  %v6180_v16 = vshrl.u32 %v5441_v9, 16  ;;  %v8309_v20 = vld [vmem:[#allocation2 + $0xd0] sm:$0xf]  ;;  %v17977_v7 = vsel %vm16154_vm14, %v8557_v27, %v8558_v42  ;;  %v12221_v9 = vcombine.low %v17962_v17, %v17966_v54 }
 0x49f   :  { %v17970_v38 = vld [vmem:[#allocation2 + $0xf4] sm:$0xf]  ;;  %v6172_v48 = vrot.slane %v6170_v56, 5  ;;  %v6178_v11 = vrot.slane %v6176_v40, 5  ;;  %v6186_v10 = vshll.u32 %v5442_v13, 16  ;;  %v17988_v2 = vsel %vm16154_vm14, %v12190_v58, %v8555_v55 }
 0x4a0   :  { %12551 = vmatmul.mubr.bf16.gmra.mrb[16].mxu0 %v20052_v53  ;;  %v17979_v0 = vld [vmem:[#allocation2 + $0xf0] sm:$0xe]  ;;  %v6182_v60 = vrot.slane %v6180_v16, 4  ;;  %v6785_v52 = vrot.slane %v6468_v28, 5  ;;  %v8313_v27 = vld [vmem:[#allocation2 + $0xf8] sm:$0x1]  ;;  %10546 = vmatmul.mubr.bf16.gmra.mrb[132].mxu1 %v12045_v34  ;;  %v12222_v47 = vcombine.low %v17988_v2, %v17977_v7 }
 0x4a1   :  { %12554 = vmatprep.mubr.bf16.mxu0 %v20053_v30  ;;  %v6173_v45 = vor.u32 %v6172_v48, %v6169_v3  ;;  %v12079_v35 = vrot.slane %v6467_v15, 9  ;;  %v2083_v13 = vsel %vm13635_vm5, 0, %v2082_v8  ;;  %v12191_v25 = vrot.slane %v8308_v33, 9  ;;  %v5443_v18 = vld [vmem:[#allocation2 + $0x198] sm:$0xf]  ;;  %10553 = vmatprep.mubr.bf16.mxu1 %v12110_v32 }
 0x4a2   :  { %v17992_v36 = vpop.f32.mrb[216].mxu0  ;;  %v6183_v42 = vor.u32 %v6182_v60, %v6178_v11  ;;  %v6787_v55 = vrot.slane %v6785_v52, 4  ;;  %v6788_v58 = vrot.slane %v6469_v39, 5  ;;  %2084 = vst [vmem:[#allocation2 + $0xd4] sm:$0x1] %v2083_v13  ;;  %v6188_v34 = vrot.slane %v6186_v10, 5 }
 0x4a3   :  { %20054 = vst [vmem:[#allocation26_spill] sm:$0xff] %v17992_v36  ;;  %v5444_v28 = vld [vmem:[#allocation2 + $0x19c] sm:$0xf]  ;;  %v9915_v56 = vpop.f32.mrb[217].mxu0  ;;  %v6174_v40 = vrot.slane %v6173_v45, 4  ;;  %v8562_v15 = vrot.slane %v8309_v20, 5  ;;  %v6786_v10 = vsel %vm16154_vm14, %v12079_v35, %v6785_v52 }
 0x4a4   :  { %v8569_v3 = vrot.slane %v17970_v38, 5  ;;  %v17997_v8 = vpop.f32.mrb[218].mxu0  ;;  %v6184_v33 = vrot.slane %v6183_v42, 4  ;;  %v6789_v32 = vsel %vm16154_vm14, %v6787_v55, %v6788_v58  ;;  %v12192_v16 = vrot.slane %v17979_v0, 9  ;;  %v5445_v48 = vld [vmem:[#allocation2 + $0x1a0] sm:$0x1] }
 0x4a5   :  { %20055 = vst [vmem:[#allocation38_spill] sm:$0xff] %v17997_v8  ;;  %v8572_v53 = vrot.slane %v8313_v27, 5  ;;  %v9918_v30 = vpop.f32.mrb[219].mxu0  ;;  %v6179_v39 = vsel %vm16171_vm15, %v6174_v40, %v6178_v11  ;;  %v18008_v20 = vsel %vm16154_vm14, %v12191_v25, %v8562_v15  ;;  %v6191_v45 = vshrl.u32 %v5443_v18, 16  ;;  %v7239_v27 = vld [vmem:[#allocation2 + $0x18] sm:$0xf] }
 0x4a6   :  { %v8571_v38 = vrot.slane %v8569_v3, 4  ;;  %v6189_v60 = vsel %vm16171_vm15, %v6184_v33, %v6188_v34  ;;  %v6194_v13 = vshll.u32 %v5443_v18, 16  ;;  %v6200_v0 = vshll.u32 %v5444_v28, 16  ;;  %v7240_v35 = vld [vmem:[#allocation2 + $0x1c] sm:$0xf] }
 0x4a7   :  { %v20056_v42 = vcombine.low %v17916_v21, %v17923_v5  ;;  %v12046_v11 = vcombine.low %v6179_v39, %v6189_v60  ;;  %v12111_v55 = vcombine.low %v6786_v10, %v6789_v32  ;;  %v8564_v58 = vrot.slane %v8562_v15, 4  ;;  %v7241_v56 = vld [vmem:[#allocation2 + $0x20] sm:$0x1]  ;;  %v7244_v54 = vld [vmem:[#allocation2 + $0x2c] sm:$0x1] }
 0x4a8   :  { %v6204_v52 = vshrl.u32 %v5444_v28, 16  ;;  %v20057_v25 = vcombine.low %v17931_v19, %v17935_v29  ;;  %v18020_v40 = vsel %vm16154_vm14, %v8571_v38, %v8572_v53  ;;  %v6193_v18 = vrot.slane %v6191_v45, 4  ;;  %v7293_v6 = vld [vmem:[#allocation2 + $0x108] sm:$0xf] }
 0x4a9   :  { %12555 = vmatmul.mubr.bf16.gmra.mrb[20].mxu0 %v20056_v42  ;;  %v6196_v34 = vrot.slane %v6194_v13, 5  ;;  %v6202_v33 = vrot.slane %v6200_v0, 5  ;;  %10554 = vmatmul.mubr.bf16.gmra.mrb[136].mxu1 %v12046_v11  ;;  %v8310_v21 = vld [vmem:[#allocation2 + $0xd4] sm:$0x1]  ;;  %v6210_v30 = vshll.u32 %v5445_v48, 16  ;;  %v7336_v32 = vshrl.u32 %v7239_v27, 16 }
 0x4aa   :  { %12558 = vmatprep.mubr.bf16.mxu0 %v20057_v25  ;;  %v6206_v5 = vrot.slane %v6204_v52, 4  ;;  %v7339_v15 = vshll.u32 %v7239_v27, 16  ;;  %v18022_v28 = vpop.f32.mrb[220].mxu0  ;;  %10561 = vmatprep.mubr.bf16.mxu1 %v12111_v55  ;;  %v8565_v39 = vrot.slane %v8310_v21, 5  ;;  %v7345_v19 = vshll.u32 %v7240_v35, 16 }
 0x4ab   :  { %20058 = vst [vmem:[#allocation40_spill] sm:$0xff] %v18022_v28  ;;  %v6197_v10 = vor.u32 %v6196_v34, %v6193_v18  ;;  %v7349_v29 = vshrl.u32 %v7240_v35, 16  ;;  %v9923_v60 = vpop.f32.mrb[221].mxu0  ;;  %v7338_v53 = vrot.slane %v7336_v32, 4  ;;  %v7355_v45 = vshll.u32 %v7241_v56, 16 }
 0x4ac   :  { %v6207_v42 = vor.u32 %v6206_v5, %v6202_v33  ;;  %v7341_v38 = vrot.slane %v7339_v15, 5  ;;  %v18024_v13 = vld [vmem:[#allocation2 + $0xfc] sm:$0xe]  ;;  %v18026_v0 = vld [vmem:[#allocation2 + $0x100] sm:$0xf]  ;;  %v18028_v11 = vpop.f32.mrb[222].mxu0  ;;  %v18032_v48 = vsel %vm16154_vm14, %v8564_v58, %v8565_v39  ;;  %v18036_v34 = vsel %vm16154_vm14, %v12192_v16, %v8569_v3 }
 0x4ad   :  { %20059 = vst [vmem:[#allocation39_spill] sm:$0xff] %v18028_v11  ;;  %v6198_v27 = vrot.slane %v6197_v10, 4  ;;  %v7347_v55 = vrot.slane %v7345_v19, 5  ;;  %v7351_v52 = vrot.slane %v7349_v29, 4  ;;  %v8316_v25 = vld [vmem:[#allocation2 + $0x104] sm:$0x1]  ;;  %v12224_v60 = vcombine.low %v18036_v34, %v18020_v40 }
 0x4ae   :  { %v8318_v35 = vld [vmem:[#allocation2 + $0x10c] sm:$0xf]  ;;  %v9926_v18 = vpop.f32.mrb[223].mxu0  ;;  %v6208_v56 = vrot.slane %v6207_v42, 4  ;;  %v6212_v21 = vrot.slane %v6210_v30, 5  ;;  %v7342_v5 = vor.u32 %v7341_v38, %v7338_v53  ;;  %v8576_v10 = vrot.slane %v18026_v0, 5 }
 0x4af   :  { %v8317_v32 = vld [vmem:[#allocation2 + $0x108] sm:$0xe]  ;;  %v7242_v15 = vld [vmem:[#allocation2 + $0x24] sm:$0xf]  ;;  %v6203_v58 = vsel %vm16171_vm15, %v6198_v27, %v6202_v33  ;;  %v7352_v39 = vor.u32 %v7351_v52, %v7347_v55  ;;  %v12223_v3 = vcombine.low %v18008_v20, %v18032_v48  ;;  %v7357_v19 = vrot.slane %v7355_v45, 5 }
 0x4b0   :  { %v6213_v16 = vsel %vm16171_vm15, %v6208_v56, %v6212_v21  ;;  %v7343_v30 = vrot.slane %v7342_v5, 4  ;;  %v8319_v29 = vld [vmem:[#allocation2 + $0x110] sm:$0x1]  ;;  %v7243_v40 = vld [vmem:[#allocation2 + $0x28] sm:$0xf]  ;;  %v12193_v53 = vrot.slane %v18024_v13, 9 }
 0x4b1   :  { %12559 = vmatmul.mubr.bf16.gmra.mrb[24].mxu0 %v12221_v9  ;;  %v12047_v33 = vcombine.low %v6203_v58, %v6213_v16  ;;  %v7353_v42 = vrot.slane %v7352_v39, 4  ;;  %v8578_v17 = vrot.slane %v8576_v10, 4  ;;  %v8320_v9 = vld [vmem:[#allocation2 + $0x114] sm:$0xe]  ;;  %v8321_v38 = vld [vmem:[#allocation2 + $0x118] sm:$0xf] }
 0x4b2   :  { %12562 = vmatprep.mubr.bf16.mxu0 %v12222_v47  ;;  %v7348_v20 = vsel %vm16171_vm15, %v7343_v30, %v7347_v55  ;;  %v8579_v0 = vrot.slane %v8316_v25, 5  ;;  %v8583_v48 = vrot.slane %v8318_v35, 5  ;;  %v7360_v45 = vshrl.u32 %v7242_v15, 16  ;;  %v18056_v27 = vpop.f32.mrb[224].mxu0  ;;  %v8322_v25 = vld [vmem:[#allocation2 + $0x11c] sm:$0x1] }
 0x4b3   :  { %20060 = vst [vmem:[#allocation42_spill] sm:$0xff] %v18056_v27  ;;  %10562 = vmatmul.mubr.bf16.gmra.mrb[140].mxu1 %v12047_v33  ;;  %v7358_v7 = vsel %vm16171_vm15, %v7353_v42, %v7357_v19  ;;  %v12194_v2 = vrot.slane %v8317_v32, 9  ;;  %v7363_v47 = vshll.u32 %v7242_v15, 16  ;;  %v7369_v52 = vshll.u32 %v7243_v40, 16  ;;  %v9931_v13 = vpop.f32.mrb[225].mxu0 }
 0x4b4   :  { %v12144_v18 = vcombine.low %v7348_v20, %v7358_v7  ;;  %v18062_v34 = vsel %vm16154_vm14, %v8578_v17, %v8579_v0  ;;  %v8585_v56 = vrot.slane %v8583_v48, 4  ;;  %v8586_v55 = vrot.slane %v8319_v29, 5  ;;  %v18064_v35 = vpop.f32.mrb[226].mxu0  ;;  %v8323_v33 = vld [vmem:[#allocation2 + $0x120] sm:$0xe]  ;;  %v13236_v13 = vld [vmem:[#allocation2 + $0x18] sm:$0xff]  }
 0x4b5   :  { %20061 = vst [vmem:[#allocation41_spill] sm:$0xff] %v18064_v35  ;;  %v7362_v21 = vrot.slane %v7360_v45, 4  ;;  %v7365_v5 = vrot.slane %v7363_v47, 5  ;;  %v7371_v58 = vrot.slane %v7369_v52, 5  ;;  %v7373_v39 = vshrl.u32 %v7243_v40, 16  ;;  %v9934_v16 = vpop.f32.mrb[227].mxu0 }
 0x4b6   :  { %10602 = vmatprep.mubr.bf16.mxu1 %v12144_v18  ;;  %v18068_v32 = vsel %vm16154_vm14, %v8585_v56, %v8586_v55  ;;  %v7379_v15 = vshll.u32 %v7244_v54, 16  ;;  %v12195_v30 = vrot.slane %v8320_v9, 9  ;;  %v8590_v19 = vrot.slane %v8321_v38, 5  ;;  %v8324_v42 = vld [vmem:[#allocation2 + $0x124] sm:$0xf] }
 0x4b7   :  { %v8577_v29 = vsel %vm16154_vm14, %v12193_v53, %v8576_v10  ;;  %v8584_v17 = vsel %vm16154_vm14, %v12194_v2, %v8583_v48  ;;  %v7366_v20 = vor.u32 %v7365_v5, %v7362_v21  ;;  %v7375_v0 = vrot.slane %v7373_v39, 4  ;;  %v7245_v40 = vld [vmem:[#allocation2 + $0x30] sm:$0xf]  ;;  %v7246_v45 = vld [vmem:[#allocation2 + $0x34] sm:$0xf] }
 0x4b8   :  { %v12225_v7 = vcombine.low %v8577_v29, %v18062_v34  ;;  %v12226_v47 = vcombine.low %v8584_v17, %v18068_v32  ;;  %v8592_v54 = vrot.slane %v8590_v19, 4  ;;  %v8593_v9 = vrot.slane %v8322_v25, 5  ;;  %v8325_v38 = vld [vmem:[#allocation2 + $0x128] sm:$0x1]  ;;  %v7247_v52 = vld [vmem:[#allocation2 + $0x38] sm:$0x1] }
 0x4b9   :  { %12563 = vmatmul.mubr.bf16.gmra.mrb[28].mxu0 %v12223_v3  ;;  %v7367_v18 = vrot.slane %v7366_v20, 4  ;;  %v7376_v10 = vor.u32 %v7375_v0, %v7371_v58  ;;  %v7381_v53 = vrot.slane %v7379_v15, 5  ;;  %v8597_v56 = vrot.slane %v8324_v42, 5  ;;  %v8327_v48 = vld [vmem:[#allocation2 + $0x130] sm:$0xf] }
 0x4ba   :  { %12566 = vmatprep.mubr.bf16.mxu0 %v12224_v60  ;;  %v18078_v2 = vsel %vm16154_vm14, %v12195_v30, %v8590_v19  ;;  %v7384_v3 = vshrl.u32 %v7245_v40, 16  ;;  %v7387_v55 = vshll.u32 %v7245_v40, 16  ;;  %v7393_v34 = vshll.u32 %v7246_v45, 16  ;;  %v8326_v21 = vld [vmem:[#allocation2 + $0x12c] sm:$0xe]  ;;  %v18080_v5 = vpop.f32.mrb[228].mxu0 }
 0x4bb   :  { %20062 = vst [vmem:[#allocation10_spill] sm:$0xff] %v18080_v5  ;;  %10603 = vmatmul.mubr.bf16.vlgmr.msra.gmra.mrb[144].mxu1 %v13236_v13  ;;  %v7372_v60 = vsel %vm16171_vm15, %v7367_v18, %v7371_v58  ;;  %v7377_v25 = vrot.slane %v7376_v10, 4  ;;  %v18086_v39 = vsel %vm16154_vm14, %v8592_v54, %v8593_v9  ;;  %v12196_v16 = vrot.slane %v8323_v33, 9  ;;  %v8328_v32 = vld [vmem:[#allocation2 + $0x134] sm:$0x1]  ;;  %v9939_v15 = vpop.f32.mrb[229].mxu0 }
 0x4bc   :  { %v8599_v30 = vrot.slane %v8597_v56, 4  ;;  %v8600_v19 = vrot.slane %v8325_v38, 5  ;;  %v7386_v42 = vrot.slane %v7384_v3, 4  ;;  %v7389_v29 = vrot.slane %v7387_v55, 5  ;;  %v8329_v17 = vld [vmem:[#allocation2 + $0x138] sm:$0xe] }
 0x4bd   :  { %v8330_v20 = vld [vmem:[#allocation2 + $0x13c] sm:$0xf]  ;;  %v18088_v0 = vpop.f32.mrb[230].mxu0  ;;  %v7382_v40 = vsel %vm16171_vm15, %v7377_v25, %v7381_v53  ;;  %v7395_v58 = vrot.slane %v7393_v34, 5  ;;  %v7397_v13 = vshrl.u32 %v7246_v45, 16  ;;  %v7403_v18 = vshll.u32 %v7247_v52, 16 }
 0x4be   :  { %20063 = vst [vmem:[#allocation29_spill] sm:$0xff] %v18088_v0  ;;  %v7248_v10 = vld [vmem:[#allocation2 + $0x3c] sm:$0xf]  ;;  %v9942_v54 = vpop.f32.mrb[231].mxu0  ;;  %v12145_v9 = vcombine.low %v7372_v60, %v7382_v40  ;;  %v12227_v33 = vcombine.low %v18078_v2, %v18086_v39  ;;  %v7390_v15 = vor.u32 %v7389_v29, %v7386_v42  ;;  %v8604_v38 = vrot.slane %v8327_v48, 5  ;;  %v13237_v2 = vld [vmem:[#allocation2 + $0x24] sm:$0xff]  }
 0x4bf   :  { %v18096_v3 = vsel %vm16154_vm14, %v12196_v16, %v8597_v56  ;;  %v8601_v55 = vsel %vm16154_vm14, %v8599_v30, %v8600_v19  ;;  %v7399_v0 = vrot.slane %v7397_v13, 4  ;;  %v12197_v53 = vrot.slane %v8326_v21, 9  ;;  %v7249_v34 = vld [vmem:[#allocation2 + $0x40] sm:$0xf]  ;;  %v7250_v56 = vld [vmem:[#allocation2 + $0x44] sm:$0x1] }
 0x4c0   :  { %10610 = vmatprep.mubr.bf16.mxu1 %v12145_v9  ;;  %v7391_v45 = vrot.slane %v7390_v15, 4  ;;  %v7405_v52 = vrot.slane %v7403_v18, 5  ;;  %v8606_v60 = vrot.slane %v8604_v38, 4  ;;  %v8607_v25 = vrot.slane %v8328_v32, 5  ;;  %v8331_v40 = vld [vmem:[#allocation2 + $0x140] sm:$0x1] }
 0x4c1   :  { %12567 = vmatmul.mubr.bf16.gmra.mrb[32].mxu0 %v12225_v7  ;;  %v7400_v48 = vor.u32 %v7399_v0, %v7395_v58  ;;  %v12198_v39 = vrot.slane %v8329_v17, 9  ;;  %v8611_v42 = vrot.slane %v8330_v20, 5  ;;  %v7408_v16 = vshrl.u32 %v7248_v10, 16  ;;  %v18105_v19 = vld [vmem:[#allocation2 + $0x144] sm:$0xe] }
 0x4c2   :  { %12570 = vmatprep.mubr.bf16.mxu0 %v12226_v47  ;;  %v12228_v29 = vcombine.low %v18096_v3, %v8601_v55  ;;  %v18103_v21 = vsel %vm16154_vm14, %v8606_v60, %v8607_v25  ;;  %v7411_v7 = vshll.u32 %v7248_v10, 16  ;;  %v7417_v30 = vshll.u32 %v7249_v34, 16  ;;  %v8333_v13 = vld [vmem:[#allocation2 + $0x148] sm:$0xf]  ;;  %v18107_v32 = vpop.f32.mrb[232].mxu0 }
 0x4c3   :  { %20064 = vst [vmem:[#allocation15_spill] sm:$0xff] %v18107_v32  ;;  %10611 = vmatmul.mubr.bf16.gmra.mrb[148].mxu1 %v13237_v2  ;;  %v7396_v47 = vsel %vm16171_vm15, %v7391_v45, %v7395_v58  ;;  %v7401_v17 = vrot.slane %v7400_v48, 4  ;;  %v18113_v20 = vsel %vm16154_vm14, %v12197_v53, %v8604_v38  ;;  %v8613_v0 = vrot.slane %v8611_v42, 4  ;;  %v8334_v18 = vld [vmem:[#allocation2 + $0x14c] sm:$0x1]  ;;  %v9947_v10 = vpop.f32.mrb[233].mxu0 }
 0x4c4   :  { %v18115_v54 = vld [vmem:[#allocation2 + $0x154] sm:$0xf]  ;;  %v7410_v9 = vrot.slane %v7408_v16, 4  ;;  %v7413_v15 = vrot.slane %v7411_v7, 5  ;;  %v7419_v3 = vrot.slane %v7417_v30, 5  ;;  %v7421_v55 = vshrl.u32 %v7249_v34, 16 }
 0x4c5   :  { %v8335_v60 = vld [vmem:[#allocation2 + $0x150] sm:$0xe]  ;;  %v18117_v25 = vpop.f32.mrb[234].mxu0  ;;  %v7406_v58 = vsel %vm16171_vm15, %v7401_v17, %v7405_v52  ;;  %v8614_v38 = vrot.slane %v8331_v40, 5  ;;  %v7427_v53 = vshll.u32 %v7250_v56, 16  ;;  %v18125_v16 = vsel %vm16154_vm14, %v12198_v39, %v8611_v42 }
 0x4c6   :  { %20065 = vst [vmem:[#allocation13_spill] sm:$0xff] %v18117_v25  ;;  %v8337_v2 = vld [vmem:[#allocation2 + $0x158] sm:$0x1]  ;;  %v9950_v48 = vpop.f32.mrb[235].mxu0  ;;  %v12146_v32 = vcombine.low %v7396_v47, %v7406_v58  ;;  %v7414_v7 = vor.u32 %v7413_v15, %v7410_v9  ;;  %v7423_v34 = vrot.slane %v7421_v55, 4  ;;  %v12199_v52 = vrot.slane %v18105_v19, 9 }
 0x4c7   :  { %v7251_v30 = vld [vmem:[#allocation2 + $0x48] sm:$0xf]  ;;  %v8615_v10 = vsel %vm16154_vm14, %v8613_v0, %v8614_v38  ;;  %v7429_v25 = vrot.slane %v7427_v53, 5  ;;  %v8618_v17 = vrot.slane %v8333_v13, 5  ;;  %v13238_v40 = vld [vmem:[#allocation2 + $0x30] sm:$0xff]   ;;  %v8621_v47 = vrot.slane %v8334_v18, 5 }
 0x4c8   :  { %10618 = vmatprep.mubr.bf16.mxu1 %v12146_v32  ;;  %v7415_v56 = vrot.slane %v7414_v7, 4  ;;  %v7424_v48 = vor.u32 %v7423_v34, %v7419_v3  ;;  %v8625_v58 = vrot.slane %v18115_v54, 5  ;;  %v7252_v39 = vld [vmem:[#allocation2 + $0x4c] sm:$0xf]  ;;  %v12200_v9 = vrot.slane %v8335_v60, 9 }
 0x4c9   :  { %12571 = vmatmul.mubr.bf16.gmra.mrb[36].mxu0 %v12227_v33  ;;  %v8620_v42 = vrot.slane %v8618_v17, 4  ;;  %v7253_v15 = vld [vmem:[#allocation2 + $0x50] sm:$0x1]  ;;  %v7432_v55 = vshrl.u32 %v7251_v30, 16  ;;  %v7435_v45 = vshll.u32 %v7251_v30, 16  ;;  %v8628_v32 = vrot.slane %v8337_v2, 5 }
 0x4ca   :  { %12574 = vmatprep.mubr.bf16.mxu0 %v12228_v29  ;;  %v8339_v0 = vld [vmem:[#allocation2 + $0x160] sm:$0xf]  ;;  %v7420_v19 = vsel %vm16171_vm15, %v7415_v56, %v7419_v3  ;;  %v7425_v13 = vrot.slane %v7424_v48, 4  ;;  %v8627_v33 = vrot.slane %v8625_v58, 4  ;;  %v8338_v38 = vld [vmem:[#allocation2 + $0x15c] sm:$0xe]  ;;  %v12230_v18 = vcombine.low %v18125_v16, %v8615_v10 }
 0x4cb   :  { %v18133_v53 = vpop.f32.mrb[236].mxu0  ;;  %10619 = vmatmul.mubr.bf16.gmra.mrb[152].mxu1 %v13238_v40  ;;  %v7434_v54 = vrot.slane %v7432_v55, 4  ;;  %v7437_v29 = vrot.slane %v7435_v45, 5  ;;  %v7441_v7 = vshll.u32 %v7252_v39, 16  ;;  %v8340_v60 = vld [vmem:[#allocation2 + $0x164] sm:$0x1]  ;;  %v18140_v3 = vsel %vm16154_vm14, %v12199_v52, %v8618_v17 }
 0x4cc   :  { %20066 = vst [vmem:[#allocation19_spill] sm:$0xff] %v18133_v53  ;;  %v9955_v34 = vpop.f32.mrb[237].mxu0  ;;  %v7430_v30 = vsel %vm16171_vm15, %v7425_v13, %v7429_v25  ;;  %v18144_v2 = vsel %vm16154_vm14, %v8620_v42, %v8621_v47  ;;  %v7445_v56 = vshrl.u32 %v7252_v39, 16  ;;  %v8341_v48 = vld [vmem:[#allocation2 + $0x168] sm:$0xe]  ;;  %v18150_v40 = vsel %vm16154_vm14, %v8627_v33, %v8628_v32 }
 0x4cd   :  { %v8342_v16 = vld [vmem:[#allocation2 + $0x16c] sm:$0xf]  ;;  %v18146_v10 = vpop.f32.mrb[238].mxu0  ;;  %v12147_v45 = vcombine.low %v7420_v19, %v7430_v30  ;;  %v7438_v55 = vor.u32 %v7437_v29, %v7434_v54  ;;  %v7443_v25 = vrot.slane %v7441_v7, 5  ;;  %v8343_v13 = vld [vmem:[#allocation2 + $0x170] sm:$0x1]  ;;  %v18154_v52 = vsel %vm16154_vm14, %v12200_v9, %v8625_v58 }
 0x4ce   :  { %20067 = vst [vmem:[#allocation16_spill] sm:$0xff] %v18146_v10  ;;  %v9958_v34 = vpop.f32.mrb[239].mxu0  ;;  %v7447_v17 = vrot.slane %v7445_v56, 4  ;;  %v7451_v47 = vshll.u32 %v7253_v15, 16  ;;  %v8632_v39 = vrot.slane %v8339_v0, 5  ;;  %v12231_v19 = vcombine.low %v18140_v3, %v18144_v2  ;;  %v13239_v7 = vld [vmem:[#allocation2 + $0x3c] sm:$0xff]  }
 0x4cf   :  { %v7254_v42 = vld [vmem:[#allocation2 + $0x54] sm:$0xf]  ;;  %10626 = vmatprep.mubr.bf16.mxu1 %v12147_v45  ;;  %v7439_v30 = vrot.slane %v7438_v55, 4  ;;  %v12201_v10 = vrot.slane %v8338_v38, 9  ;;  %v8639_v33 = vrot.slane %v8342_v16, 5  ;;  %v20068_v32 = vcombine.low %v18113_v20, %v18103_v21 }
 0x4d0   :  { %v12232_v54 = vcombine.low %v18154_v52, %v18150_v40  ;;  %v7448_v58 = vor.u32 %v7447_v17, %v7443_v25  ;;  %v8634_v9 = vrot.slane %v8632_v39, 4  ;;  %v8635_v29 = vrot.slane %v8340_v60, 5  ;;  %v7255_v15 = vld [vmem:[#allocation2 + $0x58] sm:$0xf]  ;;  %v7256_v0 = vld [vmem:[#allocation2 + $0x5c] sm:$0x1] }
 0x4d1   :  { %12575 = vmatmul.mubr.bf16.gmra.mrb[40].mxu0 %v20068_v32  ;;  %v7444_v3 = vsel %vm16171_vm15, %v7439_v30, %v7443_v25  ;;  %v7453_v2 = vrot.slane %v7451_v47, 5  ;;  %v12202_v38 = vrot.slane %v8341_v48, 9  ;;  %v8641_v56 = vrot.slane %v8639_v33, 4  ;;  %v8345_v16 = vld [vmem:[#allocation2 + $0x178] sm:$0xf] }
 0x4d2   :  { %12578 = vmatprep.mubr.bf16.mxu0 %v12230_v18  ;;  %v7449_v45 = vrot.slane %v7448_v58, 4  ;;  %v8642_v21 = vrot.slane %v8343_v13, 5  ;;  %v7456_v20 = vshrl.u32 %v7254_v42, 16  ;;  %v7459_v55 = vshll.u32 %v7254_v42, 16  ;;  %v8344_v34 = vld [vmem:[#allocation2 + $0x174] sm:$0xe] }
 0x4d3   :  { %v18165_v40 = vpop.f32.mrb[240].mxu0  ;;  %10627 = vmatmul.mubr.bf16.gmra.mrb[156].mxu1 %v13239_v7  ;;  %v18169_v60 = vsel %vm16154_vm14, %v12201_v10, %v8632_v39  ;;  %v18173_v18 = vsel %vm16154_vm14, %v8634_v9, %v8635_v29  ;;  %v7465_v25 = vshll.u32 %v7255_v15, 16  ;;  %v7469_v48 = vshrl.u32 %v7255_v15, 16  ;;  %v8346_v52 = vld [vmem:[#allocation2 + $0x17c] sm:$0x1] }
 0x4d4   :  { %20069 = vst [vmem:[#allocation21_spill] sm:$0xff] %v18165_v40  ;;  %v9963_v17 = vpop.f32.mrb[241].mxu0  ;;  %v7454_v13 = vsel %vm16171_vm15, %v7449_v45, %v7453_v2  ;;  %v18179_v47 = vsel %vm16154_vm14, %v8641_v56, %v8642_v21  ;;  %v7458_v42 = vrot.slane %v7456_v20, 4  ;;  %v7461_v30 = vrot.slane %v7459_v55, 5  ;;  %v8347_v32 = vld [vmem:[#allocation2 + $0x180] sm:$0xe] }
 0x4d5   :  { %v8348_v10 = vld [vmem:[#allocation2 + $0x184] sm:$0xf]  ;;  %v18181_v39 = vpop.f32.mrb[242].mxu0  ;;  %v12148_v58 = vcombine.low %v7444_v3, %v7454_v13  ;;  %v7467_v9 = vrot.slane %v7465_v25, 5  ;;  %v7471_v29 = vrot.slane %v7469_v48, 4  ;;  %v7475_v7 = vshll.u32 %v7256_v0, 16 }
 0x4d6   :  { %20070 = vst [vmem:[#allocation20_spill] sm:$0xff] %v18181_v39  ;;  %v8349_v15 = vld [vmem:[#allocation2 + $0x188] sm:$0x1]  ;;  %v9966_v40 = vpop.f32.mrb[243].mxu0  ;;  %v12233_v17 = vcombine.low %v18169_v60, %v18173_v18  ;;  %v18187_v2 = vsel %vm16154_vm14, %v12202_v38, %v8639_v33  ;;  %v7462_v56 = vor.u32 %v7461_v30, %v7458_v42  ;;  %v8646_v45 = vrot.slane %v8345_v16, 5 }
 0x4d7   :  { %v7257_v21 = vld [vmem:[#allocation2 + $0x60] sm:$0xf]  ;;  %10634 = vmatprep.mubr.bf16.mxu1 %v12148_v58  ;;  %v12234_v20 = vcombine.low %v18187_v2, %v18179_v47  ;;  %v13240_v3 = vld [vmem:[#allocation2 + $0x48] sm:$0xff]   ;;  %v7472_v55 = vor.u32 %v7471_v29, %v7467_v9  ;;  %v12203_v25 = vrot.slane %v8344_v34, 9  ;;  %v8653_v0 = vrot.slane %v8348_v10, 5 }
 0x4d8   :  { %v7258_v48 = vld [vmem:[#allocation2 + $0x64] sm:$0xf]  ;;  %v7463_v40 = vrot.slane %v7462_v56, 4  ;;  %v7477_v13 = vrot.slane %v7475_v7, 5  ;;  %v8648_v60 = vrot.slane %v8646_v45, 4  ;;  %v8649_v18 = vrot.slane %v8346_v52, 5 }
 0x4d9   :  { %12579 = vmatmul.mubr.bf16.gmra.mrb[44].mxu0 %v12231_v19  ;;  %v7259_v39 = vld [vmem:[#allocation2 + $0x68] sm:$0x1]  ;;  %v8350_v33 = vld [vmem:[#allocation2 + $0x18c] sm:$0xe]  ;;  %v8351_v38 = vld [vmem:[#allocation2 + $0x190] sm:$0xf] }
 0x4da   :  { %12582 = vmatprep.mubr.bf16.mxu0 %v12232_v54  ;;  %v7473_v16 = vrot.slane %v7472_v55, 4  ;;  %v12204_v42 = vrot.slane %v8347_v32, 9  ;;  %v8655_v30 = vrot.slane %v8653_v0, 4  ;;  %v7480_v58 = vshrl.u32 %v7257_v21, 16  ;;  %v8353_v53 = vld [vmem:[#allocation2 + $0x198] sm:$0xe] }
 0x4db   :  { %v7468_v47 = vsel %vm16171_vm15, %v7463_v40, %v7467_v9  ;;  %v8656_v34 = vrot.slane %v8349_v15, 5  ;;  %v7483_v10 = vshll.u32 %v7257_v21, 16  ;;  %v7489_v29 = vshll.u32 %v7258_v48, 16  ;;  %v18193_v19 = vpop.f32.mrb[244].mxu0  ;;  %10635 = vmatmul.mubr.bf16.gmra.mrb[160].mxu1 %v13240_v3  ;;  %v8354_v2 = vld [vmem:[#allocation2 + $0x19c] sm:$0xf] }
 0x4dc   :  { %20071 = vst [vmem:[#allocation8_spill] sm:$0xff] %v18193_v19  ;;  %v7478_v52 = vsel %vm16171_vm15, %v7473_v16, %v7477_v13  ;;  %v18199_v54 = vsel %vm16154_vm14, %v12203_v25, %v8646_v45  ;;  %v18203_v32 = vsel %vm16154_vm14, %v8648_v60, %v8649_v18  ;;  %v7482_v7 = vrot.slane %v7480_v58, 4  ;;  %v9971_v9 = vpop.f32.mrb[245].mxu0  ;;  %v8352_v55 = vld [vmem:[#allocation2 + $0x194] sm:$0x1] }
 0x4dd   :  { %v12149_v15 = vcombine.low %v7468_v47, %v7478_v52  ;;  %v18207_v56 = vsel %vm16154_vm14, %v8655_v30, %v8656_v34  ;;  %v7485_v21 = vrot.slane %v7483_v10, 5  ;;  %v7491_v3 = vrot.slane %v7489_v29, 5  ;;  %v18209_v40 = vpop.f32.mrb[246].mxu0  ;;  %v7260_v30 = vld [vmem:[#allocation2 + $0x6c] sm:$0xf]  ;;  %v13241_v29 = vld [vmem:[#allocation2 + $0x54] sm:$0xff]  }
 0x4de   :  { %20072 = vst [vmem:[#allocation43_spill] sm:$0xff] %v18209_v40  ;;  %v7493_v13 = vshrl.u32 %v7258_v48, 16  ;;  %v7499_v45 = vshll.u32 %v7259_v39, 16  ;;  %v12205_v25 = vrot.slane %v8350_v33, 9  ;;  %v8660_v16 = vrot.slane %v8351_v38, 5  ;;  %v9974_v19 = vpop.f32.mrb[247].mxu0 }
 0x4df   :  { %10642 = vmatprep.mubr.bf16.mxu1 %v12149_v15  ;;  %v18213_v60 = vsel %vm16154_vm14, %v12204_v42, %v8653_v0  ;;  %v7486_v18 = vor.u32 %v7485_v21, %v7482_v7  ;;  %v12206_v58 = vrot.slane %v8353_v53, 9  ;;  %v8667_v47 = vrot.slane %v8354_v2, 5  ;;  %v8355_v33 = vld [vmem:[#allocation2 + $0x1a0] sm:$0x1]  ;;  %v7261_v38 = vld [vmem:[#allocation2 + $0x70] sm:$0xf] }
 0x4e0   :  { %v12235_v34 = vcombine.low %v18199_v54, %v18203_v32  ;;  %v12236_v10 = vcombine.low %v18213_v60, %v18207_v56  ;;  %v7495_v48 = vrot.slane %v7493_v13, 4  ;;  %v8662_v39 = vrot.slane %v8660_v16, 4  ;;  %v7262_v32 = vld [vmem:[#allocation2 + $0x74] sm:$0x1]  ;;  %v7263_v9 = vld [vmem:[#allocation2 + $0x78] sm:$0xf] }
 0x4e1   :  { %12583 = vmatmul.mubr.bf16.gmra.mrb[48].mxu0 %v12233_v17  ;;  %v7487_v19 = vrot.slane %v7486_v18, 4  ;;  %v7501_v52 = vrot.slane %v7499_v45, 5  ;;  %v18221_v0 = vsel %vm16154_vm14, %v12205_v25, %v8660_v16  ;;  %v8663_v53 = vrot.slane %v8352_v55, 5  ;;  %v7264_v13 = vld [vmem:[#allocation2 + $0x7c] sm:$0xf] }
 0x4e2   :  { %12586 = vmatprep.mubr.bf16.mxu0 %v12234_v20  ;;  %v7496_v42 = vor.u32 %v7495_v48, %v7491_v3  ;;  %v18225_v54 = vsel %vm16154_vm14, %v12206_v58, %v8667_v47  ;;  %v7504_v7 = vshrl.u32 %v7260_v30, 16  ;;  %v7507_v2 = vshll.u32 %v7260_v30, 16  ;;  %v18231_v45 = vpop.f32.mrb[248].mxu0  ;;  %v7265_v48 = vld [vmem:[#allocation2 + $0x80] sm:$0x1] }
 0x4e3   :  { %v18229_v17 = vsel %vm16154_vm14, %v8662_v39, %v8663_v53  ;;  %v8669_v15 = vrot.slane %v8667_v47, 4  ;;  %v8670_v56 = vrot.slane %v8355_v33, 5  ;;  %v7513_v21 = vshll.u32 %v7261_v38, 16  ;;  %20073 = vst [vmem:[#allocation44_spill] sm:$0xff] %v18231_v45  ;;  %10643 = vmatmul.mubr.bf16.gmra.mrb[164].mxu1 %v13241_v29  ;;  %v9979_v60 = vpop.f32.mrb[249].mxu0 }
 0x4e4   :  { %v7492_v20 = vsel %vm16171_vm15, %v7487_v19, %v7491_v3  ;;  %v7497_v55 = vrot.slane %v7496_v42, 4  ;;  %v7506_v25 = vrot.slane %v7504_v7, 4  ;;  %v7509_v16 = vrot.slane %v7507_v2, 5  ;;  %v18235_v53 = vpop.f32.mrb[250].mxu0  ;;  %v7266_v40 = vld [vmem:[#allocation2 + $0x84] sm:$0xf] }
 0x4e5   :  { %v7515_v18 = vrot.slane %v7513_v21, 5  ;;  %v7517_v58 = vshrl.u32 %v7261_v38, 16  ;;  %v7523_v30 = vshll.u32 %v7262_v32, 16  ;;  %v7528_v39 = vshrl.u32 %v7263_v9, 16  ;;  %20074 = vst [vmem:[#allocation45_spill] sm:$0xff] %v18235_v53  ;;  %v9982_v5 = vpop.f32.mrb[251].mxu0 }
 0x4e6   :  { %v7502_v47 = vsel %vm16171_vm15, %v7497_v55, %v7501_v52  ;;  %v7510_v33 = vor.u32 %v7509_v16, %v7506_v25  ;;  %v7531_v45 = vshll.u32 %v7263_v9, 16  ;;  %v7537_v29 = vshll.u32 %v7264_v13, 16  ;;  %v7267_v38 = vld [vmem:[#allocation2 + $0x88] sm:$0xf]  ;;  %v13242_v25 = vld [vmem:[#allocation2 + $0x60] sm:$0xff]  }
 0x4e7   :  { %v12150_v3 = vcombine.low %v7492_v20, %v7502_v47  ;;  %v8671_v19 = vsel %vm16154_vm14, %v8669_v15, %v8670_v56  ;;  %v7519_v42 = vrot.slane %v7517_v58, 4  ;;  %v7530_v7 = vrot.slane %v7528_v39, 4  ;;  %v7286_v11 = vld [vmem:[#allocation2 + $0xd4] sm:$0x1]  ;;  %v7287_v28 = vld [vmem:[#allocation2 + $0xf0] sm:$0xf] }
 0x4e8   :  { %v7511_v32 = vrot.slane %v7510_v33, 4  ;;  %v7533_v2 = vrot.slane %v7531_v45, 5  ;;  %v7539_v21 = vrot.slane %v7537_v29, 5  ;;  %v7541_v60 = vshrl.u32 %v7264_v13, 16 }
 0x4e9   :  { %12587 = vmatmul.mubr.bf16.gmra.mrb[52].mxu0 %v12235_v34  ;;  %10650 = vmatprep.mubr.bf16.mxu1 %v12150_v3  ;;  %v7520_v53 = vor.u32 %v7519_v42, %v7515_v18  ;;  %v7525_v52 = vrot.slane %v7523_v30, 5  ;;  %v7552_v55 = vshrl.u32 %v7266_v40, 16  ;;  %v7555_v9 = vshll.u32 %v7266_v40, 16  ;;  %v7269_v40 = vld [vmem:[#allocation2 + $0x90] sm:$0xf] }
 0x4ea   :  { %12590 = vmatprep.mubr.bf16.mxu0 %v12236_v10  ;;  %v7534_v5 = vor.u32 %v7533_v2, %v7530_v7  ;;  %v7543_v20 = vrot.slane %v7541_v60, 4  ;;  %v7547_v16 = vshll.u32 %v7265_v48, 16  ;;  %v7561_v47 = vshll.u32 %v7267_v38, 16  ;;  %v18243_v39 = vpop.f32.mrb[252].mxu0 }
 0x4eb   :  { %v7516_v15 = vsel %vm16171_vm15, %v7511_v32, %v7515_v18  ;;  %v7521_v56 = vrot.slane %v7520_v53, 4  ;;  %v7554_v58 = vrot.slane %v7552_v55, 4  ;;  %v7557_v45 = vrot.slane %v7555_v9, 5  ;;  %20075 = vst [vmem:[#allocation46_spill] sm:$0xff] %v18243_v39  ;;  %10651 = vmatmul.mubr.bf16.gmra.mrb[168].mxu1 %v13242_v25  ;;  %v9987_v10 = vpop.f32.mrb[253].mxu0 }
 0x4ec   :  { %v7535_v34 = vrot.slane %v7534_v5, 4  ;;  %v7544_v13 = vor.u32 %v7543_v20, %v7539_v21  ;;  %v7563_v30 = vrot.slane %v7561_v47, 5  ;;  %v7565_v33 = vshrl.u32 %v7267_v38, 16  ;;  %v7270_v53 = vld [vmem:[#allocation2 + $0x94] sm:$0xf]  ;;  %v18250_v3 = vpop.f32.mrb[254].mxu0 }
 0x4ed   :  { %v12237_v29 = vcombine.low %v18221_v0, %v18229_v17  ;;  %v12238_v48 = vcombine.low %v18225_v54, %v8671_v19  ;;  %v7526_v18 = vsel %vm16171_vm15, %v7521_v56, %v7525_v52  ;;  %20076 = vst [vmem:[#allocation47_spill] sm:$0xff] %v18250_v3  ;;  %v7549_v32 = vrot.slane %v7547_v16, 5  ;;  %v9990_v60 = vpop.f32.mrb[255].mxu0  ;;  %v7268_v55 = vld [vmem:[#allocation2 + $0x8c] sm:$0x1] }
 0x4ee   :  { %v12151_v42 = vcombine.low %v7516_v15, %v7526_v18  ;;  %v7545_v7 = vrot.slane %v7544_v13, 4  ;;  %v7567_v2 = vrot.slane %v7565_v33, 4  ;;  %v7540_v38 = vsel %vm16171_vm15, %v7535_v34, %v7539_v21  ;;  %v13243_v5 = vld [vmem:[#allocation2 + $0x6c] sm:$0xff]   ;;  %v7272_v13 = vld [vmem:[#allocation2 + $0x9c] sm:$0xf] }
 0x4ef   :  { %v7558_v9 = vor.u32 %v7557_v45, %v7554_v58  ;;  %v7576_v25 = vshrl.u32 %v7269_v40, 16  ;;  %v7579_v0 = vshll.u32 %v7269_v40, 16  ;;  %v7585_v19 = vshll.u32 %v7270_v53, 16  ;;  %v7273_v40 = vld [vmem:[#allocation2 + $0xa0] sm:$0xf] }
 0x4f0   :  { %10658 = vmatprep.mubr.bf16.mxu1 %v12151_v42  ;;  %v7550_v54 = vsel %vm16171_vm15, %v7545_v7, %v7549_v32  ;;  %v7568_v17 = vor.u32 %v7567_v2, %v7563_v30  ;;  %v7589_v52 = vshrl.u32 %v7270_v53, 16  ;;  %v7571_v20 = vshll.u32 %v7268_v55, 16  ;;  %v7271_v53 = vld [vmem:[#allocation2 + $0x98] sm:$0x1]  ;;  %v7285_v39 = vld [vmem:[#allocation2 + $0xd0] sm:$0xf] }
 0x4f1   :  { %12591 = vmatmul.mubr.bf16.gmra.mrb[56].mxu0 %v12237_v29  ;;  %v12152_v16 = vcombine.low %v7540_v38, %v7550_v54  ;;  %v7559_v47 = vrot.slane %v7558_v9, 4  ;;  %v7578_v15 = vrot.slane %v7576_v25, 4  ;;  %v7581_v56 = vrot.slane %v7579_v0, 5  ;;  %v13244_v9 = vld [vmem:[#allocation2 + $0x78] sm:$0xff]  }
 0x4f2   :  { %12594 = vmatprep.mubr.bf16.mxu0 %v12238_v48  ;;  %v18256_v21 = vpop.f32.mrb[128].mxu0  ;;  %v7569_v58 = vrot.slane %v7568_v17, 4  ;;  %v7587_v45 = vrot.slane %v7585_v19, 5  ;;  %v7591_v34 = vrot.slane %v7589_v52, 4  ;;  %v7573_v29 = vrot.slane %v7571_v20, 5 }
 0x4f3   :  { %10659 = vmatmul.mubr.bf16.gmra.mrb[172].mxu1 %v13243_v5  ;;  %v10028_v33 = vpop.f32.mrb[129].mxu0  ;;  %v7564_v18 = vsel %vm16171_vm15, %v7559_v47, %v7563_v30  ;;  %v7582_v42 = vor.u32 %v7581_v56, %v7578_v15  ;;  %v7600_v7 = vshrl.u32 %v7272_v13, 16  ;;  %v7603_v32 = vshll.u32 %v7272_v13, 16  ;;  %v7276_v15 = vld [vmem:[#allocation2 + $0xac] sm:$0xf] }
 0x4f4   :  { %10666 = vmatprep.mubr.bf16.mxu1 %v12152_v16  ;;  %v18258_v10 = vpop.f32.mrb[130].mxu0  ;;  %v7574_v2 = vsel %vm16171_vm15, %v7569_v58, %v7573_v29  ;;  %v7592_v60 = vor.u32 %v7591_v34, %v7587_v45  ;;  %v7609_v38 = vshll.u32 %v7273_v40, 16  ;;  %v7613_v55 = vshrl.u32 %v7273_v40, 16  ;;  %v7275_v16 = vld [vmem:[#allocation2 + $0xa8] sm:$0xf] }
 0x4f5   :  { %v10031_v48 = vpop.f32.mrb[131].mxu0  ;;  %v7595_v25 = vshll.u32 %v7271_v53, 16  ;;  %v12153_v0 = vcombine.low %v7564_v18, %v7574_v2  ;;  %v7583_v54 = vrot.slane %v7582_v42, 4  ;;  %v7602_v17 = vrot.slane %v7600_v7, 4  ;;  %v7274_v34 = vld [vmem:[#allocation2 + $0xa4] sm:$0x1] }
 0x4f6   :  { %v7605_v19 = vrot.slane %v7603_v32, 5  ;;  %v7593_v30 = vrot.slane %v7592_v60, 4  ;;  %v7611_v5 = vrot.slane %v7609_v38, 5  ;;  %v7615_v20 = vrot.slane %v7613_v55, 4  ;;  %v1972_v18 = vld [vmem:[#allocation2 + $0xcc] sm:$0x1] }
 0x4f7   :  { %v7597_v58 = vrot.slane %v7595_v25, 5  ;;  %v7588_v33 = vsel %vm16171_vm15, %v7583_v54, %v7587_v45  ;;  %v7624_v29 = vshrl.u32 %v7275_v16, 16  ;;  %v7627_v48 = vshll.u32 %v7275_v16, 16  ;;  %v13245_v2 = vld [vmem:[#allocation2 + $0x84] sm:$0xff]   ;;  %v7279_v16 = vld [vmem:[#allocation2 + $0xb8] sm:$0xf] }
 0x4f8   :  { %v7606_v40 = vor.u32 %v7605_v19, %v7602_v17  ;;  %v7616_v42 = vor.u32 %v7615_v20, %v7611_v5  ;;  %v7633_v7 = vshll.u32 %v7276_v15, 16  ;;  %v7637_v32 = vshrl.u32 %v7276_v15, 16 }
 0x4f9   :  { %v7598_v53 = vsel %vm16171_vm15, %v7593_v30, %v7597_v58  ;;  %v7619_v60 = vshll.u32 %v7274_v34, 16  ;;  %v1973_v38 = vsel %vm13628_vm3, 0, %v1972_v18  ;;  %v7626_v25 = vrot.slane %v7624_v29, 4  ;;  %v7278_v30 = vld [vmem:[#allocation2 + $0xb4] sm:$0xf] }
 0x4fa   :  { %v18264_v52 = vpop.f32.mrb[132].mxu0  ;;  %v12154_v55 = vcombine.low %v7588_v33, %v7598_v53  ;;  %1974 = vst [vmem:[#allocation2 + $0xcc] sm:$0x1] %v1973_v38  ;;  %v7617_v54 = vrot.slane %v7616_v42, 4  ;;  %v7635_v17 = vrot.slane %v7633_v7, 5  ;;  %v7639_v19 = vrot.slane %v7637_v32, 4 }
 0x4fb   :  { %10667 = vmatmul.mubr.bf16.gmra.mrb[176].mxu1 %v13244_v9  ;;  %v10036_v47 = vpop.f32.mrb[133].mxu0  ;;  %v7607_v9 = vrot.slane %v7606_v40, 4  ;;  %v7621_v15 = vrot.slane %v7619_v60, 5  ;;  %v7648_v40 = vshrl.u32 %v7278_v30, 16  ;;  %v7651_v29 = vshll.u32 %v7278_v30, 16  ;;  %v13246_v7 = vld [vmem:[#allocation2 + $0x90] sm:$0xff]  }
 0x4fc   :  { %10674 = vmatprep.mubr.bf16.mxu1 %v12153_v0  ;;  %v18266_v56 = vpop.f32.mrb[134].mxu0  ;;  %v7629_v0 = vrot.slane %v7627_v48, 5  ;;  %v7640_v18 = vor.u32 %v7639_v19, %v7635_v17  ;;  %v7657_v53 = vshll.u32 %v7279_v16, 16  ;;  %v7661_v42 = vshrl.u32 %v7279_v16, 16  ;;  %v7280_v16 = vld [vmem:[#allocation2 + $0xbc] sm:$0x1] }
 0x4fd   :  { %v10039_v13 = vpop.f32.mrb[135].mxu0  ;;  %v7612_v34 = vsel %vm16171_vm15, %v7607_v9, %v7611_v5  ;;  %v7622_v48 = vsel %vm16171_vm15, %v7617_v54, %v7621_v15  ;;  %v7653_v60 = vrot.slane %v7651_v29, 5 }
 0x4fe   :  { %v7277_v13 = vld [vmem:[#allocation2 + $0xb0] sm:$0x1]  ;;  %v7630_v33 = vor.u32 %v7629_v0, %v7626_v25  ;;  %v7641_v5 = vrot.slane %v7640_v18, 4  ;;  %v7659_v9 = vrot.slane %v7657_v53, 5  ;;  %v7663_v25 = vrot.slane %v7661_v42, 4 }
 0x4ff   :  { %v7643_v32 = vshll.u32 %v7277_v13, 16  ;;  %v7281_v0 = vld [vmem:[#allocation2 + $0xc0] sm:$0xf]  ;;  %v7667_v42 = vshll.u32 %v7280_v16, 16 }
 0x500   :  { %v7631_v38 = vrot.slane %v7630_v33, 4  ;;  %v7672_v33 = vshrl.u32 %v7281_v0, 16 }
 0x501   :  { %v7645_v19 = vrot.slane %v7643_v32, 5  ;;  %v7284_v32 = vld [vmem:[#allocation2 + $0xcc] sm:$0xf] }
 0x502   :  { %v18274_v45 = vpop.f32.mrb[136].mxu0  ;;  %v7674_v3 = vrot.slane %v7672_v33, 4  ;;  %v7699_v16 = vshll.u32 %v7284_v32, 16 }
 0x503   :  { %10675 = vmatmul.mubr.bf16.gmra.mrb[180].mxu1 %v13245_v2  ;;  %v10044_v20 = vpop.f32.mrb[137].mxu0  ;;  %v12155_v2 = vcombine.low %v7612_v34, %v7622_v48  ;;  %v7636_v34 = vsel %vm16171_vm15, %v7631_v38, %v7635_v17  ;;  %v7646_v29 = vsel %vm16171_vm15, %v7641_v5, %v7645_v19  ;;  %v7664_v48 = vor.u32 %v7663_v25, %v7659_v9  ;;  %v7283_v25 = vld [vmem:[#allocation2 + $0xc8] sm:$0x1] }
 0x504   :  { %10682 = vmatprep.mubr.bf16.mxu1 %v12154_v55  ;;  %v18276_v47 = vpop.f32.mrb[138].mxu0  ;;  %v7650_v55 = vrot.slane %v7648_v40, 4  ;;  %v7675_v40 = vshll.u32 %v7281_v0, 16  ;;  %v7669_v5 = vrot.slane %v7667_v42, 5  ;;  %v7701_v42 = vrot.slane %v7699_v16, 5 }
 0x505   :  { %v10047_v58 = vpop.f32.mrb[139].mxu0  ;;  %v7665_v17 = vrot.slane %v7664_v48, 4  ;;  %v7723_v16 = vshll.u32 %v7287_v28, 16 }
 0x506   :  { %v7282_v58 = vld [vmem:[#allocation2 + $0xc4] sm:$0xf]  ;;  %v7654_v13 = vor.u32 %v7653_v60, %v7650_v55  ;;  %v7677_v38 = vrot.slane %v7675_v40, 5 }
 0x507   :  { %v7681_v18 = vshll.u32 %v7282_v58, 16  ;;  %v7685_v53 = vshrl.u32 %v7282_v58, 16  ;;  %v7696_v58 = vshrl.u32 %v7284_v32, 16  ;;  %v7670_v48 = vsel %vm16171_vm15, %v7665_v17, %v7669_v5 }
 0x508   :  { %v7678_v40 = vor.u32 %v7677_v38, %v7674_v3  ;;  %v7715_v5 = vshll.u32 %v7286_v11, 16 }
 0x509   :  { %v7683_v55 = vrot.slane %v7681_v18, 5  ;;  %v7687_v60 = vrot.slane %v7685_v53, 4  ;;  %v7691_v53 = vshll.u32 %v7283_v25, 16 }
 0x50a   :  { %v18282_v20 = vpop.f32.mrb[140].mxu0 }
 0x50b   :  { %10683 = vmatmul.mubr.bf16.gmra.mrb[184].mxu1 %v13246_v7  ;;  %v10052_v30 = vpop.f32.mrb[141].mxu0  ;;  %v13247_v7 = vld [vmem:[#allocation2 + $0x9c] sm:$0xff]   ;;  %v7688_v18 = vor.u32 %v7687_v60, %v7683_v55  ;;  %v7693_v3 = vrot.slane %v7691_v53, 5 }
 0x50c   :  { %10690 = vmatprep.mubr.bf16.mxu1 %v12155_v2  ;;  %v18284_v54 = vpop.f32.mrb[142].mxu0  ;;  %v12156_v2 = vcombine.low %v7636_v34, %v7646_v29  ;;  %v7655_v30 = vrot.slane %v7654_v13, 4  ;;  %v7705_v34 = vshll.u32 %v7285_v39, 16  ;;  %v7709_v13 = vshrl.u32 %v7285_v39, 16  ;;  %v7290_v53 = vld [vmem:[#allocation2 + $0xfc] sm:$0xf] }
 0x50d   :  { %v10055_v15 = vpop.f32.mrb[143].mxu0  ;;  %v7679_v39 = vrot.slane %v7678_v40, 4  ;;  %v13249_v40 = vld [vmem:[#allocation2 + $0xb4] sm:$0xff]  }
 0x50e   :  { %v7660_v29 = vsel %vm16171_vm15, %v7655_v30, %v7659_v9  ;;  %v7711_v35 = vrot.slane %v7709_v13, 4  ;;  %v7288_v30 = vld [vmem:[#allocation2 + $0xf4] sm:$0xf] }
 0x50f   :  { %v12157_v27 = vcombine.low %v7660_v29, %v7670_v48  ;;  %v7729_v29 = vshll.u32 %v7288_v30, 16  ;;  %v7733_v48 = vshrl.u32 %v7288_v30, 16 }
 0x512   :  { %v18290_v15 = vpop.f32.mrb[144].mxu0 }
 0x513   :  { %10691 = vmatmul.mubr.bf16.gmra.mrb[188].mxu1 %v13247_v7  ;;  %v10060_v0 = vpop.f32.mrb[145].mxu0  ;;  %v13248_v7 = vld [vmem:[#allocation2 + $0xa8] sm:$0xff]  }
 0x514   :  { %10698 = vmatprep.mubr.bf16.mxu1 %v12156_v2  ;;  %v18292_v19 = vpop.f32.mrb[146].mxu0  ;;  %v7698_v2 = vrot.slane %v7696_v58, 4  ;;  %v7707_v0 = vrot.slane %v7705_v34, 5  ;;  %v7720_v58 = vshrl.u32 %v7287_v28, 16  ;;  %v7684_v34 = vsel %vm16171_vm15, %v7679_v39, %v7683_v55 }
 0x515   :  { %v10063_v33 = vpop.f32.mrb[147].mxu0  ;;  %v7725_v28 = vrot.slane %v7723_v16, 5 }
 0x516   :  { %v7689_v33 = vrot.slane %v7688_v18, 4  ;;  %v7702_v38 = vor.u32 %v7701_v42, %v7698_v2  ;;  %v7712_v60 = vor.u32 %v7711_v35, %v7707_v0  ;;  %v7291_v2 = vld [vmem:[#allocation2 + $0x100] sm:$0xf]  ;;  %v7722_v11 = vrot.slane %v7720_v58, 4 }
 0x517   :  { %v7731_v42 = vrot.slane %v7729_v29, 5 }
 0x518   :  { %v7694_v13 = vsel %vm16171_vm15, %v7689_v33, %v7693_v3  ;;  %v7713_v18 = vrot.slane %v7712_v60, 4  ;;  %v7289_v3 = vld [vmem:[#allocation2 + $0xf8] sm:$0x1]  ;;  %v7744_v60 = vshrl.u32 %v7290_v53, 16  ;;  %v7726_v58 = vor.u32 %v7725_v28, %v7722_v11  ;;  %v7292_v11 = vld [vmem:[#allocation2 + $0x104] sm:$0x1] }
 0x519   :  { %v7768_v28 = vshrl.u32 %v7293_v6, 16 }
 0x51a   :  { %v18298_v32 = vpop.f32.mrb[148].mxu0 }
 0x51b   :  { %10699 = vmatmul.mubr.bf16.gmra.mrb[64].mxu1 %v13248_v7  ;;  %v10068_v9 = vpop.f32.mrb[149].mxu0  ;;  %v7717_v7 = vrot.slane %v7715_v5, 5  ;;  %v7747_v5 = vshll.u32 %v7290_v53, 16  ;;  %v7294_v53 = vld [vmem:[#allocation2 + $0x10c] sm:$0xf] }
 0x51c   :  { %10706 = vmatprep.mubr.bf16.mxu1 %v12157_v27  ;;  %v18300_v17 = vpop.f32.mrb[150].mxu0  ;;  %v7703_v27 = vrot.slane %v7702_v38, 4  ;;  %v12158_v9 = vcombine.low %v7684_v34, %v7694_v13  ;;  %v7753_v34 = vshll.u32 %v7291_v2, 16  ;;  %v7757_v13 = vshrl.u32 %v7291_v2, 16 }
 0x51d   :  { %v10071_v25 = vpop.f32.mrb[151].mxu0  ;;  %v7718_v30 = vsel %vm16171_vm15, %v7713_v18, %v7717_v7 }
 0x51e   :  { %v7735_v25 = vrot.slane %v7733_v48, 4  ;;  %v7708_v33 = vsel %vm16171_vm15, %v7703_v27, %v7707_v0  ;;  %v13250_v48 = vld [vmem:[#allocation2 + $0xc0] sm:$0xff]   ;;  %v7755_v8 = vrot.slane %v7753_v34, 5  ;;  %v7759_v36 = vrot.slane %v7757_v13, 4 }
 0x51f   :  { %v12159_v29 = vcombine.low %v7708_v33, %v7718_v30  ;;  %v7727_v27 = vrot.slane %v7726_v58, 4  ;;  %v7777_v13 = vshll.u32 %v7294_v53, 16  ;;  %v7781_v58 = vshrl.u32 %v7294_v53, 16 }
 0x520   :  { %v7736_v16 = vor.u32 %v7735_v25, %v7731_v42  ;;  %v7760_v30 = vor.u32 %v7759_v36, %v7755_v8 }
 0x521   :  { %v7779_v36 = vrot.slane %v7777_v13, 5 }
 0x522   :  { %v18306_v35 = vpop.f32.mrb[152].mxu0  ;;  %v7737_v18 = vrot.slane %v7736_v16, 4  ;;  %v7763_v16 = vshll.u32 %v7292_v11, 16  ;;  %v7295_v11 = vld [vmem:[#allocation2 + $0x110] sm:$0x1] }
 0x523   :  { %10707 = vmatmul.mubr.bf16.gmra.mrb[68].mxu1 %v13249_v40  ;;  %v10076_v55 = vpop.f32.mrb[153].mxu0  ;;  %v7739_v40 = vshll.u32 %v7289_v3, 16  ;;  %v7771_v3 = vshll.u32 %v7293_v6, 16  ;;  %v7783_v6 = vrot.slane %v7781_v58, 4  ;;  %v7787_v13 = vshll.u32 %v7295_v11, 16 }
 0x524   :  { %10714 = vmatprep.mubr.bf16.mxu1 %v12158_v9  ;;  %v18308_v39 = vpop.f32.mrb[154].mxu0  ;;  %v7746_v9 = vrot.slane %v7744_v60, 4  ;;  %v7749_v55 = vrot.slane %v7747_v5, 5  ;;  %v13251_v60 = vld [vmem:[#allocation2 + $0xcc] sm:$0xff]   ;;  %v7732_v5 = vsel %vm16171_vm15, %v7727_v27, %v7731_v42  ;;  %v7765_v42 = vrot.slane %v7763_v16, 5 }
 0x525   :  { %v10079_v38 = vpop.f32.mrb[155].mxu0  ;;  %v7741_v2 = vrot.slane %v7739_v40, 5  ;;  %v7761_v40 = vrot.slane %v7760_v30, 4  ;;  %v7773_v41 = vrot.slane %v7771_v3, 5  ;;  %v7297_v27 = vld [vmem:[#allocation2 + $0x118] sm:$0xf]  ;;  %v7784_v30 = vor.u32 %v7783_v6, %v7779_v36 }
 0x526   :  { %v7750_v33 = vor.u32 %v7749_v55, %v7746_v9  ;;  %v7296_v9 = vld [vmem:[#allocation2 + $0x114] sm:$0xf]  ;;  %v7789_v6 = vrot.slane %v7787_v13, 5 }
 0x527   :  { %v7742_v34 = vsel %vm16171_vm15, %v7737_v18, %v7741_v2  ;;  %v7766_v2 = vsel %vm16171_vm15, %v7761_v40, %v7765_v42  ;;  %v7795_v3 = vshll.u32 %v7296_v9, 16 }
 0x52a   :  { %v18314_v0 = vpop.f32.mrb[156].mxu0 }
 0x52b   :  { %10715 = vmatmul.mubr.bf16.gmra.mrb[72].mxu1 %v13250_v48  ;;  %v10084_v7 = vpop.f32.mrb[157].mxu0  ;;  %v12160_v48 = vcombine.low %v7732_v5, %v7742_v34  ;;  %v7805_v5 = vshrl.u32 %v7297_v27, 16  ;;  %v13252_v34 = vld [vmem:[#allocation2 + $0xf0] sm:$0xff]  }
 0x52c   :  { %10722 = vmatprep.mubr.bf16.mxu1 %v12159_v29  ;;  %v18316_v38 = vpop.f32.mrb[158].mxu0  ;;  %v7770_v29 = vrot.slane %v7768_v28, 4  ;;  %v7751_v7 = vrot.slane %v7750_v33, 4  ;;  %v7792_v33 = vshrl.u32 %v7296_v9, 16 }
 0x52d   :  { %v10087_v25 = vpop.f32.mrb[159].mxu0  ;;  %v7807_v42 = vrot.slane %v7805_v5, 4  ;;  %v13253_v5 = vld [vmem:[#allocation2 + $0xfc] sm:$0xff]  }
 0x52e   :  { %v7756_v53 = vsel %vm16171_vm15, %v7751_v7, %v7755_v8  ;;  %v7774_v28 = vor.u32 %v7773_v41, %v7770_v29  ;;  %v7785_v8 = vrot.slane %v7784_v30, 4  ;;  %v7797_v7 = vrot.slane %v7795_v3, 5 }
 0x52f   :  { %v12161_v58 = vcombine.low %v7756_v53, %v7766_v2  ;;  %v7298_v53 = vld [vmem:[#allocation2 + $0x11c] sm:$0x1] }
 0x530   :  { %v7775_v16 = vrot.slane %v7774_v28, 4  ;;  %v7790_v30 = vsel %vm16171_vm15, %v7785_v8, %v7789_v6  ;;  %v7303_v8 = vld [vmem:[#allocation2 + $0x130] sm:$0xf] }
 0x532   :  { %v18322_v63 = vpop.f32.mrb[160].mxu0 }
 0x533   :  { %10723 = vmatmul.mubr.bf16.gmra.mrb[76].mxu1 %v13251_v60  ;;  %v10092_v55 = vpop.f32.mrb[161].mxu0  ;;  %v7801_v60 = vshll.u32 %v7297_v27, 16 }
 0x534   :  { %10730 = vmatprep.mubr.bf16.mxu1 %v12160_v48  ;;  %v18324_v25 = vpop.f32.mrb[162].mxu0  ;;  %v7794_v48 = vrot.slane %v7792_v33, 4  ;;  %v7299_v55 = vld [vmem:[#allocation2 + $0x120] sm:$0xf]  ;;  %v7780_v33 = vsel %vm16171_vm15, %v7775_v16, %v7779_v36  ;;  %v2136_v36 = vld [vmem:[#allocation2 + $0x1ac] sm:$0x1] }
 0x535   :  { %20077 = vst [vmem:[#allocation48_spill] sm:$0xff] %v18324_v25  ;;  %v10095_v18 = vpop.f32.mrb[163].mxu0  ;;  %v7803_v40 = vrot.slane %v7801_v60, 5  ;;  %v7816_v9 = vshrl.u32 %v7299_v55, 16  ;;  %v7819_v27 = vshll.u32 %v7299_v55, 16  ;;  %v12162_v46 = vcombine.low %v7780_v33, %v7790_v30 }
 0x536   :  { %v7300_v18 = vld [vmem:[#allocation2 + $0x124] sm:$0xf]  ;;  %v7798_v3 = vor.u32 %v7797_v7, %v7794_v48  ;;  %v2137_v33 = vsel %vm13635_vm5, 0, %v2136_v36  ;;  %v8357_v30 = vld [vmem:[#allocation2 + $0x1a8] sm:$0xf] }
 0x537   :  { %v7825_v2 = vshll.u32 %v7300_v18, 16  ;;  %v7829_v28 = vshrl.u32 %v7300_v18, 16  ;;  %v7808_v60 = vor.u32 %v7807_v42, %v7803_v40  ;;  %v7301_v42 = vld [vmem:[#allocation2 + $0x128] sm:$0x1]  ;;  %2138 = vst [vmem:[#allocation2 + $0x1ac] sm:$0x1] %v2137_v33 }
 0x538   :  { %v7799_v18 = vrot.slane %v7798_v3, 4 }
 0x539   :  { %v18338_v13 = vrot.slane %v7825_v2, 5  ;;  %v7831_v55 = vrot.slane %v7829_v28, 4  ;;  %v7809_v44 = vrot.slane %v7808_v60, 4  ;;  %v7849_v60 = vshll.u32 %v7303_v8, 16 }
 0x53a   :  { %v18330_v23 = vpop.f32.mrb[164].mxu0  ;;  %v7804_v3 = vsel %vm16171_vm15, %v7799_v18, %v7803_v40  ;;  %v7305_v40 = vld [vmem:[#allocation2 + $0x138] sm:$0xf] }
 0x53b   :  { %20078 = vst [vmem:[#allocation49_spill] sm:$0xff] %v18330_v23  ;;  %10731 = vmatmul.mubr.bf16.gmra.mrb[80].mxu1 %v13252_v34  ;;  %v10100_v41 = vpop.f32.mrb[165].mxu0  ;;  %v7811_v34 = vshll.u32 %v7298_v53, 16  ;;  %v7832_v53 = vor.u32 %v7831_v55, %v18338_v13  ;;  %v13254_v55 = vld [vmem:[#allocation2 + $0x108] sm:$0xff]  }
 0x53c   :  { %10738 = vmatprep.mubr.bf16.mxu1 %v12161_v58  ;;  %v18332_v29 = vpop.f32.mrb[166].mxu0  ;;  %v7818_v58 = vrot.slane %v7816_v9, 4  ;;  %v7821_v41 = vrot.slane %v7819_v27, 5  ;;  %v2026_v9 = vld [vmem:[#allocation2 + $0x1a4] sm:$0x1] }
 0x53d   :  { %20079 = vst [vmem:[#allocation50_spill] sm:$0xff] %v18332_v29  ;;  %v10103_v11 = vpop.f32.mrb[167].mxu0  ;;  %v7813_v7 = vrot.slane %v7811_v34, 5  ;;  %v7835_v34 = vshll.u32 %v7301_v42, 16  ;;  %v7833_v36 = vrot.slane %v7832_v53, 4 }
 0x53e   :  { %v7302_v11 = vld [vmem:[#allocation2 + $0x12c] sm:$0xf]  ;;  %v7822_v6 = vor.u32 %v7821_v41, %v7818_v58  ;;  %v8356_v58 = vld [vmem:[#allocation2 + $0x1a4] sm:$0xe]  ;;  %v2027_v41 = vsel %vm13628_vm3, 0, %v2026_v9 }
 0x53f   :  { %v7840_v2 = vshrl.u32 %v7302_v11, 16  ;;  %v7843_v28 = vshll.u32 %v7302_v11, 16  ;;  %2028 = vst [vmem:[#allocation2 + $0x1a4] sm:$0x1] %v2027_v41  ;;  %v12207_v42 = vrot.slane %v8356_v58, 9  ;;  %v7837_v49 = vrot.slane %v7835_v34, 5 }
 0x540   :  { %v7823_v11 = vrot.slane %v7822_v6, 4  ;;  %v7304_v53 = vld [vmem:[#allocation2 + $0x134] sm:$0x1]  ;;  %v8358_v58 = vld [vmem:[#allocation2 + $0x1ac] sm:$0x1] }
 0x541   :  { %v7845_v62 = vrot.slane %v7843_v28, 5  ;;  %v7323_v29 = vld [vmem:[#allocation2 + $0x180] sm:$0xf] }
 0x542   :  { %v18340_v14 = vpop.f32.mrb[168].mxu0  ;;  %v7828_v6 = vsel %vm16171_vm15, %v7823_v11, %v18338_v13  ;;  %v7859_v13 = vshll.u32 %v7304_v53, 16 }
 0x543   :  { %20080 = vst [vmem:[#allocation51_spill] sm:$0xff] %v18340_v14  ;;  %10739 = vmatmul.mubr.bf16.gmra.mrb[84].mxu1 %v13253_v5  ;;  %v10108_v16 = vpop.f32.mrb[169].mxu0  ;;  %v7853_v5 = vshrl.u32 %v7303_v8, 16 }
 0x544   :  { %10746 = vmatprep.mubr.bf16.mxu1 %v12162_v46  ;;  %v18342_v48 = vpop.f32.mrb[170].mxu0  ;;  %v7814_v46 = vsel %vm16171_vm15, %v7809_v44, %v7813_v7  ;;  %v8674_v16 = vrot.slane %v8357_v30, 5  ;;  %v7851_v44 = vrot.slane %v7849_v60, 5  ;;  %v7306_v7 = vld [vmem:[#allocation2 + $0x13c] sm:$0xf]  ;;  %v7867_v60 = vshll.u32 %v7305_v40, 16 }
 0x545   :  { %20081 = vst [vmem:[#allocation52_spill] sm:$0xff] %v18342_v48  ;;  %v10111_v27 = vpop.f32.mrb[171].mxu0  ;;  %v12163_v37 = vcombine.low %v7804_v3, %v7814_v46  ;;  %v7855_v8 = vrot.slane %v7853_v5, 4  ;;  %v7838_v3 = vsel %vm16171_vm15, %v7833_v36, %v7837_v49  ;;  %v7873_v5 = vshll.u32 %v7306_v7, 16 }
 0x546   :  { %v7842_v27 = vrot.slane %v7840_v2, 4  ;;  %v7864_v2 = vshrl.u32 %v7305_v40, 16  ;;  %v8676_v28 = vrot.slane %v8674_v16, 4  ;;  %v8675_v34 = vsel %vm16154_vm14, %v12207_v42, %v8674_v16  ;;  %v7309_v16 = vld [vmem:[#allocation2 + $0x148] sm:$0xf] }
 0x547   :  { %v7856_v41 = vor.u32 %v7855_v8, %v7851_v44  ;;  %v12164_v26 = vcombine.low %v7828_v6, %v7838_v3  ;;  %v7869_v24 = vrot.slane %v7867_v60, 5  ;;  %v7875_v40 = vrot.slane %v7873_v5, 5 }
 0x548   :  { %v7846_v46 = vor.u32 %v7845_v62, %v7842_v27  ;;  %v7866_v22 = vrot.slane %v7864_v2, 4  ;;  %v7861_v4 = vrot.slane %v7859_v13, 5  ;;  %v7307_v2 = vld [vmem:[#allocation2 + $0x140] sm:$0x1] }
 0x549   :  { %v7857_v27 = vrot.slane %v7856_v41, 4  ;;  %v13256_v41 = vld [vmem:[#allocation2 + $0x120] sm:$0xff]  }
 0x54a   :  { %v18353_v18 = vpop.f32.mrb[172].mxu0 }
 0x54b   :  { %20082 = vst [vmem:[#allocation53_spill] sm:$0xff] %v18353_v18  ;;  %10747 = vmatmul.mubr.bf16.gmra.mrb[88].mxu1 %v13254_v55  ;;  %v10116_v33 = vpop.f32.mrb[173].mxu0  ;;  %v7877_v55 = vshrl.u32 %v7306_v7, 16  ;;  %v7308_v7 = vld [vmem:[#allocation2 + $0x144] sm:$0xf]  ;;  %v7862_v60 = vsel %vm16171_vm15, %v7857_v27, %v7861_v4 }
 0x54c   :  { %10754 = vmatprep.mubr.bf16.mxu1 %v12163_v37  ;;  %v18355_v9 = vpop.f32.mrb[174].mxu0  ;;  %v8677_v37 = vrot.slane %v8358_v58, 5  ;;  %v13255_v33 = vld [vmem:[#allocation2 + $0x114] sm:$0xff]   ;;  %v7888_v3 = vshrl.u32 %v7308_v7, 16  ;;  %v7897_v58 = vshll.u32 %v7309_v16, 16 }
 0x54d   :  { %20083 = vst [vmem:[#allocation54_spill] sm:$0xff] %v18355_v9  ;;  %v10119_v30 = vpop.f32.mrb[175].mxu0  ;;  %v7879_v8 = vrot.slane %v7877_v55, 4  ;;  %v7883_v55 = vshll.u32 %v7307_v2, 16  ;;  %v7312_v27 = vld [vmem:[#allocation2 + $0x154] sm:$0xf] }
 0x54e   :  { %v8678_v11 = vsel %vm16154_vm14, %v8676_v28, %v8677_v37  ;;  %v7847_v30 = vrot.slane %v7846_v46, 4  ;;  %v7870_v28 = vor.u32 %v7869_v24, %v7866_v22  ;;  %v7891_v46 = vshll.u32 %v7308_v7, 16  ;;  %v7311_v22 = vld [vmem:[#allocation2 + $0x150] sm:$0xf] }
 0x54f   :  { %v12239_v36 = vcombine.low %v8675_v34, %v8678_v11  ;;  %v7880_v5 = vor.u32 %v7879_v8, %v7875_v40  ;;  %v7885_v7 = vrot.slane %v7883_v55, 5 }
 0x550   :  { %v7852_v53 = vsel %vm16171_vm15, %v7847_v30, %v7851_v44  ;;  %v7871_v37 = vrot.slane %v7870_v28, 4  ;;  %v7893_v13 = vrot.slane %v7891_v46, 5  ;;  %v7899_v30 = vrot.slane %v7897_v58, 5 }
 0x551   :  { %12595 = vmatmul.mubr.bf16.gmra.mrb[60].mxu0 %v12239_v36  ;;  %v12165_v34 = vcombine.low %v7852_v53, %v7862_v60  ;;  %v7881_v44 = vrot.slane %v7880_v5, 4  ;;  %v7310_v53 = vld [vmem:[#allocation2 + $0x14c] sm:$0x1]  ;;  %v7912_v28 = vshrl.u32 %v7311_v22, 16  ;;  %v7921_v5 = vshll.u32 %v7312_v27, 16 }
 0x552   :  { %v18366_v62 = vpop.f32.mrb[0].mxu0  ;;  %v7876_v4 = vsel %vm16171_vm15, %v7871_v37, %v7875_v40  ;;  %v7925_v58 = vshrl.u32 %v7312_v27, 16 }
 0x553   :  { %10755 = vmatmul.mubr.bf16.gmra.mrb[92].mxu1 %v13255_v33  ;;  %v18368_v49 = vpop.f32.mrb[1].mxu0  ;;  %v7890_v33 = vrot.slane %v7888_v3, 4  ;;  %v7915_v3 = vshll.u32 %v7311_v22, 16  ;;  %v7886_v46 = vsel %vm16171_vm15, %v7881_v44, %v7885_v7  ;;  %v7914_v55 = vrot.slane %v7912_v28, 4  ;;  %v7315_v44 = vld [vmem:[#allocation2 + $0x160] sm:$0xf] }
 0x554   :  { %10762 = vmatprep.mubr.bf16.mxu1 %v12164_v26  ;;  %v18370_v42 = vpop.f32.mrb[2].mxu0  ;;  %v7901_v26 = vshrl.u32 %v7309_v16, 16  ;;  %v7923_v37 = vrot.slane %v7921_v5, 5  ;;  %v7945_v5 = vshll.u32 %v7315_v44, 16 }
 0x555   :  { %v18372_v6 = vpop.f32.mrb[3].mxu0  ;;  %v7894_v2 = vor.u32 %v7893_v13, %v7890_v33  ;;  %v7917_v51 = vrot.slane %v7915_v3, 5  ;;  %v7927_v33 = vrot.slane %v7925_v58, 4  ;;  %v7314_v13 = vld [vmem:[#allocation2 + $0x15c] sm:$0xf]  ;;  %v7949_v58 = vshrl.u32 %v7315_v44, 16 }
 0x556   :  { %v7903_v24 = vrot.slane %v7901_v26, 4  ;;  %v13257_v26 = vld [vmem:[#allocation2 + $0x12c] sm:$0xff]   ;;  %v7936_v28 = vshrl.u32 %v7314_v13, 16  ;;  %v7939_v3 = vshll.u32 %v7314_v13, 16 }
 0x557   :  { %v7895_v1 = vrot.slane %v7894_v2, 4  ;;  %v7918_v2 = vor.u32 %v7917_v51, %v7914_v55  ;;  %v7951_v51 = vrot.slane %v7949_v58, 4  ;;  %v7317_v55 = vld [vmem:[#allocation2 + $0x168] sm:$0xf] }
 0x558   :  { %v7904_v60 = vor.u32 %v7903_v24, %v7899_v30  ;;  %v7941_v50 = vrot.slane %v7939_v3, 5  ;;  %v7963_v3 = vshll.u32 %v7317_v55, 16 }
 0x559   :  { %v7919_v57 = vrot.slane %v7918_v2, 4 }
 0x55a   :  { %v18378_v11 = vpop.f32.mrb[4].mxu0  ;;  %v7905_v40 = vrot.slane %v7904_v60, 4  ;;  %v7928_v60 = vor.u32 %v7927_v33, %v7923_v37  ;;  %v7965_v18 = vrot.slane %v7963_v3, 5 }
 0x55b   :  { %10763 = vmatmul.mubr.bf16.gmra.mrb[96].mxu1 %v13256_v41  ;;  %v18380_v36 = vpop.f32.mrb[5].mxu0  ;;  %v7907_v41 = vshll.u32 %v7310_v53, 16  ;;  %v7313_v53 = vld [vmem:[#allocation2 + $0x158] sm:$0x1] }
 0x55c   :  { %10770 = vmatprep.mubr.bf16.mxu1 %v12165_v34  ;;  %v18382_v8 = vpop.f32.mrb[6].mxu0  ;;  %v12166_v34 = vcombine.low %v7876_v4, %v7886_v46  ;;  %v7900_v4 = vsel %vm16171_vm15, %v7895_v1, %v7899_v30  ;;  %v7929_v1 = vrot.slane %v7928_v60, 4  ;;  %v7947_v30 = vrot.slane %v7945_v5, 5 }
 0x55d   :  { %v18384_v16 = vpop.f32.mrb[7].mxu0  ;;  %v7909_v27 = vrot.slane %v7907_v41, 5  ;;  %v7938_v41 = vrot.slane %v7936_v28, 4  ;;  %v7960_v28 = vshrl.u32 %v7317_v55, 16 }
 0x55e   :  { %v7952_v60 = vor.u32 %v7951_v51, %v7947_v30 }
 0x55f   :  { %v7910_v46 = vsel %vm16171_vm15, %v7905_v40, %v7909_v27  ;;  %v7318_v40 = vld [vmem:[#allocation2 + $0x16c] sm:$0xf]  ;;  %v7942_v2 = vor.u32 %v7941_v50, %v7938_v41  ;;  %v7320_v41 = vld [vmem:[#allocation2 + $0x174] sm:$0xf] }
 0x560   :  { %v12167_v43 = vcombine.low %v7900_v4, %v7910_v46  ;;  %v7924_v4 = vsel %vm16171_vm15, %v7919_v57, %v7923_v37  ;;  %v7969_v5 = vshll.u32 %v7318_v40, 16  ;;  %v7973_v58 = vshrl.u32 %v7318_v40, 16 }
 0x561   :  { %v7943_v9 = vrot.slane %v7942_v2, 4  ;;  %v7953_v57 = vrot.slane %v7952_v60, 4  ;;  %v7987_v3 = vshll.u32 %v7320_v41, 16 }
 0x562   :  { %v18390_v59 = vpop.f32.mrb[8].mxu0  ;;  %v7971_v37 = vrot.slane %v7969_v5, 5  ;;  %v7975_v50 = vrot.slane %v7973_v58, 4 }
 0x563   :  { %10771 = vmatmul.mubr.bf16.gmra.mrb[100].mxu1 %v13257_v26  ;;  %v18392_v22 = vpop.f32.mrb[9].mxu0  ;;  %v13258_v26 = vld [vmem:[#allocation2 + $0x138] sm:$0xff]  }
 0x564   :  { %10778 = vmatprep.mubr.bf16.mxu1 %v12166_v34  ;;  %v18394_v24 = vpop.f32.mrb[10].mxu0  ;;  %v7931_v34 = vshll.u32 %v7313_v53, 16  ;;  %v7316_v53 = vld [vmem:[#allocation2 + $0x164] sm:$0x1]  ;;  %v7976_v60 = vor.u32 %v7975_v50, %v7971_v37 }
 0x565   :  { %v18396_v7 = vpop.f32.mrb[11].mxu0 }
 0x566   :  { %v7933_v44 = vrot.slane %v7931_v34, 5  ;;  %v7962_v34 = vrot.slane %v7960_v28, 4  ;;  %v7984_v28 = vshrl.u32 %v7320_v41, 16 }
 0x568   :  { %v7934_v46 = vsel %vm16171_vm15, %v7929_v1, %v7933_v44  ;;  %v7321_v1 = vld [vmem:[#allocation2 + $0x178] sm:$0xf]  ;;  %v7966_v2 = vor.u32 %v7965_v18, %v7962_v34  ;;  %v7989_v18 = vrot.slane %v7987_v3, 5 }
 0x569   :  { %v12168_v61 = vcombine.low %v7924_v4, %v7934_v46  ;;  %v7948_v4 = vsel %vm16171_vm15, %v7943_v9, %v7947_v30  ;;  %v7993_v5 = vshll.u32 %v7321_v1, 16  ;;  %v7997_v58 = vshrl.u32 %v7321_v1, 16 }
 0x56a   :  { %v7977_v9 = vrot.slane %v7976_v60, 4  ;;  %v8008_v1 = vshrl.u32 %v7323_v29, 16 }
 0x56b   :  { %v18402_v12 = vpop.f32.mrb[12].mxu0  ;;  %10779 = vmatmul.mubr.bf16.gmra.mrb[104].mxu1 %v13258_v26  ;;  %v7955_v26 = vshll.u32 %v7316_v53, 16  ;;  %v7319_v53 = vld [vmem:[#allocation2 + $0x170] sm:$0x1]  ;;  %v7995_v30 = vrot.slane %v7993_v5, 5  ;;  %v7999_v34 = vrot.slane %v7997_v58, 4 }
 0x56c   :  { %v18404_v13 = vpop.f32.mrb[13].mxu0  ;;  %10786 = vmatprep.mubr.bf16.mxu1 %v12167_v43  ;;  %v13259_v43 = vld [vmem:[#allocation2 + $0x144] sm:$0xff]   ;;  %v13261_v58 = vld [vmem:[#allocation2 + $0x15c] sm:$0xff]  }
 0x56d   :  { %v18406_v33 = vpop.f32.mrb[14].mxu0  ;;  %v7957_v40 = vrot.slane %v7955_v26, 5  ;;  %v7986_v26 = vrot.slane %v7984_v28, 4  ;;  %v8000_v5 = vor.u32 %v7999_v34, %v7995_v30 }
 0x56e   :  { %v18408_v27 = vpop.f32.mrb[15].mxu0 }
 0x56f   :  { %v7958_v46 = vsel %vm16171_vm15, %v7953_v57, %v7957_v40  ;;  %v7990_v60 = vor.u32 %v7989_v18, %v7986_v26 }
 0x570   :  { %v12169_v14 = vcombine.low %v7948_v4, %v7958_v46  ;;  %v7322_v4 = vld [vmem:[#allocation2 + $0x17c] sm:$0x1] }
 0x573   :  { %v18414_v48 = vpop.f32.mrb[16].mxu0  ;;  %10787 = vmatmul.mubr.bf16.gmra.mrb[108].mxu1 %v13259_v43  ;;  %v7979_v43 = vshll.u32 %v7319_v53, 16  ;;  %v8011_v53 = vshll.u32 %v7323_v29, 16  ;;  %v7991_v29 = vrot.slane %v7990_v60, 4 }
 0x574   :  { %20084 = vst [vmem:[#allocation55_spill] sm:$0xff] %v18414_v48  ;;  %v18416_v55 = vpop.f32.mrb[17].mxu0  ;;  %10794 = vmatprep.mubr.bf16.mxu1 %v12168_v61  ;;  %v13260_v61 = vld [vmem:[#allocation2 + $0x150] sm:$0xff]   ;;  %v7324_v48 = vld [vmem:[#allocation2 + $0x184] sm:$0xf] }
 0x575   :  { %v18418_v51 = vpop.f32.mrb[18].mxu0  ;;  %v7981_v50 = vrot.slane %v7979_v43, 5  ;;  %v8021_v28 = vshrl.u32 %v7324_v48, 16  ;;  %v8013_v43 = vrot.slane %v8011_v53, 5  ;;  %v7996_v53 = vsel %vm16171_vm15, %v7991_v29, %v7995_v30 }
 0x576   :  { %20085 = vst [vmem:[#allocation56_spill] sm:$0xff] %v18418_v51  ;;  %v18420_v44 = vpop.f32.mrb[19].mxu0  ;;  %v7967_v51 = vrot.slane %v7966_v2, 4  ;;  %v8017_v2 = vshll.u32 %v7324_v48, 16  ;;  %v8001_v48 = vrot.slane %v8000_v5, 4 }
 0x577   :  { %20086 = vst [vmem:[#allocation57_spill] sm:$0xff] %v18420_v44  ;;  %v7982_v3 = vsel %vm16171_vm15, %v7977_v9, %v7981_v50  ;;  %v7325_v9 = vld [vmem:[#allocation2 + $0x188] sm:$0x1] }
 0x578   :  { %v7972_v46 = vsel %vm16171_vm15, %v7967_v51, %v7971_v37  ;;  %v7327_v37 = vld [vmem:[#allocation2 + $0x190] sm:$0xf] }
 0x57b   :  { %10795 = vmatmul.mubr.bf16.gmra.mrb[112].mxu1 %v13260_v61  ;;  %v8010_v61 = vrot.slane %v8008_v1, 4 }
 0x57c   :  { %v18426_v23 = vpop.f32.mrb[20].mxu0  ;;  %10802 = vmatprep.mubr.bf16.mxu1 %v12169_v14  ;;  %v8003_v14 = vshll.u32 %v7322_v4, 16 }
 0x57d   :  { %20087 = vst [vmem:[#allocation58_spill] sm:$0xff] %v18426_v23  ;;  %v18428_v41 = vpop.f32.mrb[21].mxu0  ;;  %v8019_v23 = vrot.slane %v8017_v2, 5  ;;  %v8014_v50 = vor.u32 %v8013_v43, %v8010_v61  ;;  %v7330_v43 = vld [vmem:[#allocation2 + $0x19c] sm:$0xf] }
 0x57e   :  { %20088 = vst [vmem:[#allocation59_spill] sm:$0xff] %v18428_v41  ;;  %v18430_v57 = vpop.f32.mrb[22].mxu0  ;;  %v8023_v41 = vrot.slane %v8021_v28, 4  ;;  %v8005_v26 = vrot.slane %v8003_v14, 5  ;;  %v8041_v28 = vshll.u32 %v7327_v37, 16 }
 0x57f   :  { %20089 = vst [vmem:[#allocation60_spill] sm:$0xff] %v18430_v57  ;;  %v18432_v40 = vpop.f32.mrb[23].mxu0  ;;  %v12170_v57 = vcombine.low %v7972_v46, %v7982_v3  ;;  %v8045_v46 = vshrl.u32 %v7327_v37, 16  ;;  %v13262_v3 = vld [vmem:[#allocation2 + $0x168] sm:$0xff]  }
 0x580   :  { %20090 = vst [vmem:[#allocation61_spill] sm:$0xff] %v18432_v40  ;;  %v7326_v40 = vld [vmem:[#allocation2 + $0x18c] sm:$0xf]  ;;  %v8024_v1 = vor.u32 %v8023_v41, %v8019_v23  ;;  %v8006_v2 = vsel %vm16171_vm15, %v8001_v48, %v8005_v26  ;;  %v18452_v41 = vrot.slane %v8041_v28, 5 }
 0x581   :  { %v8032_v18 = vshrl.u32 %v7326_v40, 16  ;;  %v8035_v4 = vshll.u32 %v7326_v40, 16  ;;  %v12171_v5 = vcombine.low %v7996_v53, %v8006_v2  ;;  %v8047_v40 = vrot.slane %v8045_v46, 4 }
 0x582   :  { %v8025_v14 = vrot.slane %v8024_v1, 4  ;;  %v8065_v46 = vshll.u32 %v7330_v43, 16 }
 0x583   :  { %10803 = vmatmul.mubr.bf16.gmra.mrb[116].mxu1 %v13261_v58  ;;  %v8034_v60 = vrot.slane %v8032_v18, 4  ;;  %v8015_v58 = vrot.slane %v8014_v50, 4  ;;  %v7328_v50 = vld [vmem:[#allocation2 + $0x194] sm:$0x1]  ;;  %v8048_v28 = vor.u32 %v8047_v40, %v18452_v41 }
 0x584   :  { %v18438_v44 = vpop.f32.mrb[24].mxu0  ;;  %10810 = vmatprep.mubr.bf16.mxu1 %v12170_v57  ;;  %v8027_v57 = vshll.u32 %v7325_v9, 16 }
 0x585   :  { %20091 = vst [vmem:[#allocation62_spill] sm:$0xff] %v18438_v44  ;;  %v18440_v25 = vpop.f32.mrb[25].mxu0  ;;  %v7329_v44 = vld [vmem:[#allocation2 + $0x198] sm:$0xf]  ;;  %v8020_v9 = vsel %vm16171_vm15, %v8015_v58, %v8019_v23 }
 0x586   :  { %v18442_v51 = vpop.f32.mrb[26].mxu0  ;;  %v8029_v61 = vrot.slane %v8027_v57, 5  ;;  %v8056_v48 = vshrl.u32 %v7329_v44, 16  ;;  %v8069_v57 = vshrl.u32 %v7330_v43, 16  ;;  %v13263_v58 = vld [vmem:[#allocation2 + $0x174] sm:$0xff]   ;;  %v8049_v43 = vrot.slane %v8048_v28, 4 }
 0x587   :  { %20092 = vst [vmem:[#allocation63_spill] sm:$0xff] %v18442_v51  ;;  %v18444_v34 = vpop.f32.mrb[27].mxu0  ;;  %v8037_v51 = vrot.slane %v8035_v4, 5  ;;  %v8059_v4 = vshll.u32 %v7329_v44, 16 }
 0x588   :  { %20093 = vst [vmem:[#allocation64_spill] sm:$0xff] %v18444_v34  ;;  %v8030_v18 = vsel %vm16171_vm15, %v8025_v14, %v8029_v61  ;;  %v7333_v14 = vld [vmem:[#allocation2 + $0x1a8] sm:$0xf]  ;;  %v8058_v44 = vrot.slane %v8056_v48, 4  ;;  %v7331_v48 = vld [vmem:[#allocation2 + $0x1a0] sm:$0x1] }
 0x589   :  { %v8038_v1 = vor.u32 %v8037_v51, %v8034_v60  ;;  %v12172_v61 = vcombine.low %v8020_v9, %v8030_v18  ;;  %v8061_v60 = vrot.slane %v8059_v4, 5 }
 0x58b   :  { %10811 = vmatmul.mubr.bf16.gmra.mrb[120].mxu1 %v13262_v3  ;;  %v8039_v51 = vrot.slane %v8038_v1, 4 }
 0x58c   :  { %v18450_v34 = vpop.f32.mrb[28].mxu0  ;;  %10818 = vmatprep.mubr.bf16.mxu1 %v12171_v5 }
 0x58d   :  { %20094 = vst [vmem:[#allocation65_spill] sm:$0xff] %v18450_v34  ;;  %v18454_v30 = vpop.f32.mrb[29].mxu0  ;;  %v8051_v34 = vshll.u32 %v7328_v50, 16  ;;  %v8093_v50 = vshrl.u32 %v7333_v14, 16 }
 0x58e   :  { %v18456_v29 = vpop.f32.mrb[30].mxu0  ;;  %v10604_v26 = vpop.f32.mrb[144].mxu1 }
 0x58f   :  { %20095 = vst [vmem:[#allocation66_spill] sm:$0xff] %v18456_v29  ;;  %v18458_v37 = vpop.f32.mrb[31].mxu0  ;;  %v12630_v53 = vadd.f32 %v10604_v26, %v18256_v21  ;;  %v10606_v2 = vpop.f32.mrb[145].mxu1  ;;  %v7332_v21 = vld [vmem:[#allocation2 + $0x1a4] sm:$0xf]  ;;  %v8053_v9 = vrot.slane %v8051_v34, 5 }
 0x590   :  { %v10607_v3 = vpop.f32.mrb[146].mxu1  ;;  %v8080_v18 = vshrl.u32 %v7332_v21, 16  ;;  %v8083_v1 = vshll.u32 %v7332_v21, 16  ;;  %v8075_v34 = vshll.u32 %v7331_v48, 16 }
 0x591   :  { %v18467_v5 = vadd.f32 %v12630_v53, %v18368_v49  ;;  %v12631_v29 = vadd.f32 %v10607_v3, %v18258_v10  ;;  %v10609_v23 = vpop.f32.mrb[147].mxu1  ;;  %v8067_v49 = vrot.slane %v8065_v46, 5  ;;  %v8071_v53 = vrot.slane %v8069_v57, 4 }
 0x592   :  { %v8089_v10 = vshll.u32 %v7333_v14, 16  ;;  %v8054_v46 = vsel %vm16171_vm15, %v8049_v43, %v8053_v9  ;;  %v8062_v57 = vor.u32 %v8061_v60, %v8058_v44 }
 0x593   :  { %v18473_v40 = vadd.f32 %v12631_v29, %v18372_v6  ;;  %10819 = vmatmul.mubr.bf16.gmra.mrb[124].mxu1 %v13263_v58  ;;  %v8044_v6 = vsel %vm16171_vm15, %v8039_v51, %v18452_v41  ;;  %v8072_v58 = vor.u32 %v8071_v53, %v8067_v49  ;;  %v8082_v41 = vrot.slane %v8080_v18, 4 }
 0x594   :  { %v18470_v26 = vpop.f32.mrb[32].mxu0  ;;  %10826 = vmatprep.mubr.bf16.mxu1 %v12172_v61  ;;  %v8091_v61 = vrot.slane %v8089_v10, 5  ;;  %v8085_v51 = vrot.slane %v8083_v1, 5  ;;  %v8063_v60 = vrot.slane %v8062_v57, 4  ;;  %v13265_v57 = vld [vmem:[#allocation2 + $0x18c] sm:$0xff]  }
 0x595   :  { %20096 = vst [vmem:[#allocation67_spill] sm:$0xff] %v18470_v26  ;;  %v18475_v2 = vpop.f32.mrb[33].mxu0  ;;  %v8073_v43 = vrot.slane %v8072_v58, 4 }
 0x596   :  { %20097 = vst [vmem:[#allocation68_spill] sm:$0xff] %v18475_v2  ;;  %v18477_v3 = vpop.f32.mrb[34].mxu0  ;;  %v10612_v23 = vpop.f32.mrb[148].mxu1  ;;  %v13264_v2 = vld [vmem:[#allocation2 + $0x180] sm:$0xff]  }
 0x597   :  { %20098 = vst [vmem:[#allocation69_spill] sm:$0xff] %v18477_v3  ;;  %v18479_v4 = vpop.f32.mrb[35].mxu0  ;;  %v12632_v29 = vadd.f32 %v10612_v23, %v18264_v52  ;;  %v10614_v28 = vpop.f32.mrb[149].mxu1  ;;  %v8095_v3 = vrot.slane %v8093_v50, 4  ;;  %v12173_v52 = vcombine.low %v8044_v6, %v8054_v46  ;;  %v7334_v23 = vld [vmem:[#allocation2 + $0x1ac] sm:$0x1]  ;;  %v8086_v50 = vor.u32 %v8085_v51, %v8082_v41 }
 0x598   :  { %20099 = vst [vmem:[#allocation70_spill] sm:$0xff] %v18479_v4  ;;  %v10615_v14 = vpop.f32.mrb[150].mxu1  ;;  %v8099_v9 = vshll.u32 %v7334_v23, 16 }
 0x599   :  { %v18488_v21 = vadd.f32 %v12632_v29, %v18366_v62  ;;  %v12633_v26 = vadd.f32 %v10615_v14, %v18266_v56  ;;  %v10617_v4 = vpop.f32.mrb[151].mxu1  ;;  %v8096_v62 = vor.u32 %v8095_v3, %v8091_v61  ;;  %v8077_v56 = vrot.slane %v8075_v34, 5 }
 0x59a   :  { %v8087_v58 = vrot.slane %v8086_v50, 4  ;;  %v8101_v14 = vrot.slane %v8099_v9, 5 }
 0x59b   :  { %v18494_v44 = vadd.f32 %v12633_v26, %v18370_v42  ;;  %10827 = vmatmul.mubr.bf16.gmra.mrb[128].mxu1 %v13264_v2  ;;  %v8068_v42 = vsel %vm16171_vm15, %v8063_v60, %v8067_v49  ;;  %v8078_v26 = vsel %vm16171_vm15, %v8073_v43, %v8077_v56  ;;  %v8097_v6 = vrot.slane %v8096_v62, 4 }
 0x59c   :  { %v18491_v28 = vpop.f32.mrb[36].mxu0  ;;  %10834 = vmatprep.mubr.bf16.mxu1 %v12173_v52  ;;  %v12174_v34 = vcombine.low %v8068_v42, %v8078_v26 }
 0x59d   :  { %20100 = vst [vmem:[#allocation71_spill] sm:$0xff] %v18494_v44  ;;  %v18496_v53 = vpop.f32.mrb[37].mxu0 }
 0x59e   :  { %v18498_v10 = vpop.f32.mrb[38].mxu0  ;;  %v10620_v18 = vpop.f32.mrb[152].mxu1 }
 0x59f   :  { %v18500_v48 = vpop.f32.mrb[39].mxu0  ;;  %v12634_v1 = vadd.f32 %v10620_v18, %v18274_v45  ;;  %v10622_v4 = vpop.f32.mrb[153].mxu1  ;;  %v13266_v18 = vld [vmem:[#allocation2 + $0x198] sm:$0xff]  }
 0x5a0   :  { %v10623_v2 = vpop.f32.mrb[154].mxu1 }
 0x5a1   :  { %v18508_v3 = vadd.f32 %v12634_v1, %v18380_v36  ;;  %v12635_v29 = vadd.f32 %v10623_v2, %v18276_v47  ;;  %v10625_v46 = vpop.f32.mrb[155].mxu1  ;;  %v8092_v36 = vsel %vm16171_vm15, %v8087_v58, %v8091_v61  ;;  %v8102_v47 = vsel %vm16171_vm15, %v8097_v6, %v8101_v14 }
 0x5a2   :  { %v12175_v62 = vcombine.low %v8092_v36, %v8102_v47 }
 0x5a3   :  { %20101 = vst [vmem:[#allocation72_spill] sm:$0xff] %v18508_v3  ;;  %v18514_v41 = vadd.f32 %v12635_v29, %v18384_v16  ;;  %10835 = vmatmul.mubr.bf16.gmra.mrb[132].mxu1 %v13265_v57 }
 0x5a4   :  { %v18511_v45 = vpop.f32.mrb[40].mxu0  ;;  %10842 = vmatprep.mubr.bf16.mxu1 %v12174_v34 }
 0x5a5   :  { %20102 = vst [vmem:[#allocation73_spill] sm:$0xff] %v18514_v41  ;;  %v18516_v49 = vpop.f32.mrb[41].mxu0 }
 0x5a6   :  { %v18518_v51 = vpop.f32.mrb[42].mxu0  ;;  %v10628_v23 = vpop.f32.mrb[156].mxu1 }
 0x5a7   :  { %v18524_v52 = vpop.f32.mrb[43].mxu0  ;;  %v12636_v60 = vadd.f32 %v10628_v23, %v18282_v20  ;;  %v10630_v43 = vpop.f32.mrb[157].mxu1 }
 0x5a8   :  { %v10631_v16 = vpop.f32.mrb[158].mxu1 }
 0x5a9   :  { %v18528_v56 = vadd.f32 %v12636_v60, %v18378_v11  ;;  %v12637_v50 = vadd.f32 %v10631_v16, %v18284_v54  ;;  %v10633_v9 = vpop.f32.mrb[159].mxu1  ;;  %v13267_v54 = vld [vmem:[#allocation2 + $0x1a4] sm:$0xff]  }
 0x5ab   :  { %20103 = vst [vmem:[#allocation74_spill] sm:$0xff] %v18528_v56  ;;  %v18534_v31 = vadd.f32 %v12637_v50, %v18382_v8  ;;  %10843 = vmatmul.mubr.bf16.gmra.mrb[136].mxu1 %v13266_v18 }
 0x5ac   :  { %v18531_v1 = vpop.f32.mrb[44].mxu0  ;;  %10850 = vmatprep.mubr.bf16.mxu1 %v12175_v62 }
 0x5ad   :  { %20104 = vst [vmem:[#allocation75_spill] sm:$0xff] %v18534_v31  ;;  %v18536_v61 = vpop.f32.mrb[45].mxu0 }
 0x5ae   :  { %v18538_v20 = vpop.f32.mrb[46].mxu0  ;;  %v10636_v42 = vpop.f32.mrb[160].mxu1 }
 0x5af   :  { %v18540_v4 = vpop.f32.mrb[47].mxu0  ;;  %v12638_v11 = vadd.f32 %v10636_v42, %v18290_v15  ;;  %v10638_v26 = vpop.f32.mrb[161].mxu1 }
 0x5b0   :  { %v10639_v2 = vpop.f32.mrb[162].mxu1 }
 0x5b1   :  { %v18544_v6 = vadd.f32 %v12638_v11, %v18392_v22  ;;  %v12639_v8 = vadd.f32 %v10639_v2, %v18292_v19  ;;  %v10641_v29 = vpop.f32.mrb[163].mxu1 }
 0x5b3   :  { %v18550_v57 = vadd.f32 %v12639_v8, %v18396_v7  ;;  %10851 = vmatmul.mubr.bf16.gmra.mrb[140].mxu1 %v13267_v54 }
 0x5b4   :  { %v18547_v46 = vpop.f32.mrb[48].mxu0 }
 0x5b5   :  { %v18552_v58 = vpop.f32.mrb[49].mxu0 }
 0x5b6   :  { %v18554_v14 = vpop.f32.mrb[50].mxu0  ;;  %v10644_v34 = vpop.f32.mrb[164].mxu1 }
 0x5b7   :  { %v18556_v15 = vpop.f32.mrb[51].mxu0  ;;  %v12640_v36 = vadd.f32 %v10644_v34, %v18298_v32  ;;  %v10646_v22 = vpop.f32.mrb[165].mxu1 }
 0x5b8   :  { %v10647_v47 = vpop.f32.mrb[166].mxu1 }
 0x5b9   :  { %v18560_v19 = vadd.f32 %v12640_v36, %v18390_v59  ;;  %v12641_v23 = vadd.f32 %v10647_v47, %v18300_v17  ;;  %v10649_v60 = vpop.f32.mrb[167].mxu1 }
 0x5bb   :  { %v18566_v43 = vadd.f32 %v12641_v23, %v18394_v24 }
 0x5bc   :  { %v18563_v7 = vpop.f32.mrb[52].mxu0 }
 0x5bd   :  { %20105 = vst [vmem:[#allocation76_spill] sm:$0xff] %v18566_v43  ;;  %v18568_v16 = vpop.f32.mrb[53].mxu0 }
 0x5be   :  { %v18570_v62 = vpop.f32.mrb[54].mxu0  ;;  %v10652_v32 = vpop.f32.mrb[168].mxu1 }
 0x5bf   :  { %v18572_v50 = vpop.f32.mrb[55].mxu0  ;;  %v12642_v9 = vadd.f32 %v10652_v32, %v18306_v35  ;;  %v10654_v18 = vpop.f32.mrb[169].mxu1 }
 0x5c0   :  { %v10655_v59 = vpop.f32.mrb[170].mxu1 }
 0x5c1   :  { %v18576_v42 = vadd.f32 %v12642_v9, %v18404_v13  ;;  %v12643_v17 = vadd.f32 %v10655_v59, %v18308_v39  ;;  %v10657_v11 = vpop.f32.mrb[171].mxu1 }
 0x5c2   :  { %v11220_v11 = vmul.f32 %v18488_v21, %v18488_v21 }
 0x5c3   :  { %20106 = vst [vmem:[#allocation77_spill] sm:$0xff] %v18576_v42  ;;  %v18582_v24 = vadd.f32 %v12643_v17, %v18408_v27  ;;  %v20109_v17 = vld [vmem:[#allocation57_spill] sm:$0xff] }
 0x5c4   :  { %v18579_v26 = vpop.f32.mrb[56].mxu0 }
 0x5c5   :  { %20107 = vst [vmem:[#allocation78_spill] sm:$0xff] %v18582_v24  ;;  %v18584_v54 = vpop.f32.mrb[57].mxu0 }
 0x5c6   :  { %v18586_v2 = vpop.f32.mrb[58].mxu0  ;;  %v10660_v35 = vpop.f32.mrb[172].mxu1 }
 0x5c7   :  { %v18588_v8 = vpop.f32.mrb[59].mxu0  ;;  %v12644_v29 = vadd.f32 %v10660_v35, %v18314_v0  ;;  %v10662_v34 = vpop.f32.mrb[173].mxu1  ;;  %v20108_v0 = vld [vmem:[#allocation48_spill] sm:$0xff] }
 0x5c8   :  { %v10663_v13 = vpop.f32.mrb[174].mxu1  ;;  %v20111_v34 = vld [vmem:[#allocation49_spill] sm:$0xff] }
 0x5c9   :  { %v18592_v36 = vadd.f32 %v12644_v29, %v18402_v12  ;;  %v12645_v39 = vadd.f32 %v10663_v13, %v18316_v38  ;;  %v10665_v22 = vpop.f32.mrb[175].mxu1  ;;  %v11219_v12 = vmul.f32 %v18473_v40, %v18473_v40 }
 0x5cb   :  { %v18596_v27 = vadd.f32 %v12645_v39, %v18406_v33  ;;  %v11218_v33 = vmul.f32 %v18467_v5, %v18467_v5 }
 0x5cd   :  { %v11282_v35 = vadd.f32 %v11219_v12, %v11218_v33  ;;  %v11222_v12 = vmul.f32 %v18508_v3, %v18508_v3  ;;  %v20114_v33 = vld [vmem:[#allocation56_spill] sm:$0xff] }
 0x5ce   :  { %v10668_v47 = vpop.f32.mrb[176].mxu1 }
 0x5cf   :  { %v12646_v23 = vadd.f32 %v10668_v47, %v18322_v63  ;;  %v10670_v60 = vpop.f32.mrb[177].mxu1  ;;  %v11148_v63 = vadd.f32 %v18473_v40, %v18467_v5  ;;  %v11283_v47 = vadd.f32 %v11282_v35, %v11220_v11 }
 0x5d0   :  { %v10671_v32 = vpop.f32.mrb[178].mxu1  ;;  %v20112_v60 = vld [vmem:[#allocation55_spill] sm:$0xff] }
 0x5d1   :  { %v18600_v9 = vadd.f32 %v12646_v23, %v18416_v55  ;;  %v12647_v18 = vadd.f32 %v10671_v32, %v20108_v0  ;;  %v10673_v59 = vpop.f32.mrb[179].mxu1  ;;  %v11149_v29 = vadd.f32 %v11148_v63, %v18488_v21  ;;  %v11221_v23 = vmul.f32 %v18494_v44, %v18494_v44  ;;  %v20113_v0 = vld [vmem:[#allocation50_spill] sm:$0xff] }
 0x5d3   :  { %v18606_v38 = vadd.f32 %v12647_v18, %v20109_v17  ;;  %v11150_v17 = vadd.f32 %v11149_v29, %v18494_v44  ;;  %v20117_v44 = vld [vmem:[#allocation59_spill] sm:$0xff] }
 0x5d5   :  { %20110 = vst [vmem:[#allocation48_spill] sm:$0xff] %v18606_v38  ;;  %v11151_v11 = vadd.f32 %v11150_v17, %v18508_v3 }
 0x5d6   :  { %v10676_v55 = vpop.f32.mrb[180].mxu1 }
 0x5d7   :  { %v12648_v13 = vadd.f32 %v10676_v55, %v20111_v34  ;;  %v10678_v39 = vpop.f32.mrb[181].mxu1  ;;  %v11284_v55 = vadd.f32 %v11283_v47, %v11221_v23  ;;  %v11152_v29 = vadd.f32 %v11151_v11, %v18514_v41  ;;  %v20119_v47 = vld [vmem:[#allocation52_spill] sm:$0xff] }
 0x5d8   :  { %v10679_v22 = vpop.f32.mrb[182].mxu1  ;;  %v20116_v39 = vld [vmem:[#allocation51_spill] sm:$0xff] }
 0x5d9   :  { %v18619_v32 = vadd.f32 %v12648_v13, %v20112_v60  ;;  %v12649_v18 = vadd.f32 %v10679_v22, %v20113_v0  ;;  %v10681_v59 = vpop.f32.mrb[183].mxu1  ;;  %v11285_v34 = vadd.f32 %v11284_v55, %v11222_v12  ;;  %v11223_v13 = vmul.f32 %v18514_v41, %v18514_v41  ;;  %v20120_v55 = vld [vmem:[#allocation61_spill] sm:$0xff] }
 0x5da   :  { %v11224_v59 = vmul.f32 %v18528_v56, %v18528_v56  ;;  %v11153_v12 = vadd.f32 %v11152_v29, %v18528_v56  ;;  %v20123_v29 = vld [vmem:[#allocation58_spill] sm:$0xff] }
 0x5db   :  { %v18626_v63 = vadd.f32 %v12649_v18, %v20114_v33  ;;  %v11286_v33 = vadd.f32 %v11285_v34, %v11223_v13 }
 0x5dd   :  { %20115 = vst [vmem:[#allocation57_spill] sm:$0xff] %v18626_v63 }
 0x5de   :  { %v10684_v35 = vpop.f32.mrb[184].mxu1 }
 0x5df   :  { %v12650_v60 = vadd.f32 %v10684_v35, %v20116_v39  ;;  %v10686_v22 = vpop.f32.mrb[185].mxu1  ;;  %v11287_v35 = vadd.f32 %v11286_v33, %v11224_v59  ;;  %v11225_v39 = vmul.f32 %v18534_v31, %v18534_v31  ;;  %v20125_v59 = vld [vmem:[#allocation54_spill] sm:$0xff] }
 0x5e0   :  { %v10687_v0 = vpop.f32.mrb[186].mxu1  ;;  %v11154_v22 = vadd.f32 %v11153_v12, %v18534_v31  ;;  %v11227_v12 = vmul.f32 %v18550_v57, %v18550_v57  ;;  %v20126_v31 = vld [vmem:[#allocation60_spill] sm:$0xff] }
 0x5e1   :  { %v18636_v18 = vadd.f32 %v12650_v60, %v20117_v44  ;;  %v12651_v23 = vadd.f32 %v10687_v0, %v20119_v47  ;;  %v10689_v17 = vpop.f32.mrb[187].mxu1  ;;  %v11226_v44 = vmul.f32 %v18544_v6, %v18544_v6  ;;  %v20122_v60 = vld [vmem:[#allocation53_spill] sm:$0xff]  ;;  %v11288_v34 = vadd.f32 %v11287_v35, %v11225_v39 }
 0x5e2   :  { %v11155_v13 = vadd.f32 %v11154_v22, %v18544_v6  ;;  %v11228_v35 = vmul.f32 %v18560_v19, %v18560_v19 }
 0x5e3   :  { %20118 = vst [vmem:[#allocation49_spill] sm:$0xff] %v18636_v18  ;;  %v18641_v3 = vadd.f32 %v12651_v23, %v20120_v55  ;;  %v11289_v55 = vadd.f32 %v11288_v34, %v11226_v44  ;;  %v11229_v34 = vmul.f32 %v18566_v43, %v18566_v43 }
 0x5e5   :  { %20121 = vst [vmem:[#allocation55_spill] sm:$0xff] %v18641_v3  ;;  %v11290_v22 = vadd.f32 %v11289_v55, %v11227_v12  ;;  %v11230_v55 = vmul.f32 %v18576_v42, %v18576_v42  ;;  %v20130_v12 = vld [vmem:[#allocation64_spill] sm:$0xff] }
 0x5e6   :  { %v10692_v11 = vpop.f32.mrb[188].mxu1 }
 0x5e7   :  { %v12652_v41 = vadd.f32 %v10692_v11, %v20122_v60  ;;  %v10694_v0 = vpop.f32.mrb[189].mxu1  ;;  %v11156_v11 = vadd.f32 %v11155_v13, %v18550_v57  ;;  %v20128_v60 = vld [vmem:[#allocation25_spill] sm:$0xff]  ;;  %v11291_v44 = vadd.f32 %v11290_v22, %v11228_v35 }
 0x5e8   :  { %v10695_v47 = vpop.f32.mrb[190].mxu1 }
 0x5e9   :  { %v18651_v23 = vadd.f32 %v12652_v41, %v20123_v29  ;;  %v12653_v17 = vadd.f32 %v10695_v47, %v20125_v59  ;;  %v10697_v33 = vpop.f32.mrb[191].mxu1  ;;  %v11157_v41 = vadd.f32 %v11156_v11, %v18560_v19  ;;  %v20129_v59 = vld [vmem:[#allocation27_spill] sm:$0xff] }
 0x5eb   :  { %20124 = vst [vmem:[#allocation50_spill] sm:$0xff] %v18651_v23  ;;  %v18657_v56 = vadd.f32 %v12653_v17, %v20126_v31  ;;  %v11158_v33 = vadd.f32 %v11157_v41, %v18566_v43  ;;  %v20132_v43 = vld [vmem:[#allocation62_spill] sm:$0xff] }
 0x5ed   :  { %20127 = vst [vmem:[#allocation56_spill] sm:$0xff] %v18657_v56  ;;  %v11159_v35 = vadd.f32 %v11158_v33, %v18576_v42 }
 0x5ee   :  { %v10700_v39 = vpop.f32.mrb[64].mxu1 }
 0x5ef   :  { %v12654_v0 = vadd.f32 %v10700_v39, %v20128_v60  ;;  %v10702_v47 = vpop.f32.mrb[65].mxu1  ;;  %v11292_v39 = vadd.f32 %v11291_v44, %v11229_v34  ;;  %v11160_v41 = vadd.f32 %v11159_v35, %v18582_v24  ;;  %v20133_v44 = vld [vmem:[#allocation7_spill] sm:$0xff] }
 0x5f0   :  { %v10703_v29 = vpop.f32.mrb[66].mxu1 }
 0x5f1   :  { %v18667_v31 = vadd.f32 %v12654_v0, %v18440_v25  ;;  %v12655_v13 = vadd.f32 %v10703_v29, %v20129_v59  ;;  %v10705_v17 = vpop.f32.mrb[67].mxu1  ;;  %v11293_v60 = vadd.f32 %v11292_v39, %v11230_v55  ;;  %v11231_v25 = vmul.f32 %v18582_v24, %v18582_v24  ;;  %v20131_v0 = vld [vmem:[#allocation17_spill] sm:$0xff]  ;;  %v20134_v39 = vld [vmem:[#allocation63_spill] sm:$0xff] }
 0x5f2   :  { %v11232_v17 = vmul.f32 %v18592_v36, %v18592_v36  ;;  %v11161_v55 = vadd.f32 %v11160_v41, %v18592_v36 }
 0x5f3   :  { %v18674_v11 = vadd.f32 %v12655_v13, %v20130_v12  ;;  %v11294_v12 = vadd.f32 %v11293_v60, %v11231_v25 }
 0x5f6   :  { %v10708_v22 = vpop.f32.mrb[68].mxu1 }
 0x5f7   :  { %v12656_v47 = vadd.f32 %v10708_v22, %v20131_v0  ;;  %v10710_v29 = vpop.f32.mrb[69].mxu1  ;;  %v11295_v22 = vadd.f32 %v11294_v12, %v11232_v17  ;;  %v11233_v0 = vmul.f32 %v18596_v27, %v18596_v27  ;;  %v20138_v17 = vld [vmem:[#allocation28_spill] sm:$0xff] }
 0x5f8   :  { %v10711_v59 = vpop.f32.mrb[70].mxu1  ;;  %v11162_v29 = vadd.f32 %v11161_v55, %v18596_v27  ;;  %v11235_v55 = vmul.f32 %v18606_v38, %v18606_v38 }
 0x5f9   :  { %v18684_v13 = vadd.f32 %v12656_v47, %v20132_v43  ;;  %v12657_v34 = vadd.f32 %v10711_v59, %v20133_v44  ;;  %v10713_v33 = vpop.f32.mrb[71].mxu1  ;;  %v11234_v43 = vmul.f32 %v18600_v9, %v18600_v9  ;;  %v20136_v47 = vld [vmem:[#allocation30_spill] sm:$0xff]  ;;  %v11296_v60 = vadd.f32 %v11295_v22, %v11233_v0 }
 0x5fa   :  { %v11163_v25 = vadd.f32 %v11162_v29, %v18600_v9  ;;  %v11236_v22 = vmul.f32 %v18619_v32, %v18619_v32 }
 0x5fb   :  { %v18689_v42 = vadd.f32 %v12657_v34, %v20134_v39  ;;  %v11297_v12 = vadd.f32 %v11296_v60, %v11234_v43  ;;  %v11237_v60 = vmul.f32 %v18626_v63, %v18626_v63 }
 0x5fd   :  { %20135 = vst [vmem:[#allocation51_spill] sm:$0xff] %v18689_v42  ;;  %v11298_v29 = vadd.f32 %v11297_v12, %v11235_v55  ;;  %v11238_v12 = vmul.f32 %v18636_v18, %v18636_v18  ;;  %v20143_v55 = vld [vmem:[#allocation66_spill] sm:$0xff] }
 0x5fe   :  { %v10716_v35 = vpop.f32.mrb[72].mxu1 }
 0x5ff   :  { %v12658_v24 = vadd.f32 %v10716_v35, %v20136_v47  ;;  %v10718_v59 = vpop.f32.mrb[73].mxu1  ;;  %v11164_v35 = vadd.f32 %v11163_v25, %v18606_v38  ;;  %v11299_v43 = vadd.f32 %v11298_v29, %v11236_v22 }
 0x600   :  { %v10719_v44 = vpop.f32.mrb[74].mxu1 }
 0x601   :  { %v18699_v41 = vadd.f32 %v12658_v24, %v18454_v30  ;;  %v12659_v34 = vadd.f32 %v10719_v44, %v20138_v17  ;;  %v10721_v33 = vpop.f32.mrb[75].mxu1  ;;  %v11165_v30 = vadd.f32 %v11164_v35, %v18619_v32  ;;  %v20140_v24 = vld [vmem:[#allocation32_spill] sm:$0xff]  ;;  %v20141_v17 = vld [vmem:[#allocation65_spill] sm:$0xff] }
 0x603   :  { %20137 = vst [vmem:[#allocation59_spill] sm:$0xff] %v18699_v41  ;;  %v18705_v39 = vadd.f32 %v12659_v34, %v18458_v37  ;;  %v20142_v34 = vld [vmem:[#allocation31_spill] sm:$0xff]  ;;  %v11166_v38 = vadd.f32 %v11165_v30, %v18626_v63  ;;  %v20146_v63 = vld [vmem:[#allocation68_spill] sm:$0xff] }
 0x605   :  { %20139 = vst [vmem:[#allocation52_spill] sm:$0xff] %v18705_v39  ;;  %v11167_v22 = vadd.f32 %v11166_v38, %v18636_v18 }
 0x606   :  { %v10724_v0 = vpop.f32.mrb[76].mxu1 }
 0x607   :  { %v12660_v47 = vadd.f32 %v10724_v0, %v20140_v24  ;;  %v10726_v59 = vpop.f32.mrb[77].mxu1  ;;  %v11300_v0 = vadd.f32 %v11299_v43, %v11237_v60  ;;  %v11168_v30 = vadd.f32 %v11167_v22, %v18641_v3  ;;  %v20147_v43 = vld [vmem:[#allocation33_spill] sm:$0xff] }
 0x608   :  { %v10727_v44 = vpop.f32.mrb[78].mxu1  ;;  %v20145_v59 = vld [vmem:[#allocation9_spill] sm:$0xff] }
 0x609   :  { %v18715_v37 = vadd.f32 %v12660_v47, %v20141_v17  ;;  %v12661_v25 = vadd.f32 %v10727_v44, %v20142_v34  ;;  %v10729_v33 = vpop.f32.mrb[79].mxu1  ;;  %v11301_v24 = vadd.f32 %v11300_v0, %v11238_v12  ;;  %v11239_v47 = vmul.f32 %v18641_v3, %v18641_v3  ;;  %v20148_v0 = vld [vmem:[#allocation70_spill] sm:$0xff] }
 0x60a   :  { %v11240_v33 = vmul.f32 %v18651_v23, %v18651_v23  ;;  %v11169_v12 = vadd.f32 %v11168_v30, %v18651_v23  ;;  %v20150_v30 = vld [vmem:[#allocation67_spill] sm:$0xff] }
 0x60b   :  { %v18722_v35 = vadd.f32 %v12661_v25, %v20143_v55  ;;  %v11302_v55 = vadd.f32 %v11301_v24, %v11239_v47 }
 0x60d   :  { %20144 = vst [vmem:[#allocation61_spill] sm:$0xff] %v18722_v35 }
 0x60e   :  { %v10732_v29 = vpop.f32.mrb[80].mxu1 }
 0x60f   :  { %v12662_v17 = vadd.f32 %v10732_v29, %v20145_v59  ;;  %v10734_v44 = vpop.f32.mrb[81].mxu1  ;;  %v11303_v29 = vadd.f32 %v11302_v55, %v11240_v33  ;;  %v11241_v59 = vmul.f32 %v18657_v56, %v18657_v56  ;;  %v20151_v33 = vld [vmem:[#allocation12_spill] sm:$0xff] }
 0x610   :  { %v10735_v34 = vpop.f32.mrb[82].mxu1  ;;  %v11170_v44 = vadd.f32 %v11169_v12, %v18657_v56  ;;  %v11243_v12 = vmul.f32 %v18674_v11, %v18674_v11  ;;  %v20152_v56 = vld [vmem:[#allocation69_spill] sm:$0xff] }
 0x611   :  { %v18732_v25 = vadd.f32 %v12662_v17, %v20146_v63  ;;  %v12663_v60 = vadd.f32 %v10735_v34, %v20147_v43  ;;  %v10737_v38 = vpop.f32.mrb[83].mxu1  ;;  %v11242_v63 = vmul.f32 %v18667_v31, %v18667_v31  ;;  %v20149_v17 = vld [vmem:[#allocation14_spill] sm:$0xff]  ;;  %v11304_v24 = vadd.f32 %v11303_v29, %v11241_v59 }
 0x612   :  { %v11171_v47 = vadd.f32 %v11170_v44, %v18667_v31  ;;  %v11244_v29 = vmul.f32 %v18684_v13, %v18684_v13 }
 0x613   :  { %v18737_v18 = vadd.f32 %v12663_v60, %v20148_v0  ;;  %v11305_v0 = vadd.f32 %v11304_v24, %v11242_v63  ;;  %v11245_v24 = vmul.f32 %v18689_v42, %v18689_v42 }
 0x615   :  { %v11306_v44 = vadd.f32 %v11305_v0, %v11243_v12  ;;  %v11246_v0 = vmul.f32 %v18699_v41, %v18699_v41 }
 0x616   :  { %v10740_v22 = vpop.f32.mrb[84].mxu1 }
 0x617   :  { %v12664_v3 = vadd.f32 %v10740_v22, %v20149_v17  ;;  %v10742_v34 = vpop.f32.mrb[85].mxu1  ;;  %v11172_v22 = vadd.f32 %v11171_v47, %v18674_v11  ;;  %v20153_v17 = vld [vmem:[#allocation11_spill] sm:$0xff]  ;;  %v11307_v63 = vadd.f32 %v11306_v44, %v11244_v29 }
 0x618   :  { %v10743_v43 = vpop.f32.mrb[86].mxu1 }
 0x619   :  { %v18747_v60 = vadd.f32 %v12664_v3, %v20150_v30  ;;  %v12665_v38 = vadd.f32 %v10743_v43, %v20151_v33  ;;  %v10745_v55 = vpop.f32.mrb[87].mxu1  ;;  %v11173_v3 = vadd.f32 %v11172_v22, %v18684_v13  ;;  %v20154_v33 = vld [vmem:[#allocation18_spill] sm:$0xff]  ;;  %v11308_v22 = vadd.f32 %v11307_v63, %v11245_v24  ;;  %v20156_v24 = vld [vmem:[#allocation35_spill] sm:$0xff] }
 0x61b   :  { %v18753_v23 = vadd.f32 %v12665_v38, %v20152_v56  ;;  %v11174_v55 = vadd.f32 %v11173_v3, %v18689_v42  ;;  %v11309_v44 = vadd.f32 %v11308_v22, %v11246_v0 }
 0x61d   :  { %v11175_v29 = vadd.f32 %v11174_v55, %v18699_v41 }
 0x61e   :  { %v10748_v59 = vpop.f32.mrb[88].mxu1 }
 0x61f   :  { %v12666_v34 = vadd.f32 %v10748_v59, %v20153_v17  ;;  %v10750_v43 = vpop.f32.mrb[89].mxu1  ;;  %v20155_v17 = vld [vmem:[#allocation24_spill] sm:$0xff] }
 0x620   :  { %v10751_v30 = vpop.f32.mrb[90].mxu1 }
 0x621   :  { %v18763_v56 = vadd.f32 %v12666_v34, %v18496_v53  ;;  %v12667_v47 = vadd.f32 %v10751_v30, %v20154_v33  ;;  %v10753_v38 = vpop.f32.mrb[91].mxu1  ;;  %v11247_v53 = vmul.f32 %v18705_v39, %v18705_v39 }
 0x622   :  { %v11176_v38 = vadd.f32 %v11175_v29, %v18705_v39  ;;  %v11249_v39 = vmul.f32 %v18722_v35, %v18722_v35 }
 0x623   :  { %v18770_v12 = vadd.f32 %v12667_v47, %v18500_v48  ;;  %v11248_v48 = vmul.f32 %v18715_v37, %v18715_v37 }
 0x624   :  { %v18776_v30 = vpop.f32.mrb[60].mxu0 }
 0x625   :  { %v18778_v33 = vpop.f32.mrb[61].mxu0 }
 0x626   :  { %v10756_v59 = vpop.f32.mrb[92].mxu1  ;;  %v18787_v0 = vpop.f32.mrb[62].mxu0 }
 0x627   :  { %v12668_v34 = vadd.f32 %v10756_v59, %v20155_v17  ;;  %v10758_v43 = vpop.f32.mrb[93].mxu1  ;;  %v18789_v22 = vpop.f32.mrb[63].mxu0  ;;  %v11310_v59 = vadd.f32 %v11309_v44, %v11247_v53  ;;  %v11177_v17 = vadd.f32 %v11176_v38, %v18715_v37  ;;  %v20158_v38 = vld [vmem:[#allocation23_spill] sm:$0xff] }
 0x628   :  { %v10759_v3 = vpop.f32.mrb[94].mxu1 }
 0x629   :  { %v18784_v63 = vadd.f32 %v12668_v34, %v18491_v28  ;;  %v12669_v47 = vadd.f32 %v10759_v3, %v20156_v24  ;;  %v10761_v55 = vpop.f32.mrb[95].mxu1  ;;  %v11311_v29 = vadd.f32 %v11310_v59, %v11248_v48  ;;  %v11178_v28 = vadd.f32 %v11177_v17, %v18722_v35  ;;  %v20157_v3 = vld [vmem:[#allocation22_spill] sm:$0xff] }
 0x62a   :  { %v11250_v34 = vmul.f32 %v18732_v25, %v18732_v25  ;;  %v11251_v17 = vmul.f32 %v18737_v18, %v18737_v18 }
 0x62b   :  { %v18793_v43 = vadd.f32 %v12669_v47, %v18498_v10  ;;  %v11312_v44 = vadd.f32 %v11311_v29, %v11249_v39  ;;  %v11179_v53 = vadd.f32 %v11178_v28, %v18732_v25  ;;  %v11252_v39 = vmul.f32 %v18747_v60, %v18747_v60 }
 0x62d   :  { %v11313_v59 = vadd.f32 %v11312_v44, %v11250_v34  ;;  %v11253_v44 = vmul.f32 %v18753_v23, %v18753_v23 }
 0x62e   :  { %v10764_v41 = vpop.f32.mrb[96].mxu1 }
 0x62f   :  { %v12670_v24 = vadd.f32 %v10764_v41, %v20157_v3  ;;  %v10766_v55 = vpop.f32.mrb[97].mxu1  ;;  %v11180_v41 = vadd.f32 %v11179_v53, %v18737_v18  ;;  %v11314_v28 = vadd.f32 %v11313_v59, %v11251_v17  ;;  %v20159_v3 = vld [vmem:[#allocation37_spill] sm:$0xff]  ;;  %v11254_v59 = vmul.f32 %v18763_v56, %v18763_v56 }
 0x630   :  { %v10767_v42 = vpop.f32.mrb[98].mxu1 }
 0x631   :  { %v18803_v10 = vadd.f32 %v12670_v24, %v18516_v49  ;;  %v12671_v48 = vadd.f32 %v10767_v42, %v20158_v38  ;;  %v10769_v47 = vpop.f32.mrb[99].mxu1  ;;  %v11181_v49 = vadd.f32 %v11180_v41, %v18747_v60  ;;  %v11315_v34 = vadd.f32 %v11314_v28, %v11252_v39  ;;  %v20160_v38 = vld [vmem:[#allocation36_spill] sm:$0xff] }
 0x633   :  { %v18809_v35 = vadd.f32 %v12671_v48, %v18524_v52  ;;  %v11182_v47 = vadd.f32 %v11181_v49, %v18753_v23  ;;  %v11316_v41 = vadd.f32 %v11315_v34, %v11253_v44  ;;  %v20162_v34 = vld [vmem:[#allocation38_spill] sm:$0xff] }
 0x635   :  { %v11183_v39 = vadd.f32 %v11182_v47, %v18763_v56  ;;  %v11317_v28 = vadd.f32 %v11316_v41, %v11254_v59 }
 0x636   :  { %v10772_v29 = vpop.f32.mrb[100].mxu1 }
 0x637   :  { %v12672_v24 = vadd.f32 %v10772_v29, %v20159_v3  ;;  %v10774_v42 = vpop.f32.mrb[101].mxu1  ;;  %v20161_v3 = vld [vmem:[#allocation26_spill] sm:$0xff]  ;;  %v11184_v49 = vadd.f32 %v11183_v39, %v18770_v12 }
 0x638   :  { %v10775_v55 = vpop.f32.mrb[102].mxu1 }
 0x639   :  { %v18819_v52 = vadd.f32 %v12672_v24, %v18511_v45  ;;  %v12673_v53 = vadd.f32 %v10775_v55, %v20160_v38  ;;  %v10777_v48 = vpop.f32.mrb[103].mxu1  ;;  %v11255_v45 = vmul.f32 %v18770_v12, %v18770_v12  ;;  %v11256_v38 = vmul.f32 %v18784_v63, %v18784_v63 }
 0x63a   :  { %v11185_v47 = vadd.f32 %v11184_v49, %v18784_v63  ;;  %v20164_v49 = vld [vmem:[#allocation39_spill] sm:$0xff] }
 0x63b   :  { %v18826_v17 = vadd.f32 %v12673_v53, %v18518_v51  ;;  %v11318_v48 = vadd.f32 %v11317_v28, %v11255_v45 }
 0x63d   :  { %v11319_v41 = vadd.f32 %v11318_v48, %v11256_v38  ;;  %v11259_v48 = vmul.f32 %v18809_v35, %v18809_v35 }
 0x63e   :  { %v10780_v29 = vpop.f32.mrb[104].mxu1 }
 0x63f   :  { %v12674_v24 = vadd.f32 %v10780_v29, %v20161_v3  ;;  %v10782_v42 = vpop.f32.mrb[105].mxu1  ;;  %v11257_v29 = vmul.f32 %v18793_v43, %v18793_v43  ;;  %v11186_v3 = vadd.f32 %v11185_v47, %v18793_v43 }
 0x640   :  { %v10783_v55 = vpop.f32.mrb[106].mxu1 }
 0x641   :  { %v18836_v51 = vadd.f32 %v12674_v24, %v18536_v61  ;;  %v12675_v44 = vadd.f32 %v10783_v55, %v20162_v34  ;;  %v10785_v53 = vpop.f32.mrb[107].mxu1  ;;  %v11258_v61 = vmul.f32 %v18803_v10, %v18803_v10  ;;  %v20163_v24 = vld [vmem:[#allocation40_spill] sm:$0xff]  ;;  %v11320_v28 = vadd.f32 %v11319_v41, %v11257_v29 }
 0x642   :  { %v11187_v45 = vadd.f32 %v11186_v3, %v18803_v10  ;;  %v11260_v41 = vmul.f32 %v18819_v52, %v18819_v52 }
 0x643   :  { %v18841_v59 = vadd.f32 %v12675_v44, %v18540_v4  ;;  %v11321_v53 = vadd.f32 %v11320_v28, %v11258_v61  ;;  %v11261_v28 = vmul.f32 %v18826_v17, %v18826_v17 }
 0x645   :  { %v11322_v3 = vadd.f32 %v11321_v53, %v11259_v48  ;;  %v11262_v53 = vmul.f32 %v18836_v51, %v18836_v51 }
 0x646   :  { %v10788_v39 = vpop.f32.mrb[108].mxu1 }
 0x647   :  { %v12676_v42 = vadd.f32 %v10788_v39, %v20163_v24  ;;  %v10790_v55 = vpop.f32.mrb[109].mxu1  ;;  %v11188_v39 = vadd.f32 %v11187_v45, %v18809_v35  ;;  %v20165_v24 = vld [vmem:[#allocation42_spill] sm:$0xff]  ;;  %v11323_v61 = vadd.f32 %v11322_v3, %v11260_v41 }
 0x648   :  { %v10791_v34 = vpop.f32.mrb[110].mxu1 }
 0x649   :  { %v18851_v4 = vadd.f32 %v12676_v42, %v18531_v1  ;;  %v12677_v38 = vadd.f32 %v10791_v34, %v20164_v49  ;;  %v10793_v44 = vpop.f32.mrb[111].mxu1  ;;  %v11189_v1 = vadd.f32 %v11188_v39, %v18819_v52  ;;  %v20166_v49 = vld [vmem:[#allocation41_spill] sm:$0xff]  ;;  %v11324_v39 = vadd.f32 %v11323_v61, %v11261_v28 }
 0x64a   :  { %v20168_v61 = vld [vmem:[#allocation29_spill] sm:$0xff] }
 0x64b   :  { %v18857_v47 = vadd.f32 %v12677_v38, %v18538_v20  ;;  %v11190_v44 = vadd.f32 %v11189_v1, %v18826_v17  ;;  %v11325_v3 = vadd.f32 %v11324_v39, %v11262_v53 }
 0x64d   :  { %v11191_v41 = vadd.f32 %v11190_v44, %v18836_v51 }
 0x64e   :  { %v10796_v29 = vpop.f32.mrb[112].mxu1 }
 0x64f   :  { %v12678_v42 = vadd.f32 %v10796_v29, %v20165_v24  ;;  %v10798_v55 = vpop.f32.mrb[113].mxu1  ;;  %v20167_v24 = vld [vmem:[#allocation10_spill] sm:$0xff]  ;;  %v11192_v1 = vadd.f32 %v11191_v41, %v18841_v59 }
 0x650   :  { %v10799_v34 = vpop.f32.mrb[114].mxu1 }
 0x651   :  { %v18867_v20 = vadd.f32 %v12678_v42, %v18552_v58  ;;  %v12679_v45 = vadd.f32 %v10799_v34, %v20166_v49  ;;  %v10801_v38 = vpop.f32.mrb[115].mxu1  ;;  %v11263_v58 = vmul.f32 %v18841_v59, %v18841_v59  ;;  %v11264_v49 = vmul.f32 %v18851_v4, %v18851_v4 }
 0x652   :  { %v11193_v44 = vadd.f32 %v11192_v1, %v18851_v4  ;;  %v20170_v1 = vld [vmem:[#allocation13_spill] sm:$0xff] }
 0x653   :  { %v18874_v48 = vadd.f32 %v12679_v45, %v18556_v15  ;;  %v11326_v38 = vadd.f32 %v11325_v3, %v11263_v58 }
 0x655   :  { %v11327_v39 = vadd.f32 %v11326_v38, %v11264_v49  ;;  %v11267_v38 = vmul.f32 %v18874_v48, %v18874_v48 }
 0x656   :  { %v10804_v29 = vpop.f32.mrb[116].mxu1 }
 0x657   :  { %v12680_v42 = vadd.f32 %v10804_v29, %v20167_v24  ;;  %v10806_v55 = vpop.f32.mrb[117].mxu1  ;;  %v11265_v29 = vmul.f32 %v18857_v47, %v18857_v47  ;;  %v11194_v24 = vadd.f32 %v11193_v44, %v18857_v47 }
 0x658   :  { %v10807_v34 = vpop.f32.mrb[118].mxu1 }
 0x659   :  { %v18884_v15 = vadd.f32 %v12680_v42, %v18547_v46  ;;  %v12681_v28 = vadd.f32 %v10807_v34, %v20168_v61  ;;  %v10809_v45 = vpop.f32.mrb[119].mxu1  ;;  %v11266_v46 = vmul.f32 %v18867_v20, %v18867_v20  ;;  %v20169_v42 = vld [vmem:[#allocation15_spill] sm:$0xff]  ;;  %v11328_v3 = vadd.f32 %v11327_v39, %v11265_v29 }
 0x65a   :  { %v11195_v58 = vadd.f32 %v11194_v24, %v18867_v20 }
 0x65b   :  { %v18889_v53 = vadd.f32 %v12681_v28, %v18554_v14  ;;  %v11329_v45 = vadd.f32 %v11328_v3, %v11266_v46  ;;  %v11268_v39 = vmul.f32 %v18884_v15, %v18884_v15 }
 0x65d   :  { %v11330_v24 = vadd.f32 %v11329_v45, %v11267_v38  ;;  %v11269_v3 = vmul.f32 %v18889_v53, %v18889_v53 }
 0x65e   :  { %v10812_v41 = vpop.f32.mrb[120].mxu1 }
 0x65f   :  { %v12682_v55 = vadd.f32 %v10812_v41, %v20169_v42  ;;  %v10814_v34 = vpop.f32.mrb[121].mxu1  ;;  %v11196_v41 = vadd.f32 %v11195_v58, %v18874_v48  ;;  %v20171_v42 = vld [vmem:[#allocation19_spill] sm:$0xff]  ;;  %v11331_v46 = vadd.f32 %v11330_v24, %v11268_v39 }
 0x660   :  { %v10815_v61 = vpop.f32.mrb[122].mxu1 }
 0x661   :  { %v18899_v14 = vadd.f32 %v12682_v55, %v18568_v16  ;;  %v12683_v49 = vadd.f32 %v10815_v61, %v20170_v1  ;;  %v10817_v28 = vpop.f32.mrb[123].mxu1  ;;  %v11197_v16 = vadd.f32 %v11196_v41, %v18884_v15  ;;  %v20172_v1 = vld [vmem:[#allocation16_spill] sm:$0xff]  ;;  %v11332_v41 = vadd.f32 %v11331_v46, %v11269_v3 }
 0x662   :  { %v20174_v46 = vld [vmem:[#allocation20_spill] sm:$0xff] }
 0x663   :  { %v18905_v44 = vadd.f32 %v12683_v49, %v18572_v50  ;;  %v11198_v28 = vadd.f32 %v11197_v16, %v18889_v53  ;;  %v11270_v45 = vmul.f32 %v18899_v14, %v18899_v14 }
 0x665   :  { %v11199_v39 = vadd.f32 %v11198_v28, %v18899_v14  ;;  %v11333_v24 = vadd.f32 %v11332_v41, %v11270_v45 }
 0x666   :  { %v10820_v29 = vpop.f32.mrb[124].mxu1 }
 0x667   :  { %v12684_v55 = vadd.f32 %v10820_v29, %v20171_v42  ;;  %v10822_v34 = vpop.f32.mrb[125].mxu1  ;;  %v20173_v42 = vld [vmem:[#allocation21_spill] sm:$0xff]  ;;  %v11200_v16 = vadd.f32 %v11199_v39, %v18905_v44 }
 0x668   :  { %v10823_v61 = vpop.f32.mrb[126].mxu1 }
 0x669   :  { %v18915_v50 = vadd.f32 %v12684_v55, %v18563_v7  ;;  %v12685_v58 = vadd.f32 %v10823_v61, %v20172_v1  ;;  %v10825_v49 = vpop.f32.mrb[127].mxu1  ;;  %v11271_v7 = vmul.f32 %v18905_v44, %v18905_v44 }
 0x66b   :  { %v18922_v38 = vadd.f32 %v12685_v58, %v18570_v62  ;;  %v11272_v1 = vmul.f32 %v18915_v50, %v18915_v50  ;;  %v11334_v49 = vadd.f32 %v11333_v24, %v11271_v7  ;;  %v11201_v28 = vadd.f32 %v11200_v16, %v18915_v50  ;;  %v20178_v16 = vld [vmem:[#allocation43_spill] sm:$0xff] }
 0x66d   :  { %v11335_v41 = vadd.f32 %v11334_v49, %v11272_v1 }
 0x66e   :  { %v10828_v29 = vpop.f32.mrb[128].mxu1 }
 0x66f   :  { %v12686_v55 = vadd.f32 %v10828_v29, %v20173_v42  ;;  %v10830_v34 = vpop.f32.mrb[129].mxu1  ;;  %v11273_v29 = vmul.f32 %v18922_v38, %v18922_v38  ;;  %v11202_v42 = vadd.f32 %v11201_v28, %v18922_v38 }
 0x670   :  { %v10831_v61 = vpop.f32.mrb[130].mxu1 }
 0x671   :  { %v18932_v62 = vadd.f32 %v12686_v55, %v18584_v54  ;;  %v12687_v3 = vadd.f32 %v10831_v61, %v20174_v46  ;;  %v10833_v58 = vpop.f32.mrb[131].mxu1  ;;  %v20176_v55 = vld [vmem:[#allocation8_spill] sm:$0xff]  ;;  %v11336_v24 = vadd.f32 %v11335_v41, %v11273_v29 }
 0x673   :  { %v18937_v45 = vadd.f32 %v12687_v3, %v18588_v8  ;;  %v11274_v54 = vmul.f32 %v18932_v62, %v18932_v62  ;;  %v11203_v7 = vadd.f32 %v11202_v42, %v18932_v62 }
 0x675   :  { %20175 = vst [vmem:[#allocation53_spill] sm:$0xff] %v18937_v45  ;;  %v11337_v58 = vadd.f32 %v11336_v24, %v11274_v54  ;;  %v11275_v49 = vmul.f32 %v18937_v45, %v18937_v45 }
 0x676   :  { %v10836_v39 = vpop.f32.mrb[132].mxu1 }
 0x677   :  { %v12688_v34 = vadd.f32 %v10836_v39, %v20176_v55  ;;  %v10838_v61 = vpop.f32.mrb[133].mxu1  ;;  %v11204_v39 = vadd.f32 %v11203_v7, %v18937_v45  ;;  %v11338_v42 = vadd.f32 %v11337_v58, %v11275_v49  ;;  %v20180_v55 = vld [vmem:[#allocation44_spill] sm:$0xff] }
 0x678   :  { %v10839_v46 = vpop.f32.mrb[134].mxu1 }
 0x679   :  { %v18947_v8 = vadd.f32 %v12688_v34, %v18579_v26  ;;  %v12689_v1 = vadd.f32 %v10839_v46, %v20178_v16  ;;  %v10841_v3 = vpop.f32.mrb[135].mxu1  ;;  %v20181_v16 = vld [vmem:[#allocation45_spill] sm:$0xff] }
 0x67b   :  { %20177 = vst [vmem:[#allocation58_spill] sm:$0xff] %v18947_v8  ;;  %v18953_v28 = vadd.f32 %v12689_v1, %v18586_v2  ;;  %v11276_v41 = vmul.f32 %v18947_v8, %v18947_v8  ;;  %v11205_v26 = vadd.f32 %v11204_v39, %v18947_v8 }
 0x67d   :  { %20179 = vst [vmem:[#allocation54_spill] sm:$0xff] %v18953_v28  ;;  %v11339_v54 = vadd.f32 %v11338_v42, %v11276_v41  ;;  %v11277_v24 = vmul.f32 %v18953_v28, %v18953_v28  ;;  %v11206_v3 = vadd.f32 %v11205_v26, %v18953_v28 }
 0x67e   :  { %v10844_v29 = vpop.f32.mrb[136].mxu1 }
 0x67f   :  { %v12690_v34 = vadd.f32 %v10844_v29, %v20180_v55  ;;  %v10846_v61 = vpop.f32.mrb[137].mxu1  ;;  %v11340_v41 = vadd.f32 %v11339_v54, %v11277_v24 }
 0x680   :  { %v10847_v46 = vpop.f32.mrb[138].mxu1  ;;  %v20184_v61 = vld [vmem:[#allocation46_spill] sm:$0xff] }
 0x681   :  { %v12691_v2 = vadd.f32 %v10847_v46, %v20181_v16  ;;  %v18964_v1 = vadd.f32 %v12690_v34, %v18778_v33  ;;  %v10849_v7 = vpop.f32.mrb[139].mxu1 }
 0x682   :  { %v20186_v7 = vld [vmem:[#allocation47_spill] sm:$0xff] }
 0x683   :  { %20182 = vst [vmem:[#allocation60_spill] sm:$0xff] %v18964_v1  ;;  %v11278_v58 = vmul.f32 %v18964_v1, %v18964_v1  ;;  %v18970_v49 = vadd.f32 %v12691_v2, %v18789_v22  ;;  %v11207_v39 = vadd.f32 %v11206_v3, %v18964_v1 }
 0x685   :  { %20183 = vst [vmem:[#allocation25_spill] sm:$0xff] %v18970_v49  ;;  %v11341_v42 = vadd.f32 %v11340_v41, %v11278_v58  ;;  %v11279_v55 = vmul.f32 %v18970_v49, %v18970_v49  ;;  %v11208_v26 = vadd.f32 %v11207_v39, %v18970_v49 }
 0x686   :  { %v10852_v29 = vpop.f32.mrb[140].mxu1 }
 0x687   :  { %v12692_v33 = vadd.f32 %v10852_v29, %v20184_v61  ;;  %v10854_v34 = vpop.f32.mrb[141].mxu1  ;;  %v11342_v28 = vadd.f32 %v11341_v42, %v11279_v55 }
 0x688   :  { %v10855_v46 = vpop.f32.mrb[142].mxu1 }
 0x689   :  { %v18978_v16 = vadd.f32 %v12692_v33, %v18776_v30  ;;  %v12693_v22 = vadd.f32 %v10855_v46, %v20186_v7  ;;  %v10857_v2 = vpop.f32.mrb[143].mxu1 }
 0x68b   :  { %20185 = vst [vmem:[#allocation27_spill] sm:$0xff] %v18978_v16  ;;  %v11209_v54 = vadd.f32 %v11208_v26, %v18978_v16  ;;  %v11280_v24 = vmul.f32 %v18978_v16, %v18978_v16  ;;  %v11145_v3 = vadd.f32 %v12693_v22, %v18787_v0 }
 0x68d   :  { %v11343_v58 = vadd.f32 %v11342_v28, %v11280_v24  ;;  %v11210_v41 = vadd.f32 %v11209_v54, %v11145_v3  ;;  %v11281_v29 = vmul.f32 %v11145_v3, %v11145_v3  ;;  %v11355_v54 = vld [vmem:[%s19583_s5] sm:$0x1]  ;;  %s13313_s5 = smov [#allocation4]  }
 0x68f   :  { %v11211_v61 = vrot.slane %v11210_v41, 4  ;;  %v11344_v34 = vadd.f32 %v11343_v58, %v11281_v29  ;;  %v11359_v58 = vld [vmem:[%s19584_s6] sm:$0x1]  ;;  %s11635_s6 = sshll.u32 %s13313_s5, 4  ;;  %s11636_s6 = int_to_ptr.vmem [resolvable:$true] %s11635_s6 }
 0x690   :  { %s13288_s11 = scalar_lea.vmem %s11636_s6, 8192  ;;  %p13293_p1 = scmp.lt.s32.totalorder %s11636_s6, %s11636_s6 }
 0x691   :  { %v11212_v39 = vadd.f32 %v11211_v61, %v11210_v41  ;;  %v11345_v49 = vrot.slane %v11344_v34, 4  ;;  %v20187_v41 = vld [vmem:[#allocation34_spill] sm:$0xff]  ;;  %p13289_p0 = scmp.ne.s32.totalorder %s11636_s6, %s13288_s11  ;;  %p13294_p2 = scmp.lt.s32.totalorder %s13288_s11, %s13288_s11 }
 0x693   :  { %v11213_v30 = vrot.slane %v11212_v39, 2  ;;  %v11346_v33 = vadd.f32 %v11345_v49, %v11344_v34  ;;  %p13295_p3 = por %p13294_p2, %p13293_p1 }
 0x695   :  { %v11214_v1 = vadd.f32 %v11213_v30, %v11212_v39  ;;  %v11347_v46 = vrot.slane %v11346_v33, 2  ;;  %v20188_v39 = vld [vmem:[#allocation71_spill] sm:$0xff]  ;;  %p13296_p4 = pnand %p13295_p3, %p13289_p0 }
 0x697   :  { %v11215_v7 = vrot.slane %v11214_v1, 1  ;;  %v11348_v42 = vadd.f32 %v11347_v46, %v11346_v33  ;;  %v20189_v33 = vld [vmem:[#allocation72_spill] sm:$0xff] }
 0x699   :  { %v11216_v55 = vadd.f32 %v11215_v7, %v11214_v1  ;;  %v11349_v26 = vrot.slane %v11348_v42, 1 }
 0x69b   :  { %v11217_v2 = vmul.f32 0.001953125, %v11216_v55  ;;  %v11350_v8 = vadd.f32 %v11349_v26, %v11348_v42 }
 0x69d   :  { %v11351_v16 = vmul.f32 0.001953125, %v11350_v8  ;;  %v11352_v45 = vmul.f32 %v11217_v2, %v11217_v2 }
 0x69f   :  { %v11353_v0 = vsub.f32 %v11351_v16, %v11352_v45 }
 0x6a1   :  { %v11354_v28 = vmax.f32 %v11353_v0, 0.0 }
 0x6a3   :  { %v11356_v22 = vadd.f32 1e-05, %v11354_v28  ;;  %v20193_v28 = vld [vmem:[#allocation76_spill] sm:$0xff] }
 0x6a5   :  { %13270 = vrsqrt.f32 %v11356_v22 }
 0x6af   :  { %v13271_v24 = vpop.eup %13270 }
 0x6b0   :  { %v11358_v49 = vmul.f32 %v13271_v24, %v11355_v54  ;;  %v20194_v54 = vld [vmem:[#allocation77_spill] sm:$0xff] }
 0x6b2   :  { %v11360_v1 = vmul.f32 %v11358_v49, %v11217_v2  ;;  %v18992_v29 = vrot.slane %v11358_v49, %v20187_v41 }
 0x6b4   :  { %v11361_v8 = vsub.f32 %v11359_v58, %v11360_v1  ;;  %v11431_v45 = vmul.f32 %v18992_v29, %v11145_v3  ;;  %v18997_v16 = vmul.f32 %v18992_v29, %v18467_v5  ;;  %v19001_v61 = vmul.f32 %v18992_v29, %v18473_v40  ;;  %v20190_v3 = vld [vmem:[#allocation73_spill] sm:$0xff]  ;;  %v20191_v40 = vld [vmem:[#allocation74_spill] sm:$0xff] }
 0x6b5   :  { %v19005_v34 = vmul.f32 %v18992_v29, %v18488_v21  ;;  %v19009_v30 = vmul.f32 %v18992_v29, %v20188_v39  ;;  %v19013_v46 = vmul.f32 %v18992_v29, %v20189_v33  ;;  %v19017_v5 = vmul.f32 %v18992_v29, %v20190_v3  ;;  %v20192_v21 = vld [vmem:[#allocation75_spill] sm:$0xff]  ;;  %v20197_v39 = vld [vmem:[#allocation57_spill] sm:$0xff] }
 0x6b6   :  { %v19020_v7 = vrot.slane %v11361_v8, %v20187_v41  ;;  %v19024_v42 = vmul.f32 %v18992_v29, %v20191_v40  ;;  %v19028_v55 = vmul.f32 %v18992_v29, %v20192_v21  ;;  %v19032_v26 = vmul.f32 %v18992_v29, %v18544_v6  ;;  %v20195_v6 = vld [vmem:[#allocation78_spill] sm:$0xff]  ;;  %v20196_v41 = vld [vmem:[#allocation48_spill] sm:$0xff]  ;;  %v20198_v3 = vld [vmem:[#allocation49_spill] sm:$0xff] }
 0x6b7   :  { %v19036_v2 = vmul.f32 %v18992_v29, %v18550_v57  ;;  %v19040_v0 = vmul.f32 %v18992_v29, %v18560_v19  ;;  %v19044_v22 = vmul.f32 %v18992_v29, %v20193_v28  ;;  %v19048_v24 = vmul.f32 %v18992_v29, %v20194_v54  ;;  %v20199_v40 = vld [vmem:[#allocation55_spill] sm:$0xff]  ;;  %v20200_v21 = vld [vmem:[#allocation50_spill] sm:$0xff]  ;;  %v20201_v54 = vld [vmem:[#allocation56_spill] sm:$0xff] }
 0x6b8   :  { %v11501_v49 = vadd.f32 %v19020_v7, %v11431_v45  ;;  %v19053_v58 = vmul.f32 %v18992_v29, %v20195_v6  ;;  %v19057_v57 = vmul.f32 %v18992_v29, %v18592_v36  ;;  %v19061_v19 = vmul.f32 %v18992_v29, %v18596_v27 }
 0x6b9   :  { %v19065_v1 = vmul.f32 %v18992_v29, %v18600_v9  ;;  %v19069_v8 = vmul.f32 %v18992_v29, %v20196_v41  ;;  %v19073_v45 = vmul.f32 %v18992_v29, %v18619_v32  ;;  %v19077_v36 = vmul.f32 %v18992_v29, %v20197_v39  ;;  %v20203_v39 = vld [vmem:[#allocation51_spill] sm:$0xff] }
 0x6ba   :  { %v11565_v33 = vmax.f32 %v11501_v49, 0.0  ;;  %v19081_v27 = vmul.f32 %v18992_v29, %v20198_v3  ;;  %v19085_v9 = vmul.f32 %v18992_v29, %v20199_v40  ;;  %v19089_v28 = vmul.f32 %v18992_v29, %v20200_v21  ;;  %v20204_v40 = vld [vmem:[#allocation59_spill] sm:$0xff] }
 0x6bb   :  { %v19093_v32 = vmul.f32 %v18992_v29, %v20201_v54  ;;  %v19097_v6 = vmul.f32 %v18992_v29, %v18667_v31  ;;  %v19101_v49 = vmul.f32 %v18992_v29, %v18674_v11  ;;  %v19105_v41 = vmul.f32 %v18992_v29, %v18684_v13  ;;  %v20205_v54 = vld [vmem:[#allocation52_spill] sm:$0xff] }
 0x6bc   :  { %11629 = vst [vmem:[#allocation4 + $0x1f8] sm:$0xff] %v11565_v33  ;;  %v19109_v3 = vmul.f32 %v18992_v29, %v20203_v39  ;;  %v19113_v21 = vmul.f32 %v18992_v29, %v20204_v40  ;;  %v19117_v31 = vmul.f32 %v18992_v29, %v20205_v54  ;;  %v19121_v11 = vmul.f32 %v18992_v29, %v18715_v37  ;;  %v20212_v54 = vld [vmem:[#allocation53_spill] sm:$0xff] }
 0x6bd   :  { %20202 = vst [vmem:[#allocation64_spill] sm:$0xff] %v19101_v49  ;;  %v20206_v49 = vld [vmem:[#allocation61_spill] sm:$0xff]  ;;  %v19129_v33 = vmul.f32 %v18992_v29, %v18732_v25  ;;  %v19133_v39 = vmul.f32 %v18992_v29, %v18737_v18  ;;  %v19137_v40 = vmul.f32 %v18992_v29, %v18747_v60  ;;  %v19141_v37 = vmul.f32 %v18992_v29, %v18753_v23 }
 0x6be   :  { %v19125_v13 = vmul.f32 %v18992_v29, %v20206_v49  ;;  %v19145_v49 = vmul.f32 %v18992_v29, %v18763_v56  ;;  %v19149_v25 = vmul.f32 %v18992_v29, %v18770_v12  ;;  %v19153_v18 = vmul.f32 %v18992_v29, %v18784_v63 }
 0x6bf   :  { %v19157_v60 = vmul.f32 %v18992_v29, %v18793_v43  ;;  %v19161_v23 = vmul.f32 %v18992_v29, %v18803_v10  ;;  %v19165_v56 = vmul.f32 %v18992_v29, %v18809_v35  ;;  %v19169_v12 = vmul.f32 %v18992_v29, %v18819_v52 }
 0x6c0   :  { %v19173_v63 = vmul.f32 %v18992_v29, %v18826_v17  ;;  %v19177_v43 = vmul.f32 %v18992_v29, %v18836_v51  ;;  %v19181_v10 = vmul.f32 %v18992_v29, %v18841_v59  ;;  %v19185_v35 = vmul.f32 %v18992_v29, %v18851_v4 }
 0x6c1   :  { %v19189_v52 = vmul.f32 %v18992_v29, %v18857_v47  ;;  %v19193_v17 = vmul.f32 %v18992_v29, %v18867_v20  ;;  %v19197_v51 = vmul.f32 %v18992_v29, %v18874_v48  ;;  %v19201_v59 = vmul.f32 %v18992_v29, %v18884_v15 }
 0x6c2   :  { %v19205_v4 = vmul.f32 %v18992_v29, %v18889_v53  ;;  %v19209_v47 = vmul.f32 %v18992_v29, %v18899_v14  ;;  %v19213_v20 = vmul.f32 %v18992_v29, %v18905_v44  ;;  %v19217_v48 = vmul.f32 %v18992_v29, %v18915_v50 }
 0x6c3   :  { %v19221_v15 = vmul.f32 %v18992_v29, %v18922_v38  ;;  %v19225_v53 = vmul.f32 %v18992_v29, %v18932_v62  ;;  %v19229_v14 = vmul.f32 %v18992_v29, %v20212_v54 }
 0x6c4   :  { %20207 = vst [vmem:[#allocation17_spill] sm:$0xff] %v19209_v47  ;;  %20208 = vst [vmem:[#allocation62_spill] sm:$0xff] %v19213_v20  ;;  %v20213_v47 = vld [vmem:[#allocation58_spill] sm:$0xff] }
 0x6c5   :  { %20209 = vst [vmem:[#allocation7_spill] sm:$0xff] %v19217_v48  ;;  %20210 = vst [vmem:[#allocation63_spill] sm:$0xff] %v19221_v15  ;;  %v19233_v44 = vmul.f32 %v18992_v29, %v20213_v47  ;;  %v20214_v20 = vld [vmem:[#allocation54_spill] sm:$0xff]  ;;  %v20215_v48 = vld [vmem:[#allocation60_spill] sm:$0xff]  ;;  %v19253_v47 = vadd.f32 %v19020_v7, %v18997_v16  ;;  %v19273_v16 = vadd.f32 %v19020_v7, %v19017_v5 }
 0x6c6   :  { %20211 = vst [vmem:[#allocation30_spill] sm:$0xff] %v19225_v53  ;;  %v19237_v50 = vmul.f32 %v18992_v29, %v20214_v20  ;;  %v19241_v38 = vmul.f32 %v18992_v29, %v20215_v48  ;;  %v20216_v15 = vld [vmem:[#allocation25_spill] sm:$0xff]  ;;  %v20217_v53 = vld [vmem:[#allocation27_spill] sm:$0xff]  ;;  %v19257_v20 = vadd.f32 %v19020_v7, %v19001_v61  ;;  %v19261_v48 = vadd.f32 %v19020_v7, %v19005_v34 }
 0x6c7   :  { %v19245_v62 = vmul.f32 %v18992_v29, %v20216_v15  ;;  %v19249_v54 = vmul.f32 %v18992_v29, %v20217_v53  ;;  %v19265_v15 = vadd.f32 %v19020_v7, %v19009_v30  ;;  %v19269_v29 = vadd.f32 %v19020_v7, %v19013_v46  ;;  %v20218_v53 = vld [vmem:[#allocation64_spill] sm:$0xff] }
 0x6c8   :  { %v19277_v61 = vadd.f32 %v19020_v7, %v19024_v42  ;;  %v19281_v34 = vadd.f32 %v19020_v7, %v19028_v55  ;;  %v19285_v30 = vadd.f32 %v19020_v7, %v19032_v26  ;;  %v19289_v46 = vadd.f32 %v19020_v7, %v19036_v2 }
 0x6c9   :  { %v19293_v5 = vadd.f32 %v19020_v7, %v19040_v0  ;;  %v19297_v42 = vadd.f32 %v19020_v7, %v19044_v22  ;;  %v19301_v55 = vadd.f32 %v19020_v7, %v19048_v24  ;;  %v19305_v26 = vadd.f32 %v19020_v7, %v19053_v58 }
 0x6ca   :  { %v19309_v2 = vadd.f32 %v19020_v7, %v19057_v57  ;;  %v19313_v0 = vadd.f32 %v19020_v7, %v19061_v19  ;;  %v19317_v22 = vadd.f32 %v19020_v7, %v19065_v1  ;;  %v19321_v24 = vadd.f32 %v19020_v7, %v19069_v8 }
 0x6cb   :  { %v19325_v58 = vadd.f32 %v19020_v7, %v19073_v45  ;;  %v19329_v57 = vadd.f32 %v19020_v7, %v19077_v36  ;;  %v19333_v19 = vadd.f32 %v19020_v7, %v19081_v27  ;;  %v19337_v1 = vadd.f32 %v19020_v7, %v19085_v9 }
 0x6cc   :  { %v19341_v8 = vadd.f32 %v19020_v7, %v19089_v28  ;;  %v19345_v45 = vadd.f32 %v19020_v7, %v19093_v32  ;;  %v19349_v36 = vadd.f32 %v19020_v7, %v19097_v6  ;;  %v19353_v27 = vadd.f32 %v19020_v7, %v20218_v53 }
 0x6cd   :  { %v19357_v9 = vadd.f32 %v19020_v7, %v19105_v41  ;;  %v19361_v28 = vadd.f32 %v19020_v7, %v19109_v3  ;;  %v19365_v32 = vadd.f32 %v19020_v7, %v19113_v21  ;;  %v19369_v6 = vadd.f32 %v19020_v7, %v19117_v31 }
 0x6ce   :  { %v19373_v53 = vadd.f32 %v19020_v7, %v19121_v11  ;;  %v19377_v41 = vadd.f32 %v19020_v7, %v19125_v13  ;;  %v19381_v3 = vadd.f32 %v19020_v7, %v19129_v33  ;;  %v19385_v21 = vadd.f32 %v19020_v7, %v19133_v39 }
 0x6cf   :  { %v19389_v31 = vadd.f32 %v19020_v7, %v19137_v40  ;;  %v19393_v11 = vadd.f32 %v19020_v7, %v19141_v37  ;;  %v19397_v13 = vadd.f32 %v19020_v7, %v19145_v49  ;;  %v19401_v33 = vadd.f32 %v19020_v7, %v19149_v25 }
 0x6d0   :  { %v19405_v39 = vadd.f32 %v19020_v7, %v19153_v18  ;;  %v19409_v40 = vadd.f32 %v19020_v7, %v19157_v60  ;;  %v19413_v37 = vadd.f32 %v19020_v7, %v19161_v23  ;;  %v19417_v49 = vadd.f32 %v19020_v7, %v19165_v56 }
 0x6d1   :  { %v19421_v25 = vadd.f32 %v19020_v7, %v19169_v12  ;;  %v19425_v18 = vadd.f32 %v19020_v7, %v19173_v63  ;;  %v19429_v60 = vadd.f32 %v19020_v7, %v19177_v43  ;;  %v19433_v23 = vadd.f32 %v19020_v7, %v19181_v10 }
 0x6d2   :  { %v19437_v56 = vadd.f32 %v19020_v7, %v19185_v35  ;;  %v19441_v12 = vadd.f32 %v19020_v7, %v19189_v52  ;;  %v19445_v63 = vadd.f32 %v19020_v7, %v19193_v17  ;;  %v19449_v43 = vadd.f32 %v19020_v7, %v19197_v51 }
 0x6d3   :  { %v19453_v10 = vadd.f32 %v19020_v7, %v19201_v59  ;;  %v19457_v35 = vadd.f32 %v19020_v7, %v19205_v4 }
 0x6d4   :  { %20219 = vst [vmem:[#allocation28_spill] sm:$0xff] %v19437_v56  ;;  %20220 = vst [vmem:[#allocation32_spill] sm:$0xff] %v19441_v12  ;;  %v20224_v56 = vld [vmem:[#allocation17_spill] sm:$0xff]  ;;  %v20225_v12 = vld [vmem:[#allocation62_spill] sm:$0xff] }
 0x6d5   :  { %20221 = vst [vmem:[#allocation65_spill] sm:$0xff] %v19445_v63  ;;  %20222 = vst [vmem:[#allocation31_spill] sm:$0xff] %v19449_v43  ;;  %v19461_v52 = vadd.f32 %v19020_v7, %v20224_v56  ;;  %v19465_v17 = vadd.f32 %v19020_v7, %v20225_v12  ;;  %v20226_v63 = vld [vmem:[#allocation7_spill] sm:$0xff]  ;;  %v19481_v56 = vadd.f32 %v19020_v7, %v19229_v14 }
 0x6d6   :  { %20223 = vst [vmem:[#allocation66_spill] sm:$0xff] %v19453_v10  ;;  %v19469_v51 = vadd.f32 %v19020_v7, %v20226_v63  ;;  %v20227_v43 = vld [vmem:[#allocation63_spill] sm:$0xff]  ;;  %v20228_v10 = vld [vmem:[#allocation30_spill] sm:$0xff]  ;;  %v19485_v12 = vadd.f32 %v19020_v7, %v19233_v44  ;;  %v19489_v63 = vadd.f32 %v19020_v7, %v19237_v50  ;;  %v19501_v14 = vadd.f32 %v19020_v7, %v19249_v54 }
 0x6d7   :  { %v19473_v59 = vadd.f32 %v19020_v7, %v20227_v43  ;;  %v19477_v4 = vadd.f32 %v19020_v7, %v20228_v10  ;;  %20229 = vst [vmem:[#allocation9_spill] sm:$0xff] %v19481_v56  ;;  %v19493_v43 = vadd.f32 %v19020_v7, %v19241_v38  ;;  %v19497_v10 = vadd.f32 %v19020_v7, %v19245_v62 }
 0x6d8   :  { %20230 = vst [vmem:[#allocation68_spill] sm:$0xff] %v19485_v12  ;;  %20231 = vst [vmem:[#allocation33_spill] sm:$0xff] %v19489_v63  ;;  %v11502_v56 = vmax.f32 %v19253_v47, 0.0  ;;  %v11503_v44 = vmax.f32 %v19257_v20, 0.0  ;;  %v11504_v12 = vmax.f32 %v19261_v48, 0.0  ;;  %v11505_v50 = vmax.f32 %v19265_v15, 0.0 }
 0x6d9   :  { %20232 = vst [vmem:[#allocation70_spill] sm:$0xff] %v19493_v43  ;;  %20233 = vst [vmem:[#allocation14_spill] sm:$0xff] %v19497_v10  ;;  %v11506_v63 = vmax.f32 %v19269_v29, 0.0  ;;  %v11507_v38 = vmax.f32 %v19273_v16, 0.0  ;;  %v11508_v43 = vmax.f32 %v19277_v61, 0.0  ;;  %v11509_v62 = vmax.f32 %v19281_v34, 0.0 }
 0x6da   :  { %v11510_v10 = vmax.f32 %v19285_v30, 0.0  ;;  %11566 = vst [vmem:[#allocation4] sm:$0xff] %v11502_v56  ;;  %v11511_v7 = vmax.f32 %v19289_v46, 0.0  ;;  %v11512_v54 = vmax.f32 %v19293_v5, 0.0  ;;  %v11513_v47 = vmax.f32 %v19297_v42, 0.0  ;;  %11567 = vst [vmem:[#allocation4 + $0x8] sm:$0xff] %v11503_v44 }
 0x6db   :  { %v11514_v20 = vmax.f32 %v19301_v55, 0.0  ;;  %11568 = vst [vmem:[#allocation4 + $0x10] sm:$0xff] %v11504_v12  ;;  %11569 = vst [vmem:[#allocation4 + $0x18] sm:$0xff] %v11505_v50  ;;  %v11515_v48 = vmax.f32 %v19305_v26, 0.0  ;;  %v11516_v15 = vmax.f32 %v19309_v2, 0.0  ;;  %v11517_v29 = vmax.f32 %v19313_v0, 0.0 }
 0x6dc   :  { %11570 = vst [vmem:[#allocation4 + $0x20] sm:$0xff] %v11506_v63  ;;  %v11518_v16 = vmax.f32 %v19317_v22, 0.0  ;;  %11571 = vst [vmem:[#allocation4 + $0x28] sm:$0xff] %v11507_v38  ;;  %v11519_v61 = vmax.f32 %v19321_v24, 0.0  ;;  %v11520_v34 = vmax.f32 %v19325_v58, 0.0  ;;  %v11521_v30 = vmax.f32 %v19329_v57, 0.0 }
 0x6dd   :  { %11572 = vst [vmem:[#allocation4 + $0x30] sm:$0xff] %v11508_v43  ;;  %11573 = vst [vmem:[#allocation4 + $0x38] sm:$0xff] %v11509_v62  ;;  %v11522_v46 = vmax.f32 %v19333_v19, 0.0  ;;  %v11523_v5 = vmax.f32 %v19337_v1, 0.0  ;;  %v11524_v42 = vmax.f32 %v19341_v8, 0.0  ;;  %v11525_v55 = vmax.f32 %v19345_v45, 0.0 }
 0x6de   :  { %11574 = vst [vmem:[#allocation4 + $0x40] sm:$0xff] %v11510_v10  ;;  %11575 = vst [vmem:[#allocation4 + $0x48] sm:$0xff] %v11511_v7  ;;  %v11526_v26 = vmax.f32 %v19349_v36, 0.0  ;;  %v11527_v2 = vmax.f32 %v19353_v27, 0.0  ;;  %v11528_v0 = vmax.f32 %v19357_v9, 0.0  ;;  %v11529_v22 = vmax.f32 %v19361_v28, 0.0 }
 0x6df   :  { %11576 = vst [vmem:[#allocation4 + $0x50] sm:$0xff] %v11512_v54  ;;  %11577 = vst [vmem:[#allocation4 + $0x58] sm:$0xff] %v11513_v47  ;;  %v11530_v24 = vmax.f32 %v19365_v32, 0.0  ;;  %v11531_v58 = vmax.f32 %v19369_v6, 0.0  ;;  %v11532_v57 = vmax.f32 %v19373_v53, 0.0  ;;  %v11533_v19 = vmax.f32 %v19377_v41, 0.0 }
 0x6e0   :  { %11578 = vst [vmem:[#allocation4 + $0x60] sm:$0xff] %v11514_v20  ;;  %11579 = vst [vmem:[#allocation4 + $0x68] sm:$0xff] %v11515_v48  ;;  %v11534_v1 = vmax.f32 %v19381_v3, 0.0  ;;  %v11535_v8 = vmax.f32 %v19385_v21, 0.0  ;;  %v11536_v45 = vmax.f32 %v19389_v31, 0.0  ;;  %v11537_v36 = vmax.f32 %v19393_v11, 0.0 }
 0x6e1   :  { %11580 = vst [vmem:[#allocation4 + $0x70] sm:$0xff] %v11516_v15  ;;  %11581 = vst [vmem:[#allocation4 + $0x78] sm:$0xff] %v11517_v29  ;;  %v11538_v27 = vmax.f32 %v19397_v13, 0.0  ;;  %v11539_v9 = vmax.f32 %v19401_v33, 0.0  ;;  %v11540_v28 = vmax.f32 %v19405_v39, 0.0  ;;  %v11541_v32 = vmax.f32 %v19409_v40, 0.0 }
 0x6e2   :  { %11582 = vst [vmem:[#allocation4 + $0x80] sm:$0xff] %v11518_v16  ;;  %11583 = vst [vmem:[#allocation4 + $0x88] sm:$0xff] %v11519_v61  ;;  %v11542_v6 = vmax.f32 %v19413_v37, 0.0  ;;  %v11543_v53 = vmax.f32 %v19417_v49, 0.0  ;;  %v11544_v41 = vmax.f32 %v19421_v25, 0.0  ;;  %v11545_v3 = vmax.f32 %v19425_v18, 0.0 }
 0x6e3   :  { %11584 = vst [vmem:[#allocation4 + $0x90] sm:$0xff] %v11520_v34  ;;  %11585 = vst [vmem:[#allocation4 + $0x98] sm:$0xff] %v11521_v30  ;;  %v11546_v21 = vmax.f32 %v19429_v60, 0.0  ;;  %v11547_v31 = vmax.f32 %v19433_v23, 0.0  ;;  %v20234_v11 = vld [vmem:[#allocation28_spill] sm:$0xff]  ;;  %v20236_v40 = vld [vmem:[#allocation65_spill] sm:$0xff] }
 0x6e4   :  { %11586 = vst [vmem:[#allocation4 + $0xa0] sm:$0xff] %v11522_v46  ;;  %11587 = vst [vmem:[#allocation4 + $0xa8] sm:$0xff] %v11523_v5  ;;  %v11548_v13 = vmax.f32 %v20234_v11, 0.0  ;;  %v20235_v33 = vld [vmem:[#allocation32_spill] sm:$0xff]  ;;  %v11550_v37 = vmax.f32 %v20236_v40, 0.0  ;;  %v20237_v49 = vld [vmem:[#allocation31_spill] sm:$0xff] }
 0x6e5   :  { %11588 = vst [vmem:[#allocation4 + $0xb0] sm:$0xff] %v11524_v42  ;;  %11589 = vst [vmem:[#allocation4 + $0xb8] sm:$0xff] %v11525_v55  ;;  %v11549_v39 = vmax.f32 %v20235_v33, 0.0  ;;  %v11551_v25 = vmax.f32 %v20237_v49, 0.0  ;;  %v20238_v18 = vld [vmem:[#allocation66_spill] sm:$0xff]  ;;  %v11553_v56 = vmax.f32 %v19457_v35, 0.0 }
 0x6e6   :  { %11590 = vst [vmem:[#allocation4 + $0xc0] sm:$0xff] %v11526_v26  ;;  %11591 = vst [vmem:[#allocation4 + $0xc8] sm:$0xff] %v11527_v2  ;;  %v11552_v60 = vmax.f32 %v20238_v18, 0.0  ;;  %v11554_v12 = vmax.f32 %v19461_v52, 0.0  ;;  %v11555_v23 = vmax.f32 %v19465_v17, 0.0  ;;  %v11556_v63 = vmax.f32 %v19469_v51, 0.0 }
 0x6e7   :  { %11592 = vst [vmem:[#allocation4 + $0xd0] sm:$0xff] %v11528_v0  ;;  %11593 = vst [vmem:[#allocation4 + $0xd8] sm:$0xff] %v11529_v22  ;;  %v11557_v43 = vmax.f32 %v19473_v59, 0.0  ;;  %v11558_v10 = vmax.f32 %v19477_v4, 0.0  ;;  %v20239_v35 = vld [vmem:[#allocation9_spill] sm:$0xff]  ;;  %v20240_v44 = vld [vmem:[#allocation68_spill] sm:$0xff] }
 0x6e8   :  { %11594 = vst [vmem:[#allocation4 + $0xe0] sm:$0xff] %v11530_v24  ;;  %11595 = vst [vmem:[#allocation4 + $0xe8] sm:$0xff] %v11531_v58  ;;  %v11559_v52 = vmax.f32 %v20239_v35, 0.0  ;;  %v11560_v50 = vmax.f32 %v20240_v44, 0.0  ;;  %v20241_v38 = vld [vmem:[#allocation33_spill] sm:$0xff]  ;;  %v20242_v7 = vld [vmem:[#allocation70_spill] sm:$0xff] }
 0x6e9   :  { %11596 = vst [vmem:[#allocation4 + $0xf0] sm:$0xff] %v11532_v57  ;;  %11597 = vst [vmem:[#allocation4 + $0xf8] sm:$0xff] %v11533_v19  ;;  %v11561_v62 = vmax.f32 %v20241_v38, 0.0  ;;  %v11562_v54 = vmax.f32 %v20242_v7, 0.0  ;;  %v20243_v17 = vld [vmem:[#allocation14_spill] sm:$0xff]  ;;  %v11564_v59 = vmax.f32 %v19501_v14, 0.0 }
 0x6ea   :  { %11598 = vst [vmem:[#allocation4 + $0x100] sm:$0xff] %v11534_v1  ;;  %11599 = vst [vmem:[#allocation4 + $0x108] sm:$0xff] %v11535_v8  ;;  %v11563_v51 = vmax.f32 %v20243_v17, 0.0 }
 0x6eb   :  { %11600 = vst [vmem:[#allocation4 + $0x110] sm:$0xff] %v11536_v45  ;;  %11601 = vst [vmem:[#allocation4 + $0x118] sm:$0xff] %v11537_v36 }
 0x6ec   :  { %11602 = vst [vmem:[#allocation4 + $0x120] sm:$0xff] %v11538_v27  ;;  %11603 = vst [vmem:[#allocation4 + $0x128] sm:$0xff] %v11539_v9 }
 0x6ed   :  { %11604 = vst [vmem:[#allocation4 + $0x130] sm:$0xff] %v11540_v28  ;;  %11605 = vst [vmem:[#allocation4 + $0x138] sm:$0xff] %v11541_v32 }
 0x6ee   :  { %11606 = vst [vmem:[#allocation4 + $0x140] sm:$0xff] %v11542_v6  ;;  %11607 = vst [vmem:[#allocation4 + $0x148] sm:$0xff] %v11543_v53 }
 0x6ef   :  { %11608 = vst [vmem:[#allocation4 + $0x150] sm:$0xff] %v11544_v41  ;;  %11609 = vst [vmem:[#allocation4 + $0x158] sm:$0xff] %v11545_v3 }
 0x6f0   :  { %11610 = vst [vmem:[#allocation4 + $0x160] sm:$0xff] %v11546_v21  ;;  %11611 = vst [vmem:[#allocation4 + $0x168] sm:$0xff] %v11547_v31 }
 0x6f1   :  { %11612 = vst [vmem:[#allocation4 + $0x170] sm:$0xff] %v11548_v13  ;;  %11613 = vst [vmem:[#allocation4 + $0x178] sm:$0xff] %v11549_v39 }
 0x6f2   :  { %11614 = vst [vmem:[#allocation4 + $0x180] sm:$0xff] %v11550_v37  ;;  %11615 = vst [vmem:[#allocation4 + $0x188] sm:$0xff] %v11551_v25 }
 0x6f3   :  { %11616 = vst [vmem:[#allocation4 + $0x190] sm:$0xff] %v11552_v60  ;;  %11617 = vst [vmem:[#allocation4 + $0x198] sm:$0xff] %v11553_v56 }
 0x6f4   :  { %11618 = vst [vmem:[#allocation4 + $0x1a0] sm:$0xff] %v11554_v12  ;;  %11619 = vst [vmem:[#allocation4 + $0x1a8] sm:$0xff] %v11555_v23 }
 0x6f5   :  { %11620 = vst [vmem:[#allocation4 + $0x1b0] sm:$0xff] %v11556_v63  ;;  %11621 = vst [vmem:[#allocation4 + $0x1b8] sm:$0xff] %v11557_v43 }
 0x6f6   :  { %11622 = vst [vmem:[#allocation4 + $0x1c0] sm:$0xff] %v11558_v10  ;;  %11623 = vst [vmem:[#allocation4 + $0x1c8] sm:$0xff] %v11559_v52 }
 0x6f7   :  { %11624 = vst [vmem:[#allocation4 + $0x1d0] sm:$0xff] %v11560_v50  ;;  %11625 = vst [vmem:[#allocation4 + $0x1d8] sm:$0xff] %v11561_v62 }
 0x6f8   :  { %11626 = vst [vmem:[#allocation4 + $0x1e0] sm:$0xff] %v11562_v54  ;;  %11627 = vst [vmem:[#allocation4 + $0x1e8] sm:$0xff] %v11563_v51 }
 0x6f9   :  { %11628 = vst [vmem:[#allocation4 + $0x1f0] sm:$0xff] %v11564_v59 }
 0x6fa   :  { %13299 = shalt.err (!%p13296_p4)
}
 0x6fb   :  { %s13300_s14 = scalar_lea.hbm %s19585_s7, 8192 }
 0x6fc   :  { %p13301_p5 = scmp.ne.s32.totalorder %s19585_s7, %s13300_s14  ;;  %p13304_p6 = scmp.lt.u32.totalorder %s13300_s14, %s19585_s7 }
 0x6fe   :  { %p13306_p7 = pnand %p13304_p6, %p13301_p5 }
 0x700   :  { %13309 = shalt.err (!%p13306_p7)
}
 0x701   :  { %s13314_s16 = smov 128   ;;  %s13315_s17 = smov 8  }
 0x702   :  { %11641 = dma.vmem_to_hbm [thread:$0]  %s11636_s6, 8192, %s19585_s7, [#allocation5], %s13314_s16, %s13314_s16, %s13315_s17  }
 0x703   :  { %13310 = dma.done.wait [#allocation5], 8192  }
 0x704   :  { %13311 = vsyncadd [#allocation5], 4294959104 }
 0x705   :  { %11645 = vsyncpa [#allocation5], 1 }

</bundles_post_ra>
